<compile_context>
chip_gen: v7x
topology: tpu7x:2x2x1
jax: 0.10.0
libtpu: 0.0.40
codegen_flags: <defaults>
</compile_context>

<pallas_src>
import jax
import jax.numpy as jnp
from jax.experimental import pallas as pl
from jax.experimental.pallas import tpu as pltpu

KSIZE = 7
PAD = (KSIZE - 1) // 2  # 3


# ---------------------------------------------------------------------------
# Fused Pallas kernel: fused pooling sweep + three tiny convs + vectorized combine
# ---------------------------------------------------------------------------
def _triplet_fused_kernel(x_ref, w_ref, bn_ref, o_ref,
                          cw_max_ref, cw_sum_ref, ch_max_ref, ch_sum_ref):
    # x_ref  : (BB, C, H, W) VMEM   -- batch block in native NCHW
    # w_ref  : (3*2*7*7,) f32 SMEM  -- flat conv weights, branch-major:
    #            branch 0: spatial conv over (H, W)
    #            branch 1: H-gate conv over (C, W)
    #            branch 2: W-gate conv over (C, H) (kernel pre-transposed on host)
    # bn_ref : (6,) f32 SMEM        -- folded BN [scale, shift] per branch
    # o_ref  : (BB, C, H, W) VMEM
    # cw_*   : (C, W) f32 VMEM scratch -- branch-1 pooled maps (max / sum over H)
    # ch_*   : (C, H) f32 VMEM scratch -- branch-2 pooled maps (max / sum over W)
    bb_blk, C, H, W = x_ref.shape

    def conv_gate(pool_max, pool_mean, widx):
        # sigmoid(BN(conv7x7([max, mean]))) on a small 2D map, shape preserved.
        # 4 independent partial accumulators expose ILP across the 98 taps.
        R, Cc = pool_max.shape
        zrow = jnp.zeros((PAD, Cc + 2 * PAD), jnp.float32)
        zcol = jnp.zeros((R, PAD), jnp.float32)

        def pad2(m):
            m = jnp.concatenate([zcol, m, zcol], axis=1)      # (R, Cc + 6)
            return jnp.concatenate([zrow, m, zrow], axis=0)   # (R + 6, Cc + 6)

        planes = (pad2(pool_max), pad2(pool_mean))
        base = widx * 2 * KSIZE * KSIZE
        accs = [jnp.zeros((R, Cc), jnp.float32) for _ in range(4)]
        t = 0
        for ci in range(2):                                   # {max, mean} channels
            p = planes[ci]
            for ky in range(KSIZE):
                for kx in range(KSIZE):
                    wv = w_ref[base + ci * KSIZE * KSIZE + ky * KSIZE + kx]
                    accs[t % 4] = accs[t % 4] + wv * p[ky:ky + R, kx:kx + Cc]
                    t += 1
        acc = (accs[0] + accs[1]) + (accs[2] + accs[3])
        y = acc * bn_ref[2 * widx] + bn_ref[2 * widx + 1]     # folded BatchNorm
        return jax.nn.sigmoid(y)

    inv_c = 1.0 / C
    inv_h = 1.0 / H
    inv_w = 1.0 / W

    # bb_blk <= 2: tiny static unroll is fine now that the per-element body is
    # fully vectorized over channels.
    for bb in range(bb_blk):
        # ---- single sweep over channels: all three axis pools in one pass ----
        def pool_body(c, carry):
            hw_max, hw_sum = carry
            plane = x_ref[bb, c].astype(jnp.float32)          # (H, W), read once
            cw_max_ref[c] = jnp.max(plane, axis=0)            # pool over H -> (W,)
            cw_sum_ref[c] = jnp.sum(plane, axis=0)
            ch_max_ref[c] = jnp.max(plane, axis=1)            # pool over W -> (H,)
            ch_sum_ref[c] = jnp.sum(plane, axis=1)
            return jnp.maximum(hw_max, plane), hw_sum + plane  # pool over C

        hw_max, hw_sum = jax.lax.fori_loop(
            0, C, pool_body,
            (jnp.full((H, W), -jnp.inf, jnp.float32),
             jnp.zeros((H, W), jnp.float32)))

        # ---- three tiny 7x7 convs (+BN+sigmoid) on lane-friendly 2D maps ----
        g_hw = conv_gate(hw_max, hw_sum * inv_c, 0)                        # (H, W)
        g_cw = conv_gate(cw_max_ref[...], cw_sum_ref[...] * inv_h, 1)      # (C, W)
        g_ch = conv_gate(ch_max_ref[...], ch_sum_ref[...] * inv_w, 2)      # (C, H)

        # ---- vectorized combine: one broadcast expression + one block store ----
        g = g_hw[None, :, :] + g_cw[:, None, :] + g_ch[:, :, None]         # (C,H,W)
        xb = x_ref[bb].astype(jnp.float32)
        o_ref[bb] = (xb * (g * (1.0 / 3.0))).astype(o_ref.dtype)


# ---------------------------------------------------------------------------
# Wrapper
# ---------------------------------------------------------------------------
def _vmem_capacity_bytes():
    try:
        info = pltpu.get_tpu_info()
        cap = int(getattr(info, "vmem_capacity_bytes", 0) or 0)
        if cap > 0:
            return cap
    except Exception:
        pass
    return 64 * 1024 * 1024  # conservative default (v7x per-core VMEM)


def _pick_batch_block(batch, per_elem_bytes, max_block_bytes):
    """Batch group of 1 or 2 that fits the block cap and keeps >= 2 grid steps
    whenever B >= 2 (both v7x TensorCores get work via dimension_semantics)."""
    best = 1
    for cand in (1, 2):
        if batch % cand:
            continue
        if cand * per_elem_bytes > max_block_bytes:
            continue
        if batch // cand < min(batch, 2):
            continue
        best = cand
    return best


def triplet_attention(x, params):
    """x: (B, C, H, W), NCHW like the PyTorch module.  Output dtype == input dtype."""
    B, C, H, W = x.shape
    itemsize = jnp.dtype(x.dtype).itemsize

    # Conv weights: (1, 2, 7, 7) per gate.  Branch-W kernel is pre-transposed so the
    # in-kernel conv runs on the (C, H)-layout pooled map with no data transpose.
    w_s = params["s_w"][0]                                # conv over (H, W)
    w_h = params["h_w"][0]                                # conv over (C, W)
    w_w = jnp.swapaxes(params["w_w"][0], -1, -2)          # conv over (C, H)
    w_flat = jnp.concatenate(
        [w_s.reshape(-1), w_h.reshape(-1), w_w.reshape(-1)]).astype(jnp.float32)
    bn_flat = jnp.concatenate(
        [params["s_bn"], params["h_bn"], params["w_bn"]]).astype(jnp.float32)

    per_elem = C * H * W * itemsize
    vmem_cap = _vmem_capacity_bytes()
    # Tighter block cap on 64 MiB-VMEM parts (v7x), larger on 128 MiB parts (v5e/v6e).
    max_block_bytes = (2 << 20) if vmem_cap <= (64 << 20) else (6 << 20)
    bb = _pick_batch_block(B, per_elem, max_block_bytes)
    grid = (B // bb,)

    # VMEM budget: double-buffered in + out blocks, pooled-map scratch, slack.
    # TODO(synk): tiled two-pass fallback when a single element exceeds the cap.
    block_bytes = bb * per_elem
    scratch_bytes = 4 * 2 * (C * W + C * H)
    vmem_limit = 4 * block_bytes + scratch_bytes + (8 << 20)
    vmem_limit = int(min(max(vmem_limit, 32 << 20), vmem_cap - (2 << 20)))

    map_elems = H * W + C * W + C * H
    cost = pl.CostEstimate(
        flops=int(B * (C * H * W * 8 + map_elems * (4 * KSIZE * KSIZE + 4))),
        transcendentals=int(B * map_elems),
        bytes_accessed=int(2 * B * per_elem),
    )

    return pl.pallas_call(
        _triplet_fused_kernel,
        out_shape=jax.ShapeDtypeStruct((B, C, H, W), x.dtype),
        grid=grid,
        in_specs=[
            pl.BlockSpec((bb, C, H, W), lambda b: (b, 0, 0, 0)),
            pl.BlockSpec(memory_space=pltpu.MemorySpace.SMEM),
            pl.BlockSpec(memory_space=pltpu.MemorySpace.SMEM),
        ],
        out_specs=pl.BlockSpec((bb, C, H, W), lambda b: (b, 0, 0, 0)),
        scratch_shapes=[
            pltpu.VMEM((C, W), jnp.float32),   # branch-1 pooled max
            pltpu.VMEM((C, W), jnp.float32),   # branch-1 pooled sum
            pltpu.VMEM((C, H), jnp.float32),   # branch-2 pooled max
            pltpu.VMEM((C, H), jnp.float32),   # branch-2 pooled sum
        ],
        compiler_params=pltpu.CompilerParams(
            dimension_semantics=("parallel",),
            vmem_limit_bytes=vmem_limit),
        cost_estimate=cost,
    )(x, w_flat, bn_flat)


# ---------------------------------------------------------------------------
# Deterministic parameter init (synthetic; mirrors Conv2d(2,1,7,7,bias=False)+BN)
# ---------------------------------------------------------------------------
def init_params(key):
    def one_gate(k):
        k1, k2, k3, k4 = jax.random.split(k, 4)
        w = 0.1 * jax.random.normal(k1, (1, 2, KSIZE, KSIZE), jnp.float32)
        gamma = 1.0 + 0.1 * jax.random.normal(k2, (), jnp.float32)
        beta = 0.1 * jax.random.normal(k3, (), jnp.float32)
        run_mean = 0.05 * jax.random.normal(k4, (), jnp.float32)
        run_var = jnp.float32(1.0)
        eps = 1e-5
        scale = gamma / jnp.sqrt(run_var + eps)
        shift = beta - run_mean * scale
        return w, jnp.stack([scale, shift]).astype(jnp.float32)

    kh, kw, ks = jax.random.split(key, 3)
    h_w, h_bn = one_gate(kh)
    w_w, w_bn = one_gate(kw)
    s_w, s_bn = one_gate(ks)
    return dict(h_w=h_w, h_bn=h_bn, w_w=w_w, w_bn=w_bn, s_w=s_w, s_bn=s_bn)


# ---------------------------------------------------------------------------
# Pure-JAX reference (for correctness check)
# ---------------------------------------------------------------------------
def _ref_gate(x, w, bn):
    pooled = jnp.stack([jnp.max(x, axis=1), jnp.mean(x, axis=1)], axis=1)
    conv = jax.lax.conv_general_dilated(
        pooled, w, window_strides=(1, 1), padding=((PAD, PAD), (PAD, PAD)),
        dimension_numbers=("NCHW", "OIHW", "NCHW"))
    y = conv * bn[0] + bn[1]
    return x * jax.nn.sigmoid(y)


def _ref_triplet(x, p):
    y1 = jnp.transpose(_ref_gate(jnp.transpose(x, (0, 2, 1, 3)), p["h_w"], p["h_bn"]),
                       (0, 2, 1, 3))
    y2 = jnp.transpose(_ref_gate(jnp.transpose(x, (0, 3, 2, 1)), p["w_w"], p["w_bn"]),
                       (0, 3, 2, 1))
    y3 = _ref_gate(x, p["s_w"], p["s_bn"])
    return (y3 + y1 + y2) * (1.0 / 3.0)


# ---------------------------------------------------------------------------
if __name__ == "__main__":
    key = jax.random.PRNGKey(0)
    kx, kp = jax.random.split(key)
    B, C, H, W = 2, 4, 16, 16
    x = jax.random.normal(kx, (B, C, H, W), jnp.float32)
    params = init_params(kp)

    out = jax.block_until_ready(triplet_attention(x, params))

    assert out.shape == (B, C, H, W) and out.dtype == jnp.float32
    ref = _ref_triplet(x, params)
    max_err = float(jnp.max(jnp.abs(out - ref)))
    assert max_err < 2e-4, f"mismatch vs reference: {max_err}"
    print("KERNEL_OK")
</pallas_src>

<mosaic_0001>
module attributes {stable_mosaic.version = 11 : i64} {
  func.func @_triplet_fused_kernel(%arg0: i32, %arg1: memref<1x4x16x16xf32, #tpu.memory_space<vmem>>, %arg2: memref<294xf32, #tpu.memory_space<smem>>, %arg3: memref<6xf32, #tpu.memory_space<smem>>, %arg4: memref<1x4x16x16xf32, #tpu.memory_space<vmem>>, %arg5: memref<4x16xf32, #tpu.memory_space<vmem>>, %arg6: memref<4x16xf32, #tpu.memory_space<vmem>>, %arg7: memref<4x16xf32, #tpu.memory_space<vmem>>, %arg8: memref<4x16xf32, #tpu.memory_space<vmem>>) attributes {dimension_semantics = [#tpu.dimension_semantics<parallel>], iteration_bounds = array<i64: 2>, scalar_prefetch = 0 : i64, scratch_operands = 4 : i64, tpu.core_type = #tpu.core_type<tc>, window_params = [{transform_indices = @transform_0, window_bounds = array<i64: 1, 4, 16, 16>}, {transform_indices = @transform_1, window_bounds = array<i64: 294>}, {transform_indices = @transform_2, window_bounds = array<i64: 6>}, {transform_indices = @transform_3, window_bounds = array<i64: 1, 4, 16, 16>}]} {
    %cst = arith.constant 0xFF800000 : f32
    %0 = vector.broadcast %cst : f32 to vector<16x16xf32>
    %cst_0 = arith.constant 0.000000e+00 : f32
    %1 = vector.broadcast %cst_0 : f32 to vector<16x16xf32>
    %c0_i32 = arith.constant 0 : i32
    %c4_i32 = arith.constant 4 : i32
    %2 = arith.addi %c0_i32, %c4_i32 : i32
    %c1_i32 = arith.constant 1 : i32
    %3:2 = scf.for %arg9 = %c0_i32 to %2 step %c1_i32 iter_args(%arg10 = %0, %arg11 = %1) -> (vector<16x16xf32>, vector<16x16xf32>)  : i32 {
      %c0_49 = arith.constant 0 : index
      %1572 = arith.index_cast %arg9 : i32 to index
      %c0_50 = arith.constant 0 : index
      %c0_51 = arith.constant 0 : index
      %1573 = vector.load %arg1[%c0_49, %1572, %c0_50, %c0_51] : memref<1x4x16x16xf32, #tpu.memory_space<vmem>>, vector<1x1x16x16xf32>
      %1574 = vector.shape_cast %1573 : vector<1x1x16x16xf32> to vector<16x16xf32>
      %cst_52 = arith.constant dense<0xFF800000> : vector<16xf32>
      %1575 = vector.multi_reduction <maximumf>, %1574, %cst_52 [0] : vector<16x16xf32> to vector<16xf32>
      %1576 = arith.index_cast %arg9 : i32 to index
      %c0_53 = arith.constant 0 : index
      %1577 = vector.load %arg5[%1576, %c0_53] : memref<4x16xf32, #tpu.memory_space<vmem>>, vector<1x16xf32>
      %1578 = vector.shape_cast %1577 : vector<1x16xf32> to vector<16xf32>
      %1579 = vector.shape_cast %1575 : vector<16xf32> to vector<1x16xf32>
      tpu.vector_store %arg5[%1576, %c0_53], %1579 {strides = array<i32>} : memref<4x16xf32, #tpu.memory_space<vmem>>, vector<1x16xf32>,
      %cst_54 = arith.constant dense<0.000000e+00> : vector<16xf32>
      %1580 = vector.multi_reduction <add>, %1574, %cst_54 [0] : vector<16x16xf32> to vector<16xf32>
      %1581 = arith.index_cast %arg9 : i32 to index
      %c0_55 = arith.constant 0 : index
      %1582 = vector.load %arg6[%1581, %c0_55] : memref<4x16xf32, #tpu.memory_space<vmem>>, vector<1x16xf32>
      %1583 = vector.shape_cast %1582 : vector<1x16xf32> to vector<16xf32>
      %1584 = vector.shape_cast %1580 : vector<16xf32> to vector<1x16xf32>
      tpu.vector_store %arg6[%1581, %c0_55], %1584 {strides = array<i32>} : memref<4x16xf32, #tpu.memory_space<vmem>>, vector<1x16xf32>,
      %cst_56 = arith.constant dense<0xFF800000> : vector<16xf32>
      %1585 = vector.multi_reduction <maximumf>, %1574, %cst_56 [1] : vector<16x16xf32> to vector<16xf32>
      %1586 = arith.index_cast %arg9 : i32 to index
      %c0_57 = arith.constant 0 : index
      %1587 = vector.load %arg7[%1586, %c0_57] : memref<4x16xf32, #tpu.memory_space<vmem>>, vector<1x16xf32>
      %1588 = vector.shape_cast %1587 : vector<1x16xf32> to vector<16xf32>
      %1589 = vector.shape_cast %1585 : vector<16xf32> to vector<1x16xf32>
      tpu.vector_store %arg7[%1586, %c0_57], %1589 {strides = array<i32>} : memref<4x16xf32, #tpu.memory_space<vmem>>, vector<1x16xf32>,
      %cst_58 = arith.constant dense<0.000000e+00> : vector<16xf32>
      %1590 = vector.multi_reduction <add>, %1574, %cst_58 [1] : vector<16x16xf32> to vector<16xf32>
      %1591 = arith.index_cast %arg9 : i32 to index
      %c0_59 = arith.constant 0 : index
      %1592 = vector.load %arg8[%1591, %c0_59] : memref<4x16xf32, #tpu.memory_space<vmem>>, vector<1x16xf32>
      %1593 = vector.shape_cast %1592 : vector<1x16xf32> to vector<16xf32>
      %1594 = vector.shape_cast %1590 : vector<16xf32> to vector<1x16xf32>
      tpu.vector_store %arg8[%1591, %c0_59], %1594 {strides = array<i32>} : memref<4x16xf32, #tpu.memory_space<vmem>>, vector<1x16xf32>,
      %1595 = arith.maximumf %arg10, %1574 : vector<16x16xf32>
      %1596 = arith.addf %arg11, %1574 : vector<16x16xf32>
      scf.yield %1595, %1596 : vector<16x16xf32>, vector<16x16xf32>
    }
    %c4_i32_1 = arith.constant 4 : i32
    %cst_2 = arith.constant 2.500000e-01 : f32
    %4 = vector.broadcast %cst_2 : f32 to vector<16x16xf32>
    %5 = arith.mulf %3#1, %4 : vector<16x16xf32>
    %cst_3 = arith.constant 0.000000e+00 : f32
    %6 = vector.broadcast %cst_3 : f32 to vector<3x22xf32>
    %cst_4 = arith.constant 0.000000e+00 : f32
    %7 = vector.broadcast %cst_4 : f32 to vector<16x3xf32>
    %8 = tpu.concatenate %7, %3#0, %7 in 1 : vector<16x3xf32>, vector<16x16xf32>, vector<16x3xf32> -> vector<16x22xf32>
    %9 = tpu.concatenate %6, %8, %6 in 0 : vector<3x22xf32>, vector<16x22xf32>, vector<3x22xf32> -> vector<22x22xf32>
    %10 = tpu.concatenate %7, %5, %7 in 1 : vector<16x3xf32>, vector<16x16xf32>, vector<16x3xf32> -> vector<16x22xf32>
    %11 = tpu.concatenate %6, %10, %6 in 0 : vector<3x22xf32>, vector<16x22xf32>, vector<3x22xf32> -> vector<22x22xf32>
    %cst_5 = arith.constant 0.000000e+00 : f32
    %12 = vector.broadcast %cst_5 : f32 to vector<16x16xf32>
    %cst_6 = arith.constant 0.000000e+00 : f32
    %13 = vector.broadcast %cst_6 : f32 to vector<16x16xf32>
    %cst_7 = arith.constant 0.000000e+00 : f32
    %14 = vector.broadcast %cst_7 : f32 to vector<16x16xf32>
    %cst_8 = arith.constant 0.000000e+00 : f32
    %15 = vector.broadcast %cst_8 : f32 to vector<16x16xf32>
    %c0 = arith.constant 0 : index
    %16 = memref.load %arg2[%c0] : memref<294xf32, #tpu.memory_space<smem>>
    %17 = vector.extract_strided_slice %9 {offsets = [0, 0], sizes = [16, 16], strides = [1, 1]} : vector<22x22xf32> to vector<16x16xf32>
    %18 = vector.broadcast %16 : f32 to vector<16x16xf32>
    %19 = arith.mulf %18, %17 : vector<16x16xf32>
    %20 = arith.addf %12, %19 : vector<16x16xf32>
    %c1 = arith.constant 1 : index
    %21 = memref.load %arg2[%c1] : memref<294xf32, #tpu.memory_space<smem>>
    %22 = vector.extract_strided_slice %9 {offsets = [0, 1], sizes = [16, 16], strides = [1, 1]} : vector<22x22xf32> to vector<16x16xf32>
    %23 = vector.broadcast %21 : f32 to vector<16x16xf32>
    %24 = arith.mulf %23, %22 : vector<16x16xf32>
    %25 = arith.addf %13, %24 : vector<16x16xf32>
    %c2 = arith.constant 2 : index
    %26 = memref.load %arg2[%c2] : memref<294xf32, #tpu.memory_space<smem>>
    %27 = vector.extract_strided_slice %9 {offsets = [0, 2], sizes = [16, 16], strides = [1, 1]} : vector<22x22xf32> to vector<16x16xf32>
    %28 = vector.broadcast %26 : f32 to vector<16x16xf32>
    %29 = arith.mulf %28, %27 : vector<16x16xf32>
    %30 = arith.addf %14, %29 : vector<16x16xf32>
    %c3 = arith.constant 3 : index
    %31 = memref.load %arg2[%c3] : memref<294xf32, #tpu.memory_space<smem>>
    %32 = vector.extract_strided_slice %9 {offsets = [0, 3], sizes = [16, 16], strides = [1, 1]} : vector<22x22xf32> to vector<16x16xf32>
    %33 = vector.broadcast %31 : f32 to vector<16x16xf32>
    %34 = arith.mulf %33, %32 : vector<16x16xf32>
    %35 = arith.addf %15, %34 : vector<16x16xf32>
    %c4 = arith.constant 4 : index
    %36 = memref.load %arg2[%c4] : memref<294xf32, #tpu.memory_space<smem>>
    %37 = vector.extract_strided_slice %9 {offsets = [0, 4], sizes = [16, 16], strides = [1, 1]} : vector<22x22xf32> to vector<16x16xf32>
    %38 = vector.broadcast %36 : f32 to vector<16x16xf32>
    %39 = arith.mulf %38, %37 : vector<16x16xf32>
    %40 = arith.addf %20, %39 : vector<16x16xf32>
    %c5 = arith.constant 5 : index
    %41 = memref.load %arg2[%c5] : memref<294xf32, #tpu.memory_space<smem>>
    %42 = vector.extract_strided_slice %9 {offsets = [0, 5], sizes = [16, 16], strides = [1, 1]} : vector<22x22xf32> to vector<16x16xf32>
    %43 = vector.broadcast %41 : f32 to vector<16x16xf32>
    %44 = arith.mulf %43, %42 : vector<16x16xf32>
    %45 = arith.addf %25, %44 : vector<16x16xf32>
    %c6 = arith.constant 6 : index
    %46 = memref.load %arg2[%c6] : memref<294xf32, #tpu.memory_space<smem>>
    %47 = vector.extract_strided_slice %9 {offsets = [0, 6], sizes = [16, 16], strides = [1, 1]} : vector<22x22xf32> to vector<16x16xf32>
    %48 = vector.broadcast %46 : f32 to vector<16x16xf32>
    %49 = arith.mulf %48, %47 : vector<16x16xf32>
    %50 = arith.addf %30, %49 : vector<16x16xf32>
    %c7 = arith.constant 7 : index
    %51 = memref.load %arg2[%c7] : memref<294xf32, #tpu.memory_space<smem>>
    %52 = vector.extract_strided_slice %9 {offsets = [1, 0], sizes = [16, 16], strides = [1, 1]} : vector<22x22xf32> to vector<16x16xf32>
    %53 = vector.broadcast %51 : f32 to vector<16x16xf32>
    %54 = arith.mulf %53, %52 : vector<16x16xf32>
    %55 = arith.addf %35, %54 : vector<16x16xf32>
    %c8 = arith.constant 8 : index
    %56 = memref.load %arg2[%c8] : memref<294xf32, #tpu.memory_space<smem>>
    %57 = vector.extract_strided_slice %9 {offsets = [1, 1], sizes = [16, 16], strides = [1, 1]} : vector<22x22xf32> to vector<16x16xf32>
    %58 = vector.broadcast %56 : f32 to vector<16x16xf32>
    %59 = arith.mulf %58, %57 : vector<16x16xf32>
    %60 = arith.addf %40, %59 : vector<16x16xf32>
    %c9 = arith.constant 9 : index
    %61 = memref.load %arg2[%c9] : memref<294xf32, #tpu.memory_space<smem>>
    %62 = vector.extract_strided_slice %9 {offsets = [1, 2], sizes = [16, 16], strides = [1, 1]} : vector<22x22xf32> to vector<16x16xf32>
    %63 = vector.broadcast %61 : f32 to vector<16x16xf32>
    %64 = arith.mulf %63, %62 : vector<16x16xf32>
    %65 = arith.addf %45, %64 : vector<16x16xf32>
    %c10 = arith.constant 10 : index
    %66 = memref.load %arg2[%c10] : memref<294xf32, #tpu.memory_space<smem>>
    %67 = vector.extract_strided_slice %9 {offsets = [1, 3], sizes = [16, 16], strides = [1, 1]} : vector<22x22xf32> to vector<16x16xf32>
    %68 = vector.broadcast %66 : f32 to vector<16x16xf32>
    %69 = arith.mulf %68, %67 : vector<16x16xf32>
    %70 = arith.addf %50, %69 : vector<16x16xf32>
    %c11 = arith.constant 11 : index
    %71 = memref.load %arg2[%c11] : memref<294xf32, #tpu.memory_space<smem>>
    %72 = vector.extract_strided_slice %9 {offsets = [1, 4], sizes = [16, 16], strides = [1, 1]} : vector<22x22xf32> to vector<16x16xf32>
    %73 = vector.broadcast %71 : f32 to vector<16x16xf32>
    %74 = arith.mulf %73, %72 : vector<16x16xf32>
    %75 = arith.addf %55, %74 : vector<16x16xf32>
    %c12 = arith.constant 12 : index
    %76 = memref.load %arg2[%c12] : memref<294xf32, #tpu.memory_space<smem>>
    %77 = vector.extract_strided_slice %9 {offsets = [1, 5], sizes = [16, 16], strides = [1, 1]} : vector<22x22xf32> to vector<16x16xf32>
    %78 = vector.broadcast %76 : f32 to vector<16x16xf32>
    %79 = arith.mulf %78, %77 : vector<16x16xf32>
    %80 = arith.addf %60, %79 : vector<16x16xf32>
    %c13 = arith.constant 13 : index
    %81 = memref.load %arg2[%c13] : memref<294xf32, #tpu.memory_space<smem>>
    %82 = vector.extract_strided_slice %9 {offsets = [1, 6], sizes = [16, 16], strides = [1, 1]} : vector<22x22xf32> to vector<16x16xf32>
    %83 = vector.broadcast %81 : f32 to vector<16x16xf32>
    %84 = arith.mulf %83, %82 : vector<16x16xf32>
    %85 = arith.addf %65, %84 : vector<16x16xf32>
    %c14 = arith.constant 14 : index
    %86 = memref.load %arg2[%c14] : memref<294xf32, #tpu.memory_space<smem>>
    %87 = vector.extract_strided_slice %9 {offsets = [2, 0], sizes = [16, 16], strides = [1, 1]} : vector<22x22xf32> to vector<16x16xf32>
    %88 = vector.broadcast %86 : f32 to vector<16x16xf32>
    %89 = arith.mulf %88, %87 : vector<16x16xf32>
    %90 = arith.addf %70, %89 : vector<16x16xf32>
    %c15 = arith.constant 15 : index
    %91 = memref.load %arg2[%c15] : memref<294xf32, #tpu.memory_space<smem>>
    %92 = vector.extract_strided_slice %9 {offsets = [2, 1], sizes = [16, 16], strides = [1, 1]} : vector<22x22xf32> to vector<16x16xf32>
    %93 = vector.broadcast %91 : f32 to vector<16x16xf32>
    %94 = arith.mulf %93, %92 : vector<16x16xf32>
    %95 = arith.addf %75, %94 : vector<16x16xf32>
    %c16 = arith.constant 16 : index
    %96 = memref.load %arg2[%c16] : memref<294xf32, #tpu.memory_space<smem>>
    %97 = vector.extract_strided_slice %9 {offsets = [2, 2], sizes = [16, 16], strides = [1, 1]} : vector<22x22xf32> to vector<16x16xf32>
    %98 = vector.broadcast %96 : f32 to vector<16x16xf32>
    %99 = arith.mulf %98, %97 : vector<16x16xf32>
    %100 = arith.addf %80, %99 : vector<16x16xf32>
    %c17 = arith.constant 17 : index
    %101 = memref.load %arg2[%c17] : memref<294xf32, #tpu.memory_space<smem>>
    %102 = vector.extract_strided_slice %9 {offsets = [2, 3], sizes = [16, 16], strides = [1, 1]} : vector<22x22xf32> to vector<16x16xf32>
    %103 = vector.broadcast %101 : f32 to vector<16x16xf32>
    %104 = arith.mulf %103, %102 : vector<16x16xf32>
    %105 = arith.addf %85, %104 : vector<16x16xf32>
    %c18 = arith.constant 18 : index
    %106 = memref.load %arg2[%c18] : memref<294xf32, #tpu.memory_space<smem>>
    %107 = vector.extract_strided_slice %9 {offsets = [2, 4], sizes = [16, 16], strides = [1, 1]} : vector<22x22xf32> to vector<16x16xf32>
    %108 = vector.broadcast %106 : f32 to vector<16x16xf32>
    %109 = arith.mulf %108, %107 : vector<16x16xf32>
    %110 = arith.addf %90, %109 : vector<16x16xf32>
    %c19 = arith.constant 19 : index
    %111 = memref.load %arg2[%c19] : memref<294xf32, #tpu.memory_space<smem>>
    %112 = vector.extract_strided_slice %9 {offsets = [2, 5], sizes = [16, 16], strides = [1, 1]} : vector<22x22xf32> to vector<16x16xf32>
    %113 = vector.broadcast %111 : f32 to vector<16x16xf32>
    %114 = arith.mulf %113, %112 : vector<16x16xf32>
    %115 = arith.addf %95, %114 : vector<16x16xf32>
    %c20 = arith.constant 20 : index
    %116 = memref.load %arg2[%c20] : memref<294xf32, #tpu.memory_space<smem>>
    %117 = vector.extract_strided_slice %9 {offsets = [2, 6], sizes = [16, 16], strides = [1, 1]} : vector<22x22xf32> to vector<16x16xf32>
    %118 = vector.broadcast %116 : f32 to vector<16x16xf32>
    %119 = arith.mulf %118, %117 : vector<16x16xf32>
    %120 = arith.addf %100, %119 : vector<16x16xf32>
    %c21 = arith.constant 21 : index
    %121 = memref.load %arg2[%c21] : memref<294xf32, #tpu.memory_space<smem>>
    %122 = vector.extract_strided_slice %9 {offsets = [3, 0], sizes = [16, 16], strides = [1, 1]} : vector<22x22xf32> to vector<16x16xf32>
    %123 = vector.broadcast %121 : f32 to vector<16x16xf32>
    %124 = arith.mulf %123, %122 : vector<16x16xf32>
    %125 = arith.addf %105, %124 : vector<16x16xf32>
    %c22 = arith.constant 22 : index
    %126 = memref.load %arg2[%c22] : memref<294xf32, #tpu.memory_space<smem>>
    %127 = vector.extract_strided_slice %9 {offsets = [3, 1], sizes = [16, 16], strides = [1, 1]} : vector<22x22xf32> to vector<16x16xf32>
    %128 = vector.broadcast %126 : f32 to vector<16x16xf32>
    %129 = arith.mulf %128, %127 : vector<16x16xf32>
    %130 = arith.addf %110, %129 : vector<16x16xf32>
    %c23 = arith.constant 23 : index
    %131 = memref.load %arg2[%c23] : memref<294xf32, #tpu.memory_space<smem>>
    %132 = vector.extract_strided_slice %9 {offsets = [3, 2], sizes = [16, 16], strides = [1, 1]} : vector<22x22xf32> to vector<16x16xf32>
    %133 = vector.broadcast %131 : f32 to vector<16x16xf32>
    %134 = arith.mulf %133, %132 : vector<16x16xf32>
    %135 = arith.addf %115, %134 : vector<16x16xf32>
    %c24 = arith.constant 24 : index
    %136 = memref.load %arg2[%c24] : memref<294xf32, #tpu.memory_space<smem>>
    %137 = vector.extract_strided_slice %9 {offsets = [3, 3], sizes = [16, 16], strides = [1, 1]} : vector<22x22xf32> to vector<16x16xf32>
    %138 = vector.broadcast %136 : f32 to vector<16x16xf32>
    %139 = arith.mulf %138, %137 : vector<16x16xf32>
    %140 = arith.addf %120, %139 : vector<16x16xf32>
    %c25 = arith.constant 25 : index
    %141 = memref.load %arg2[%c25] : memref<294xf32, #tpu.memory_space<smem>>
    %142 = vector.extract_strided_slice %9 {offsets = [3, 4], sizes = [16, 16], strides = [1, 1]} : vector<22x22xf32> to vector<16x16xf32>
    %143 = vector.broadcast %141 : f32 to vector<16x16xf32>
    %144 = arith.mulf %143, %142 : vector<16x16xf32>
    %145 = arith.addf %125, %144 : vector<16x16xf32>
    %c26 = arith.constant 26 : index
    %146 = memref.load %arg2[%c26] : memref<294xf32, #tpu.memory_space<smem>>
    %147 = vector.extract_strided_slice %9 {offsets = [3, 5], sizes = [16, 16], strides = [1, 1]} : vector<22x22xf32> to vector<16x16xf32>
    %148 = vector.broadcast %146 : f32 to vector<16x16xf32>
    %149 = arith.mulf %148, %147 : vector<16x16xf32>
    %150 = arith.addf %130, %149 : vector<16x16xf32>
    %c27 = arith.constant 27 : index
    %151 = memref.load %arg2[%c27] : memref<294xf32, #tpu.memory_space<smem>>
    %152 = vector.extract_strided_slice %9 {offsets = [3, 6], sizes = [16, 16], strides = [1, 1]} : vector<22x22xf32> to vector<16x16xf32>
    %153 = vector.broadcast %151 : f32 to vector<16x16xf32>
    %154 = arith.mulf %153, %152 : vector<16x16xf32>
    %155 = arith.addf %135, %154 : vector<16x16xf32>
    %c28 = arith.constant 28 : index
    %156 = memref.load %arg2[%c28] : memref<294xf32, #tpu.memory_space<smem>>
    %157 = vector.extract_strided_slice %9 {offsets = [4, 0], sizes = [16, 16], strides = [1, 1]} : vector<22x22xf32> to vector<16x16xf32>
    %158 = vector.broadcast %156 : f32 to vector<16x16xf32>
    %159 = arith.mulf %158, %157 : vector<16x16xf32>
    %160 = arith.addf %140, %159 : vector<16x16xf32>
    %c29 = arith.constant 29 : index
    %161 = memref.load %arg2[%c29] : memref<294xf32, #tpu.memory_space<smem>>
    %162 = vector.extract_strided_slice %9 {offsets = [4, 1], sizes = [16, 16], strides = [1, 1]} : vector<22x22xf32> to vector<16x16xf32>
    %163 = vector.broadcast %161 : f32 to vector<16x16xf32>
    %164 = arith.mulf %163, %162 : vector<16x16xf32>
    %165 = arith.addf %145, %164 : vector<16x16xf32>
    %c30 = arith.constant 30 : index
    %166 = memref.load %arg2[%c30] : memref<294xf32, #tpu.memory_space<smem>>
    %167 = vector.extract_strided_slice %9 {offsets = [4, 2], sizes = [16, 16], strides = [1, 1]} : vector<22x22xf32> to vector<16x16xf32>
    %168 = vector.broadcast %166 : f32 to vector<16x16xf32>
    %169 = arith.mulf %168, %167 : vector<16x16xf32>
    %170 = arith.addf %150, %169 : vector<16x16xf32>
    %c31 = arith.constant 31 : index
    %171 = memref.load %arg2[%c31] : memref<294xf32, #tpu.memory_space<smem>>
    %172 = vector.extract_strided_slice %9 {offsets = [4, 3], sizes = [16, 16], strides = [1, 1]} : vector<22x22xf32> to vector<16x16xf32>
    %173 = vector.broadcast %171 : f32 to vector<16x16xf32>
    %174 = arith.mulf %173, %172 : vector<16x16xf32>
    %175 = arith.addf %155, %174 : vector<16x16xf32>
    %c32 = arith.constant 32 : index
    %176 = memref.load %arg2[%c32] : memref<294xf32, #tpu.memory_space<smem>>
    %177 = vector.extract_strided_slice %9 {offsets = [4, 4], sizes = [16, 16], strides = [1, 1]} : vector<22x22xf32> to vector<16x16xf32>
    %178 = vector.broadcast %176 : f32 to vector<16x16xf32>
    %179 = arith.mulf %178, %177 : vector<16x16xf32>
    %180 = arith.addf %160, %179 : vector<16x16xf32>
    %c33 = arith.constant 33 : index
    %181 = memref.load %arg2[%c33] : memref<294xf32, #tpu.memory_space<smem>>
    %182 = vector.extract_strided_slice %9 {offsets = [4, 5], sizes = [16, 16], strides = [1, 1]} : vector<22x22xf32> to vector<16x16xf32>
    %183 = vector.broadcast %181 : f32 to vector<16x16xf32>
    %184 = arith.mulf %183, %182 : vector<16x16xf32>
    %185 = arith.addf %165, %184 : vector<16x16xf32>
    %c34 = arith.constant 34 : index
    %186 = memref.load %arg2[%c34] : memref<294xf32, #tpu.memory_space<smem>>
    %187 = vector.extract_strided_slice %9 {offsets = [4, 6], sizes = [16, 16], strides = [1, 1]} : vector<22x22xf32> to vector<16x16xf32>
    %188 = vector.broadcast %186 : f32 to vector<16x16xf32>
    %189 = arith.mulf %188, %187 : vector<16x16xf32>
    %190 = arith.addf %170, %189 : vector<16x16xf32>
    %c35 = arith.constant 35 : index
    %191 = memref.load %arg2[%c35] : memref<294xf32, #tpu.memory_space<smem>>
    %192 = vector.extract_strided_slice %9 {offsets = [5, 0], sizes = [16, 16], strides = [1, 1]} : vector<22x22xf32> to vector<16x16xf32>
    %193 = vector.broadcast %191 : f32 to vector<16x16xf32>
    %194 = arith.mulf %193, %192 : vector<16x16xf32>
    %195 = arith.addf %175, %194 : vector<16x16xf32>
    %c36 = arith.constant 36 : index
    %196 = memref.load %arg2[%c36] : memref<294xf32, #tpu.memory_space<smem>>
    %197 = vector.extract_strided_slice %9 {offsets = [5, 1], sizes = [16, 16], strides = [1, 1]} : vector<22x22xf32> to vector<16x16xf32>
    %198 = vector.broadcast %196 : f32 to vector<16x16xf32>
    %199 = arith.mulf %198, %197 : vector<16x16xf32>
    %200 = arith.addf %180, %199 : vector<16x16xf32>
    %c37 = arith.constant 37 : index
    %201 = memref.load %arg2[%c37] : memref<294xf32, #tpu.memory_space<smem>>
    %202 = vector.extract_strided_slice %9 {offsets = [5, 2], sizes = [16, 16], strides = [1, 1]} : vector<22x22xf32> to vector<16x16xf32>
    %203 = vector.broadcast %201 : f32 to vector<16x16xf32>
    %204 = arith.mulf %203, %202 : vector<16x16xf32>
    %205 = arith.addf %185, %204 : vector<16x16xf32>
    %c38 = arith.constant 38 : index
    %206 = memref.load %arg2[%c38] : memref<294xf32, #tpu.memory_space<smem>>
    %207 = vector.extract_strided_slice %9 {offsets = [5, 3], sizes = [16, 16], strides = [1, 1]} : vector<22x22xf32> to vector<16x16xf32>
    %208 = vector.broadcast %206 : f32 to vector<16x16xf32>
    %209 = arith.mulf %208, %207 : vector<16x16xf32>
    %210 = arith.addf %190, %209 : vector<16x16xf32>
    %c39 = arith.constant 39 : index
    %211 = memref.load %arg2[%c39] : memref<294xf32, #tpu.memory_space<smem>>
    %212 = vector.extract_strided_slice %9 {offsets = [5, 4], sizes = [16, 16], strides = [1, 1]} : vector<22x22xf32> to vector<16x16xf32>
    %213 = vector.broadcast %211 : f32 to vector<16x16xf32>
    %214 = arith.mulf %213, %212 : vector<16x16xf32>
    %215 = arith.addf %195, %214 : vector<16x16xf32>
    %c40 = arith.constant 40 : index
    %216 = memref.load %arg2[%c40] : memref<294xf32, #tpu.memory_space<smem>>
    %217 = vector.extract_strided_slice %9 {offsets = [5, 5], sizes = [16, 16], strides = [1, 1]} : vector<22x22xf32> to vector<16x16xf32>
    %218 = vector.broadcast %216 : f32 to vector<16x16xf32>
    %219 = arith.mulf %218, %217 : vector<16x16xf32>
    %220 = arith.addf %200, %219 : vector<16x16xf32>
    %c41 = arith.constant 41 : index
    %221 = memref.load %arg2[%c41] : memref<294xf32, #tpu.memory_space<smem>>
    %222 = vector.extract_strided_slice %9 {offsets = [5, 6], sizes = [16, 16], strides = [1, 1]} : vector<22x22xf32> to vector<16x16xf32>
    %223 = vector.broadcast %221 : f32 to vector<16x16xf32>
    %224 = arith.mulf %223, %222 : vector<16x16xf32>
    %225 = arith.addf %205, %224 : vector<16x16xf32>
    %c42 = arith.constant 42 : index
    %226 = memref.load %arg2[%c42] : memref<294xf32, #tpu.memory_space<smem>>
    %227 = vector.extract_strided_slice %9 {offsets = [6, 0], sizes = [16, 16], strides = [1, 1]} : vector<22x22xf32> to vector<16x16xf32>
    %228 = vector.broadcast %226 : f32 to vector<16x16xf32>
    %229 = arith.mulf %228, %227 : vector<16x16xf32>
    %230 = arith.addf %210, %229 : vector<16x16xf32>
    %c43 = arith.constant 43 : index
    %231 = memref.load %arg2[%c43] : memref<294xf32, #tpu.memory_space<smem>>
    %232 = vector.extract_strided_slice %9 {offsets = [6, 1], sizes = [16, 16], strides = [1, 1]} : vector<22x22xf32> to vector<16x16xf32>
    %233 = vector.broadcast %231 : f32 to vector<16x16xf32>
    %234 = arith.mulf %233, %232 : vector<16x16xf32>
    %235 = arith.addf %215, %234 : vector<16x16xf32>
    %c44 = arith.constant 44 : index
    %236 = memref.load %arg2[%c44] : memref<294xf32, #tpu.memory_space<smem>>
    %237 = vector.extract_strided_slice %9 {offsets = [6, 2], sizes = [16, 16], strides = [1, 1]} : vector<22x22xf32> to vector<16x16xf32>
    %238 = vector.broadcast %236 : f32 to vector<16x16xf32>
    %239 = arith.mulf %238, %237 : vector<16x16xf32>
    %240 = arith.addf %220, %239 : vector<16x16xf32>
    %c45 = arith.constant 45 : index
    %241 = memref.load %arg2[%c45] : memref<294xf32, #tpu.memory_space<smem>>
    %242 = vector.extract_strided_slice %9 {offsets = [6, 3], sizes = [16, 16], strides = [1, 1]} : vector<22x22xf32> to vector<16x16xf32>
    %243 = vector.broadcast %241 : f32 to vector<16x16xf32>
    %244 = arith.mulf %243, %242 : vector<16x16xf32>
    %245 = arith.addf %225, %244 : vector<16x16xf32>
    %c46 = arith.constant 46 : index
    %246 = memref.load %arg2[%c46] : memref<294xf32, #tpu.memory_space<smem>>
    %247 = vector.extract_strided_slice %9 {offsets = [6, 4], sizes = [16, 16], strides = [1, 1]} : vector<22x22xf32> to vector<16x16xf32>
    %248 = vector.broadcast %246 : f32 to vector<16x16xf32>
    %249 = arith.mulf %248, %247 : vector<16x16xf32>
    %250 = arith.addf %230, %249 : vector<16x16xf32>
    %c47 = arith.constant 47 : index
    %251 = memref.load %arg2[%c47] : memref<294xf32, #tpu.memory_space<smem>>
    %252 = vector.extract_strided_slice %9 {offsets = [6, 5], sizes = [16, 16], strides = [1, 1]} : vector<22x22xf32> to vector<16x16xf32>
    %253 = vector.broadcast %251 : f32 to vector<16x16xf32>
    %254 = arith.mulf %253, %252 : vector<16x16xf32>
    %255 = arith.addf %235, %254 : vector<16x16xf32>
    %c48 = arith.constant 48 : index
    %256 = memref.load %arg2[%c48] : memref<294xf32, #tpu.memory_space<smem>>
    %257 = vector.extract_strided_slice %9 {offsets = [6, 6], sizes = [16, 16], strides = [1, 1]} : vector<22x22xf32> to vector<16x16xf32>
    %258 = vector.broadcast %256 : f32 to vector<16x16xf32>
    %259 = arith.mulf %258, %257 : vector<16x16xf32>
    %260 = arith.addf %240, %259 : vector<16x16xf32>
    %c49 = arith.constant 49 : index
    %261 = memref.load %arg2[%c49] : memref<294xf32, #tpu.memory_space<smem>>
    %262 = vector.extract_strided_slice %11 {offsets = [0, 0], sizes = [16, 16], strides = [1, 1]} : vector<22x22xf32> to vector<16x16xf32>
    %263 = vector.broadcast %261 : f32 to vector<16x16xf32>
    %264 = arith.mulf %263, %262 : vector<16x16xf32>
    %265 = arith.addf %245, %264 : vector<16x16xf32>
    %c50 = arith.constant 50 : index
    %266 = memref.load %arg2[%c50] : memref<294xf32, #tpu.memory_space<smem>>
    %267 = vector.extract_strided_slice %11 {offsets = [0, 1], sizes = [16, 16], strides = [1, 1]} : vector<22x22xf32> to vector<16x16xf32>
    %268 = vector.broadcast %266 : f32 to vector<16x16xf32>
    %269 = arith.mulf %268, %267 : vector<16x16xf32>
    %270 = arith.addf %250, %269 : vector<16x16xf32>
    %c51 = arith.constant 51 : index
    %271 = memref.load %arg2[%c51] : memref<294xf32, #tpu.memory_space<smem>>
    %272 = vector.extract_strided_slice %11 {offsets = [0, 2], sizes = [16, 16], strides = [1, 1]} : vector<22x22xf32> to vector<16x16xf32>
    %273 = vector.broadcast %271 : f32 to vector<16x16xf32>
    %274 = arith.mulf %273, %272 : vector<16x16xf32>
    %275 = arith.addf %255, %274 : vector<16x16xf32>
    %c52 = arith.constant 52 : index
    %276 = memref.load %arg2[%c52] : memref<294xf32, #tpu.memory_space<smem>>
    %277 = vector.extract_strided_slice %11 {offsets = [0, 3], sizes = [16, 16], strides = [1, 1]} : vector<22x22xf32> to vector<16x16xf32>
    %278 = vector.broadcast %276 : f32 to vector<16x16xf32>
    %279 = arith.mulf %278, %277 : vector<16x16xf32>
    %280 = arith.addf %260, %279 : vector<16x16xf32>
    %c53 = arith.constant 53 : index
    %281 = memref.load %arg2[%c53] : memref<294xf32, #tpu.memory_space<smem>>
    %282 = vector.extract_strided_slice %11 {offsets = [0, 4], sizes = [16, 16], strides = [1, 1]} : vector<22x22xf32> to vector<16x16xf32>
    %283 = vector.broadcast %281 : f32 to vector<16x16xf32>
    %284 = arith.mulf %283, %282 : vector<16x16xf32>
    %285 = arith.addf %265, %284 : vector<16x16xf32>
    %c54 = arith.constant 54 : index
    %286 = memref.load %arg2[%c54] : memref<294xf32, #tpu.memory_space<smem>>
    %287 = vector.extract_strided_slice %11 {offsets = [0, 5], sizes = [16, 16], strides = [1, 1]} : vector<22x22xf32> to vector<16x16xf32>
    %288 = vector.broadcast %286 : f32 to vector<16x16xf32>
    %289 = arith.mulf %288, %287 : vector<16x16xf32>
    %290 = arith.addf %270, %289 : vector<16x16xf32>
    %c55 = arith.constant 55 : index
    %291 = memref.load %arg2[%c55] : memref<294xf32, #tpu.memory_space<smem>>
    %292 = vector.extract_strided_slice %11 {offsets = [0, 6], sizes = [16, 16], strides = [1, 1]} : vector<22x22xf32> to vector<16x16xf32>
    %293 = vector.broadcast %291 : f32 to vector<16x16xf32>
    %294 = arith.mulf %293, %292 : vector<16x16xf32>
    %295 = arith.addf %275, %294 : vector<16x16xf32>
    %c56 = arith.constant 56 : index
    %296 = memref.load %arg2[%c56] : memref<294xf32, #tpu.memory_space<smem>>
    %297 = vector.extract_strided_slice %11 {offsets = [1, 0], sizes = [16, 16], strides = [1, 1]} : vector<22x22xf32> to vector<16x16xf32>
    %298 = vector.broadcast %296 : f32 to vector<16x16xf32>
    %299 = arith.mulf %298, %297 : vector<16x16xf32>
    %300 = arith.addf %280, %299 : vector<16x16xf32>
    %c57 = arith.constant 57 : index
    %301 = memref.load %arg2[%c57] : memref<294xf32, #tpu.memory_space<smem>>
    %302 = vector.extract_strided_slice %11 {offsets = [1, 1], sizes = [16, 16], strides = [1, 1]} : vector<22x22xf32> to vector<16x16xf32>
    %303 = vector.broadcast %301 : f32 to vector<16x16xf32>
    %304 = arith.mulf %303, %302 : vector<16x16xf32>
    %305 = arith.addf %285, %304 : vector<16x16xf32>
    %c58 = arith.constant 58 : index
    %306 = memref.load %arg2[%c58] : memref<294xf32, #tpu.memory_space<smem>>
    %307 = vector.extract_strided_slice %11 {offsets = [1, 2], sizes = [16, 16], strides = [1, 1]} : vector<22x22xf32> to vector<16x16xf32>
    %308 = vector.broadcast %306 : f32 to vector<16x16xf32>
    %309 = arith.mulf %308, %307 : vector<16x16xf32>
    %310 = arith.addf %290, %309 : vector<16x16xf32>
    %c59 = arith.constant 59 : index
    %311 = memref.load %arg2[%c59] : memref<294xf32, #tpu.memory_space<smem>>
    %312 = vector.extract_strided_slice %11 {offsets = [1, 3], sizes = [16, 16], strides = [1, 1]} : vector<22x22xf32> to vector<16x16xf32>
    %313 = vector.broadcast %311 : f32 to vector<16x16xf32>
    %314 = arith.mulf %313, %312 : vector<16x16xf32>
    %315 = arith.addf %295, %314 : vector<16x16xf32>
    %c60 = arith.constant 60 : index
    %316 = memref.load %arg2[%c60] : memref<294xf32, #tpu.memory_space<smem>>
    %317 = vector.extract_strided_slice %11 {offsets = [1, 4], sizes = [16, 16], strides = [1, 1]} : vector<22x22xf32> to vector<16x16xf32>
    %318 = vector.broadcast %316 : f32 to vector<16x16xf32>
    %319 = arith.mulf %318, %317 : vector<16x16xf32>
    %320 = arith.addf %300, %319 : vector<16x16xf32>
    %c61 = arith.constant 61 : index
    %321 = memref.load %arg2[%c61] : memref<294xf32, #tpu.memory_space<smem>>
    %322 = vector.extract_strided_slice %11 {offsets = [1, 5], sizes = [16, 16], strides = [1, 1]} : vector<22x22xf32> to vector<16x16xf32>
    %323 = vector.broadcast %321 : f32 to vector<16x16xf32>
    %324 = arith.mulf %323, %322 : vector<16x16xf32>
    %325 = arith.addf %305, %324 : vector<16x16xf32>
    %c62 = arith.constant 62 : index
    %326 = memref.load %arg2[%c62] : memref<294xf32, #tpu.memory_space<smem>>
    %327 = vector.extract_strided_slice %11 {offsets = [1, 6], sizes = [16, 16], strides = [1, 1]} : vector<22x22xf32> to vector<16x16xf32>
    %328 = vector.broadcast %326 : f32 to vector<16x16xf32>
    %329 = arith.mulf %328, %327 : vector<16x16xf32>
    %330 = arith.addf %310, %329 : vector<16x16xf32>
    %c63 = arith.constant 63 : index
    %331 = memref.load %arg2[%c63] : memref<294xf32, #tpu.memory_space<smem>>
    %332 = vector.extract_strided_slice %11 {offsets = [2, 0], sizes = [16, 16], strides = [1, 1]} : vector<22x22xf32> to vector<16x16xf32>
    %333 = vector.broadcast %331 : f32 to vector<16x16xf32>
    %334 = arith.mulf %333, %332 : vector<16x16xf32>
    %335 = arith.addf %315, %334 : vector<16x16xf32>
    %c64 = arith.constant 64 : index
    %336 = memref.load %arg2[%c64] : memref<294xf32, #tpu.memory_space<smem>>
    %337 = vector.extract_strided_slice %11 {offsets = [2, 1], sizes = [16, 16], strides = [1, 1]} : vector<22x22xf32> to vector<16x16xf32>
    %338 = vector.broadcast %336 : f32 to vector<16x16xf32>
    %339 = arith.mulf %338, %337 : vector<16x16xf32>
    %340 = arith.addf %320, %339 : vector<16x16xf32>
    %c65 = arith.constant 65 : index
    %341 = memref.load %arg2[%c65] : memref<294xf32, #tpu.memory_space<smem>>
    %342 = vector.extract_strided_slice %11 {offsets = [2, 2], sizes = [16, 16], strides = [1, 1]} : vector<22x22xf32> to vector<16x16xf32>
    %343 = vector.broadcast %341 : f32 to vector<16x16xf32>
    %344 = arith.mulf %343, %342 : vector<16x16xf32>
    %345 = arith.addf %325, %344 : vector<16x16xf32>
    %c66 = arith.constant 66 : index
    %346 = memref.load %arg2[%c66] : memref<294xf32, #tpu.memory_space<smem>>
    %347 = vector.extract_strided_slice %11 {offsets = [2, 3], sizes = [16, 16], strides = [1, 1]} : vector<22x22xf32> to vector<16x16xf32>
    %348 = vector.broadcast %346 : f32 to vector<16x16xf32>
    %349 = arith.mulf %348, %347 : vector<16x16xf32>
    %350 = arith.addf %330, %349 : vector<16x16xf32>
    %c67 = arith.constant 67 : index
    %351 = memref.load %arg2[%c67] : memref<294xf32, #tpu.memory_space<smem>>
    %352 = vector.extract_strided_slice %11 {offsets = [2, 4], sizes = [16, 16], strides = [1, 1]} : vector<22x22xf32> to vector<16x16xf32>
    %353 = vector.broadcast %351 : f32 to vector<16x16xf32>
    %354 = arith.mulf %353, %352 : vector<16x16xf32>
    %355 = arith.addf %335, %354 : vector<16x16xf32>
    %c68 = arith.constant 68 : index
    %356 = memref.load %arg2[%c68] : memref<294xf32, #tpu.memory_space<smem>>
    %357 = vector.extract_strided_slice %11 {offsets = [2, 5], sizes = [16, 16], strides = [1, 1]} : vector<22x22xf32> to vector<16x16xf32>
    %358 = vector.broadcast %356 : f32 to vector<16x16xf32>
    %359 = arith.mulf %358, %357 : vector<16x16xf32>
    %360 = arith.addf %340, %359 : vector<16x16xf32>
    %c69 = arith.constant 69 : index
    %361 = memref.load %arg2[%c69] : memref<294xf32, #tpu.memory_space<smem>>
    %362 = vector.extract_strided_slice %11 {offsets = [2, 6], sizes = [16, 16], strides = [1, 1]} : vector<22x22xf32> to vector<16x16xf32>
    %363 = vector.broadcast %361 : f32 to vector<16x16xf32>
    %364 = arith.mulf %363, %362 : vector<16x16xf32>
    %365 = arith.addf %345, %364 : vector<16x16xf32>
    %c70 = arith.constant 70 : index
    %366 = memref.load %arg2[%c70] : memref<294xf32, #tpu.memory_space<smem>>
    %367 = vector.extract_strided_slice %11 {offsets = [3, 0], sizes = [16, 16], strides = [1, 1]} : vector<22x22xf32> to vector<16x16xf32>
    %368 = vector.broadcast %366 : f32 to vector<16x16xf32>
    %369 = arith.mulf %368, %367 : vector<16x16xf32>
    %370 = arith.addf %350, %369 : vector<16x16xf32>
    %c71 = arith.constant 71 : index
    %371 = memref.load %arg2[%c71] : memref<294xf32, #tpu.memory_space<smem>>
    %372 = vector.extract_strided_slice %11 {offsets = [3, 1], sizes = [16, 16], strides = [1, 1]} : vector<22x22xf32> to vector<16x16xf32>
    %373 = vector.broadcast %371 : f32 to vector<16x16xf32>
    %374 = arith.mulf %373, %372 : vector<16x16xf32>
    %375 = arith.addf %355, %374 : vector<16x16xf32>
    %c72 = arith.constant 72 : index
    %376 = memref.load %arg2[%c72] : memref<294xf32, #tpu.memory_space<smem>>
    %377 = vector.extract_strided_slice %11 {offsets = [3, 2], sizes = [16, 16], strides = [1, 1]} : vector<22x22xf32> to vector<16x16xf32>
    %378 = vector.broadcast %376 : f32 to vector<16x16xf32>
    %379 = arith.mulf %378, %377 : vector<16x16xf32>
    %380 = arith.addf %360, %379 : vector<16x16xf32>
    %c73 = arith.constant 73 : index
    %381 = memref.load %arg2[%c73] : memref<294xf32, #tpu.memory_space<smem>>
    %382 = vector.extract_strided_slice %11 {offsets = [3, 3], sizes = [16, 16], strides = [1, 1]} : vector<22x22xf32> to vector<16x16xf32>
    %383 = vector.broadcast %381 : f32 to vector<16x16xf32>
    %384 = arith.mulf %383, %382 : vector<16x16xf32>
    %385 = arith.addf %365, %384 : vector<16x16xf32>
    %c74 = arith.constant 74 : index
    %386 = memref.load %arg2[%c74] : memref<294xf32, #tpu.memory_space<smem>>
    %387 = vector.extract_strided_slice %11 {offsets = [3, 4], sizes = [16, 16], strides = [1, 1]} : vector<22x22xf32> to vector<16x16xf32>
    %388 = vector.broadcast %386 : f32 to vector<16x16xf32>
    %389 = arith.mulf %388, %387 : vector<16x16xf32>
    %390 = arith.addf %370, %389 : vector<16x16xf32>
    %c75 = arith.constant 75 : index
    %391 = memref.load %arg2[%c75] : memref<294xf32, #tpu.memory_space<smem>>
    %392 = vector.extract_strided_slice %11 {offsets = [3, 5], sizes = [16, 16], strides = [1, 1]} : vector<22x22xf32> to vector<16x16xf32>
    %393 = vector.broadcast %391 : f32 to vector<16x16xf32>
    %394 = arith.mulf %393, %392 : vector<16x16xf32>
    %395 = arith.addf %375, %394 : vector<16x16xf32>
    %c76 = arith.constant 76 : index
    %396 = memref.load %arg2[%c76] : memref<294xf32, #tpu.memory_space<smem>>
    %397 = vector.extract_strided_slice %11 {offsets = [3, 6], sizes = [16, 16], strides = [1, 1]} : vector<22x22xf32> to vector<16x16xf32>
    %398 = vector.broadcast %396 : f32 to vector<16x16xf32>
    %399 = arith.mulf %398, %397 : vector<16x16xf32>
    %400 = arith.addf %380, %399 : vector<16x16xf32>
    %c77 = arith.constant 77 : index
    %401 = memref.load %arg2[%c77] : memref<294xf32, #tpu.memory_space<smem>>
    %402 = vector.extract_strided_slice %11 {offsets = [4, 0], sizes = [16, 16], strides = [1, 1]} : vector<22x22xf32> to vector<16x16xf32>
    %403 = vector.broadcast %401 : f32 to vector<16x16xf32>
    %404 = arith.mulf %403, %402 : vector<16x16xf32>
    %405 = arith.addf %385, %404 : vector<16x16xf32>
    %c78 = arith.constant 78 : index
    %406 = memref.load %arg2[%c78] : memref<294xf32, #tpu.memory_space<smem>>
    %407 = vector.extract_strided_slice %11 {offsets = [4, 1], sizes = [16, 16], strides = [1, 1]} : vector<22x22xf32> to vector<16x16xf32>
    %408 = vector.broadcast %406 : f32 to vector<16x16xf32>
    %409 = arith.mulf %408, %407 : vector<16x16xf32>
    %410 = arith.addf %390, %409 : vector<16x16xf32>
    %c79 = arith.constant 79 : index
    %411 = memref.load %arg2[%c79] : memref<294xf32, #tpu.memory_space<smem>>
    %412 = vector.extract_strided_slice %11 {offsets = [4, 2], sizes = [16, 16], strides = [1, 1]} : vector<22x22xf32> to vector<16x16xf32>
    %413 = vector.broadcast %411 : f32 to vector<16x16xf32>
    %414 = arith.mulf %413, %412 : vector<16x16xf32>
    %415 = arith.addf %395, %414 : vector<16x16xf32>
    %c80 = arith.constant 80 : index
    %416 = memref.load %arg2[%c80] : memref<294xf32, #tpu.memory_space<smem>>
    %417 = vector.extract_strided_slice %11 {offsets = [4, 3], sizes = [16, 16], strides = [1, 1]} : vector<22x22xf32> to vector<16x16xf32>
    %418 = vector.broadcast %416 : f32 to vector<16x16xf32>
    %419 = arith.mulf %418, %417 : vector<16x16xf32>
    %420 = arith.addf %400, %419 : vector<16x16xf32>
    %c81 = arith.constant 81 : index
    %421 = memref.load %arg2[%c81] : memref<294xf32, #tpu.memory_space<smem>>
    %422 = vector.extract_strided_slice %11 {offsets = [4, 4], sizes = [16, 16], strides = [1, 1]} : vector<22x22xf32> to vector<16x16xf32>
    %423 = vector.broadcast %421 : f32 to vector<16x16xf32>
    %424 = arith.mulf %423, %422 : vector<16x16xf32>
    %425 = arith.addf %405, %424 : vector<16x16xf32>
    %c82 = arith.constant 82 : index
    %426 = memref.load %arg2[%c82] : memref<294xf32, #tpu.memory_space<smem>>
    %427 = vector.extract_strided_slice %11 {offsets = [4, 5], sizes = [16, 16], strides = [1, 1]} : vector<22x22xf32> to vector<16x16xf32>
    %428 = vector.broadcast %426 : f32 to vector<16x16xf32>
    %429 = arith.mulf %428, %427 : vector<16x16xf32>
    %430 = arith.addf %410, %429 : vector<16x16xf32>
    %c83 = arith.constant 83 : index
    %431 = memref.load %arg2[%c83] : memref<294xf32, #tpu.memory_space<smem>>
    %432 = vector.extract_strided_slice %11 {offsets = [4, 6], sizes = [16, 16], strides = [1, 1]} : vector<22x22xf32> to vector<16x16xf32>
    %433 = vector.broadcast %431 : f32 to vector<16x16xf32>
    %434 = arith.mulf %433, %432 : vector<16x16xf32>
    %435 = arith.addf %415, %434 : vector<16x16xf32>
    %c84 = arith.constant 84 : index
    %436 = memref.load %arg2[%c84] : memref<294xf32, #tpu.memory_space<smem>>
    %437 = vector.extract_strided_slice %11 {offsets = [5, 0], sizes = [16, 16], strides = [1, 1]} : vector<22x22xf32> to vector<16x16xf32>
    %438 = vector.broadcast %436 : f32 to vector<16x16xf32>
    %439 = arith.mulf %438, %437 : vector<16x16xf32>
    %440 = arith.addf %420, %439 : vector<16x16xf32>
    %c85 = arith.constant 85 : index
    %441 = memref.load %arg2[%c85] : memref<294xf32, #tpu.memory_space<smem>>
    %442 = vector.extract_strided_slice %11 {offsets = [5, 1], sizes = [16, 16], strides = [1, 1]} : vector<22x22xf32> to vector<16x16xf32>
    %443 = vector.broadcast %441 : f32 to vector<16x16xf32>
    %444 = arith.mulf %443, %442 : vector<16x16xf32>
    %445 = arith.addf %425, %444 : vector<16x16xf32>
    %c86 = arith.constant 86 : index
    %446 = memref.load %arg2[%c86] : memref<294xf32, #tpu.memory_space<smem>>
    %447 = vector.extract_strided_slice %11 {offsets = [5, 2], sizes = [16, 16], strides = [1, 1]} : vector<22x22xf32> to vector<16x16xf32>
    %448 = vector.broadcast %446 : f32 to vector<16x16xf32>
    %449 = arith.mulf %448, %447 : vector<16x16xf32>
    %450 = arith.addf %430, %449 : vector<16x16xf32>
    %c87 = arith.constant 87 : index
    %451 = memref.load %arg2[%c87] : memref<294xf32, #tpu.memory_space<smem>>
    %452 = vector.extract_strided_slice %11 {offsets = [5, 3], sizes = [16, 16], strides = [1, 1]} : vector<22x22xf32> to vector<16x16xf32>
    %453 = vector.broadcast %451 : f32 to vector<16x16xf32>
    %454 = arith.mulf %453, %452 : vector<16x16xf32>
    %455 = arith.addf %435, %454 : vector<16x16xf32>
    %c88 = arith.constant 88 : index
    %456 = memref.load %arg2[%c88] : memref<294xf32, #tpu.memory_space<smem>>
    %457 = vector.extract_strided_slice %11 {offsets = [5, 4], sizes = [16, 16], strides = [1, 1]} : vector<22x22xf32> to vector<16x16xf32>
    %458 = vector.broadcast %456 : f32 to vector<16x16xf32>
    %459 = arith.mulf %458, %457 : vector<16x16xf32>
    %460 = arith.addf %440, %459 : vector<16x16xf32>
    %c89 = arith.constant 89 : index
    %461 = memref.load %arg2[%c89] : memref<294xf32, #tpu.memory_space<smem>>
    %462 = vector.extract_strided_slice %11 {offsets = [5, 5], sizes = [16, 16], strides = [1, 1]} : vector<22x22xf32> to vector<16x16xf32>
    %463 = vector.broadcast %461 : f32 to vector<16x16xf32>
    %464 = arith.mulf %463, %462 : vector<16x16xf32>
    %465 = arith.addf %445, %464 : vector<16x16xf32>
    %c90 = arith.constant 90 : index
    %466 = memref.load %arg2[%c90] : memref<294xf32, #tpu.memory_space<smem>>
    %467 = vector.extract_strided_slice %11 {offsets = [5, 6], sizes = [16, 16], strides = [1, 1]} : vector<22x22xf32> to vector<16x16xf32>
    %468 = vector.broadcast %466 : f32 to vector<16x16xf32>
    %469 = arith.mulf %468, %467 : vector<16x16xf32>
    %470 = arith.addf %450, %469 : vector<16x16xf32>
    %c91 = arith.constant 91 : index
    %471 = memref.load %arg2[%c91] : memref<294xf32, #tpu.memory_space<smem>>
    %472 = vector.extract_strided_slice %11 {offsets = [6, 0], sizes = [16, 16], strides = [1, 1]} : vector<22x22xf32> to vector<16x16xf32>
    %473 = vector.broadcast %471 : f32 to vector<16x16xf32>
    %474 = arith.mulf %473, %472 : vector<16x16xf32>
    %475 = arith.addf %455, %474 : vector<16x16xf32>
    %c92 = arith.constant 92 : index
    %476 = memref.load %arg2[%c92] : memref<294xf32, #tpu.memory_space<smem>>
    %477 = vector.extract_strided_slice %11 {offsets = [6, 1], sizes = [16, 16], strides = [1, 1]} : vector<22x22xf32> to vector<16x16xf32>
    %478 = vector.broadcast %476 : f32 to vector<16x16xf32>
    %479 = arith.mulf %478, %477 : vector<16x16xf32>
    %480 = arith.addf %460, %479 : vector<16x16xf32>
    %c93 = arith.constant 93 : index
    %481 = memref.load %arg2[%c93] : memref<294xf32, #tpu.memory_space<smem>>
    %482 = vector.extract_strided_slice %11 {offsets = [6, 2], sizes = [16, 16], strides = [1, 1]} : vector<22x22xf32> to vector<16x16xf32>
    %483 = vector.broadcast %481 : f32 to vector<16x16xf32>
    %484 = arith.mulf %483, %482 : vector<16x16xf32>
    %485 = arith.addf %465, %484 : vector<16x16xf32>
    %c94 = arith.constant 94 : index
    %486 = memref.load %arg2[%c94] : memref<294xf32, #tpu.memory_space<smem>>
    %487 = vector.extract_strided_slice %11 {offsets = [6, 3], sizes = [16, 16], strides = [1, 1]} : vector<22x22xf32> to vector<16x16xf32>
    %488 = vector.broadcast %486 : f32 to vector<16x16xf32>
    %489 = arith.mulf %488, %487 : vector<16x16xf32>
    %490 = arith.addf %470, %489 : vector<16x16xf32>
    %c95 = arith.constant 95 : index
    %491 = memref.load %arg2[%c95] : memref<294xf32, #tpu.memory_space<smem>>
    %492 = vector.extract_strided_slice %11 {offsets = [6, 4], sizes = [16, 16], strides = [1, 1]} : vector<22x22xf32> to vector<16x16xf32>
    %493 = vector.broadcast %491 : f32 to vector<16x16xf32>
    %494 = arith.mulf %493, %492 : vector<16x16xf32>
    %495 = arith.addf %475, %494 : vector<16x16xf32>
    %c96 = arith.constant 96 : index
    %496 = memref.load %arg2[%c96] : memref<294xf32, #tpu.memory_space<smem>>
    %497 = vector.extract_strided_slice %11 {offsets = [6, 5], sizes = [16, 16], strides = [1, 1]} : vector<22x22xf32> to vector<16x16xf32>
    %498 = vector.broadcast %496 : f32 to vector<16x16xf32>
    %499 = arith.mulf %498, %497 : vector<16x16xf32>
    %500 = arith.addf %480, %499 : vector<16x16xf32>
    %c97 = arith.constant 97 : index
    %501 = memref.load %arg2[%c97] : memref<294xf32, #tpu.memory_space<smem>>
    %502 = vector.extract_strided_slice %11 {offsets = [6, 6], sizes = [16, 16], strides = [1, 1]} : vector<22x22xf32> to vector<16x16xf32>
    %503 = vector.broadcast %501 : f32 to vector<16x16xf32>
    %504 = arith.mulf %503, %502 : vector<16x16xf32>
    %505 = arith.addf %485, %504 : vector<16x16xf32>
    %506 = arith.addf %500, %505 : vector<16x16xf32>
    %507 = arith.addf %490, %495 : vector<16x16xf32>
    %508 = arith.addf %506, %507 : vector<16x16xf32>
    %c0_9 = arith.constant 0 : index
    %509 = memref.load %arg3[%c0_9] : memref<6xf32, #tpu.memory_space<smem>>
    %510 = vector.broadcast %509 : f32 to vector<16x16xf32>
    %511 = arith.mulf %508, %510 : vector<16x16xf32>
    %c1_10 = arith.constant 1 : index
    %512 = memref.load %arg3[%c1_10] : memref<6xf32, #tpu.memory_space<smem>>
    %513 = vector.broadcast %512 : f32 to vector<16x16xf32>
    %514 = arith.addf %511, %513 : vector<16x16xf32>
    %515 = arith.negf %514 : vector<16x16xf32>
    %516 = math.exp %515 : vector<16x16xf32>
    %cst_11 = arith.constant 1.000000e+00 : f32
    %517 = vector.broadcast %cst_11 : f32 to vector<16x16xf32>
    %518 = arith.addf %517, %516 : vector<16x16xf32>
    %519 = arith.divf %517, %518 : vector<16x16xf32>
    %c0_12 = arith.constant 0 : index
    %c0_13 = arith.constant 0 : index
    %520 = vector.load %arg5[%c0_12, %c0_13] : memref<4x16xf32, #tpu.memory_space<vmem>>, vector<4x16xf32>
    %c0_14 = arith.constant 0 : index
    %c0_15 = arith.constant 0 : index
    %521 = vector.load %arg6[%c0_14, %c0_15] : memref<4x16xf32, #tpu.memory_space<vmem>>, vector<4x16xf32>
    %cst_16 = arith.constant 6.250000e-02 : f32
    %522 = vector.broadcast %cst_16 : f32 to vector<4x16xf32>
    %523 = arith.mulf %521, %522 : vector<4x16xf32>
    %cst_17 = arith.constant 0.000000e+00 : f32
    %524 = vector.broadcast %cst_17 : f32 to vector<3x22xf32>
    %cst_18 = arith.constant 0.000000e+00 : f32
    %525 = vector.broadcast %cst_18 : f32 to vector<4x3xf32>
    %526 = tpu.concatenate %525, %520, %525 in 1 : vector<4x3xf32>, vector<4x16xf32>, vector<4x3xf32> -> vector<4x22xf32>
    %527 = tpu.concatenate %524, %526, %524 in 0 : vector<3x22xf32>, vector<4x22xf32>, vector<3x22xf32> -> vector<10x22xf32>
    %528 = tpu.concatenate %525, %523, %525 in 1 : vector<4x3xf32>, vector<4x16xf32>, vector<4x3xf32> -> vector<4x22xf32>
    %529 = tpu.concatenate %524, %528, %524 in 0 : vector<3x22xf32>, vector<4x22xf32>, vector<3x22xf32> -> vector<10x22xf32>
    %cst_19 = arith.constant 0.000000e+00 : f32
    %530 = vector.broadcast %cst_19 : f32 to vector<4x16xf32>
    %cst_20 = arith.constant 0.000000e+00 : f32
    %531 = vector.broadcast %cst_20 : f32 to vector<4x16xf32>
    %cst_21 = arith.constant 0.000000e+00 : f32
    %532 = vector.broadcast %cst_21 : f32 to vector<4x16xf32>
    %cst_22 = arith.constant 0.000000e+00 : f32
    %533 = vector.broadcast %cst_22 : f32 to vector<4x16xf32>
    %c98 = arith.constant 98 : index
    %534 = memref.load %arg2[%c98] : memref<294xf32, #tpu.memory_space<smem>>
    %535 = vector.extract_strided_slice %527 {offsets = [0, 0], sizes = [4, 16], strides = [1, 1]} : vector<10x22xf32> to vector<4x16xf32>
    %536 = vector.broadcast %534 : f32 to vector<4x16xf32>
    %537 = arith.mulf %536, %535 : vector<4x16xf32>
    %538 = arith.addf %530, %537 : vector<4x16xf32>
    %c99 = arith.constant 99 : index
    %539 = memref.load %arg2[%c99] : memref<294xf32, #tpu.memory_space<smem>>
    %540 = vector.extract_strided_slice %527 {offsets = [0, 1], sizes = [4, 16], strides = [1, 1]} : vector<10x22xf32> to vector<4x16xf32>
    %541 = vector.broadcast %539 : f32 to vector<4x16xf32>
    %542 = arith.mulf %541, %540 : vector<4x16xf32>
    %543 = arith.addf %531, %542 : vector<4x16xf32>
    %c100 = arith.constant 100 : index
    %544 = memref.load %arg2[%c100] : memref<294xf32, #tpu.memory_space<smem>>
    %545 = vector.extract_strided_slice %527 {offsets = [0, 2], sizes = [4, 16], strides = [1, 1]} : vector<10x22xf32> to vector<4x16xf32>
    %546 = vector.broadcast %544 : f32 to vector<4x16xf32>
    %547 = arith.mulf %546, %545 : vector<4x16xf32>
    %548 = arith.addf %532, %547 : vector<4x16xf32>
    %c101 = arith.constant 101 : index
    %549 = memref.load %arg2[%c101] : memref<294xf32, #tpu.memory_space<smem>>
    %550 = vector.extract_strided_slice %527 {offsets = [0, 3], sizes = [4, 16], strides = [1, 1]} : vector<10x22xf32> to vector<4x16xf32>
    %551 = vector.broadcast %549 : f32 to vector<4x16xf32>
    %552 = arith.mulf %551, %550 : vector<4x16xf32>
    %553 = arith.addf %533, %552 : vector<4x16xf32>
    %c102 = arith.constant 102 : index
    %554 = memref.load %arg2[%c102] : memref<294xf32, #tpu.memory_space<smem>>
    %555 = vector.extract_strided_slice %527 {offsets = [0, 4], sizes = [4, 16], strides = [1, 1]} : vector<10x22xf32> to vector<4x16xf32>
    %556 = vector.broadcast %554 : f32 to vector<4x16xf32>
    %557 = arith.mulf %556, %555 : vector<4x16xf32>
    %558 = arith.addf %538, %557 : vector<4x16xf32>
    %c103 = arith.constant 103 : index
    %559 = memref.load %arg2[%c103] : memref<294xf32, #tpu.memory_space<smem>>
    %560 = vector.extract_strided_slice %527 {offsets = [0, 5], sizes = [4, 16], strides = [1, 1]} : vector<10x22xf32> to vector<4x16xf32>
    %561 = vector.broadcast %559 : f32 to vector<4x16xf32>
    %562 = arith.mulf %561, %560 : vector<4x16xf32>
    %563 = arith.addf %543, %562 : vector<4x16xf32>
    %c104 = arith.constant 104 : index
    %564 = memref.load %arg2[%c104] : memref<294xf32, #tpu.memory_space<smem>>
    %565 = vector.extract_strided_slice %527 {offsets = [0, 6], sizes = [4, 16], strides = [1, 1]} : vector<10x22xf32> to vector<4x16xf32>
    %566 = vector.broadcast %564 : f32 to vector<4x16xf32>
    %567 = arith.mulf %566, %565 : vector<4x16xf32>
    %568 = arith.addf %548, %567 : vector<4x16xf32>
    %c105 = arith.constant 105 : index
    %569 = memref.load %arg2[%c105] : memref<294xf32, #tpu.memory_space<smem>>
    %570 = vector.extract_strided_slice %527 {offsets = [1, 0], sizes = [4, 16], strides = [1, 1]} : vector<10x22xf32> to vector<4x16xf32>
    %571 = vector.broadcast %569 : f32 to vector<4x16xf32>
    %572 = arith.mulf %571, %570 : vector<4x16xf32>
    %573 = arith.addf %553, %572 : vector<4x16xf32>
    %c106 = arith.constant 106 : index
    %574 = memref.load %arg2[%c106] : memref<294xf32, #tpu.memory_space<smem>>
    %575 = vector.extract_strided_slice %527 {offsets = [1, 1], sizes = [4, 16], strides = [1, 1]} : vector<10x22xf32> to vector<4x16xf32>
    %576 = vector.broadcast %574 : f32 to vector<4x16xf32>
    %577 = arith.mulf %576, %575 : vector<4x16xf32>
    %578 = arith.addf %558, %577 : vector<4x16xf32>
    %c107 = arith.constant 107 : index
    %579 = memref.load %arg2[%c107] : memref<294xf32, #tpu.memory_space<smem>>
    %580 = vector.extract_strided_slice %527 {offsets = [1, 2], sizes = [4, 16], strides = [1, 1]} : vector<10x22xf32> to vector<4x16xf32>
    %581 = vector.broadcast %579 : f32 to vector<4x16xf32>
    %582 = arith.mulf %581, %580 : vector<4x16xf32>
    %583 = arith.addf %563, %582 : vector<4x16xf32>
    %c108 = arith.constant 108 : index
    %584 = memref.load %arg2[%c108] : memref<294xf32, #tpu.memory_space<smem>>
    %585 = vector.extract_strided_slice %527 {offsets = [1, 3], sizes = [4, 16], strides = [1, 1]} : vector<10x22xf32> to vector<4x16xf32>
    %586 = vector.broadcast %584 : f32 to vector<4x16xf32>
    %587 = arith.mulf %586, %585 : vector<4x16xf32>
    %588 = arith.addf %568, %587 : vector<4x16xf32>
    %c109 = arith.constant 109 : index
    %589 = memref.load %arg2[%c109] : memref<294xf32, #tpu.memory_space<smem>>
    %590 = vector.extract_strided_slice %527 {offsets = [1, 4], sizes = [4, 16], strides = [1, 1]} : vector<10x22xf32> to vector<4x16xf32>
    %591 = vector.broadcast %589 : f32 to vector<4x16xf32>
    %592 = arith.mulf %591, %590 : vector<4x16xf32>
    %593 = arith.addf %573, %592 : vector<4x16xf32>
    %c110 = arith.constant 110 : index
    %594 = memref.load %arg2[%c110] : memref<294xf32, #tpu.memory_space<smem>>
    %595 = vector.extract_strided_slice %527 {offsets = [1, 5], sizes = [4, 16], strides = [1, 1]} : vector<10x22xf32> to vector<4x16xf32>
    %596 = vector.broadcast %594 : f32 to vector<4x16xf32>
    %597 = arith.mulf %596, %595 : vector<4x16xf32>
    %598 = arith.addf %578, %597 : vector<4x16xf32>
    %c111 = arith.constant 111 : index
    %599 = memref.load %arg2[%c111] : memref<294xf32, #tpu.memory_space<smem>>
    %600 = vector.extract_strided_slice %527 {offsets = [1, 6], sizes = [4, 16], strides = [1, 1]} : vector<10x22xf32> to vector<4x16xf32>
    %601 = vector.broadcast %599 : f32 to vector<4x16xf32>
    %602 = arith.mulf %601, %600 : vector<4x16xf32>
    %603 = arith.addf %583, %602 : vector<4x16xf32>
    %c112 = arith.constant 112 : index
    %604 = memref.load %arg2[%c112] : memref<294xf32, #tpu.memory_space<smem>>
    %605 = vector.extract_strided_slice %527 {offsets = [2, 0], sizes = [4, 16], strides = [1, 1]} : vector<10x22xf32> to vector<4x16xf32>
    %606 = vector.broadcast %604 : f32 to vector<4x16xf32>
    %607 = arith.mulf %606, %605 : vector<4x16xf32>
    %608 = arith.addf %588, %607 : vector<4x16xf32>
    %c113 = arith.constant 113 : index
    %609 = memref.load %arg2[%c113] : memref<294xf32, #tpu.memory_space<smem>>
    %610 = vector.extract_strided_slice %527 {offsets = [2, 1], sizes = [4, 16], strides = [1, 1]} : vector<10x22xf32> to vector<4x16xf32>
    %611 = vector.broadcast %609 : f32 to vector<4x16xf32>
    %612 = arith.mulf %611, %610 : vector<4x16xf32>
    %613 = arith.addf %593, %612 : vector<4x16xf32>
    %c114 = arith.constant 114 : index
    %614 = memref.load %arg2[%c114] : memref<294xf32, #tpu.memory_space<smem>>
    %615 = vector.extract_strided_slice %527 {offsets = [2, 2], sizes = [4, 16], strides = [1, 1]} : vector<10x22xf32> to vector<4x16xf32>
    %616 = vector.broadcast %614 : f32 to vector<4x16xf32>
    %617 = arith.mulf %616, %615 : vector<4x16xf32>
    %618 = arith.addf %598, %617 : vector<4x16xf32>
    %c115 = arith.constant 115 : index
    %619 = memref.load %arg2[%c115] : memref<294xf32, #tpu.memory_space<smem>>
    %620 = vector.extract_strided_slice %527 {offsets = [2, 3], sizes = [4, 16], strides = [1, 1]} : vector<10x22xf32> to vector<4x16xf32>
    %621 = vector.broadcast %619 : f32 to vector<4x16xf32>
    %622 = arith.mulf %621, %620 : vector<4x16xf32>
    %623 = arith.addf %603, %622 : vector<4x16xf32>
    %c116 = arith.constant 116 : index
    %624 = memref.load %arg2[%c116] : memref<294xf32, #tpu.memory_space<smem>>
    %625 = vector.extract_strided_slice %527 {offsets = [2, 4], sizes = [4, 16], strides = [1, 1]} : vector<10x22xf32> to vector<4x16xf32>
    %626 = vector.broadcast %624 : f32 to vector<4x16xf32>
    %627 = arith.mulf %626, %625 : vector<4x16xf32>
    %628 = arith.addf %608, %627 : vector<4x16xf32>
    %c117 = arith.constant 117 : index
    %629 = memref.load %arg2[%c117] : memref<294xf32, #tpu.memory_space<smem>>
    %630 = vector.extract_strided_slice %527 {offsets = [2, 5], sizes = [4, 16], strides = [1, 1]} : vector<10x22xf32> to vector<4x16xf32>
    %631 = vector.broadcast %629 : f32 to vector<4x16xf32>
    %632 = arith.mulf %631, %630 : vector<4x16xf32>
    %633 = arith.addf %613, %632 : vector<4x16xf32>
    %c118 = arith.constant 118 : index
    %634 = memref.load %arg2[%c118] : memref<294xf32, #tpu.memory_space<smem>>
    %635 = vector.extract_strided_slice %527 {offsets = [2, 6], sizes = [4, 16], strides = [1, 1]} : vector<10x22xf32> to vector<4x16xf32>
    %636 = vector.broadcast %634 : f32 to vector<4x16xf32>
    %637 = arith.mulf %636, %635 : vector<4x16xf32>
    %638 = arith.addf %618, %637 : vector<4x16xf32>
    %c119 = arith.constant 119 : index
    %639 = memref.load %arg2[%c119] : memref<294xf32, #tpu.memory_space<smem>>
    %640 = vector.extract_strided_slice %527 {offsets = [3, 0], sizes = [4, 16], strides = [1, 1]} : vector<10x22xf32> to vector<4x16xf32>
    %641 = vector.broadcast %639 : f32 to vector<4x16xf32>
    %642 = arith.mulf %641, %640 : vector<4x16xf32>
    %643 = arith.addf %623, %642 : vector<4x16xf32>
    %c120 = arith.constant 120 : index
    %644 = memref.load %arg2[%c120] : memref<294xf32, #tpu.memory_space<smem>>
    %645 = vector.extract_strided_slice %527 {offsets = [3, 1], sizes = [4, 16], strides = [1, 1]} : vector<10x22xf32> to vector<4x16xf32>
    %646 = vector.broadcast %644 : f32 to vector<4x16xf32>
    %647 = arith.mulf %646, %645 : vector<4x16xf32>
    %648 = arith.addf %628, %647 : vector<4x16xf32>
    %c121 = arith.constant 121 : index
    %649 = memref.load %arg2[%c121] : memref<294xf32, #tpu.memory_space<smem>>
    %650 = vector.extract_strided_slice %527 {offsets = [3, 2], sizes = [4, 16], strides = [1, 1]} : vector<10x22xf32> to vector<4x16xf32>
    %651 = vector.broadcast %649 : f32 to vector<4x16xf32>
    %652 = arith.mulf %651, %650 : vector<4x16xf32>
    %653 = arith.addf %633, %652 : vector<4x16xf32>
    %c122 = arith.constant 122 : index
    %654 = memref.load %arg2[%c122] : memref<294xf32, #tpu.memory_space<smem>>
    %655 = vector.extract_strided_slice %527 {offsets = [3, 3], sizes = [4, 16], strides = [1, 1]} : vector<10x22xf32> to vector<4x16xf32>
    %656 = vector.broadcast %654 : f32 to vector<4x16xf32>
    %657 = arith.mulf %656, %655 : vector<4x16xf32>
    %658 = arith.addf %638, %657 : vector<4x16xf32>
    %c123 = arith.constant 123 : index
    %659 = memref.load %arg2[%c123] : memref<294xf32, #tpu.memory_space<smem>>
    %660 = vector.extract_strided_slice %527 {offsets = [3, 4], sizes = [4, 16], strides = [1, 1]} : vector<10x22xf32> to vector<4x16xf32>
    %661 = vector.broadcast %659 : f32 to vector<4x16xf32>
    %662 = arith.mulf %661, %660 : vector<4x16xf32>
    %663 = arith.addf %643, %662 : vector<4x16xf32>
    %c124 = arith.constant 124 : index
    %664 = memref.load %arg2[%c124] : memref<294xf32, #tpu.memory_space<smem>>
    %665 = vector.extract_strided_slice %527 {offsets = [3, 5], sizes = [4, 16], strides = [1, 1]} : vector<10x22xf32> to vector<4x16xf32>
    %666 = vector.broadcast %664 : f32 to vector<4x16xf32>
    %667 = arith.mulf %666, %665 : vector<4x16xf32>
    %668 = arith.addf %648, %667 : vector<4x16xf32>
    %c125 = arith.constant 125 : index
    %669 = memref.load %arg2[%c125] : memref<294xf32, #tpu.memory_space<smem>>
    %670 = vector.extract_strided_slice %527 {offsets = [3, 6], sizes = [4, 16], strides = [1, 1]} : vector<10x22xf32> to vector<4x16xf32>
    %671 = vector.broadcast %669 : f32 to vector<4x16xf32>
    %672 = arith.mulf %671, %670 : vector<4x16xf32>
    %673 = arith.addf %653, %672 : vector<4x16xf32>
    %c126 = arith.constant 126 : index
    %674 = memref.load %arg2[%c126] : memref<294xf32, #tpu.memory_space<smem>>
    %675 = vector.extract_strided_slice %527 {offsets = [4, 0], sizes = [4, 16], strides = [1, 1]} : vector<10x22xf32> to vector<4x16xf32>
    %676 = vector.broadcast %674 : f32 to vector<4x16xf32>
    %677 = arith.mulf %676, %675 : vector<4x16xf32>
    %678 = arith.addf %658, %677 : vector<4x16xf32>
    %c127 = arith.constant 127 : index
    %679 = memref.load %arg2[%c127] : memref<294xf32, #tpu.memory_space<smem>>
    %680 = vector.extract_strided_slice %527 {offsets = [4, 1], sizes = [4, 16], strides = [1, 1]} : vector<10x22xf32> to vector<4x16xf32>
    %681 = vector.broadcast %679 : f32 to vector<4x16xf32>
    %682 = arith.mulf %681, %680 : vector<4x16xf32>
    %683 = arith.addf %663, %682 : vector<4x16xf32>
    %c128 = arith.constant 128 : index
    %684 = memref.load %arg2[%c128] : memref<294xf32, #tpu.memory_space<smem>>
    %685 = vector.extract_strided_slice %527 {offsets = [4, 2], sizes = [4, 16], strides = [1, 1]} : vector<10x22xf32> to vector<4x16xf32>
    %686 = vector.broadcast %684 : f32 to vector<4x16xf32>
    %687 = arith.mulf %686, %685 : vector<4x16xf32>
    %688 = arith.addf %668, %687 : vector<4x16xf32>
    %c129 = arith.constant 129 : index
    %689 = memref.load %arg2[%c129] : memref<294xf32, #tpu.memory_space<smem>>
    %690 = vector.extract_strided_slice %527 {offsets = [4, 3], sizes = [4, 16], strides = [1, 1]} : vector<10x22xf32> to vector<4x16xf32>
    %691 = vector.broadcast %689 : f32 to vector<4x16xf32>
    %692 = arith.mulf %691, %690 : vector<4x16xf32>
    %693 = arith.addf %673, %692 : vector<4x16xf32>
    %c130 = arith.constant 130 : index
    %694 = memref.load %arg2[%c130] : memref<294xf32, #tpu.memory_space<smem>>
    %695 = vector.extract_strided_slice %527 {offsets = [4, 4], sizes = [4, 16], strides = [1, 1]} : vector<10x22xf32> to vector<4x16xf32>
    %696 = vector.broadcast %694 : f32 to vector<4x16xf32>
    %697 = arith.mulf %696, %695 : vector<4x16xf32>
    %698 = arith.addf %678, %697 : vector<4x16xf32>
    %c131 = arith.constant 131 : index
    %699 = memref.load %arg2[%c131] : memref<294xf32, #tpu.memory_space<smem>>
    %700 = vector.extract_strided_slice %527 {offsets = [4, 5], sizes = [4, 16], strides = [1, 1]} : vector<10x22xf32> to vector<4x16xf32>
    %701 = vector.broadcast %699 : f32 to vector<4x16xf32>
    %702 = arith.mulf %701, %700 : vector<4x16xf32>
    %703 = arith.addf %683, %702 : vector<4x16xf32>
    %c132 = arith.constant 132 : index
    %704 = memref.load %arg2[%c132] : memref<294xf32, #tpu.memory_space<smem>>
    %705 = vector.extract_strided_slice %527 {offsets = [4, 6], sizes = [4, 16], strides = [1, 1]} : vector<10x22xf32> to vector<4x16xf32>
    %706 = vector.broadcast %704 : f32 to vector<4x16xf32>
    %707 = arith.mulf %706, %705 : vector<4x16xf32>
    %708 = arith.addf %688, %707 : vector<4x16xf32>
    %c133 = arith.constant 133 : index
    %709 = memref.load %arg2[%c133] : memref<294xf32, #tpu.memory_space<smem>>
    %710 = vector.extract_strided_slice %527 {offsets = [5, 0], sizes = [4, 16], strides = [1, 1]} : vector<10x22xf32> to vector<4x16xf32>
    %711 = vector.broadcast %709 : f32 to vector<4x16xf32>
    %712 = arith.mulf %711, %710 : vector<4x16xf32>
    %713 = arith.addf %693, %712 : vector<4x16xf32>
    %c134 = arith.constant 134 : index
    %714 = memref.load %arg2[%c134] : memref<294xf32, #tpu.memory_space<smem>>
    %715 = vector.extract_strided_slice %527 {offsets = [5, 1], sizes = [4, 16], strides = [1, 1]} : vector<10x22xf32> to vector<4x16xf32>
    %716 = vector.broadcast %714 : f32 to vector<4x16xf32>
    %717 = arith.mulf %716, %715 : vector<4x16xf32>
    %718 = arith.addf %698, %717 : vector<4x16xf32>
    %c135 = arith.constant 135 : index
    %719 = memref.load %arg2[%c135] : memref<294xf32, #tpu.memory_space<smem>>
    %720 = vector.extract_strided_slice %527 {offsets = [5, 2], sizes = [4, 16], strides = [1, 1]} : vector<10x22xf32> to vector<4x16xf32>
    %721 = vector.broadcast %719 : f32 to vector<4x16xf32>
    %722 = arith.mulf %721, %720 : vector<4x16xf32>
    %723 = arith.addf %703, %722 : vector<4x16xf32>
    %c136 = arith.constant 136 : index
    %724 = memref.load %arg2[%c136] : memref<294xf32, #tpu.memory_space<smem>>
    %725 = vector.extract_strided_slice %527 {offsets = [5, 3], sizes = [4, 16], strides = [1, 1]} : vector<10x22xf32> to vector<4x16xf32>
    %726 = vector.broadcast %724 : f32 to vector<4x16xf32>
    %727 = arith.mulf %726, %725 : vector<4x16xf32>
    %728 = arith.addf %708, %727 : vector<4x16xf32>
    %c137 = arith.constant 137 : index
    %729 = memref.load %arg2[%c137] : memref<294xf32, #tpu.memory_space<smem>>
    %730 = vector.extract_strided_slice %527 {offsets = [5, 4], sizes = [4, 16], strides = [1, 1]} : vector<10x22xf32> to vector<4x16xf32>
    %731 = vector.broadcast %729 : f32 to vector<4x16xf32>
    %732 = arith.mulf %731, %730 : vector<4x16xf32>
    %733 = arith.addf %713, %732 : vector<4x16xf32>
    %c138 = arith.constant 138 : index
    %734 = memref.load %arg2[%c138] : memref<294xf32, #tpu.memory_space<smem>>
    %735 = vector.extract_strided_slice %527 {offsets = [5, 5], sizes = [4, 16], strides = [1, 1]} : vector<10x22xf32> to vector<4x16xf32>
    %736 = vector.broadcast %734 : f32 to vector<4x16xf32>
    %737 = arith.mulf %736, %735 : vector<4x16xf32>
    %738 = arith.addf %718, %737 : vector<4x16xf32>
    %c139 = arith.constant 139 : index
    %739 = memref.load %arg2[%c139] : memref<294xf32, #tpu.memory_space<smem>>
    %740 = vector.extract_strided_slice %527 {offsets = [5, 6], sizes = [4, 16], strides = [1, 1]} : vector<10x22xf32> to vector<4x16xf32>
    %741 = vector.broadcast %739 : f32 to vector<4x16xf32>
    %742 = arith.mulf %741, %740 : vector<4x16xf32>
    %743 = arith.addf %723, %742 : vector<4x16xf32>
    %c140 = arith.constant 140 : index
    %744 = memref.load %arg2[%c140] : memref<294xf32, #tpu.memory_space<smem>>
    %745 = vector.extract_strided_slice %527 {offsets = [6, 0], sizes = [4, 16], strides = [1, 1]} : vector<10x22xf32> to vector<4x16xf32>
    %746 = vector.broadcast %744 : f32 to vector<4x16xf32>
    %747 = arith.mulf %746, %745 : vector<4x16xf32>
    %748 = arith.addf %728, %747 : vector<4x16xf32>
    %c141 = arith.constant 141 : index
    %749 = memref.load %arg2[%c141] : memref<294xf32, #tpu.memory_space<smem>>
    %750 = vector.extract_strided_slice %527 {offsets = [6, 1], sizes = [4, 16], strides = [1, 1]} : vector<10x22xf32> to vector<4x16xf32>
    %751 = vector.broadcast %749 : f32 to vector<4x16xf32>
    %752 = arith.mulf %751, %750 : vector<4x16xf32>
    %753 = arith.addf %733, %752 : vector<4x16xf32>
    %c142 = arith.constant 142 : index
    %754 = memref.load %arg2[%c142] : memref<294xf32, #tpu.memory_space<smem>>
    %755 = vector.extract_strided_slice %527 {offsets = [6, 2], sizes = [4, 16], strides = [1, 1]} : vector<10x22xf32> to vector<4x16xf32>
    %756 = vector.broadcast %754 : f32 to vector<4x16xf32>
    %757 = arith.mulf %756, %755 : vector<4x16xf32>
    %758 = arith.addf %738, %757 : vector<4x16xf32>
    %c143 = arith.constant 143 : index
    %759 = memref.load %arg2[%c143] : memref<294xf32, #tpu.memory_space<smem>>
    %760 = vector.extract_strided_slice %527 {offsets = [6, 3], sizes = [4, 16], strides = [1, 1]} : vector<10x22xf32> to vector<4x16xf32>
    %761 = vector.broadcast %759 : f32 to vector<4x16xf32>
    %762 = arith.mulf %761, %760 : vector<4x16xf32>
    %763 = arith.addf %743, %762 : vector<4x16xf32>
    %c144 = arith.constant 144 : index
    %764 = memref.load %arg2[%c144] : memref<294xf32, #tpu.memory_space<smem>>
    %765 = vector.extract_strided_slice %527 {offsets = [6, 4], sizes = [4, 16], strides = [1, 1]} : vector<10x22xf32> to vector<4x16xf32>
    %766 = vector.broadcast %764 : f32 to vector<4x16xf32>
    %767 = arith.mulf %766, %765 : vector<4x16xf32>
    %768 = arith.addf %748, %767 : vector<4x16xf32>
    %c145 = arith.constant 145 : index
    %769 = memref.load %arg2[%c145] : memref<294xf32, #tpu.memory_space<smem>>
    %770 = vector.extract_strided_slice %527 {offsets = [6, 5], sizes = [4, 16], strides = [1, 1]} : vector<10x22xf32> to vector<4x16xf32>
    %771 = vector.broadcast %769 : f32 to vector<4x16xf32>
    %772 = arith.mulf %771, %770 : vector<4x16xf32>
    %773 = arith.addf %753, %772 : vector<4x16xf32>
    %c146 = arith.constant 146 : index
    %774 = memref.load %arg2[%c146] : memref<294xf32, #tpu.memory_space<smem>>
    %775 = vector.extract_strided_slice %527 {offsets = [6, 6], sizes = [4, 16], strides = [1, 1]} : vector<10x22xf32> to vector<4x16xf32>
    %776 = vector.broadcast %774 : f32 to vector<4x16xf32>
    %777 = arith.mulf %776, %775 : vector<4x16xf32>
    %778 = arith.addf %758, %777 : vector<4x16xf32>
    %c147 = arith.constant 147 : index
    %779 = memref.load %arg2[%c147] : memref<294xf32, #tpu.memory_space<smem>>
    %780 = vector.extract_strided_slice %529 {offsets = [0, 0], sizes = [4, 16], strides = [1, 1]} : vector<10x22xf32> to vector<4x16xf32>
    %781 = vector.broadcast %779 : f32 to vector<4x16xf32>
    %782 = arith.mulf %781, %780 : vector<4x16xf32>
    %783 = arith.addf %763, %782 : vector<4x16xf32>
    %c148 = arith.constant 148 : index
    %784 = memref.load %arg2[%c148] : memref<294xf32, #tpu.memory_space<smem>>
    %785 = vector.extract_strided_slice %529 {offsets = [0, 1], sizes = [4, 16], strides = [1, 1]} : vector<10x22xf32> to vector<4x16xf32>
    %786 = vector.broadcast %784 : f32 to vector<4x16xf32>
    %787 = arith.mulf %786, %785 : vector<4x16xf32>
    %788 = arith.addf %768, %787 : vector<4x16xf32>
    %c149 = arith.constant 149 : index
    %789 = memref.load %arg2[%c149] : memref<294xf32, #tpu.memory_space<smem>>
    %790 = vector.extract_strided_slice %529 {offsets = [0, 2], sizes = [4, 16], strides = [1, 1]} : vector<10x22xf32> to vector<4x16xf32>
    %791 = vector.broadcast %789 : f32 to vector<4x16xf32>
    %792 = arith.mulf %791, %790 : vector<4x16xf32>
    %793 = arith.addf %773, %792 : vector<4x16xf32>
    %c150 = arith.constant 150 : index
    %794 = memref.load %arg2[%c150] : memref<294xf32, #tpu.memory_space<smem>>
    %795 = vector.extract_strided_slice %529 {offsets = [0, 3], sizes = [4, 16], strides = [1, 1]} : vector<10x22xf32> to vector<4x16xf32>
    %796 = vector.broadcast %794 : f32 to vector<4x16xf32>
    %797 = arith.mulf %796, %795 : vector<4x16xf32>
    %798 = arith.addf %778, %797 : vector<4x16xf32>
    %c151 = arith.constant 151 : index
    %799 = memref.load %arg2[%c151] : memref<294xf32, #tpu.memory_space<smem>>
    %800 = vector.extract_strided_slice %529 {offsets = [0, 4], sizes = [4, 16], strides = [1, 1]} : vector<10x22xf32> to vector<4x16xf32>
    %801 = vector.broadcast %799 : f32 to vector<4x16xf32>
    %802 = arith.mulf %801, %800 : vector<4x16xf32>
    %803 = arith.addf %783, %802 : vector<4x16xf32>
    %c152 = arith.constant 152 : index
    %804 = memref.load %arg2[%c152] : memref<294xf32, #tpu.memory_space<smem>>
    %805 = vector.extract_strided_slice %529 {offsets = [0, 5], sizes = [4, 16], strides = [1, 1]} : vector<10x22xf32> to vector<4x16xf32>
    %806 = vector.broadcast %804 : f32 to vector<4x16xf32>
    %807 = arith.mulf %806, %805 : vector<4x16xf32>
    %808 = arith.addf %788, %807 : vector<4x16xf32>
    %c153 = arith.constant 153 : index
    %809 = memref.load %arg2[%c153] : memref<294xf32, #tpu.memory_space<smem>>
    %810 = vector.extract_strided_slice %529 {offsets = [0, 6], sizes = [4, 16], strides = [1, 1]} : vector<10x22xf32> to vector<4x16xf32>
    %811 = vector.broadcast %809 : f32 to vector<4x16xf32>
    %812 = arith.mulf %811, %810 : vector<4x16xf32>
    %813 = arith.addf %793, %812 : vector<4x16xf32>
    %c154 = arith.constant 154 : index
    %814 = memref.load %arg2[%c154] : memref<294xf32, #tpu.memory_space<smem>>
    %815 = vector.extract_strided_slice %529 {offsets = [1, 0], sizes = [4, 16], strides = [1, 1]} : vector<10x22xf32> to vector<4x16xf32>
    %816 = vector.broadcast %814 : f32 to vector<4x16xf32>
    %817 = arith.mulf %816, %815 : vector<4x16xf32>
    %818 = arith.addf %798, %817 : vector<4x16xf32>
    %c155 = arith.constant 155 : index
    %819 = memref.load %arg2[%c155] : memref<294xf32, #tpu.memory_space<smem>>
    %820 = vector.extract_strided_slice %529 {offsets = [1, 1], sizes = [4, 16], strides = [1, 1]} : vector<10x22xf32> to vector<4x16xf32>
    %821 = vector.broadcast %819 : f32 to vector<4x16xf32>
    %822 = arith.mulf %821, %820 : vector<4x16xf32>
    %823 = arith.addf %803, %822 : vector<4x16xf32>
    %c156 = arith.constant 156 : index
    %824 = memref.load %arg2[%c156] : memref<294xf32, #tpu.memory_space<smem>>
    %825 = vector.extract_strided_slice %529 {offsets = [1, 2], sizes = [4, 16], strides = [1, 1]} : vector<10x22xf32> to vector<4x16xf32>
    %826 = vector.broadcast %824 : f32 to vector<4x16xf32>
    %827 = arith.mulf %826, %825 : vector<4x16xf32>
    %828 = arith.addf %808, %827 : vector<4x16xf32>
    %c157 = arith.constant 157 : index
    %829 = memref.load %arg2[%c157] : memref<294xf32, #tpu.memory_space<smem>>
    %830 = vector.extract_strided_slice %529 {offsets = [1, 3], sizes = [4, 16], strides = [1, 1]} : vector<10x22xf32> to vector<4x16xf32>
    %831 = vector.broadcast %829 : f32 to vector<4x16xf32>
    %832 = arith.mulf %831, %830 : vector<4x16xf32>
    %833 = arith.addf %813, %832 : vector<4x16xf32>
    %c158 = arith.constant 158 : index
    %834 = memref.load %arg2[%c158] : memref<294xf32, #tpu.memory_space<smem>>
    %835 = vector.extract_strided_slice %529 {offsets = [1, 4], sizes = [4, 16], strides = [1, 1]} : vector<10x22xf32> to vector<4x16xf32>
    %836 = vector.broadcast %834 : f32 to vector<4x16xf32>
    %837 = arith.mulf %836, %835 : vector<4x16xf32>
    %838 = arith.addf %818, %837 : vector<4x16xf32>
    %c159 = arith.constant 159 : index
    %839 = memref.load %arg2[%c159] : memref<294xf32, #tpu.memory_space<smem>>
    %840 = vector.extract_strided_slice %529 {offsets = [1, 5], sizes = [4, 16], strides = [1, 1]} : vector<10x22xf32> to vector<4x16xf32>
    %841 = vector.broadcast %839 : f32 to vector<4x16xf32>
    %842 = arith.mulf %841, %840 : vector<4x16xf32>
    %843 = arith.addf %823, %842 : vector<4x16xf32>
    %c160 = arith.constant 160 : index
    %844 = memref.load %arg2[%c160] : memref<294xf32, #tpu.memory_space<smem>>
    %845 = vector.extract_strided_slice %529 {offsets = [1, 6], sizes = [4, 16], strides = [1, 1]} : vector<10x22xf32> to vector<4x16xf32>
    %846 = vector.broadcast %844 : f32 to vector<4x16xf32>
    %847 = arith.mulf %846, %845 : vector<4x16xf32>
    %848 = arith.addf %828, %847 : vector<4x16xf32>
    %c161 = arith.constant 161 : index
    %849 = memref.load %arg2[%c161] : memref<294xf32, #tpu.memory_space<smem>>
    %850 = vector.extract_strided_slice %529 {offsets = [2, 0], sizes = [4, 16], strides = [1, 1]} : vector<10x22xf32> to vector<4x16xf32>
    %851 = vector.broadcast %849 : f32 to vector<4x16xf32>
    %852 = arith.mulf %851, %850 : vector<4x16xf32>
    %853 = arith.addf %833, %852 : vector<4x16xf32>
    %c162 = arith.constant 162 : index
    %854 = memref.load %arg2[%c162] : memref<294xf32, #tpu.memory_space<smem>>
    %855 = vector.extract_strided_slice %529 {offsets = [2, 1], sizes = [4, 16], strides = [1, 1]} : vector<10x22xf32> to vector<4x16xf32>
    %856 = vector.broadcast %854 : f32 to vector<4x16xf32>
    %857 = arith.mulf %856, %855 : vector<4x16xf32>
    %858 = arith.addf %838, %857 : vector<4x16xf32>
    %c163 = arith.constant 163 : index
    %859 = memref.load %arg2[%c163] : memref<294xf32, #tpu.memory_space<smem>>
    %860 = vector.extract_strided_slice %529 {offsets = [2, 2], sizes = [4, 16], strides = [1, 1]} : vector<10x22xf32> to vector<4x16xf32>
    %861 = vector.broadcast %859 : f32 to vector<4x16xf32>
    %862 = arith.mulf %861, %860 : vector<4x16xf32>
    %863 = arith.addf %843, %862 : vector<4x16xf32>
    %c164 = arith.constant 164 : index
    %864 = memref.load %arg2[%c164] : memref<294xf32, #tpu.memory_space<smem>>
    %865 = vector.extract_strided_slice %529 {offsets = [2, 3], sizes = [4, 16], strides = [1, 1]} : vector<10x22xf32> to vector<4x16xf32>
    %866 = vector.broadcast %864 : f32 to vector<4x16xf32>
    %867 = arith.mulf %866, %865 : vector<4x16xf32>
    %868 = arith.addf %848, %867 : vector<4x16xf32>
    %c165 = arith.constant 165 : index
    %869 = memref.load %arg2[%c165] : memref<294xf32, #tpu.memory_space<smem>>
    %870 = vector.extract_strided_slice %529 {offsets = [2, 4], sizes = [4, 16], strides = [1, 1]} : vector<10x22xf32> to vector<4x16xf32>
    %871 = vector.broadcast %869 : f32 to vector<4x16xf32>
    %872 = arith.mulf %871, %870 : vector<4x16xf32>
    %873 = arith.addf %853, %872 : vector<4x16xf32>
    %c166 = arith.constant 166 : index
    %874 = memref.load %arg2[%c166] : memref<294xf32, #tpu.memory_space<smem>>
    %875 = vector.extract_strided_slice %529 {offsets = [2, 5], sizes = [4, 16], strides = [1, 1]} : vector<10x22xf32> to vector<4x16xf32>
    %876 = vector.broadcast %874 : f32 to vector<4x16xf32>
    %877 = arith.mulf %876, %875 : vector<4x16xf32>
    %878 = arith.addf %858, %877 : vector<4x16xf32>
    %c167 = arith.constant 167 : index
    %879 = memref.load %arg2[%c167] : memref<294xf32, #tpu.memory_space<smem>>
    %880 = vector.extract_strided_slice %529 {offsets = [2, 6], sizes = [4, 16], strides = [1, 1]} : vector<10x22xf32> to vector<4x16xf32>
    %881 = vector.broadcast %879 : f32 to vector<4x16xf32>
    %882 = arith.mulf %881, %880 : vector<4x16xf32>
    %883 = arith.addf %863, %882 : vector<4x16xf32>
    %c168 = arith.constant 168 : index
    %884 = memref.load %arg2[%c168] : memref<294xf32, #tpu.memory_space<smem>>
    %885 = vector.extract_strided_slice %529 {offsets = [3, 0], sizes = [4, 16], strides = [1, 1]} : vector<10x22xf32> to vector<4x16xf32>
    %886 = vector.broadcast %884 : f32 to vector<4x16xf32>
    %887 = arith.mulf %886, %885 : vector<4x16xf32>
    %888 = arith.addf %868, %887 : vector<4x16xf32>
    %c169 = arith.constant 169 : index
    %889 = memref.load %arg2[%c169] : memref<294xf32, #tpu.memory_space<smem>>
    %890 = vector.extract_strided_slice %529 {offsets = [3, 1], sizes = [4, 16], strides = [1, 1]} : vector<10x22xf32> to vector<4x16xf32>
    %891 = vector.broadcast %889 : f32 to vector<4x16xf32>
    %892 = arith.mulf %891, %890 : vector<4x16xf32>
    %893 = arith.addf %873, %892 : vector<4x16xf32>
    %c170 = arith.constant 170 : index
    %894 = memref.load %arg2[%c170] : memref<294xf32, #tpu.memory_space<smem>>
    %895 = vector.extract_strided_slice %529 {offsets = [3, 2], sizes = [4, 16], strides = [1, 1]} : vector<10x22xf32> to vector<4x16xf32>
    %896 = vector.broadcast %894 : f32 to vector<4x16xf32>
    %897 = arith.mulf %896, %895 : vector<4x16xf32>
    %898 = arith.addf %878, %897 : vector<4x16xf32>
    %c171 = arith.constant 171 : index
    %899 = memref.load %arg2[%c171] : memref<294xf32, #tpu.memory_space<smem>>
    %900 = vector.extract_strided_slice %529 {offsets = [3, 3], sizes = [4, 16], strides = [1, 1]} : vector<10x22xf32> to vector<4x16xf32>
    %901 = vector.broadcast %899 : f32 to vector<4x16xf32>
    %902 = arith.mulf %901, %900 : vector<4x16xf32>
    %903 = arith.addf %883, %902 : vector<4x16xf32>
    %c172 = arith.constant 172 : index
    %904 = memref.load %arg2[%c172] : memref<294xf32, #tpu.memory_space<smem>>
    %905 = vector.extract_strided_slice %529 {offsets = [3, 4], sizes = [4, 16], strides = [1, 1]} : vector<10x22xf32> to vector<4x16xf32>
    %906 = vector.broadcast %904 : f32 to vector<4x16xf32>
    %907 = arith.mulf %906, %905 : vector<4x16xf32>
    %908 = arith.addf %888, %907 : vector<4x16xf32>
    %c173 = arith.constant 173 : index
    %909 = memref.load %arg2[%c173] : memref<294xf32, #tpu.memory_space<smem>>
    %910 = vector.extract_strided_slice %529 {offsets = [3, 5], sizes = [4, 16], strides = [1, 1]} : vector<10x22xf32> to vector<4x16xf32>
    %911 = vector.broadcast %909 : f32 to vector<4x16xf32>
    %912 = arith.mulf %911, %910 : vector<4x16xf32>
    %913 = arith.addf %893, %912 : vector<4x16xf32>
    %c174 = arith.constant 174 : index
    %914 = memref.load %arg2[%c174] : memref<294xf32, #tpu.memory_space<smem>>
    %915 = vector.extract_strided_slice %529 {offsets = [3, 6], sizes = [4, 16], strides = [1, 1]} : vector<10x22xf32> to vector<4x16xf32>
    %916 = vector.broadcast %914 : f32 to vector<4x16xf32>
    %917 = arith.mulf %916, %915 : vector<4x16xf32>
    %918 = arith.addf %898, %917 : vector<4x16xf32>
    %c175 = arith.constant 175 : index
    %919 = memref.load %arg2[%c175] : memref<294xf32, #tpu.memory_space<smem>>
    %920 = vector.extract_strided_slice %529 {offsets = [4, 0], sizes = [4, 16], strides = [1, 1]} : vector<10x22xf32> to vector<4x16xf32>
    %921 = vector.broadcast %919 : f32 to vector<4x16xf32>
    %922 = arith.mulf %921, %920 : vector<4x16xf32>
    %923 = arith.addf %903, %922 : vector<4x16xf32>
    %c176 = arith.constant 176 : index
    %924 = memref.load %arg2[%c176] : memref<294xf32, #tpu.memory_space<smem>>
    %925 = vector.extract_strided_slice %529 {offsets = [4, 1], sizes = [4, 16], strides = [1, 1]} : vector<10x22xf32> to vector<4x16xf32>
    %926 = vector.broadcast %924 : f32 to vector<4x16xf32>
    %927 = arith.mulf %926, %925 : vector<4x16xf32>
    %928 = arith.addf %908, %927 : vector<4x16xf32>
    %c177 = arith.constant 177 : index
    %929 = memref.load %arg2[%c177] : memref<294xf32, #tpu.memory_space<smem>>
    %930 = vector.extract_strided_slice %529 {offsets = [4, 2], sizes = [4, 16], strides = [1, 1]} : vector<10x22xf32> to vector<4x16xf32>
    %931 = vector.broadcast %929 : f32 to vector<4x16xf32>
    %932 = arith.mulf %931, %930 : vector<4x16xf32>
    %933 = arith.addf %913, %932 : vector<4x16xf32>
    %c178 = arith.constant 178 : index
    %934 = memref.load %arg2[%c178] : memref<294xf32, #tpu.memory_space<smem>>
    %935 = vector.extract_strided_slice %529 {offsets = [4, 3], sizes = [4, 16], strides = [1, 1]} : vector<10x22xf32> to vector<4x16xf32>
    %936 = vector.broadcast %934 : f32 to vector<4x16xf32>
    %937 = arith.mulf %936, %935 : vector<4x16xf32>
    %938 = arith.addf %918, %937 : vector<4x16xf32>
    %c179 = arith.constant 179 : index
    %939 = memref.load %arg2[%c179] : memref<294xf32, #tpu.memory_space<smem>>
    %940 = vector.extract_strided_slice %529 {offsets = [4, 4], sizes = [4, 16], strides = [1, 1]} : vector<10x22xf32> to vector<4x16xf32>
    %941 = vector.broadcast %939 : f32 to vector<4x16xf32>
    %942 = arith.mulf %941, %940 : vector<4x16xf32>
    %943 = arith.addf %923, %942 : vector<4x16xf32>
    %c180 = arith.constant 180 : index
    %944 = memref.load %arg2[%c180] : memref<294xf32, #tpu.memory_space<smem>>
    %945 = vector.extract_strided_slice %529 {offsets = [4, 5], sizes = [4, 16], strides = [1, 1]} : vector<10x22xf32> to vector<4x16xf32>
    %946 = vector.broadcast %944 : f32 to vector<4x16xf32>
    %947 = arith.mulf %946, %945 : vector<4x16xf32>
    %948 = arith.addf %928, %947 : vector<4x16xf32>
    %c181 = arith.constant 181 : index
    %949 = memref.load %arg2[%c181] : memref<294xf32, #tpu.memory_space<smem>>
    %950 = vector.extract_strided_slice %529 {offsets = [4, 6], sizes = [4, 16], strides = [1, 1]} : vector<10x22xf32> to vector<4x16xf32>
    %951 = vector.broadcast %949 : f32 to vector<4x16xf32>
    %952 = arith.mulf %951, %950 : vector<4x16xf32>
    %953 = arith.addf %933, %952 : vector<4x16xf32>
    %c182 = arith.constant 182 : index
    %954 = memref.load %arg2[%c182] : memref<294xf32, #tpu.memory_space<smem>>
    %955 = vector.extract_strided_slice %529 {offsets = [5, 0], sizes = [4, 16], strides = [1, 1]} : vector<10x22xf32> to vector<4x16xf32>
    %956 = vector.broadcast %954 : f32 to vector<4x16xf32>
    %957 = arith.mulf %956, %955 : vector<4x16xf32>
    %958 = arith.addf %938, %957 : vector<4x16xf32>
    %c183 = arith.constant 183 : index
    %959 = memref.load %arg2[%c183] : memref<294xf32, #tpu.memory_space<smem>>
    %960 = vector.extract_strided_slice %529 {offsets = [5, 1], sizes = [4, 16], strides = [1, 1]} : vector<10x22xf32> to vector<4x16xf32>
    %961 = vector.broadcast %959 : f32 to vector<4x16xf32>
    %962 = arith.mulf %961, %960 : vector<4x16xf32>
    %963 = arith.addf %943, %962 : vector<4x16xf32>
    %c184 = arith.constant 184 : index
    %964 = memref.load %arg2[%c184] : memref<294xf32, #tpu.memory_space<smem>>
    %965 = vector.extract_strided_slice %529 {offsets = [5, 2], sizes = [4, 16], strides = [1, 1]} : vector<10x22xf32> to vector<4x16xf32>
    %966 = vector.broadcast %964 : f32 to vector<4x16xf32>
    %967 = arith.mulf %966, %965 : vector<4x16xf32>
    %968 = arith.addf %948, %967 : vector<4x16xf32>
    %c185 = arith.constant 185 : index
    %969 = memref.load %arg2[%c185] : memref<294xf32, #tpu.memory_space<smem>>
    %970 = vector.extract_strided_slice %529 {offsets = [5, 3], sizes = [4, 16], strides = [1, 1]} : vector<10x22xf32> to vector<4x16xf32>
    %971 = vector.broadcast %969 : f32 to vector<4x16xf32>
    %972 = arith.mulf %971, %970 : vector<4x16xf32>
    %973 = arith.addf %953, %972 : vector<4x16xf32>
    %c186 = arith.constant 186 : index
    %974 = memref.load %arg2[%c186] : memref<294xf32, #tpu.memory_space<smem>>
    %975 = vector.extract_strided_slice %529 {offsets = [5, 4], sizes = [4, 16], strides = [1, 1]} : vector<10x22xf32> to vector<4x16xf32>
    %976 = vector.broadcast %974 : f32 to vector<4x16xf32>
    %977 = arith.mulf %976, %975 : vector<4x16xf32>
    %978 = arith.addf %958, %977 : vector<4x16xf32>
    %c187 = arith.constant 187 : index
    %979 = memref.load %arg2[%c187] : memref<294xf32, #tpu.memory_space<smem>>
    %980 = vector.extract_strided_slice %529 {offsets = [5, 5], sizes = [4, 16], strides = [1, 1]} : vector<10x22xf32> to vector<4x16xf32>
    %981 = vector.broadcast %979 : f32 to vector<4x16xf32>
    %982 = arith.mulf %981, %980 : vector<4x16xf32>
    %983 = arith.addf %963, %982 : vector<4x16xf32>
    %c188 = arith.constant 188 : index
    %984 = memref.load %arg2[%c188] : memref<294xf32, #tpu.memory_space<smem>>
    %985 = vector.extract_strided_slice %529 {offsets = [5, 6], sizes = [4, 16], strides = [1, 1]} : vector<10x22xf32> to vector<4x16xf32>
    %986 = vector.broadcast %984 : f32 to vector<4x16xf32>
    %987 = arith.mulf %986, %985 : vector<4x16xf32>
    %988 = arith.addf %968, %987 : vector<4x16xf32>
    %c189 = arith.constant 189 : index
    %989 = memref.load %arg2[%c189] : memref<294xf32, #tpu.memory_space<smem>>
    %990 = vector.extract_strided_slice %529 {offsets = [6, 0], sizes = [4, 16], strides = [1, 1]} : vector<10x22xf32> to vector<4x16xf32>
    %991 = vector.broadcast %989 : f32 to vector<4x16xf32>
    %992 = arith.mulf %991, %990 : vector<4x16xf32>
    %993 = arith.addf %973, %992 : vector<4x16xf32>
    %c190 = arith.constant 190 : index
    %994 = memref.load %arg2[%c190] : memref<294xf32, #tpu.memory_space<smem>>
    %995 = vector.extract_strided_slice %529 {offsets = [6, 1], sizes = [4, 16], strides = [1, 1]} : vector<10x22xf32> to vector<4x16xf32>
    %996 = vector.broadcast %994 : f32 to vector<4x16xf32>
    %997 = arith.mulf %996, %995 : vector<4x16xf32>
    %998 = arith.addf %978, %997 : vector<4x16xf32>
    %c191 = arith.constant 191 : index
    %999 = memref.load %arg2[%c191] : memref<294xf32, #tpu.memory_space<smem>>
    %1000 = vector.extract_strided_slice %529 {offsets = [6, 2], sizes = [4, 16], strides = [1, 1]} : vector<10x22xf32> to vector<4x16xf32>
    %1001 = vector.broadcast %999 : f32 to vector<4x16xf32>
    %1002 = arith.mulf %1001, %1000 : vector<4x16xf32>
    %1003 = arith.addf %983, %1002 : vector<4x16xf32>
    %c192 = arith.constant 192 : index
    %1004 = memref.load %arg2[%c192] : memref<294xf32, #tpu.memory_space<smem>>
    %1005 = vector.extract_strided_slice %529 {offsets = [6, 3], sizes = [4, 16], strides = [1, 1]} : vector<10x22xf32> to vector<4x16xf32>
    %1006 = vector.broadcast %1004 : f32 to vector<4x16xf32>
    %1007 = arith.mulf %1006, %1005 : vector<4x16xf32>
    %1008 = arith.addf %988, %1007 : vector<4x16xf32>
    %c193 = arith.constant 193 : index
    %1009 = memref.load %arg2[%c193] : memref<294xf32, #tpu.memory_space<smem>>
    %1010 = vector.extract_strided_slice %529 {offsets = [6, 4], sizes = [4, 16], strides = [1, 1]} : vector<10x22xf32> to vector<4x16xf32>
    %1011 = vector.broadcast %1009 : f32 to vector<4x16xf32>
    %1012 = arith.mulf %1011, %1010 : vector<4x16xf32>
    %1013 = arith.addf %993, %1012 : vector<4x16xf32>
    %c194 = arith.constant 194 : index
    %1014 = memref.load %arg2[%c194] : memref<294xf32, #tpu.memory_space<smem>>
    %1015 = vector.extract_strided_slice %529 {offsets = [6, 5], sizes = [4, 16], strides = [1, 1]} : vector<10x22xf32> to vector<4x16xf32>
    %1016 = vector.broadcast %1014 : f32 to vector<4x16xf32>
    %1017 = arith.mulf %1016, %1015 : vector<4x16xf32>
    %1018 = arith.addf %998, %1017 : vector<4x16xf32>
    %c195 = arith.constant 195 : index
    %1019 = memref.load %arg2[%c195] : memref<294xf32, #tpu.memory_space<smem>>
    %1020 = vector.extract_strided_slice %529 {offsets = [6, 6], sizes = [4, 16], strides = [1, 1]} : vector<10x22xf32> to vector<4x16xf32>
    %1021 = vector.broadcast %1019 : f32 to vector<4x16xf32>
    %1022 = arith.mulf %1021, %1020 : vector<4x16xf32>
    %1023 = arith.addf %1003, %1022 : vector<4x16xf32>
    %1024 = arith.addf %1018, %1023 : vector<4x16xf32>
    %1025 = arith.addf %1008, %1013 : vector<4x16xf32>
    %1026 = arith.addf %1024, %1025 : vector<4x16xf32>
    %c2_23 = arith.constant 2 : index
    %1027 = memref.load %arg3[%c2_23] : memref<6xf32, #tpu.memory_space<smem>>
    %1028 = vector.broadcast %1027 : f32 to vector<4x16xf32>
    %1029 = arith.mulf %1026, %1028 : vector<4x16xf32>
    %c3_24 = arith.constant 3 : index
    %1030 = memref.load %arg3[%c3_24] : memref<6xf32, #tpu.memory_space<smem>>
    %1031 = vector.broadcast %1030 : f32 to vector<4x16xf32>
    %1032 = arith.addf %1029, %1031 : vector<4x16xf32>
    %1033 = arith.negf %1032 : vector<4x16xf32>
    %1034 = math.exp %1033 : vector<4x16xf32>
    %cst_25 = arith.constant 1.000000e+00 : f32
    %1035 = vector.broadcast %cst_25 : f32 to vector<4x16xf32>
    %1036 = arith.addf %1035, %1034 : vector<4x16xf32>
    %1037 = arith.divf %1035, %1036 : vector<4x16xf32>
    %c0_26 = arith.constant 0 : index
    %c0_27 = arith.constant 0 : index
    %1038 = vector.load %arg7[%c0_26, %c0_27] : memref<4x16xf32, #tpu.memory_space<vmem>>, vector<4x16xf32>
    %c0_28 = arith.constant 0 : index
    %c0_29 = arith.constant 0 : index
    %1039 = vector.load %arg8[%c0_28, %c0_29] : memref<4x16xf32, #tpu.memory_space<vmem>>, vector<4x16xf32>
    %cst_30 = arith.constant 6.250000e-02 : f32
    %1040 = vector.broadcast %cst_30 : f32 to vector<4x16xf32>
    %1041 = arith.mulf %1039, %1040 : vector<4x16xf32>
    %cst_31 = arith.constant 0.000000e+00 : f32
    %1042 = vector.broadcast %cst_31 : f32 to vector<3x22xf32>
    %cst_32 = arith.constant 0.000000e+00 : f32
    %1043 = vector.broadcast %cst_32 : f32 to vector<4x3xf32>
    %1044 = tpu.concatenate %1043, %1038, %1043 in 1 : vector<4x3xf32>, vector<4x16xf32>, vector<4x3xf32> -> vector<4x22xf32>
    %1045 = tpu.concatenate %1042, %1044, %1042 in 0 : vector<3x22xf32>, vector<4x22xf32>, vector<3x22xf32> -> vector<10x22xf32>
    %1046 = tpu.concatenate %1043, %1041, %1043 in 1 : vector<4x3xf32>, vector<4x16xf32>, vector<4x3xf32> -> vector<4x22xf32>
    %1047 = tpu.concatenate %1042, %1046, %1042 in 0 : vector<3x22xf32>, vector<4x22xf32>, vector<3x22xf32> -> vector<10x22xf32>
    %cst_33 = arith.constant 0.000000e+00 : f32
    %1048 = vector.broadcast %cst_33 : f32 to vector<4x16xf32>
    %cst_34 = arith.constant 0.000000e+00 : f32
    %1049 = vector.broadcast %cst_34 : f32 to vector<4x16xf32>
    %cst_35 = arith.constant 0.000000e+00 : f32
    %1050 = vector.broadcast %cst_35 : f32 to vector<4x16xf32>
    %cst_36 = arith.constant 0.000000e+00 : f32
    %1051 = vector.broadcast %cst_36 : f32 to vector<4x16xf32>
    %c196 = arith.constant 196 : index
    %1052 = memref.load %arg2[%c196] : memref<294xf32, #tpu.memory_space<smem>>
    %1053 = vector.extract_strided_slice %1045 {offsets = [0, 0], sizes = [4, 16], strides = [1, 1]} : vector<10x22xf32> to vector<4x16xf32>
    %1054 = vector.broadcast %1052 : f32 to vector<4x16xf32>
    %1055 = arith.mulf %1054, %1053 : vector<4x16xf32>
    %1056 = arith.addf %1048, %1055 : vector<4x16xf32>
    %c197 = arith.constant 197 : index
    %1057 = memref.load %arg2[%c197] : memref<294xf32, #tpu.memory_space<smem>>
    %1058 = vector.extract_strided_slice %1045 {offsets = [0, 1], sizes = [4, 16], strides = [1, 1]} : vector<10x22xf32> to vector<4x16xf32>
    %1059 = vector.broadcast %1057 : f32 to vector<4x16xf32>
    %1060 = arith.mulf %1059, %1058 : vector<4x16xf32>
    %1061 = arith.addf %1049, %1060 : vector<4x16xf32>
    %c198 = arith.constant 198 : index
    %1062 = memref.load %arg2[%c198] : memref<294xf32, #tpu.memory_space<smem>>
    %1063 = vector.extract_strided_slice %1045 {offsets = [0, 2], sizes = [4, 16], strides = [1, 1]} : vector<10x22xf32> to vector<4x16xf32>
    %1064 = vector.broadcast %1062 : f32 to vector<4x16xf32>
    %1065 = arith.mulf %1064, %1063 : vector<4x16xf32>
    %1066 = arith.addf %1050, %1065 : vector<4x16xf32>
    %c199 = arith.constant 199 : index
    %1067 = memref.load %arg2[%c199] : memref<294xf32, #tpu.memory_space<smem>>
    %1068 = vector.extract_strided_slice %1045 {offsets = [0, 3], sizes = [4, 16], strides = [1, 1]} : vector<10x22xf32> to vector<4x16xf32>
    %1069 = vector.broadcast %1067 : f32 to vector<4x16xf32>
    %1070 = arith.mulf %1069, %1068 : vector<4x16xf32>
    %1071 = arith.addf %1051, %1070 : vector<4x16xf32>
    %c200 = arith.constant 200 : index
    %1072 = memref.load %arg2[%c200] : memref<294xf32, #tpu.memory_space<smem>>
    %1073 = vector.extract_strided_slice %1045 {offsets = [0, 4], sizes = [4, 16], strides = [1, 1]} : vector<10x22xf32> to vector<4x16xf32>
    %1074 = vector.broadcast %1072 : f32 to vector<4x16xf32>
    %1075 = arith.mulf %1074, %1073 : vector<4x16xf32>
    %1076 = arith.addf %1056, %1075 : vector<4x16xf32>
    %c201 = arith.constant 201 : index
    %1077 = memref.load %arg2[%c201] : memref<294xf32, #tpu.memory_space<smem>>
    %1078 = vector.extract_strided_slice %1045 {offsets = [0, 5], sizes = [4, 16], strides = [1, 1]} : vector<10x22xf32> to vector<4x16xf32>
    %1079 = vector.broadcast %1077 : f32 to vector<4x16xf32>
    %1080 = arith.mulf %1079, %1078 : vector<4x16xf32>
    %1081 = arith.addf %1061, %1080 : vector<4x16xf32>
    %c202 = arith.constant 202 : index
    %1082 = memref.load %arg2[%c202] : memref<294xf32, #tpu.memory_space<smem>>
    %1083 = vector.extract_strided_slice %1045 {offsets = [0, 6], sizes = [4, 16], strides = [1, 1]} : vector<10x22xf32> to vector<4x16xf32>
    %1084 = vector.broadcast %1082 : f32 to vector<4x16xf32>
    %1085 = arith.mulf %1084, %1083 : vector<4x16xf32>
    %1086 = arith.addf %1066, %1085 : vector<4x16xf32>
    %c203 = arith.constant 203 : index
    %1087 = memref.load %arg2[%c203] : memref<294xf32, #tpu.memory_space<smem>>
    %1088 = vector.extract_strided_slice %1045 {offsets = [1, 0], sizes = [4, 16], strides = [1, 1]} : vector<10x22xf32> to vector<4x16xf32>
    %1089 = vector.broadcast %1087 : f32 to vector<4x16xf32>
    %1090 = arith.mulf %1089, %1088 : vector<4x16xf32>
    %1091 = arith.addf %1071, %1090 : vector<4x16xf32>
    %c204 = arith.constant 204 : index
    %1092 = memref.load %arg2[%c204] : memref<294xf32, #tpu.memory_space<smem>>
    %1093 = vector.extract_strided_slice %1045 {offsets = [1, 1], sizes = [4, 16], strides = [1, 1]} : vector<10x22xf32> to vector<4x16xf32>
    %1094 = vector.broadcast %1092 : f32 to vector<4x16xf32>
    %1095 = arith.mulf %1094, %1093 : vector<4x16xf32>
    %1096 = arith.addf %1076, %1095 : vector<4x16xf32>
    %c205 = arith.constant 205 : index
    %1097 = memref.load %arg2[%c205] : memref<294xf32, #tpu.memory_space<smem>>
    %1098 = vector.extract_strided_slice %1045 {offsets = [1, 2], sizes = [4, 16], strides = [1, 1]} : vector<10x22xf32> to vector<4x16xf32>
    %1099 = vector.broadcast %1097 : f32 to vector<4x16xf32>
    %1100 = arith.mulf %1099, %1098 : vector<4x16xf32>
    %1101 = arith.addf %1081, %1100 : vector<4x16xf32>
    %c206 = arith.constant 206 : index
    %1102 = memref.load %arg2[%c206] : memref<294xf32, #tpu.memory_space<smem>>
    %1103 = vector.extract_strided_slice %1045 {offsets = [1, 3], sizes = [4, 16], strides = [1, 1]} : vector<10x22xf32> to vector<4x16xf32>
    %1104 = vector.broadcast %1102 : f32 to vector<4x16xf32>
    %1105 = arith.mulf %1104, %1103 : vector<4x16xf32>
    %1106 = arith.addf %1086, %1105 : vector<4x16xf32>
    %c207 = arith.constant 207 : index
    %1107 = memref.load %arg2[%c207] : memref<294xf32, #tpu.memory_space<smem>>
    %1108 = vector.extract_strided_slice %1045 {offsets = [1, 4], sizes = [4, 16], strides = [1, 1]} : vector<10x22xf32> to vector<4x16xf32>
    %1109 = vector.broadcast %1107 : f32 to vector<4x16xf32>
    %1110 = arith.mulf %1109, %1108 : vector<4x16xf32>
    %1111 = arith.addf %1091, %1110 : vector<4x16xf32>
    %c208 = arith.constant 208 : index
    %1112 = memref.load %arg2[%c208] : memref<294xf32, #tpu.memory_space<smem>>
    %1113 = vector.extract_strided_slice %1045 {offsets = [1, 5], sizes = [4, 16], strides = [1, 1]} : vector<10x22xf32> to vector<4x16xf32>
    %1114 = vector.broadcast %1112 : f32 to vector<4x16xf32>
    %1115 = arith.mulf %1114, %1113 : vector<4x16xf32>
    %1116 = arith.addf %1096, %1115 : vector<4x16xf32>
    %c209 = arith.constant 209 : index
    %1117 = memref.load %arg2[%c209] : memref<294xf32, #tpu.memory_space<smem>>
    %1118 = vector.extract_strided_slice %1045 {offsets = [1, 6], sizes = [4, 16], strides = [1, 1]} : vector<10x22xf32> to vector<4x16xf32>
    %1119 = vector.broadcast %1117 : f32 to vector<4x16xf32>
    %1120 = arith.mulf %1119, %1118 : vector<4x16xf32>
    %1121 = arith.addf %1101, %1120 : vector<4x16xf32>
    %c210 = arith.constant 210 : index
    %1122 = memref.load %arg2[%c210] : memref<294xf32, #tpu.memory_space<smem>>
    %1123 = vector.extract_strided_slice %1045 {offsets = [2, 0], sizes = [4, 16], strides = [1, 1]} : vector<10x22xf32> to vector<4x16xf32>
    %1124 = vector.broadcast %1122 : f32 to vector<4x16xf32>
    %1125 = arith.mulf %1124, %1123 : vector<4x16xf32>
    %1126 = arith.addf %1106, %1125 : vector<4x16xf32>
    %c211 = arith.constant 211 : index
    %1127 = memref.load %arg2[%c211] : memref<294xf32, #tpu.memory_space<smem>>
    %1128 = vector.extract_strided_slice %1045 {offsets = [2, 1], sizes = [4, 16], strides = [1, 1]} : vector<10x22xf32> to vector<4x16xf32>
    %1129 = vector.broadcast %1127 : f32 to vector<4x16xf32>
    %1130 = arith.mulf %1129, %1128 : vector<4x16xf32>
    %1131 = arith.addf %1111, %1130 : vector<4x16xf32>
    %c212 = arith.constant 212 : index
    %1132 = memref.load %arg2[%c212] : memref<294xf32, #tpu.memory_space<smem>>
    %1133 = vector.extract_strided_slice %1045 {offsets = [2, 2], sizes = [4, 16], strides = [1, 1]} : vector<10x22xf32> to vector<4x16xf32>
    %1134 = vector.broadcast %1132 : f32 to vector<4x16xf32>
    %1135 = arith.mulf %1134, %1133 : vector<4x16xf32>
    %1136 = arith.addf %1116, %1135 : vector<4x16xf32>
    %c213 = arith.constant 213 : index
    %1137 = memref.load %arg2[%c213] : memref<294xf32, #tpu.memory_space<smem>>
    %1138 = vector.extract_strided_slice %1045 {offsets = [2, 3], sizes = [4, 16], strides = [1, 1]} : vector<10x22xf32> to vector<4x16xf32>
    %1139 = vector.broadcast %1137 : f32 to vector<4x16xf32>
    %1140 = arith.mulf %1139, %1138 : vector<4x16xf32>
    %1141 = arith.addf %1121, %1140 : vector<4x16xf32>
    %c214 = arith.constant 214 : index
    %1142 = memref.load %arg2[%c214] : memref<294xf32, #tpu.memory_space<smem>>
    %1143 = vector.extract_strided_slice %1045 {offsets = [2, 4], sizes = [4, 16], strides = [1, 1]} : vector<10x22xf32> to vector<4x16xf32>
    %1144 = vector.broadcast %1142 : f32 to vector<4x16xf32>
    %1145 = arith.mulf %1144, %1143 : vector<4x16xf32>
    %1146 = arith.addf %1126, %1145 : vector<4x16xf32>
    %c215 = arith.constant 215 : index
    %1147 = memref.load %arg2[%c215] : memref<294xf32, #tpu.memory_space<smem>>
    %1148 = vector.extract_strided_slice %1045 {offsets = [2, 5], sizes = [4, 16], strides = [1, 1]} : vector<10x22xf32> to vector<4x16xf32>
    %1149 = vector.broadcast %1147 : f32 to vector<4x16xf32>
    %1150 = arith.mulf %1149, %1148 : vector<4x16xf32>
    %1151 = arith.addf %1131, %1150 : vector<4x16xf32>
    %c216 = arith.constant 216 : index
    %1152 = memref.load %arg2[%c216] : memref<294xf32, #tpu.memory_space<smem>>
    %1153 = vector.extract_strided_slice %1045 {offsets = [2, 6], sizes = [4, 16], strides = [1, 1]} : vector<10x22xf32> to vector<4x16xf32>
    %1154 = vector.broadcast %1152 : f32 to vector<4x16xf32>
    %1155 = arith.mulf %1154, %1153 : vector<4x16xf32>
    %1156 = arith.addf %1136, %1155 : vector<4x16xf32>
    %c217 = arith.constant 217 : index
    %1157 = memref.load %arg2[%c217] : memref<294xf32, #tpu.memory_space<smem>>
    %1158 = vector.extract_strided_slice %1045 {offsets = [3, 0], sizes = [4, 16], strides = [1, 1]} : vector<10x22xf32> to vector<4x16xf32>
    %1159 = vector.broadcast %1157 : f32 to vector<4x16xf32>
    %1160 = arith.mulf %1159, %1158 : vector<4x16xf32>
    %1161 = arith.addf %1141, %1160 : vector<4x16xf32>
    %c218 = arith.constant 218 : index
    %1162 = memref.load %arg2[%c218] : memref<294xf32, #tpu.memory_space<smem>>
    %1163 = vector.extract_strided_slice %1045 {offsets = [3, 1], sizes = [4, 16], strides = [1, 1]} : vector<10x22xf32> to vector<4x16xf32>
    %1164 = vector.broadcast %1162 : f32 to vector<4x16xf32>
    %1165 = arith.mulf %1164, %1163 : vector<4x16xf32>
    %1166 = arith.addf %1146, %1165 : vector<4x16xf32>
    %c219 = arith.constant 219 : index
    %1167 = memref.load %arg2[%c219] : memref<294xf32, #tpu.memory_space<smem>>
    %1168 = vector.extract_strided_slice %1045 {offsets = [3, 2], sizes = [4, 16], strides = [1, 1]} : vector<10x22xf32> to vector<4x16xf32>
    %1169 = vector.broadcast %1167 : f32 to vector<4x16xf32>
    %1170 = arith.mulf %1169, %1168 : vector<4x16xf32>
    %1171 = arith.addf %1151, %1170 : vector<4x16xf32>
    %c220 = arith.constant 220 : index
    %1172 = memref.load %arg2[%c220] : memref<294xf32, #tpu.memory_space<smem>>
    %1173 = vector.extract_strided_slice %1045 {offsets = [3, 3], sizes = [4, 16], strides = [1, 1]} : vector<10x22xf32> to vector<4x16xf32>
    %1174 = vector.broadcast %1172 : f32 to vector<4x16xf32>
    %1175 = arith.mulf %1174, %1173 : vector<4x16xf32>
    %1176 = arith.addf %1156, %1175 : vector<4x16xf32>
    %c221 = arith.constant 221 : index
    %1177 = memref.load %arg2[%c221] : memref<294xf32, #tpu.memory_space<smem>>
    %1178 = vector.extract_strided_slice %1045 {offsets = [3, 4], sizes = [4, 16], strides = [1, 1]} : vector<10x22xf32> to vector<4x16xf32>
    %1179 = vector.broadcast %1177 : f32 to vector<4x16xf32>
    %1180 = arith.mulf %1179, %1178 : vector<4x16xf32>
    %1181 = arith.addf %1161, %1180 : vector<4x16xf32>
    %c222 = arith.constant 222 : index
    %1182 = memref.load %arg2[%c222] : memref<294xf32, #tpu.memory_space<smem>>
    %1183 = vector.extract_strided_slice %1045 {offsets = [3, 5], sizes = [4, 16], strides = [1, 1]} : vector<10x22xf32> to vector<4x16xf32>
    %1184 = vector.broadcast %1182 : f32 to vector<4x16xf32>
    %1185 = arith.mulf %1184, %1183 : vector<4x16xf32>
    %1186 = arith.addf %1166, %1185 : vector<4x16xf32>
    %c223 = arith.constant 223 : index
    %1187 = memref.load %arg2[%c223] : memref<294xf32, #tpu.memory_space<smem>>
    %1188 = vector.extract_strided_slice %1045 {offsets = [3, 6], sizes = [4, 16], strides = [1, 1]} : vector<10x22xf32> to vector<4x16xf32>
    %1189 = vector.broadcast %1187 : f32 to vector<4x16xf32>
    %1190 = arith.mulf %1189, %1188 : vector<4x16xf32>
    %1191 = arith.addf %1171, %1190 : vector<4x16xf32>
    %c224 = arith.constant 224 : index
    %1192 = memref.load %arg2[%c224] : memref<294xf32, #tpu.memory_space<smem>>
    %1193 = vector.extract_strided_slice %1045 {offsets = [4, 0], sizes = [4, 16], strides = [1, 1]} : vector<10x22xf32> to vector<4x16xf32>
    %1194 = vector.broadcast %1192 : f32 to vector<4x16xf32>
    %1195 = arith.mulf %1194, %1193 : vector<4x16xf32>
    %1196 = arith.addf %1176, %1195 : vector<4x16xf32>
    %c225 = arith.constant 225 : index
    %1197 = memref.load %arg2[%c225] : memref<294xf32, #tpu.memory_space<smem>>
    %1198 = vector.extract_strided_slice %1045 {offsets = [4, 1], sizes = [4, 16], strides = [1, 1]} : vector<10x22xf32> to vector<4x16xf32>
    %1199 = vector.broadcast %1197 : f32 to vector<4x16xf32>
    %1200 = arith.mulf %1199, %1198 : vector<4x16xf32>
    %1201 = arith.addf %1181, %1200 : vector<4x16xf32>
    %c226 = arith.constant 226 : index
    %1202 = memref.load %arg2[%c226] : memref<294xf32, #tpu.memory_space<smem>>
    %1203 = vector.extract_strided_slice %1045 {offsets = [4, 2], sizes = [4, 16], strides = [1, 1]} : vector<10x22xf32> to vector<4x16xf32>
    %1204 = vector.broadcast %1202 : f32 to vector<4x16xf32>
    %1205 = arith.mulf %1204, %1203 : vector<4x16xf32>
    %1206 = arith.addf %1186, %1205 : vector<4x16xf32>
    %c227 = arith.constant 227 : index
    %1207 = memref.load %arg2[%c227] : memref<294xf32, #tpu.memory_space<smem>>
    %1208 = vector.extract_strided_slice %1045 {offsets = [4, 3], sizes = [4, 16], strides = [1, 1]} : vector<10x22xf32> to vector<4x16xf32>
    %1209 = vector.broadcast %1207 : f32 to vector<4x16xf32>
    %1210 = arith.mulf %1209, %1208 : vector<4x16xf32>
    %1211 = arith.addf %1191, %1210 : vector<4x16xf32>
    %c228 = arith.constant 228 : index
    %1212 = memref.load %arg2[%c228] : memref<294xf32, #tpu.memory_space<smem>>
    %1213 = vector.extract_strided_slice %1045 {offsets = [4, 4], sizes = [4, 16], strides = [1, 1]} : vector<10x22xf32> to vector<4x16xf32>
    %1214 = vector.broadcast %1212 : f32 to vector<4x16xf32>
    %1215 = arith.mulf %1214, %1213 : vector<4x16xf32>
    %1216 = arith.addf %1196, %1215 : vector<4x16xf32>
    %c229 = arith.constant 229 : index
    %1217 = memref.load %arg2[%c229] : memref<294xf32, #tpu.memory_space<smem>>
    %1218 = vector.extract_strided_slice %1045 {offsets = [4, 5], sizes = [4, 16], strides = [1, 1]} : vector<10x22xf32> to vector<4x16xf32>
    %1219 = vector.broadcast %1217 : f32 to vector<4x16xf32>
    %1220 = arith.mulf %1219, %1218 : vector<4x16xf32>
    %1221 = arith.addf %1201, %1220 : vector<4x16xf32>
    %c230 = arith.constant 230 : index
    %1222 = memref.load %arg2[%c230] : memref<294xf32, #tpu.memory_space<smem>>
    %1223 = vector.extract_strided_slice %1045 {offsets = [4, 6], sizes = [4, 16], strides = [1, 1]} : vector<10x22xf32> to vector<4x16xf32>
    %1224 = vector.broadcast %1222 : f32 to vector<4x16xf32>
    %1225 = arith.mulf %1224, %1223 : vector<4x16xf32>
    %1226 = arith.addf %1206, %1225 : vector<4x16xf32>
    %c231 = arith.constant 231 : index
    %1227 = memref.load %arg2[%c231] : memref<294xf32, #tpu.memory_space<smem>>
    %1228 = vector.extract_strided_slice %1045 {offsets = [5, 0], sizes = [4, 16], strides = [1, 1]} : vector<10x22xf32> to vector<4x16xf32>
    %1229 = vector.broadcast %1227 : f32 to vector<4x16xf32>
    %1230 = arith.mulf %1229, %1228 : vector<4x16xf32>
    %1231 = arith.addf %1211, %1230 : vector<4x16xf32>
    %c232 = arith.constant 232 : index
    %1232 = memref.load %arg2[%c232] : memref<294xf32, #tpu.memory_space<smem>>
    %1233 = vector.extract_strided_slice %1045 {offsets = [5, 1], sizes = [4, 16], strides = [1, 1]} : vector<10x22xf32> to vector<4x16xf32>
    %1234 = vector.broadcast %1232 : f32 to vector<4x16xf32>
    %1235 = arith.mulf %1234, %1233 : vector<4x16xf32>
    %1236 = arith.addf %1216, %1235 : vector<4x16xf32>
    %c233 = arith.constant 233 : index
    %1237 = memref.load %arg2[%c233] : memref<294xf32, #tpu.memory_space<smem>>
    %1238 = vector.extract_strided_slice %1045 {offsets = [5, 2], sizes = [4, 16], strides = [1, 1]} : vector<10x22xf32> to vector<4x16xf32>
    %1239 = vector.broadcast %1237 : f32 to vector<4x16xf32>
    %1240 = arith.mulf %1239, %1238 : vector<4x16xf32>
    %1241 = arith.addf %1221, %1240 : vector<4x16xf32>
    %c234 = arith.constant 234 : index
    %1242 = memref.load %arg2[%c234] : memref<294xf32, #tpu.memory_space<smem>>
    %1243 = vector.extract_strided_slice %1045 {offsets = [5, 3], sizes = [4, 16], strides = [1, 1]} : vector<10x22xf32> to vector<4x16xf32>
    %1244 = vector.broadcast %1242 : f32 to vector<4x16xf32>
    %1245 = arith.mulf %1244, %1243 : vector<4x16xf32>
    %1246 = arith.addf %1226, %1245 : vector<4x16xf32>
    %c235 = arith.constant 235 : index
    %1247 = memref.load %arg2[%c235] : memref<294xf32, #tpu.memory_space<smem>>
    %1248 = vector.extract_strided_slice %1045 {offsets = [5, 4], sizes = [4, 16], strides = [1, 1]} : vector<10x22xf32> to vector<4x16xf32>
    %1249 = vector.broadcast %1247 : f32 to vector<4x16xf32>
    %1250 = arith.mulf %1249, %1248 : vector<4x16xf32>
    %1251 = arith.addf %1231, %1250 : vector<4x16xf32>
    %c236 = arith.constant 236 : index
    %1252 = memref.load %arg2[%c236] : memref<294xf32, #tpu.memory_space<smem>>
    %1253 = vector.extract_strided_slice %1045 {offsets = [5, 5], sizes = [4, 16], strides = [1, 1]} : vector<10x22xf32> to vector<4x16xf32>
    %1254 = vector.broadcast %1252 : f32 to vector<4x16xf32>
    %1255 = arith.mulf %1254, %1253 : vector<4x16xf32>
    %1256 = arith.addf %1236, %1255 : vector<4x16xf32>
    %c237 = arith.constant 237 : index
    %1257 = memref.load %arg2[%c237] : memref<294xf32, #tpu.memory_space<smem>>
    %1258 = vector.extract_strided_slice %1045 {offsets = [5, 6], sizes = [4, 16], strides = [1, 1]} : vector<10x22xf32> to vector<4x16xf32>
    %1259 = vector.broadcast %1257 : f32 to vector<4x16xf32>
    %1260 = arith.mulf %1259, %1258 : vector<4x16xf32>
    %1261 = arith.addf %1241, %1260 : vector<4x16xf32>
    %c238 = arith.constant 238 : index
    %1262 = memref.load %arg2[%c238] : memref<294xf32, #tpu.memory_space<smem>>
    %1263 = vector.extract_strided_slice %1045 {offsets = [6, 0], sizes = [4, 16], strides = [1, 1]} : vector<10x22xf32> to vector<4x16xf32>
    %1264 = vector.broadcast %1262 : f32 to vector<4x16xf32>
    %1265 = arith.mulf %1264, %1263 : vector<4x16xf32>
    %1266 = arith.addf %1246, %1265 : vector<4x16xf32>
    %c239 = arith.constant 239 : index
    %1267 = memref.load %arg2[%c239] : memref<294xf32, #tpu.memory_space<smem>>
    %1268 = vector.extract_strided_slice %1045 {offsets = [6, 1], sizes = [4, 16], strides = [1, 1]} : vector<10x22xf32> to vector<4x16xf32>
    %1269 = vector.broadcast %1267 : f32 to vector<4x16xf32>
    %1270 = arith.mulf %1269, %1268 : vector<4x16xf32>
    %1271 = arith.addf %1251, %1270 : vector<4x16xf32>
    %c240 = arith.constant 240 : index
    %1272 = memref.load %arg2[%c240] : memref<294xf32, #tpu.memory_space<smem>>
    %1273 = vector.extract_strided_slice %1045 {offsets = [6, 2], sizes = [4, 16], strides = [1, 1]} : vector<10x22xf32> to vector<4x16xf32>
    %1274 = vector.broadcast %1272 : f32 to vector<4x16xf32>
    %1275 = arith.mulf %1274, %1273 : vector<4x16xf32>
    %1276 = arith.addf %1256, %1275 : vector<4x16xf32>
    %c241 = arith.constant 241 : index
    %1277 = memref.load %arg2[%c241] : memref<294xf32, #tpu.memory_space<smem>>
    %1278 = vector.extract_strided_slice %1045 {offsets = [6, 3], sizes = [4, 16], strides = [1, 1]} : vector<10x22xf32> to vector<4x16xf32>
    %1279 = vector.broadcast %1277 : f32 to vector<4x16xf32>
    %1280 = arith.mulf %1279, %1278 : vector<4x16xf32>
    %1281 = arith.addf %1261, %1280 : vector<4x16xf32>
    %c242 = arith.constant 242 : index
    %1282 = memref.load %arg2[%c242] : memref<294xf32, #tpu.memory_space<smem>>
    %1283 = vector.extract_strided_slice %1045 {offsets = [6, 4], sizes = [4, 16], strides = [1, 1]} : vector<10x22xf32> to vector<4x16xf32>
    %1284 = vector.broadcast %1282 : f32 to vector<4x16xf32>
    %1285 = arith.mulf %1284, %1283 : vector<4x16xf32>
    %1286 = arith.addf %1266, %1285 : vector<4x16xf32>
    %c243 = arith.constant 243 : index
    %1287 = memref.load %arg2[%c243] : memref<294xf32, #tpu.memory_space<smem>>
    %1288 = vector.extract_strided_slice %1045 {offsets = [6, 5], sizes = [4, 16], strides = [1, 1]} : vector<10x22xf32> to vector<4x16xf32>
    %1289 = vector.broadcast %1287 : f32 to vector<4x16xf32>
    %1290 = arith.mulf %1289, %1288 : vector<4x16xf32>
    %1291 = arith.addf %1271, %1290 : vector<4x16xf32>
    %c244 = arith.constant 244 : index
    %1292 = memref.load %arg2[%c244] : memref<294xf32, #tpu.memory_space<smem>>
    %1293 = vector.extract_strided_slice %1045 {offsets = [6, 6], sizes = [4, 16], strides = [1, 1]} : vector<10x22xf32> to vector<4x16xf32>
    %1294 = vector.broadcast %1292 : f32 to vector<4x16xf32>
    %1295 = arith.mulf %1294, %1293 : vector<4x16xf32>
    %1296 = arith.addf %1276, %1295 : vector<4x16xf32>
    %c245 = arith.constant 245 : index
    %1297 = memref.load %arg2[%c245] : memref<294xf32, #tpu.memory_space<smem>>
    %1298 = vector.extract_strided_slice %1047 {offsets = [0, 0], sizes = [4, 16], strides = [1, 1]} : vector<10x22xf32> to vector<4x16xf32>
    %1299 = vector.broadcast %1297 : f32 to vector<4x16xf32>
    %1300 = arith.mulf %1299, %1298 : vector<4x16xf32>
    %1301 = arith.addf %1281, %1300 : vector<4x16xf32>
    %c246 = arith.constant 246 : index
    %1302 = memref.load %arg2[%c246] : memref<294xf32, #tpu.memory_space<smem>>
    %1303 = vector.extract_strided_slice %1047 {offsets = [0, 1], sizes = [4, 16], strides = [1, 1]} : vector<10x22xf32> to vector<4x16xf32>
    %1304 = vector.broadcast %1302 : f32 to vector<4x16xf32>
    %1305 = arith.mulf %1304, %1303 : vector<4x16xf32>
    %1306 = arith.addf %1286, %1305 : vector<4x16xf32>
    %c247 = arith.constant 247 : index
    %1307 = memref.load %arg2[%c247] : memref<294xf32, #tpu.memory_space<smem>>
    %1308 = vector.extract_strided_slice %1047 {offsets = [0, 2], sizes = [4, 16], strides = [1, 1]} : vector<10x22xf32> to vector<4x16xf32>
    %1309 = vector.broadcast %1307 : f32 to vector<4x16xf32>
    %1310 = arith.mulf %1309, %1308 : vector<4x16xf32>
    %1311 = arith.addf %1291, %1310 : vector<4x16xf32>
    %c248 = arith.constant 248 : index
    %1312 = memref.load %arg2[%c248] : memref<294xf32, #tpu.memory_space<smem>>
    %1313 = vector.extract_strided_slice %1047 {offsets = [0, 3], sizes = [4, 16], strides = [1, 1]} : vector<10x22xf32> to vector<4x16xf32>
    %1314 = vector.broadcast %1312 : f32 to vector<4x16xf32>
    %1315 = arith.mulf %1314, %1313 : vector<4x16xf32>
    %1316 = arith.addf %1296, %1315 : vector<4x16xf32>
    %c249 = arith.constant 249 : index
    %1317 = memref.load %arg2[%c249] : memref<294xf32, #tpu.memory_space<smem>>
    %1318 = vector.extract_strided_slice %1047 {offsets = [0, 4], sizes = [4, 16], strides = [1, 1]} : vector<10x22xf32> to vector<4x16xf32>
    %1319 = vector.broadcast %1317 : f32 to vector<4x16xf32>
    %1320 = arith.mulf %1319, %1318 : vector<4x16xf32>
    %1321 = arith.addf %1301, %1320 : vector<4x16xf32>
    %c250 = arith.constant 250 : index
    %1322 = memref.load %arg2[%c250] : memref<294xf32, #tpu.memory_space<smem>>
    %1323 = vector.extract_strided_slice %1047 {offsets = [0, 5], sizes = [4, 16], strides = [1, 1]} : vector<10x22xf32> to vector<4x16xf32>
    %1324 = vector.broadcast %1322 : f32 to vector<4x16xf32>
    %1325 = arith.mulf %1324, %1323 : vector<4x16xf32>
    %1326 = arith.addf %1306, %1325 : vector<4x16xf32>
    %c251 = arith.constant 251 : index
    %1327 = memref.load %arg2[%c251] : memref<294xf32, #tpu.memory_space<smem>>
    %1328 = vector.extract_strided_slice %1047 {offsets = [0, 6], sizes = [4, 16], strides = [1, 1]} : vector<10x22xf32> to vector<4x16xf32>
    %1329 = vector.broadcast %1327 : f32 to vector<4x16xf32>
    %1330 = arith.mulf %1329, %1328 : vector<4x16xf32>
    %1331 = arith.addf %1311, %1330 : vector<4x16xf32>
    %c252 = arith.constant 252 : index
    %1332 = memref.load %arg2[%c252] : memref<294xf32, #tpu.memory_space<smem>>
    %1333 = vector.extract_strided_slice %1047 {offsets = [1, 0], sizes = [4, 16], strides = [1, 1]} : vector<10x22xf32> to vector<4x16xf32>
    %1334 = vector.broadcast %1332 : f32 to vector<4x16xf32>
    %1335 = arith.mulf %1334, %1333 : vector<4x16xf32>
    %1336 = arith.addf %1316, %1335 : vector<4x16xf32>
    %c253 = arith.constant 253 : index
    %1337 = memref.load %arg2[%c253] : memref<294xf32, #tpu.memory_space<smem>>
    %1338 = vector.extract_strided_slice %1047 {offsets = [1, 1], sizes = [4, 16], strides = [1, 1]} : vector<10x22xf32> to vector<4x16xf32>
    %1339 = vector.broadcast %1337 : f32 to vector<4x16xf32>
    %1340 = arith.mulf %1339, %1338 : vector<4x16xf32>
    %1341 = arith.addf %1321, %1340 : vector<4x16xf32>
    %c254 = arith.constant 254 : index
    %1342 = memref.load %arg2[%c254] : memref<294xf32, #tpu.memory_space<smem>>
    %1343 = vector.extract_strided_slice %1047 {offsets = [1, 2], sizes = [4, 16], strides = [1, 1]} : vector<10x22xf32> to vector<4x16xf32>
    %1344 = vector.broadcast %1342 : f32 to vector<4x16xf32>
    %1345 = arith.mulf %1344, %1343 : vector<4x16xf32>
    %1346 = arith.addf %1326, %1345 : vector<4x16xf32>
    %c255 = arith.constant 255 : index
    %1347 = memref.load %arg2[%c255] : memref<294xf32, #tpu.memory_space<smem>>
    %1348 = vector.extract_strided_slice %1047 {offsets = [1, 3], sizes = [4, 16], strides = [1, 1]} : vector<10x22xf32> to vector<4x16xf32>
    %1349 = vector.broadcast %1347 : f32 to vector<4x16xf32>
    %1350 = arith.mulf %1349, %1348 : vector<4x16xf32>
    %1351 = arith.addf %1331, %1350 : vector<4x16xf32>
    %c256 = arith.constant 256 : index
    %1352 = memref.load %arg2[%c256] : memref<294xf32, #tpu.memory_space<smem>>
    %1353 = vector.extract_strided_slice %1047 {offsets = [1, 4], sizes = [4, 16], strides = [1, 1]} : vector<10x22xf32> to vector<4x16xf32>
    %1354 = vector.broadcast %1352 : f32 to vector<4x16xf32>
    %1355 = arith.mulf %1354, %1353 : vector<4x16xf32>
    %1356 = arith.addf %1336, %1355 : vector<4x16xf32>
    %c257 = arith.constant 257 : index
    %1357 = memref.load %arg2[%c257] : memref<294xf32, #tpu.memory_space<smem>>
    %1358 = vector.extract_strided_slice %1047 {offsets = [1, 5], sizes = [4, 16], strides = [1, 1]} : vector<10x22xf32> to vector<4x16xf32>
    %1359 = vector.broadcast %1357 : f32 to vector<4x16xf32>
    %1360 = arith.mulf %1359, %1358 : vector<4x16xf32>
    %1361 = arith.addf %1341, %1360 : vector<4x16xf32>
    %c258 = arith.constant 258 : index
    %1362 = memref.load %arg2[%c258] : memref<294xf32, #tpu.memory_space<smem>>
    %1363 = vector.extract_strided_slice %1047 {offsets = [1, 6], sizes = [4, 16], strides = [1, 1]} : vector<10x22xf32> to vector<4x16xf32>
    %1364 = vector.broadcast %1362 : f32 to vector<4x16xf32>
    %1365 = arith.mulf %1364, %1363 : vector<4x16xf32>
    %1366 = arith.addf %1346, %1365 : vector<4x16xf32>
    %c259 = arith.constant 259 : index
    %1367 = memref.load %arg2[%c259] : memref<294xf32, #tpu.memory_space<smem>>
    %1368 = vector.extract_strided_slice %1047 {offsets = [2, 0], sizes = [4, 16], strides = [1, 1]} : vector<10x22xf32> to vector<4x16xf32>
    %1369 = vector.broadcast %1367 : f32 to vector<4x16xf32>
    %1370 = arith.mulf %1369, %1368 : vector<4x16xf32>
    %1371 = arith.addf %1351, %1370 : vector<4x16xf32>
    %c260 = arith.constant 260 : index
    %1372 = memref.load %arg2[%c260] : memref<294xf32, #tpu.memory_space<smem>>
    %1373 = vector.extract_strided_slice %1047 {offsets = [2, 1], sizes = [4, 16], strides = [1, 1]} : vector<10x22xf32> to vector<4x16xf32>
    %1374 = vector.broadcast %1372 : f32 to vector<4x16xf32>
    %1375 = arith.mulf %1374, %1373 : vector<4x16xf32>
    %1376 = arith.addf %1356, %1375 : vector<4x16xf32>
    %c261 = arith.constant 261 : index
    %1377 = memref.load %arg2[%c261] : memref<294xf32, #tpu.memory_space<smem>>
    %1378 = vector.extract_strided_slice %1047 {offsets = [2, 2], sizes = [4, 16], strides = [1, 1]} : vector<10x22xf32> to vector<4x16xf32>
    %1379 = vector.broadcast %1377 : f32 to vector<4x16xf32>
    %1380 = arith.mulf %1379, %1378 : vector<4x16xf32>
    %1381 = arith.addf %1361, %1380 : vector<4x16xf32>
    %c262 = arith.constant 262 : index
    %1382 = memref.load %arg2[%c262] : memref<294xf32, #tpu.memory_space<smem>>
    %1383 = vector.extract_strided_slice %1047 {offsets = [2, 3], sizes = [4, 16], strides = [1, 1]} : vector<10x22xf32> to vector<4x16xf32>
    %1384 = vector.broadcast %1382 : f32 to vector<4x16xf32>
    %1385 = arith.mulf %1384, %1383 : vector<4x16xf32>
    %1386 = arith.addf %1366, %1385 : vector<4x16xf32>
    %c263 = arith.constant 263 : index
    %1387 = memref.load %arg2[%c263] : memref<294xf32, #tpu.memory_space<smem>>
    %1388 = vector.extract_strided_slice %1047 {offsets = [2, 4], sizes = [4, 16], strides = [1, 1]} : vector<10x22xf32> to vector<4x16xf32>
    %1389 = vector.broadcast %1387 : f32 to vector<4x16xf32>
    %1390 = arith.mulf %1389, %1388 : vector<4x16xf32>
    %1391 = arith.addf %1371, %1390 : vector<4x16xf32>
    %c264 = arith.constant 264 : index
    %1392 = memref.load %arg2[%c264] : memref<294xf32, #tpu.memory_space<smem>>
    %1393 = vector.extract_strided_slice %1047 {offsets = [2, 5], sizes = [4, 16], strides = [1, 1]} : vector<10x22xf32> to vector<4x16xf32>
    %1394 = vector.broadcast %1392 : f32 to vector<4x16xf32>
    %1395 = arith.mulf %1394, %1393 : vector<4x16xf32>
    %1396 = arith.addf %1376, %1395 : vector<4x16xf32>
    %c265 = arith.constant 265 : index
    %1397 = memref.load %arg2[%c265] : memref<294xf32, #tpu.memory_space<smem>>
    %1398 = vector.extract_strided_slice %1047 {offsets = [2, 6], sizes = [4, 16], strides = [1, 1]} : vector<10x22xf32> to vector<4x16xf32>
    %1399 = vector.broadcast %1397 : f32 to vector<4x16xf32>
    %1400 = arith.mulf %1399, %1398 : vector<4x16xf32>
    %1401 = arith.addf %1381, %1400 : vector<4x16xf32>
    %c266 = arith.constant 266 : index
    %1402 = memref.load %arg2[%c266] : memref<294xf32, #tpu.memory_space<smem>>
    %1403 = vector.extract_strided_slice %1047 {offsets = [3, 0], sizes = [4, 16], strides = [1, 1]} : vector<10x22xf32> to vector<4x16xf32>
    %1404 = vector.broadcast %1402 : f32 to vector<4x16xf32>
    %1405 = arith.mulf %1404, %1403 : vector<4x16xf32>
    %1406 = arith.addf %1386, %1405 : vector<4x16xf32>
    %c267 = arith.constant 267 : index
    %1407 = memref.load %arg2[%c267] : memref<294xf32, #tpu.memory_space<smem>>
    %1408 = vector.extract_strided_slice %1047 {offsets = [3, 1], sizes = [4, 16], strides = [1, 1]} : vector<10x22xf32> to vector<4x16xf32>
    %1409 = vector.broadcast %1407 : f32 to vector<4x16xf32>
    %1410 = arith.mulf %1409, %1408 : vector<4x16xf32>
    %1411 = arith.addf %1391, %1410 : vector<4x16xf32>
    %c268 = arith.constant 268 : index
    %1412 = memref.load %arg2[%c268] : memref<294xf32, #tpu.memory_space<smem>>
    %1413 = vector.extract_strided_slice %1047 {offsets = [3, 2], sizes = [4, 16], strides = [1, 1]} : vector<10x22xf32> to vector<4x16xf32>
    %1414 = vector.broadcast %1412 : f32 to vector<4x16xf32>
    %1415 = arith.mulf %1414, %1413 : vector<4x16xf32>
    %1416 = arith.addf %1396, %1415 : vector<4x16xf32>
    %c269 = arith.constant 269 : index
    %1417 = memref.load %arg2[%c269] : memref<294xf32, #tpu.memory_space<smem>>
    %1418 = vector.extract_strided_slice %1047 {offsets = [3, 3], sizes = [4, 16], strides = [1, 1]} : vector<10x22xf32> to vector<4x16xf32>
    %1419 = vector.broadcast %1417 : f32 to vector<4x16xf32>
    %1420 = arith.mulf %1419, %1418 : vector<4x16xf32>
    %1421 = arith.addf %1401, %1420 : vector<4x16xf32>
    %c270 = arith.constant 270 : index
    %1422 = memref.load %arg2[%c270] : memref<294xf32, #tpu.memory_space<smem>>
    %1423 = vector.extract_strided_slice %1047 {offsets = [3, 4], sizes = [4, 16], strides = [1, 1]} : vector<10x22xf32> to vector<4x16xf32>
    %1424 = vector.broadcast %1422 : f32 to vector<4x16xf32>
    %1425 = arith.mulf %1424, %1423 : vector<4x16xf32>
    %1426 = arith.addf %1406, %1425 : vector<4x16xf32>
    %c271 = arith.constant 271 : index
    %1427 = memref.load %arg2[%c271] : memref<294xf32, #tpu.memory_space<smem>>
    %1428 = vector.extract_strided_slice %1047 {offsets = [3, 5], sizes = [4, 16], strides = [1, 1]} : vector<10x22xf32> to vector<4x16xf32>
    %1429 = vector.broadcast %1427 : f32 to vector<4x16xf32>
    %1430 = arith.mulf %1429, %1428 : vector<4x16xf32>
    %1431 = arith.addf %1411, %1430 : vector<4x16xf32>
    %c272 = arith.constant 272 : index
    %1432 = memref.load %arg2[%c272] : memref<294xf32, #tpu.memory_space<smem>>
    %1433 = vector.extract_strided_slice %1047 {offsets = [3, 6], sizes = [4, 16], strides = [1, 1]} : vector<10x22xf32> to vector<4x16xf32>
    %1434 = vector.broadcast %1432 : f32 to vector<4x16xf32>
    %1435 = arith.mulf %1434, %1433 : vector<4x16xf32>
    %1436 = arith.addf %1416, %1435 : vector<4x16xf32>
    %c273 = arith.constant 273 : index
    %1437 = memref.load %arg2[%c273] : memref<294xf32, #tpu.memory_space<smem>>
    %1438 = vector.extract_strided_slice %1047 {offsets = [4, 0], sizes = [4, 16], strides = [1, 1]} : vector<10x22xf32> to vector<4x16xf32>
    %1439 = vector.broadcast %1437 : f32 to vector<4x16xf32>
    %1440 = arith.mulf %1439, %1438 : vector<4x16xf32>
    %1441 = arith.addf %1421, %1440 : vector<4x16xf32>
    %c274 = arith.constant 274 : index
    %1442 = memref.load %arg2[%c274] : memref<294xf32, #tpu.memory_space<smem>>
    %1443 = vector.extract_strided_slice %1047 {offsets = [4, 1], sizes = [4, 16], strides = [1, 1]} : vector<10x22xf32> to vector<4x16xf32>
    %1444 = vector.broadcast %1442 : f32 to vector<4x16xf32>
    %1445 = arith.mulf %1444, %1443 : vector<4x16xf32>
    %1446 = arith.addf %1426, %1445 : vector<4x16xf32>
    %c275 = arith.constant 275 : index
    %1447 = memref.load %arg2[%c275] : memref<294xf32, #tpu.memory_space<smem>>
    %1448 = vector.extract_strided_slice %1047 {offsets = [4, 2], sizes = [4, 16], strides = [1, 1]} : vector<10x22xf32> to vector<4x16xf32>
    %1449 = vector.broadcast %1447 : f32 to vector<4x16xf32>
    %1450 = arith.mulf %1449, %1448 : vector<4x16xf32>
    %1451 = arith.addf %1431, %1450 : vector<4x16xf32>
    %c276 = arith.constant 276 : index
    %1452 = memref.load %arg2[%c276] : memref<294xf32, #tpu.memory_space<smem>>
    %1453 = vector.extract_strided_slice %1047 {offsets = [4, 3], sizes = [4, 16], strides = [1, 1]} : vector<10x22xf32> to vector<4x16xf32>
    %1454 = vector.broadcast %1452 : f32 to vector<4x16xf32>
    %1455 = arith.mulf %1454, %1453 : vector<4x16xf32>
    %1456 = arith.addf %1436, %1455 : vector<4x16xf32>
    %c277 = arith.constant 277 : index
    %1457 = memref.load %arg2[%c277] : memref<294xf32, #tpu.memory_space<smem>>
    %1458 = vector.extract_strided_slice %1047 {offsets = [4, 4], sizes = [4, 16], strides = [1, 1]} : vector<10x22xf32> to vector<4x16xf32>
    %1459 = vector.broadcast %1457 : f32 to vector<4x16xf32>
    %1460 = arith.mulf %1459, %1458 : vector<4x16xf32>
    %1461 = arith.addf %1441, %1460 : vector<4x16xf32>
    %c278 = arith.constant 278 : index
    %1462 = memref.load %arg2[%c278] : memref<294xf32, #tpu.memory_space<smem>>
    %1463 = vector.extract_strided_slice %1047 {offsets = [4, 5], sizes = [4, 16], strides = [1, 1]} : vector<10x22xf32> to vector<4x16xf32>
    %1464 = vector.broadcast %1462 : f32 to vector<4x16xf32>
    %1465 = arith.mulf %1464, %1463 : vector<4x16xf32>
    %1466 = arith.addf %1446, %1465 : vector<4x16xf32>
    %c279 = arith.constant 279 : index
    %1467 = memref.load %arg2[%c279] : memref<294xf32, #tpu.memory_space<smem>>
    %1468 = vector.extract_strided_slice %1047 {offsets = [4, 6], sizes = [4, 16], strides = [1, 1]} : vector<10x22xf32> to vector<4x16xf32>
    %1469 = vector.broadcast %1467 : f32 to vector<4x16xf32>
    %1470 = arith.mulf %1469, %1468 : vector<4x16xf32>
    %1471 = arith.addf %1451, %1470 : vector<4x16xf32>
    %c280 = arith.constant 280 : index
    %1472 = memref.load %arg2[%c280] : memref<294xf32, #tpu.memory_space<smem>>
    %1473 = vector.extract_strided_slice %1047 {offsets = [5, 0], sizes = [4, 16], strides = [1, 1]} : vector<10x22xf32> to vector<4x16xf32>
    %1474 = vector.broadcast %1472 : f32 to vector<4x16xf32>
    %1475 = arith.mulf %1474, %1473 : vector<4x16xf32>
    %1476 = arith.addf %1456, %1475 : vector<4x16xf32>
    %c281 = arith.constant 281 : index
    %1477 = memref.load %arg2[%c281] : memref<294xf32, #tpu.memory_space<smem>>
    %1478 = vector.extract_strided_slice %1047 {offsets = [5, 1], sizes = [4, 16], strides = [1, 1]} : vector<10x22xf32> to vector<4x16xf32>
    %1479 = vector.broadcast %1477 : f32 to vector<4x16xf32>
    %1480 = arith.mulf %1479, %1478 : vector<4x16xf32>
    %1481 = arith.addf %1461, %1480 : vector<4x16xf32>
    %c282 = arith.constant 282 : index
    %1482 = memref.load %arg2[%c282] : memref<294xf32, #tpu.memory_space<smem>>
    %1483 = vector.extract_strided_slice %1047 {offsets = [5, 2], sizes = [4, 16], strides = [1, 1]} : vector<10x22xf32> to vector<4x16xf32>
    %1484 = vector.broadcast %1482 : f32 to vector<4x16xf32>
    %1485 = arith.mulf %1484, %1483 : vector<4x16xf32>
    %1486 = arith.addf %1466, %1485 : vector<4x16xf32>
    %c283 = arith.constant 283 : index
    %1487 = memref.load %arg2[%c283] : memref<294xf32, #tpu.memory_space<smem>>
    %1488 = vector.extract_strided_slice %1047 {offsets = [5, 3], sizes = [4, 16], strides = [1, 1]} : vector<10x22xf32> to vector<4x16xf32>
    %1489 = vector.broadcast %1487 : f32 to vector<4x16xf32>
    %1490 = arith.mulf %1489, %1488 : vector<4x16xf32>
    %1491 = arith.addf %1471, %1490 : vector<4x16xf32>
    %c284 = arith.constant 284 : index
    %1492 = memref.load %arg2[%c284] : memref<294xf32, #tpu.memory_space<smem>>
    %1493 = vector.extract_strided_slice %1047 {offsets = [5, 4], sizes = [4, 16], strides = [1, 1]} : vector<10x22xf32> to vector<4x16xf32>
    %1494 = vector.broadcast %1492 : f32 to vector<4x16xf32>
    %1495 = arith.mulf %1494, %1493 : vector<4x16xf32>
    %1496 = arith.addf %1476, %1495 : vector<4x16xf32>
    %c285 = arith.constant 285 : index
    %1497 = memref.load %arg2[%c285] : memref<294xf32, #tpu.memory_space<smem>>
    %1498 = vector.extract_strided_slice %1047 {offsets = [5, 5], sizes = [4, 16], strides = [1, 1]} : vector<10x22xf32> to vector<4x16xf32>
    %1499 = vector.broadcast %1497 : f32 to vector<4x16xf32>
    %1500 = arith.mulf %1499, %1498 : vector<4x16xf32>
    %1501 = arith.addf %1481, %1500 : vector<4x16xf32>
    %c286 = arith.constant 286 : index
    %1502 = memref.load %arg2[%c286] : memref<294xf32, #tpu.memory_space<smem>>
    %1503 = vector.extract_strided_slice %1047 {offsets = [5, 6], sizes = [4, 16], strides = [1, 1]} : vector<10x22xf32> to vector<4x16xf32>
    %1504 = vector.broadcast %1502 : f32 to vector<4x16xf32>
    %1505 = arith.mulf %1504, %1503 : vector<4x16xf32>
    %1506 = arith.addf %1486, %1505 : vector<4x16xf32>
    %c287 = arith.constant 287 : index
    %1507 = memref.load %arg2[%c287] : memref<294xf32, #tpu.memory_space<smem>>
    %1508 = vector.extract_strided_slice %1047 {offsets = [6, 0], sizes = [4, 16], strides = [1, 1]} : vector<10x22xf32> to vector<4x16xf32>
    %1509 = vector.broadcast %1507 : f32 to vector<4x16xf32>
    %1510 = arith.mulf %1509, %1508 : vector<4x16xf32>
    %1511 = arith.addf %1491, %1510 : vector<4x16xf32>
    %c288 = arith.constant 288 : index
    %1512 = memref.load %arg2[%c288] : memref<294xf32, #tpu.memory_space<smem>>
    %1513 = vector.extract_strided_slice %1047 {offsets = [6, 1], sizes = [4, 16], strides = [1, 1]} : vector<10x22xf32> to vector<4x16xf32>
    %1514 = vector.broadcast %1512 : f32 to vector<4x16xf32>
    %1515 = arith.mulf %1514, %1513 : vector<4x16xf32>
    %1516 = arith.addf %1496, %1515 : vector<4x16xf32>
    %c289 = arith.constant 289 : index
    %1517 = memref.load %arg2[%c289] : memref<294xf32, #tpu.memory_space<smem>>
    %1518 = vector.extract_strided_slice %1047 {offsets = [6, 2], sizes = [4, 16], strides = [1, 1]} : vector<10x22xf32> to vector<4x16xf32>
    %1519 = vector.broadcast %1517 : f32 to vector<4x16xf32>
    %1520 = arith.mulf %1519, %1518 : vector<4x16xf32>
    %1521 = arith.addf %1501, %1520 : vector<4x16xf32>
    %c290 = arith.constant 290 : index
    %1522 = memref.load %arg2[%c290] : memref<294xf32, #tpu.memory_space<smem>>
    %1523 = vector.extract_strided_slice %1047 {offsets = [6, 3], sizes = [4, 16], strides = [1, 1]} : vector<10x22xf32> to vector<4x16xf32>
    %1524 = vector.broadcast %1522 : f32 to vector<4x16xf32>
    %1525 = arith.mulf %1524, %1523 : vector<4x16xf32>
    %1526 = arith.addf %1506, %1525 : vector<4x16xf32>
    %c291 = arith.constant 291 : index
    %1527 = memref.load %arg2[%c291] : memref<294xf32, #tpu.memory_space<smem>>
    %1528 = vector.extract_strided_slice %1047 {offsets = [6, 4], sizes = [4, 16], strides = [1, 1]} : vector<10x22xf32> to vector<4x16xf32>
    %1529 = vector.broadcast %1527 : f32 to vector<4x16xf32>
    %1530 = arith.mulf %1529, %1528 : vector<4x16xf32>
    %1531 = arith.addf %1511, %1530 : vector<4x16xf32>
    %c292 = arith.constant 292 : index
    %1532 = memref.load %arg2[%c292] : memref<294xf32, #tpu.memory_space<smem>>
    %1533 = vector.extract_strided_slice %1047 {offsets = [6, 5], sizes = [4, 16], strides = [1, 1]} : vector<10x22xf32> to vector<4x16xf32>
    %1534 = vector.broadcast %1532 : f32 to vector<4x16xf32>
    %1535 = arith.mulf %1534, %1533 : vector<4x16xf32>
    %1536 = arith.addf %1516, %1535 : vector<4x16xf32>
    %c293 = arith.constant 293 : index
    %1537 = memref.load %arg2[%c293] : memref<294xf32, #tpu.memory_space<smem>>
    %1538 = vector.extract_strided_slice %1047 {offsets = [6, 6], sizes = [4, 16], strides = [1, 1]} : vector<10x22xf32> to vector<4x16xf32>
    %1539 = vector.broadcast %1537 : f32 to vector<4x16xf32>
    %1540 = arith.mulf %1539, %1538 : vector<4x16xf32>
    %1541 = arith.addf %1521, %1540 : vector<4x16xf32>
    %1542 = arith.addf %1536, %1541 : vector<4x16xf32>
    %1543 = arith.addf %1526, %1531 : vector<4x16xf32>
    %1544 = arith.addf %1542, %1543 : vector<4x16xf32>
    %c4_37 = arith.constant 4 : index
    %1545 = memref.load %arg3[%c4_37] : memref<6xf32, #tpu.memory_space<smem>>
    %1546 = vector.broadcast %1545 : f32 to vector<4x16xf32>
    %1547 = arith.mulf %1544, %1546 : vector<4x16xf32>
    %c5_38 = arith.constant 5 : index
    %1548 = memref.load %arg3[%c5_38] : memref<6xf32, #tpu.memory_space<smem>>
    %1549 = vector.broadcast %1548 : f32 to vector<4x16xf32>
    %1550 = arith.addf %1547, %1549 : vector<4x16xf32>
    %1551 = arith.negf %1550 : vector<4x16xf32>
    %1552 = math.exp %1551 : vector<4x16xf32>
    %cst_39 = arith.constant 1.000000e+00 : f32
    %1553 = vector.broadcast %cst_39 : f32 to vector<4x16xf32>
    %1554 = arith.addf %1553, %1552 : vector<4x16xf32>
    %1555 = arith.divf %1553, %1554 : vector<4x16xf32>
    %1556 = vector.shape_cast %519 : vector<16x16xf32> to vector<1x16x16xf32>
    %1557 = vector.shape_cast %1037 : vector<4x16xf32> to vector<4x1x16xf32>
    %1558 = vector.broadcast %1556 : vector<1x16x16xf32> to vector<4x16x16xf32>
    %1559 = vector.broadcast %1557 : vector<4x1x16xf32> to vector<4x16x16xf32>
    %1560 = arith.addf %1558, %1559 : vector<4x16x16xf32>
    %1561 = vector.shape_cast %1555 : vector<4x16xf32> to vector<4x16x1xf32>
    %1562 = vector.broadcast %1561 : vector<4x16x1xf32> to vector<4x16x16xf32>
    %1563 = arith.addf %1560, %1562 : vector<4x16x16xf32>
    %c0_40 = arith.constant 0 : index
    %c0_41 = arith.constant 0 : index
    %c0_42 = arith.constant 0 : index
    %c0_43 = arith.constant 0 : index
    %1564 = vector.load %arg1[%c0_40, %c0_41, %c0_42, %c0_43] : memref<1x4x16x16xf32, #tpu.memory_space<vmem>>, vector<1x4x16x16xf32>
    %1565 = vector.shape_cast %1564 : vector<1x4x16x16xf32> to vector<4x16x16xf32>
    %cst_44 = arith.constant 0.333333343 : f32
    %1566 = vector.broadcast %cst_44 : f32 to vector<4x16x16xf32>
    %1567 = arith.mulf %1563, %1566 : vector<4x16x16xf32>
    %1568 = arith.mulf %1565, %1567 : vector<4x16x16xf32>
    %c0_45 = arith.constant 0 : index
    %c0_46 = arith.constant 0 : index
    %c0_47 = arith.constant 0 : index
    %c0_48 = arith.constant 0 : index
    %1569 = vector.load %arg4[%c0_45, %c0_46, %c0_47, %c0_48] : memref<1x4x16x16xf32, #tpu.memory_space<vmem>>, vector<1x4x16x16xf32>
    %1570 = vector.shape_cast %1569 : vector<1x4x16x16xf32> to vector<4x16x16xf32>
    %1571 = vector.shape_cast %1568 : vector<4x16x16xf32> to vector<1x4x16x16xf32>
    tpu.vector_store %arg4[%c0_45, %c0_46, %c0_47, %c0_48], %1571 {strides = array<i32>} : memref<1x4x16x16xf32, #tpu.memory_space<vmem>>, vector<1x4x16x16xf32>,
    return
  }
  func.func @transform_0(%arg0: i32) -> (i32, i32, i32, i32) {
    %c0_i32 = arith.constant 0 : i32
    %c0_i32_0 = arith.constant 0 : i32
    %c0_i32_1 = arith.constant 0 : i32
    %c0_i32_2 = arith.constant 0 : i32
    return %arg0, %c0_i32, %c0_i32_0, %c0_i32_1 : i32, i32, i32, i32
  }
  func.func @transform_1(%arg0: i32) -> i32 {
    %c0_i32 = arith.constant 0 : i32
    %c0_i32_0 = arith.constant 0 : i32
    return %c0_i32 : i32
  }
  func.func @transform_2(%arg0: i32) -> i32 {
    %c0_i32 = arith.constant 0 : i32
    %c0_i32_0 = arith.constant 0 : i32
    return %c0_i32 : i32
  }
  func.func @transform_3(%arg0: i32) -> (i32, i32, i32, i32) {
    %c0_i32 = arith.constant 0 : i32
    %c0_i32_0 = arith.constant 0 : i32
    %c0_i32_1 = arith.constant 0 : i32
    %c0_i32_2 = arith.constant 0 : i32
    return %arg0, %c0_i32, %c0_i32_0, %c0_i32_1 : i32, i32, i32, i32
  }
}

</mosaic_0001>

<bundles_post_ra>
// kernel: tpu_custom_call.1
= control target key start
LH: loop header
LB: loop body
LE: loop exit
PB: predicated region body
PF: predicated region fallthrough
CT: control target
= control target key end

     0   :  { %s7837_s0 = inlined_call_operand.hbm [shape: f32[2,4,16,16], index: 0, kind: input, shape index: {}]   ;;  %s7838_s1 = inlined_call_operand.hbm [shape: f32[294], index: 1, kind: input, shape index: {}]   ;;  %s7839_s2 = inlined_call_operand.vmem [shape: f32[6], index: 2, kind: input, shape index: {}]   ;;  %s7840_s3 = inlined_call_operand.hbm [shape: f32[2,4,16,16], index: 3, kind: output, shape index: {}]  }
   0x1   :  { %7876 = sst [smem:[#allocation123_spill]] %s7837_s0 }
   0x2   :  { %7877 = sst [smem:[#allocation124_spill]] %s7838_s1 }
   0x3   :  { %7878 = sst [smem:[#allocation125_spill]] %s7839_s2 }
   0x4   :  { %8 = vsyncpa [#allocation7], 0 }
   0x5   :  { %10 = vsyncpa [#allocation7 + $0x1], 0 }
   0x6   :  { %11 = vsyncpa [#allocation9], 0 }
   0x7   :  { %12 = vsyncpa [#allocation10], 0 }
   0x8   :  { %13 = vsyncpa [#allocation8], 0 }
   0x9   :  { %15 = vsyncpa [#allocation8 + $0x1], 0  ;;  %s5208_s12 = smov 0   ;;  %s5210_s13 = smov 0  }
   0xa   :  { %s5212_s14 = smov 0   ;;  %s5214_s15 = smov 0  }
   0xb LB: > { %s5229_s16 = sadd.s32 4294967295, %s5148_s15   ;;  %s4536_s17 = sadd.s32 4294967294, %s5148_s15   ;;  %s5148_s15 = sphi %s5214_s15, %s8147_s15   ;;  %s5144_s14 = sphi %s5212_s14, %s8146_s14   ;;  %s5140_s13 = sphi %s5210_s13, %s8145_s13   ;;  %s5136_s12 = sphi %s5208_s12, %s8144_s12  }
   0xc   : > { %s5233_s18 = sadd.s32 1, %s5148_s15   ;;  %s28_s19 = sadd.s32 1, %s5144_s14 }
   0xd   : > { %s25_s20 = ssub.s32 %s5148_s15, %s5233_s18  ;;  %p35_p0 = scmp.ne.s32.totalorder %s5144_s14, %s5140_s13 }
   0xe   : > { %p26_p1 = scmp.eq.s32.totalorder %s25_s20, 0  ;;  %p36_p2 = scmp.eq.s32.totalorder %s5148_s15, 0 }
   0xf   : > { %p41_p3 = scmp.ne.s32.totalorder %s5140_s13, %s5136_s12  ;;  %p7841_p4 = scmp.eq.s32.totalorder %s5229_s16, 0 }
  0x10   : > { %s5245_s21 = scalar_select %p26_p1, %s5144_s14, %s28_s19  }
  0x11   : > { %p5247_p5 = por %p36_p2, %p35_p0  ;;  %p5253_p6 = por %p7841_p4, %p41_p3 }
  0x12   : > { %7879 = sst [smem:[#allocation18_spill]] %s5245_s21  ;;  %p107_p7 = scmp.eq.s32.totalorder %s5229_s16, 1 }
  0x13   : > { %s7881_s23 = scalar_select %p5253_p6, 1, 0 }
  0x14   : > { %p113_p8 = scmp.eq.s32.totalorder %s4536_s17, 1  ;;  %p4537_p9 = scmp.ge.s32.totalorder %s5148_s15, 1 }
  0x15   : > { %p120_p10 = scmp.lt.s32.totalorder %s5148_s15, 3  ;;  %p5260_p11 = por %p107_p7, %p35_p0 }
  0x16   : > { %p5264_p12 = por %p113_p8, %p41_p3  ;;  %p4888_p4 = scmp.lt.s32.totalorder %s5148_s15, 2 }
  0x17   : > { %s7882_s24 = scalar_select %p5260_p11, 1, 0 }
  0x18   : > { %s7883_s25 = scalar_select %p5264_p12, 1, 0 }
  0x19   : > { %p5268_p13 = pnand %p4537_p9, %p120_p10  ;;  %s7885_s2 = sld [smem:[#allocation125_spill]] }
  0x1a   : > { %p7886_p0 = scmp.eq.s32.totalorder %s5229_s16, 0  ;;  %p5287_p3 = pnand %p4888_p4, %p5247_p5 }
  0x1b   : > { %s7884_s26 = scalar_select %p5268_p13, 1, 0 }
  0x1c   : > { %p4871_p2 = pneg %p5268_p13  ;;  %s153_s5 = sand.u32 1, %s5144_s14  }
  0x1d   : > { %s7889_s1 = sld [smem:[#allocation124_spill]] }
  0x1e   : > { %p5281_p7 = pnand %p4871_p2, %p7886_p0 }
  0x1f   : > { %s142_s29 = sshll.u32 %s7885_s2, 4  ;;  %s143_s29 = int_to_ptr.vmem [resolvable:$true] %s142_s29 }
  0x20   : > { %p4998_p9 = pneg %p5281_p7 }
  0x23   : > { %s4996_s8 = scalar_lea.hbm %s7889_s1, 48  ;;  %s5001_s19 = scalar_lea.hbm %s7889_s1, 64 }
  0x24   : > { %p4997_p8 = scmp.ne.s32.totalorder %s7889_s1, %s4996_s8  ;;  %p5002_p4 = scmp.lt.u32.totalorder %s5001_s19, %s4996_s8 }
  0x25   : > { %p5003_p5 = scmp.lt.u32.totalorder %s4996_s8, %s7889_s1 }
  0x26   : > { %p4999_p10 = pnand %p4998_p9, %p4997_p8 }
  0x27   : > { %p5004_p0 = por %p5003_p5, %p5002_p4 }
  0x28   : > { %p5000_p2 = pneg %p4999_p10 }
  0x2a   : > { %p5005_p1 = pnand %p5004_p0, %p5000_p2 }
  0x2c   : > { %5008 = shalt.err (!%p5005_p1)
}
  0x2d   : > { %s5170_s27 = smov [#allocation11]   ;;  %s5009_s7 = scalar_lea.vmem %s143_s29, 16 }
  0x2e   : > { %4874 = dma.hbm_to_smem (!%p5281_p7), %s7889_s1, 48, %s5170_s27, [#allocation9]  }
  0x2f   : > { %p5010_p8 = scmp.ne.s32.totalorder %s143_s29, %s5009_s7  ;;  %p5017_p11 = scmp.lt.s32.totalorder %s143_s29, %s143_s29 }
  0x30   : > { %p5018_p6 = scmp.lt.s32.totalorder %s5009_s7, %s5009_s7 }
  0x31   : > { %p5012_p10 = pnand %p5010_p8, %p4998_p9 }
  0x32   : > { %p5019_p13 = por %p5018_p6, %p5017_p11 }
  0x33   : > { %p5013_p12 = pneg %p5012_p10 }
  0x35   : > { %p5020_p4 = pnand %p5019_p13, %p5013_p12 }
  0x37   : > { %5023 = shalt.err (!%p5020_p4)
}
  0x38   : > { %s5171_s8 = smov [#allocation12]   ;;  %s4541_s9 = sshll.u32 %s153_s5, 6 }
  0x39   : > { %4877 = dma.vmem_to_smem (!%p5281_p7), %s143_s29, 16, %s5171_s8, [#allocation10]  }
  0x3a   : > { %s4857_s10 = sshll.u32 %s5148_s15, 10  ;;  %s7890_s0 = sld [smem:[#allocation123_spill]] }
  0x3b   : > { %s157_s20 = scalar_lea.vmem [#allocation6], %s4541_s9  ;;  %s5331_s22 = scalar_lea.sflag [#allocation7], %s153_s5 }
  0x3c   : > { %s164_s30 = sshll.u32 %s157_s20, 4  ;;  %p5026_p11 = pneg %p5287_p3  ;;  %s5327_s30 = int_to_ptr.vmem [resolvable:$true] %s164_s30 }
  0x40   : > { %s5325_s19 = scalar_lea.hbm %s7890_s0, %s4857_s10  ;;  %s5029_s6 = scalar_lea.hbm %s7890_s0, 2048 }
  0x41   : > { %s5024_s29 = scalar_lea.hbm %s5325_s19, 1024  ;;  %p5030_p1 = scmp.lt.u32.totalorder %s5325_s19, %s7890_s0 }
  0x42   : > { %p5025_p6 = scmp.ne.s32.totalorder %s5325_s19, %s5024_s29  ;;  %p5031_p7 = scmp.lt.u32.totalorder %s5029_s6, %s5024_s29 }
  0x43   : > { %p5033_p2 = scmp.lt.u32.totalorder %s5024_s29, %s5325_s19 }
  0x44   : > { %p5027_p12 = pnand %p5026_p11, %p5025_p6  ;;  %p5032_p9 = por %p5031_p7, %p5030_p1 }
  0x46   : > { %p5028_p13 = pneg %p5027_p12  ;;  %p5034_p5 = por %p5033_p2, %p5032_p9 }
  0x48   : > { %p5035_p0 = pnand %p5034_p5, %p5028_p13 }
  0x4a   : > { %5038 = shalt.err (!%p5035_p0)
}
  0x4b   : > { %s5039_s5 = scalar_lea.vmem %s5327_s30, 1024  ;;  %s5172_s9 = smov [#allocation6]  }
  0x4c   : > { %p5040_p8 = scmp.ne.s32.totalorder %s5327_s30, %s5039_s5  ;;  %s5044_s10 = sshll.u32 %s5172_s9, 4  ;;  %s5045_s10 = int_to_ptr.vmem [resolvable:$false] %s5044_s10 }
  0x4d   : > { %s5046_s11 = scalar_lea.vmem %s5045_s10, 2048  ;;  %p5047_p6 = scmp.lt.s32.totalorder %s5327_s30, %s5045_s10 }
  0x4e   : > { %p5042_p10 = pnand %p5040_p8, %p5026_p11  ;;  %p5048_p12 = scmp.lt.s32.totalorder %s5046_s11, %s5039_s5 }
  0x50   : > { %p5043_p4 = pneg %p5042_p10  ;;  %p5049_p1 = por %p5048_p12, %p5047_p6 }
  0x52   : > { %p5050_p7 = pnand %p5049_p1, %p5043_p4 }
  0x54   : > { %5053 = shalt.err (!%p5050_p7)
}
  0x55   : > { %s5173_s17 = smov 128   ;;  %s5174_s20 = smov 8  }
  0x56   : > { %4881 = dma.hbm_to_vmem [thread:$0]  (!%p5287_p3), %s5325_s19, 1024, %s5327_s30, %s5331_s22, %s5173_s17, %s5173_s17, %s5174_s20  }
  0x57   : > { %p7891_p11 = scmp.ne.s32.totalorder %s7884_s26, 0 }
  0x59   : > { %176 = sbr.rel (%p7891_p11) target bundleno = 1473 (0x5c1), region = 32 }
  0x60   : > { %s5362_s29 = sand.u32 1, %s5140_s13   ;;  %p7892_p13 = scmp.ne.s32.totalorder %s7881_s23, 0 }
  0x61   : > { %s4545_s27 = sshll.u32 %s5362_s29, 6  ;;  %s179_s28 = scalar_lea.sflag [#allocation7], %s5362_s29 }
  0x62   : > { %s5366_s6 = scalar_lea.vmem [#allocation6], %s4545_s27 }
  0x63   : > { %5119 = dma.done.wait (%p7892_p13), %s179_s28, 1024  }
  0x64   : > { %5121 = vsyncadd (%p7892_p13), %s179_s28, 4294966272  ;;  %p7893_p3 = scmp.eq.s32.totalorder %s5229_s16, 0 }
  0x66   : > { %5123 = dma.done.wait (%p7893_p3), [#allocation9], 48   ;;  %p7894_p9 = pmov %p7893_p3 }
  0x67   : > { %p7895_p2 = pmov %p7893_p3 }
  0x68   : > { %5125 = vsyncadd (%p7894_p9), [#allocation9], 4294967248 }
  0x69   : > { %5127 = dma.done.wait (%p7895_p2), [#allocation10], 16   ;;  %p7896_p5 = pmov %p7895_p2 }
  0x6b   : > { %5129 = vsyncadd (%p7896_p5), [#allocation10], 4294967280 }
  0x6c   : > { %195 = sfence }
  0x6d   : > { %s5380_s26 = scalar_lea.vmem [#allocation13], %s4545_s27  ;;  %v5382_v0 = vmov 0.0   ;;  %v5384_v1 = vmov 0.0   ;;  %v5386_v2 = vmov -inf   ;;  %v5388_v3 = vmov -inf   ;;  %s5390_s23 = smov 0  }
  0x6e LB: >> { %s4549_s4 = sshll.u32 %s5168_s23, 4  ;;  %vm228_vm0 = vcmask 130048   ;;  %vm239_vm1 = vcmask 122880   ;;  %s238_s30 = scalar_lea.vmem [#allocation2], %s5168_s23  ;;  %v258_v28 = vlaneseq  ;;  %vm269_vm2 = vcmask 130112   ;;  %s5168_s23 = sphi %s5390_s23, %s219_s23   ;;  %v5164_v3 = vphi %v5388_v3, %v7901_v3   ;;  %v5160_v2 = vphi %v5386_v2, %v7900_v2   ;;  %v5156_v1 = vphi %v5384_v1, %v7899_v1   ;;  %v5152_v0 = vphi %v5382_v0, %v7898_v0  }
  0x6f   : >> { %s225_s19 = scalar_lea.vmem %s5366_s6, %s4549_s4 [#allocation6]  ;;  %s250_s22 = scalar_lea.vmem [#allocation3], %s5168_s23 }
  0x70   : >> { %v226_v4 = vld [vmem:[%s225_s19] sm:$0xff]  ;;  %v227_v5 = vld [vmem:[%s225_s19 + $0x8] sm:$0xff]  ;;  %v259_v29 = vand.u32 127, %v258_v28  ;;  %v5409_v30 = vshrl.u32 %v258_v28, 7  ;;  %s290_s7 = scalar_lea.vmem [#allocation5], %s5168_s23  ;;  %s272_s8 = scalar_lea.vmem [#allocation4], %s5168_s23 }
  0x71   : >> { %v241_v6 = vsel %vm228_vm0, %v226_v4, 0.0  ;;  %v292_v7 = vmax.f32 %v5164_v3, %v226_v4   ;;  %v294_v8 = vadd.f32 %v5156_v1, %v226_v4   ;;  %v229_v9 = vsel %vm228_vm0, %v226_v4, -inf  ;;  %s219_s23 = sadd.s32 1, %s5168_s23  }
  0x72   : >> { %274 = vadd.xlane.f32.xlu1 %v241_v6  ;;  %252 = vmax.xlane.f32.xlu0 %v229_v9  ;;  %v242_v10 = vsel %vm228_vm0, %v227_v5, 0.0  ;;  %v293_v11 = vmax.f32 %v5160_v2, %v227_v5   ;;  %v295_v12 = vadd.f32 %v5152_v0, %v227_v5   ;;  %v230_v13 = vsel %vm228_vm0, %v227_v5, -inf  ;;  %7897 = vst [vmem:[#allocation19_spill] sm:$0xff] %v5409_v30  ;;  %p216_p0 = scmp.ge.s32.totalorder %s219_s23, 4  }
  0x73   : >> { %v243_v14 = vadd.f32 %v242_v10, %v241_v6  ;;  %v231_v15 = vmax.f32 %v229_v9, %v230_v13  ;;  %v264_v31 = vadd.s32 4294967288, %v259_v29  ;;  %v262_v34 = vsub.s32 %v259_v29, %v5409_v30  ;;  %s7863_s5 = smov (%p216_p0), 3   ;;  %s4553_s9 = sld [smem:[#allocation11 + $0x4]] (%p216_p0) }
  0x74   : >> { %v7898_v0 = vmov %v295_v12  ;;  %v7899_v1 = vmov %v294_v8  ;;  %v7900_v2 = vmov %v293_v11  ;;  %v7901_v3 = vmov %v292_v7  ;;  %s5432_s10 = sld [smem:[#allocation11 + $0x5]] (%p216_p0)  ;;  %s4556_s11 = sld [smem:[#allocation11 + $0x7]] (%p216_p0) }
  0x75   : >> { %v244_v16 = vrot.slane %v243_v14, 4  ;;  %v232_v17 = vrot.slane %v231_v15, 4  ;;  %v267_v35 = vsub.s32 %v264_v31, %v5409_v30  ;;  %v296_v44 = vmul.f32 (%p216_p0), 0.25, %v294_v8  ;;  %s5436_s17 = sld [smem:[#allocation11 + $0x6]] (%p216_p0)  ;;  %s4557_s20 = sld [smem:[#allocation11 + $0x8]] (%p216_p0) }
  0x76   : >> { %276 = vadd.xlane.f32.xlu1 %v242_v10  ;;  %254 = vmax.xlane.f32.xlu0 %v230_v13  ;;  %v297_v45 = vmul.f32 (%p216_p0), 0.25, %v295_v12  ;;  %vm306_vm3 = vcmask (%p216_p0), 23552   ;;  %vm309_vm4 = vcmask (%p216_p0), 154624   ;;  %vm314_vm5 = vcmask (%p216_p0), 1042432   ;;  %s7855_s27 = smov (%p216_p0), 124   ;;  %s4558_s28 = sld [smem:[#allocation11 + $0x9]] (%p216_p0) }
  0x77   : >> { %v245_v18 = vadd.f32 %v244_v16, %v243_v14  ;;  %v233_v19 = vmax.f32 %v231_v15, %v232_v17  ;;  %s4559_s23 = sld [smem:[#allocation11 + $0xa]] (%p216_p0)  ;;  %vm419_vm6 = vcmask (%p216_p0), 1046528   ;;  %s4560_s4 = sld [smem:[#allocation11 + $0xb]] (%p216_p0)  ;;  %vm567_vm7 = vcmask (%p216_p0), 1045504  }
  0x78   : > { %s4561_s19 = sld [smem:[#allocation11 + $0xc]] (%p216_p0)  ;;  %vm715_vm8 = vcmask (%p216_p0), 1044480   ;;  %vm863_vm9 = vcmask (%p216_p0), 1043456   ;;  %vm1142_vm10 = vcmask (%p216_p0), 1041408   ;;  %s6824_s0 = sld [smem:[#allocation11 + $0xe6]] (%p216_p0) }
  0x79   : >> { %v246_v20 = vrot.slane %v245_v18, 2  ;;  %v234_v21 = vrot.slane %v233_v19, 2  ;;  %v370_v50 = vstv (%p216_p0), %s4553_s9  ;;  %s4565_s9 = sld [smem:[#allocation11 + $0x10]] (%p216_p0)  ;;  %s6840_s1 = sld [smem:[#allocation11 + $0xee]] (%p216_p0) }
  0x7a   : > { %v384_v57 = vstv (%p216_p0), %s5432_s10  ;;  %v412_v61 = vstv (%p216_p0), %s4556_s11  ;;  %s7853_s10 = smov (%p216_p0), 123   ;;  %s4566_s11 = sld [smem:[#allocation11 + $0x11]] (%p216_p0) }
  0x7b   : >> { %v247_v22 = vadd.f32 %v246_v20, %v245_v18  ;;  %v235_v23 = vmax.f32 %v233_v19, %v234_v21  ;;  %v398_v62 = vstv (%p216_p0), %s5436_s17  ;;  %v434_v4 = vstv (%p216_p0), %s4557_s20  ;;  %s4567_s17 = sld [smem:[#allocation11 + $0x12]] (%p216_p0)  ;;  %s7859_s20 = smov (%p216_p0), 2  }
  0x7c   : > { %v455_v10 = vstv (%p216_p0), %s4558_s28  ;;  %s4568_s28 = sld [smem:[#allocation11 + $0x13]] (%p216_p0)  ;;  %s6971_s2 = sld [smem:[#allocation11 + $0x106]] (%p216_p0) }
  0x7d   : >> { %v248_v24 = vrot.slane %v247_v22, 1  ;;  %v236_v25 = vrot.slane %v235_v23, 1  ;;  %v476_v19 = vstv (%p216_p0), %s4559_s23  ;;  %v497_v28 = vstv (%p216_p0), %s4560_s4  ;;  %s4569_s23 = sld [smem:[#allocation11 + $0x14]] (%p216_p0)  ;;  %s7857_s4 = smov (%p216_p0), 126  }
  0x7e   : > { %s7384_s21 = sld [smem:[#allocation11 + $0xbb]] (%p216_p0)  ;;  %p8140_p10 = scmp.ne.s32.totalorder (%p216_p0), %s7882_s24, 0 }
  0x7f   : >> { %v249_v26 = vadd.f32 %v248_v24, %v247_v22  ;;  %v237_v27 = vmax.f32 %v235_v23, %v236_v25 }
  0x81   : >> { %240 = vst.msk [vmem:[%s238_s30] sm:$0x1] %vm239_vm1, %v237_v27  ;;  %251 = vst.msk [vmem:[%s250_s22] sm:$0x1] %vm239_vm1, %v249_v26  ;;  %s7861_s30 = smov (%p216_p0), 127   ;;  %s4562_s22 = sld [smem:[#allocation11 + $0xd]] (%p216_p0) }
  0x87   : > { %325 = vrot.lane.b32.xlu1 (%p216_p0), %v296_v44, %s7863_s5 }
  0x8b   : > { %327 = vrot.lane.b32.xlu1 (%p216_p0), %v297_v45, %s7863_s5 }
  0x8c   : > { %300 = vrot.lane.b32.xlu0 (%p216_p0), %v292_v7, %s7863_s5 }
  0x90   : > { %302 = vrot.lane.b32.xlu0 (%p216_p0), %v293_v11, %s7863_s5 }
  0xff   : >> { %v275_v32 = vpop.xlane.xlu1 %274  ;;  %v253_v33 = vpop.xlane.xlu0 %252 }
 0x100   : >> { %v283_v38 = vrot.slane %v275_v32, %v262_v34  ;;  %v263_v39 = vrot.slane %v253_v33, %v262_v34 }
 0x101   : > { %218 = sbr.rel (!%p216_p0) target bundleno = 110 (0x6e), region = 99 }
 0x103   : >> { %v277_v36 = vpop.xlane.xlu1 %276  ;;  %v255_v37 = vpop.xlane.xlu0 %254 }
 0x104   : >> { %v287_v40 = vrot.slane %v277_v36, %v267_v35  ;;  %v268_v41 = vrot.slane %v255_v37, %v267_v35 }
 0x106   : >> { %v288_v42 = vsel %vm269_vm2, %v287_v40, %v283_v38  ;;  %v270_v43 = vsel %vm269_vm2, %v268_v41, %v263_v39  ;;  %v518_v40 = vstv (%p216_p0), %s4561_s19  ;;  %s4570_s19 = sld [smem:[#allocation11 + $0x15]] (%p216_p0) }
 0x107   : >> { %291 = vst.msk [vmem:[%s290_s7] sm:$0x1] %vm239_vm1, %v288_v42  ;;  %273 = vst.msk [vmem:[%s272_s8] sm:$0x1] %vm239_vm1, %v270_v43  ;;  %v301_v46 = vpop.permute.xlu0 (%p216_p0), %300  ;;  %s4563_s7 = sld [smem:[#allocation11 + $0xe]] (%p216_p0)  ;;  %s4564_s8 = sld [smem:[#allocation11 + $0xf]] (%p216_p0) }
 0x108   : > { %v307_v47 = vsel %vm306_vm3, 0.0, %v301_v46 }
 0x109   : > { %v310_v48 = vsel %vm309_vm4, %v307_v47, 0.0  ;;  %v539_v47 = vstv %s4562_s22  ;;  %s4571_s22 = sld [smem:[#allocation11 + $0x16]] }
 0x10a   : > { %v315_v49 = vrot.slane %v310_v48, 5 }
 0x10b   : > { %v303_v51 = vpop.permute.xlu0 %302 }
 0x10c   : > { %v5439_v52 = vsel %vm314_vm5, 0.0, %v315_v49  ;;  %v308_v53 = vsel %vm306_vm3, 0.0, %v303_v51 }
 0x10d   : > { %7902 = vst [vmem:[#allocation20_spill] sm:$0xff] %v5439_v52  ;;  %v311_v54 = vsel %vm309_vm4, %v308_v53, 0.0  ;;  %v371_v55 = vmul.f32 %v370_v50, %v5439_v52  ;;  %v385_v59 = vmul.f32 %v384_v57, %v5439_v52  ;;  %v413_v1 = vmul.f32 %v412_v61, %v5439_v52 }
 0x10e   : > { %v316_v56 = vrot.slane %v311_v54, 5  ;;  %v399_v2 = vmul.f32 %v398_v62, %v5439_v52  ;;  %v435_v9 = vmul.f32 %v434_v4, %v5439_v52  ;;  %v456_v18 = vmul.f32 %v455_v10, %v5439_v52 }
 0x10f   : > { %375 = vrot.lane.b32.xlu0 %v371_v55, %s7855_s27  ;;  %v420_v8 = vrot.slane %v413_v1, 1  ;;  %v477_v26 = vmul.f32 %v476_v19, %v5439_v52  ;;  %v498_v37 = vmul.f32 %v497_v28, %v5439_v52  ;;  %v519_v46 = vmul.f32 %v518_v40, %v5439_v52 }
 0x110   : > { %v5447_v58 = vsel %vm314_vm5, %v315_v49, %v316_v56  ;;  %v5454_v0 = vsel %vm314_vm5, %v316_v56, 0.0  ;;  %v441_v17 = vrot.slane %v435_v9, 1  ;;  %v462_v27 = vrot.slane %v456_v18, 1 }
 0x111   : > { %7903 = vst [vmem:[#allocation21_spill] sm:$0xff] %v5447_v58  ;;  %v372_v60 = vmul.f32 %v370_v50, %v5447_v58  ;;  %v414_v63 = vmul.f32 %v412_v61, %v5447_v58  ;;  %7904 = vst [vmem:[#allocation22_spill] sm:$0xff] %v5454_v0  ;;  %v386_v3 = vmul.f32 %v384_v57, %v5447_v58  ;;  %v483_v36 = vrot.slane %v477_v26, 1 }
 0x112   : > { %v436_v6 = vmul.f32 %v434_v4, %v5447_v58  ;;  %v415_v7 = vmul.f32 %v412_v61, %v5454_v0  ;;  %v400_v11 = vmul.f32 %v398_v62, %v5447_v58  ;;  %v457_v12 = vmul.f32 %v455_v10, %v5447_v58 }
 0x113   : > { %389 = vrot.lane.b32.xlu0 %v385_v59, %s7855_s27  ;;  %377 = vrot.lane.b32.xlu1 %v372_v60, %s7855_s27  ;;  %v421_v5 = vrot.slane %v414_v63, 1  ;;  %v437_v16 = vmul.f32 %v434_v4, %v5454_v0  ;;  %v478_v21 = vmul.f32 %v476_v19, %v5447_v58  ;;  %v458_v25 = vmul.f32 %v455_v10, %v5454_v0 }
 0x114   : > { %v442_v14 = vrot.slane %v436_v6, 1  ;;  %v423_v15 = vrot.slane %v415_v7, 1  ;;  %v463_v20 = vrot.slane %v457_v12, 1  ;;  %v499_v31 = vmul.f32 %v497_v28, %v5447_v58 }
 0x115   : > { %v422_v13 = vsel %vm419_vm6, %v420_v8, %v421_v5  ;;  %v444_v24 = vrot.slane %v437_v16, 1  ;;  %v484_v29 = vrot.slane %v478_v21, 1  ;;  %v465_v34 = vrot.slane %v458_v25, 1 }
 0x116   : > { %v443_v22 = vsel %vm419_vm6, %v441_v17, %v442_v14  ;;  %v424_v23 = vsel %vm419_vm6, %v421_v5, %v423_v15  ;;  %v464_v32 = vsel %vm419_vm6, %v462_v27, %v463_v20  ;;  %v479_v35 = vmul.f32 %v476_v19, %v5454_v0 }
 0x117   : > { %403 = vrot.lane.b32.xlu0 %v399_v2, %s7855_s27  ;;  %391 = vrot.lane.b32.xlu1 %v386_v3, %s7855_s27  ;;  %v445_v33 = vsel %vm419_vm6, %v442_v14, %v444_v24  ;;  %v485_v38 = vsel %vm419_vm6, %v483_v36, %v484_v29  ;;  %v505_v39 = vrot.slane %v499_v31, 1  ;;  %v466_v41 = vsel %vm419_vm6, %v463_v20, %v465_v34 }
 0x118   : > { %v486_v42 = vrot.slane %v479_v35, 1  ;;  %v520_v43 = vmul.f32 %v518_v40, %v5447_v58  ;;  %v500_v44 = vmul.f32 %v497_v28, %v5454_v0  ;;  %v504_v45 = vrot.slane %v498_v37, 1 }
 0x119   : > { %v541_v49 = vmul.f32 %v539_v47, %v5447_v58  ;;  %v521_v54 = vmul.f32 %v518_v40, %v5454_v0  ;;  %v525_v55 = vrot.slane %v519_v46, 1  ;;  %v540_v56 = vmul.f32 %v539_v47, %v5439_v52 }
 0x11a   : > { %v506_v48 = vsel %vm419_vm6, %v504_v45, %v505_v39  ;;  %v487_v50 = vsel %vm419_vm6, %v484_v29, %v486_v42  ;;  %v526_v51 = vrot.slane %v520_v43, 1  ;;  %v507_v53 = vrot.slane %v500_v44, 1 }
 0x11b   : > { %425 = vrot.lane.b32.xlu0 %v422_v13, %s7863_s5  ;;  %405 = vrot.lane.b32.xlu1 %v400_v11, %s7855_s27  ;;  %v560_v57 = vstv %s4563_s7  ;;  %v547_v59 = vrot.slane %v541_v49, 1  ;;  %v528_v63 = vrot.slane %v521_v54, 1  ;;  %v542_v1 = vmul.f32 %v539_v47, %v5454_v0  ;;  %s4572_s7 = sld [smem:[#allocation11 + $0x17]] }
 0x11c   : > { %v562_v60 = vmul.f32 %v560_v57, %v5447_v58  ;;  %v527_v61 = vsel %vm419_vm6, %v525_v55, %v526_v51  ;;  %v508_v62 = vsel %vm419_vm6, %v505_v39, %v507_v53  ;;  %v561_v2 = vmul.f32 %v560_v57, %v5439_v52 }
 0x11d   : > { %v546_v3 = vrot.slane %v540_v56, 1  ;;  %v582_v4 = vstv %s4564_s8  ;;  %v529_v8 = vsel %vm419_vm6, %v526_v51, %v528_v63  ;;  %v549_v9 = vrot.slane %v542_v1, 1  ;;  %s4573_s8 = sld [smem:[#allocation11 + $0x18]] }
 0x11e   : > { %v569_v5 = vrot.slane %v562_v60, 2  ;;  %v584_v6 = vmul.f32 %v582_v4, %v5447_v58  ;;  %v563_v10 = vmul.f32 %v560_v57, %v5454_v0  ;;  %v568_v11 = vrot.slane %v561_v2, 2 }
 0x11f   : > { %446 = vrot.lane.b32.xlu0 %v443_v22, %s7861_s30  ;;  %427 = vrot.lane.b32.xlu1 %v424_v23, %s7863_s5  ;;  %v548_v7 = vsel %vm419_vm6, %v546_v3, %v547_v59  ;;  %v583_v12 = vmul.f32 %v582_v4, %v5439_v52  ;;  %v603_v15 = vstv %s4565_s9  ;;  %v550_v16 = vsel %vm419_vm6, %v547_v59, %v549_v9  ;;  %s7851_s9 = smov 122  }
 0x120   : > { %v570_v13 = vsel %vm567_vm7, %v568_v11, %v569_v5  ;;  %v590_v14 = vrot.slane %v584_v6, 2  ;;  %v571_v17 = vrot.slane %v563_v10, 2  ;;  %v605_v18 = vmul.f32 %v603_v15, %v5447_v58 }
 0x121   : > { %v585_v19 = vmul.f32 %v582_v4, %v5454_v0  ;;  %v589_v20 = vrot.slane %v583_v12, 2  ;;  %v604_v21 = vmul.f32 %v603_v15, %v5439_v52  ;;  %v624_v22 = vstv %s4566_s11  ;;  %s4574_s11 = sld [smem:[#allocation11 + $0x19]] }
 0x122   : > { %v626_v24 = vmul.f32 %v624_v22, %v5447_v58  ;;  %v572_v25 = vsel %vm567_vm7, %v569_v5, %v571_v17  ;;  %v611_v26 = vrot.slane %v605_v18, 2  ;;  %v606_v28 = vmul.f32 %v603_v15, %v5454_v0 }
 0x123   : > { %467 = vrot.lane.b32.xlu0 %v464_v32, %s7861_s30  ;;  %448 = vrot.lane.b32.xlu1 %v445_v33, %s7861_s30  ;;  %v591_v23 = vsel %vm567_vm7, %v589_v20, %v590_v14  ;;  %v592_v27 = vrot.slane %v585_v19, 2  ;;  %v625_v29 = vmul.f32 %v624_v22, %v5439_v52  ;;  %v610_v31 = vrot.slane %v604_v21, 2 }
 0x124   : > { %v645_v32 = vstv %s4567_s17  ;;  %v632_v33 = vrot.slane %v626_v24, 2  ;;  %v613_v37 = vrot.slane %v606_v28, 2  ;;  %v666_v43 = vstv %s4568_s28  ;;  %s7849_s17 = smov 1   ;;  %s4575_s28 = sld [smem:[#allocation11 + $0x1a]] }
 0x125   : > { %v647_v34 = vmul.f32 %v645_v32, %v5447_v58  ;;  %v612_v35 = vsel %vm567_vm7, %v610_v31, %v611_v26  ;;  %v593_v36 = vsel %vm567_vm7, %v590_v14, %v592_v27  ;;  %v631_v39 = vrot.slane %v625_v29, 2 }
 0x126   : > { %v646_v40 = vmul.f32 %v645_v32, %v5439_v52  ;;  %v614_v44 = vsel %vm567_vm7, %v611_v26, %v613_v37  ;;  %v668_v46 = vmul.f32 %v666_v43, %v5447_v58  ;;  %v648_v47 = vmul.f32 %v645_v32, %v5454_v0 }
 0x127   : > { %488 = vrot.lane.b32.xlu0 %v485_v38, %s7861_s30  ;;  %469 = vrot.lane.b32.xlu1 %v466_v41, %s7861_s30  ;;  %v627_v38 = vmul.f32 %v624_v22, %v5454_v0  ;;  %v633_v41 = vsel %vm567_vm7, %v631_v39, %v632_v33  ;;  %v653_v42 = vrot.slane %v647_v34, 2  ;;  %v667_v49 = vmul.f32 %v666_v43, %v5439_v52 }
 0x128   : > { %v674_v55 = vrot.slane %v668_v46, 2  ;;  %v655_v56 = vrot.slane %v648_v47, 2  ;;  %v669_v57 = vmul.f32 %v666_v43, %v5454_v0  ;;  %v730_v9 = vstv %s4571_s22  ;;  %s7847_s22 = smov 125  }
 0x129   : > { %v634_v45 = vrot.slane %v627_v38, 2  ;;  %v673_v60 = vrot.slane %v667_v49, 2  ;;  %v732_v12 = vmul.f32 %v730_v9, %v5447_v58  ;;  %v731_v15 = vmul.f32 %v730_v9, %v5439_v52 }
 0x12a   : > { %v656_v2 = vsel %vm567_vm7, %v653_v42, %v655_v56  ;;  %v676_v3 = vrot.slane %v669_v57, 2  ;;  %v733_v22 = vmul.f32 %v730_v9, %v5454_v0  ;;  %v793_v37 = vstv %s4574_s11  ;;  %s4584_s11 = sld [smem:[#allocation11 + $0x23]] }
 0x12b   : > { %509 = vrot.lane.b32.xlu0 %v506_v48, %s7861_s30  ;;  %490 = vrot.lane.b32.xlu1 %v487_v50, %s7861_s30  ;;  %v652_v48 = vrot.slane %v646_v40, 2  ;;  %v687_v50 = vstv %s4569_s23  ;;  %v635_v54 = vsel %vm567_vm7, %v632_v33, %v634_v45  ;;  %v675_v1 = vsel %vm567_vm7, %v673_v60, %v674_v55  ;;  %s4576_s23 = sld [smem:[#allocation11 + $0x1b]] }
 0x12c   : > { %v689_v53 = vmul.f32 %v687_v50, %v5447_v58  ;;  %v688_v59 = vmul.f32 %v687_v50, %v5439_v52  ;;  %v690_v4 = vmul.f32 %v687_v50, %v5454_v0  ;;  %v677_v10 = vsel %vm567_vm7, %v674_v55, %v676_v3 }
 0x12d   : > { %v654_v51 = vsel %vm567_vm7, %v652_v48, %v653_v42  ;;  %v738_v20 = vrot.slane %v732_v12, 3  ;;  %v737_v24 = vrot.slane %v731_v15, 3  ;;  %v740_v31 = vrot.slane %v733_v22, 3 }
 0x12e   : > { %v694_v5 = vrot.slane %v688_v59, 2  ;;  %v697_v11 = vrot.slane %v690_v4, 2  ;;  %v795_v40 = vmul.f32 %v793_v37, %v5447_v58  ;;  %v794_v43 = vmul.f32 %v793_v37, %v5439_v52 }
 0x12f   : > { %530 = vrot.lane.b32.xlu0 %v527_v61, %s7853_s10  ;;  %511 = vrot.lane.b32.xlu1 %v508_v62, %s7861_s30  ;;  %v708_v61 = vstv %s4570_s19  ;;  %v695_v62 = vrot.slane %v689_v53, 2  ;;  %v739_v28 = vsel %vm715_vm8, %v737_v24, %v738_v20  ;;  %v741_v38 = vsel %vm715_vm8, %v738_v20, %v740_v31  ;;  %s4581_s19 = sld [smem:[#allocation11 + $0x20]] }
 0x130   : > { %v710_v63 = vmul.f32 %v708_v61, %v5447_v58  ;;  %v709_v6 = vmul.f32 %v708_v61, %v5439_v52  ;;  %v801_v48 = vrot.slane %v795_v40, 3  ;;  %v796_v50 = vmul.f32 %v793_v37, %v5454_v0 }
 0x131   : > { %v698_v19 = vsel %vm567_vm7, %v695_v62, %v697_v11  ;;  %v800_v53 = vrot.slane %v794_v43, 3  ;;  %v988_v31 = vstv %s4584_s11  ;;  %s4590_s11 = sld [smem:[#allocation11 + $0x29]] }
 0x132   : > { %v716_v14 = vrot.slane %v709_v6, 3  ;;  %v803_v60 = vrot.slane %v796_v50, 3  ;;  %v989_v37 = vmul.f32 %v988_v31, %v5439_v52 }
 0x133   : > { %551 = vrot.lane.b32.xlu0 %v548_v7, %s7853_s10  ;;  %532 = vrot.lane.b32.xlu1 %v529_v8, %s7853_s10  ;;  %v696_v7 = vsel %vm567_vm7, %v694_v5, %v695_v62  ;;  %v717_v8 = vrot.slane %v710_v63, 3  ;;  %v802_v57 = vsel %vm715_vm8, %v800_v53, %v801_v48 }
 0x134   : > { %v804_v4 = vsel %vm715_vm8, %v801_v48, %v803_v60  ;;  %v5634_v48 = vpop.permute.xlu1 %325 }
 0x135   : > { %v718_v17 = vsel %vm715_vm8, %v716_v14, %v717_v8  ;;  %v925_v3 = vstv %s4581_s19  ;;  %s4587_s19 = sld [smem:[#allocation11 + $0x26]] }
 0x136   : > { %v927_v6 = vmul.f32 %v925_v3, %v5447_v58  ;;  %v926_v9 = vmul.f32 %v925_v3, %v5439_v52 }
 0x137   : > { %573 = vrot.lane.b32.xlu0 %v570_v13, %s7859_s20  ;;  %553 = vrot.lane.b32.xlu1 %v550_v16, %s7853_s10  ;;  %v711_v13 = vmul.f32 %v708_v61, %v5454_v0  ;;  %v751_v16 = vstv %s4572_s7  ;;  %s4582_s7 = sld [smem:[#allocation11 + $0x21]] }
 0x138   : > { %v753_v18 = vmul.f32 %v751_v16, %v5447_v58  ;;  %v754_v32 = vmul.f32 %v751_v16, %v5454_v0  ;;  %v933_v14 = vrot.slane %v927_v6, 4 }
 0x139   : > { %v719_v21 = vrot.slane %v711_v13, 3 }
 0x13a   : > { %v759_v26 = vrot.slane %v753_v18, 3  ;;  %v761_v39 = vrot.slane %v754_v32, 3  ;;  %v932_v18 = vrot.slane %v926_v9, 4 }
 0x13b   : > { %594 = vrot.lane.b32.xlu0 %v591_v23, %s7859_s20  ;;  %575 = vrot.lane.b32.xlu1 %v572_v25, %s7859_s20  ;;  %v752_v23 = vmul.f32 %v751_v16, %v5439_v52  ;;  %v772_v25 = vstv %s4573_s8  ;;  %v720_v29 = vsel %vm715_vm8, %v717_v8, %v719_v21  ;;  %s4583_s8 = sld [smem:[#allocation11 + $0x22]]  ;;  %v928_v16 = vmul.f32 %v925_v3, %v5454_v0  ;;  %v5649_v3 = vpop.permute.xlu1 %327 }
 0x13c   : > { %v774_v27 = vmul.f32 %v772_v25, %v5447_v58  ;;  %v773_v34 = vmul.f32 %v772_v25, %v5439_v52  ;;  %v762_v47 = vsel %vm715_vm8, %v759_v26, %v761_v39  ;;  %v934_v22 = vsel %vm863_vm9, %v932_v18, %v933_v14 }
 0x13d   : > { %v758_v33 = vrot.slane %v752_v23, 3  ;;  %v935_v24 = vrot.slane %v928_v16, 4 }
 0x13e   : > { %v779_v42 = vrot.slane %v773_v34, 3  ;;  %v990_v34 = vmul.f32 %v988_v31, %v5447_v58 }
 0x13f   : > { %615 = vrot.lane.b32.xlu0 %v612_v35, %s7857_s4  ;;  %596 = vrot.lane.b32.xlu1 %v593_v36, %s7859_s20  ;;  %v760_v35 = vsel %vm715_vm8, %v758_v33, %v759_v26  ;;  %v780_v36 = vrot.slane %v774_v27, 3  ;;  %v936_v32 = vsel %vm863_vm9, %v933_v14, %v935_v24 }
 0x141   : > { %v781_v45 = vsel %vm715_vm8, %v779_v42, %v780_v36  ;;  %v996_v42 = vrot.slane %v990_v34, 5 }
 0x143   : > { %636 = vrot.lane.b32.xlu0 %v633_v41, %s7857_s4  ;;  %617 = vrot.lane.b32.xlu1 %v614_v44, %s7857_s4  ;;  %v775_v41 = vmul.f32 %v772_v25, %v5454_v0  ;;  %v814_v44 = vstv %s4575_s28  ;;  %s4585_s28 = sld [smem:[#allocation11 + $0x24]] }
 0x144   : > { %v816_v46 = vmul.f32 %v814_v44, %v5447_v58  ;;  %v817_v61 = vmul.f32 %v814_v44, %v5454_v0 }
 0x145   : > { %v782_v49 = vrot.slane %v775_v41, 3 }
 0x146   : > { %v822_v55 = vrot.slane %v816_v46, 3  ;;  %v824_v5 = vrot.slane %v817_v61, 3 }
 0x147   : > { %657 = vrot.lane.b32.xlu0 %v654_v51, %s7857_s4  ;;  %638 = vrot.lane.b32.xlu1 %v635_v54, %s7857_s4  ;;  %v815_v51 = vmul.f32 %v814_v44, %v5439_v52  ;;  %v835_v54 = vstv %s4576_s23  ;;  %v783_v59 = vsel %vm715_vm8, %v780_v36, %v782_v49  ;;  %s4586_s23 = sld [smem:[#allocation11 + $0x25]]  ;;  %v991_v44 = vmul.f32 %v988_v31, %v5454_v0 }
 0x148   : > { %v837_v56 = vmul.f32 %v835_v54, %v5447_v58  ;;  %v836_v63 = vmul.f32 %v835_v54, %v5439_v52  ;;  %v825_v13 = vsel %vm715_vm8, %v822_v55, %v824_v5 }
 0x149   : > { %v821_v62 = vrot.slane %v815_v51, 3 }
 0x14a   : > { %v842_v8 = vrot.slane %v836_v63, 3 }
 0x14b   : > { %678 = vrot.lane.b32.xlu0 %v675_v1, %s7857_s4  ;;  %659 = vrot.lane.b32.xlu1 %v656_v2, %s7857_s4  ;;  %v823_v1 = vsel %vm715_vm8, %v821_v62, %v822_v55  ;;  %v843_v2 = vrot.slane %v837_v56, 3 }
 0x14d   : > { %v844_v11 = vsel %vm715_vm8, %v842_v8, %v843_v2 }
 0x14f   : > { %699 = vrot.lane.b32.xlu0 %v696_v7, %s7851_s9  ;;  %680 = vrot.lane.b32.xlu1 %v677_v10, %s7857_s4  ;;  %v838_v7 = vmul.f32 %v835_v54, %v5454_v0  ;;  %v946_v10 = vstv %s4582_s7  ;;  %s4588_s7 = sld [smem:[#allocation11 + $0x27]]  ;;  %v998_v54 = vrot.slane %v991_v44, 5 }
 0x150   : > { %v948_v12 = vmul.f32 %v946_v10, %v5447_v58  ;;  %v949_v25 = vmul.f32 %v946_v10, %v5454_v0 }
 0x151   : > { %v845_v15 = vrot.slane %v838_v7, 3  ;;  %v999_v63 = vsel %vm314_vm5, %v996_v42, %v998_v54 }
 0x152   : > { %v954_v20 = vrot.slane %v948_v12, 4  ;;  %v956_v33 = vrot.slane %v949_v25, 4 }
 0x153   : > { %721 = vrot.lane.b32.xlu0 %v718_v17, %s7849_s17  ;;  %701 = vrot.lane.b32.xlu1 %v698_v19, %s7851_s9  ;;  %v947_v17 = vmul.f32 %v946_v10, %v5439_v52  ;;  %v967_v19 = vstv %s4583_s8  ;;  %v846_v23 = vsel %vm715_vm8, %v843_v2, %v845_v15  ;;  %s4589_s8 = sld [smem:[#allocation11 + $0x28]] }
 0x154   : > { %v969_v21 = vmul.f32 %v967_v19, %v5447_v58  ;;  %v968_v27 = vmul.f32 %v967_v19, %v5439_v52  ;;  %v957_v41 = vsel %vm863_vm9, %v954_v20, %v956_v33 }
 0x155   : > { %v953_v26 = vrot.slane %v947_v17, 4  ;;  %v1072_v9 = vstv %s4588_s7  ;;  %s4594_s7 = sld [smem:[#allocation11 + $0x2d]] }
 0x156   : > { %v974_v36 = vrot.slane %v968_v27, 4  ;;  %v1074_v12 = vmul.f32 %v1072_v9, %v5447_v58  ;;  %v1073_v15 = vmul.f32 %v1072_v9, %v5439_v52  ;;  %v1075_v24 = vmul.f32 %v1072_v9, %v5454_v0 }
 0x157   : > { %742 = vrot.lane.b32.xlu0 %v739_v28, %s7849_s17  ;;  %723 = vrot.lane.b32.xlu1 %v720_v29, %s7849_s17  ;;  %v955_v28 = vsel %vm863_vm9, %v953_v26, %v954_v20  ;;  %v975_v29 = vrot.slane %v969_v21, 4  ;;  %v1114_v27 = vstv %s4590_s11  ;;  %s4596_s11 = sld [smem:[#allocation11 + $0x2f]] }
 0x158   : > { %v1079_v26 = vrot.slane %v1073_v15, 5 }
 0x159   : > { %v976_v39 = vsel %vm863_vm9, %v974_v36, %v975_v29  ;;  %v1093_v16 = vstv %s4589_s8  ;;  %s4595_s8 = sld [smem:[#allocation11 + $0x2e]] }
 0x15a   : > { %v1095_v20 = vmul.f32 %v1093_v16, %v5447_v58  ;;  %v1094_v25 = vmul.f32 %v1093_v16, %v5439_v52  ;;  %v1096_v36 = vmul.f32 %v1093_v16, %v5454_v0 }
 0x15b   : > { %763 = vrot.lane.b32.xlu0 %v760_v35, %s7849_s17  ;;  %744 = vrot.lane.b32.xlu1 %v741_v38, %s7849_s17  ;;  %v970_v35 = vmul.f32 %v967_v19, %v5454_v0  ;;  %v1009_v38 = vstv %s4585_s28  ;;  %s4591_s28 = sld [smem:[#allocation11 + $0x2a]] }
 0x15c   : > { %v1011_v40 = vmul.f32 %v1009_v38, %v5447_v58  ;;  %v1010_v46 = vmul.f32 %v1009_v38, %v5439_v52  ;;  %v1012_v55 = vmul.f32 %v1009_v38, %v5454_v0  ;;  %v1101_v31 = vrot.slane %v1095_v20, 5 }
 0x15d   : > { %v977_v43 = vrot.slane %v970_v35, 4  ;;  %v1082_v35 = vrot.slane %v1075_v24, 5  ;;  %v1115_v38 = vmul.f32 %v1114_v27, %v5439_v52  ;;  %v1199_v20 = vstv %s4594_s7  ;;  %s5792_s7 = sld [smem:[#allocation11 + $0x33]] }
 0x15e   : > { %v1017_v49 = vrot.slane %v1011_v40, 5 }
 0x15f   : > { %784 = vrot.lane.b32.xlu0 %v781_v45, %s7847_s22  ;;  %765 = vrot.lane.b32.xlu1 %v762_v47, %s7849_s17  ;;  %v995_v45 = vrot.slane %v989_v37, 5  ;;  %v1030_v47 = vstv %s4586_s23  ;;  %v978_v53 = vsel %vm863_vm9, %v975_v29, %v977_v43  ;;  %s4592_s23 = sld [smem:[#allocation11 + $0x2b]]  ;;  %v1100_v37 = vrot.slane %v1094_v25, 5 }
 0x160   : > { %v1032_v50 = vmul.f32 %v1030_v47, %v5447_v58  ;;  %v1031_v56 = vmul.f32 %v1030_v47, %v5439_v52  ;;  %v1033_v2 = vmul.f32 %v1030_v47, %v5454_v0  ;;  %v1117_v47 = vmul.f32 %v1114_v27, %v5454_v0 }
 0x161   : > { %v997_v51 = vsel %vm314_vm5, %v995_v45, %v996_v42  ;;  %v1135_v43 = vstv %s4591_s28  ;;  %v1103_v45 = vrot.slane %v1096_v36, 5  ;;  %s4597_s28 = sld [smem:[#allocation11 + $0x30]] }
 0x162   : > { %v1038_v60 = vrot.slane %v1032_v50, 5  ;;  %v1136_v50 = vmul.f32 %v1135_v43, %v5439_v52 }
 0x163   : > { %805 = vrot.lane.b32.xlu0 %v802_v57, %s7847_s22  ;;  %786 = vrot.lane.b32.xlu1 %v783_v59, %s7847_s22  ;;  %v1016_v57 = vrot.slane %v1010_v46, 5  ;;  %v1051_v59 = vstv %s4587_s19  ;;  %s4593_s19 = sld [smem:[#allocation11 + $0x2c]]  ;;  %v1137_v46 = vmul.f32 %v1135_v43, %v5447_v58 }
 0x164   : > { %v1053_v61 = vmul.f32 %v1051_v59, %v5447_v58  ;;  %v1052_v5 = vmul.f32 %v1051_v59, %v5439_v52 }
 0x165   : > { %v1018_v62 = vsel %vm314_vm5, %v1016_v57, %v1017_v49  ;;  %v1104_v57 = vsel %vm314_vm5, %v1101_v31, %v1103_v45 }
 0x166   : > { %v1059_v8 = vrot.slane %v1053_v61, 5  ;;  %v1058_v14 = vrot.slane %v1052_v5, 5  ;;  %v1138_v61 = vmul.f32 %v1135_v43, %v5454_v0  ;;  %v1241_v43 = vstv %s4596_s11  ;;  %s5817_s11 = sld [smem:[#allocation11 + $0x35]] }
 0x167   : > { %826 = vrot.lane.b32.xlu0 %v823_v1, %s7847_s22  ;;  %807 = vrot.lane.b32.xlu1 %v804_v4, %s7847_s22  ;;  %v1019_v1 = vrot.slane %v1012_v55, 5  ;;  %v1037_v4 = vrot.slane %v1031_v56, 5 }
 0x168   : > { %v1060_v19 = vsel %vm314_vm5, %v1058_v14, %v1059_v8 }
 0x169   : > { %v1039_v7 = vsel %vm314_vm5, %v1037_v4, %v1038_v60  ;;  %v1020_v10 = vsel %vm314_vm5, %v1017_v49, %v1019_v1  ;;  %v1121_v49 = vrot.slane %v1115_v38, 5  ;;  %v1178_v1 = vstv %s4593_s19  ;;  %s5777_s19 = sld [smem:[#allocation11 + $0x32]] }
 0x16a   : > { %v1181_v24 = vmul.f32 %v1178_v1, %v5454_v0  ;;  %v1202_v38 = vmul.f32 %v1199_v20, %v5454_v0 }
 0x16b   : > { %847 = vrot.lane.b32.xlu0 %v844_v11, %s7847_s22  ;;  %828 = vrot.lane.b32.xlu1 %v825_v13, %s7847_s22  ;;  %v1040_v11 = vrot.slane %v1033_v2, 5  ;;  %v1054_v13 = vmul.f32 %v1051_v59, %v5454_v0  ;;  %v1144_v59 = vrot.slane %v1137_v46, 6 }
 0x16d   : > { %v1041_v21 = vsel %vm314_vm5, %v1038_v60, %v1040_v11  ;;  %v1124_v60 = vrot.slane %v1117_v47, 5 }
 0x16f   : > { %937 = vrot.lane.b32.xlu0 %v934_v22, %s7855_s27  ;;  %849 = vrot.lane.b32.xlu1 %v846_v23, %s7847_s22  ;;  %v1080_v22 = vrot.slane %v1074_v12, 5  ;;  %v1061_v23 = vrot.slane %v1054_v13, 5  ;;  %v1179_v13 = vmul.f32 %v1178_v1, %v5439_v52 }
 0x171   : > { %v1081_v33 = vsel %vm314_vm5, %v1079_v26, %v1080_v22  ;;  %v1062_v34 = vsel %vm314_vm5, %v1059_v8, %v1061_v23  ;;  %v1083_v44 = vsel %vm314_vm5, %v1080_v22, %v1082_v35  ;;  %v1201_v23 = vmul.f32 %v1199_v20, %v5447_v58 }
 0x172   : > { %v1185_v25 = vrot.slane %v1179_v13, 6  ;;  %v1200_v26 = vmul.f32 %v1199_v20, %v5439_v52 }
 0x173   : > { %958 = vrot.lane.b32.xlu0 %v955_v28, %s7855_s27  ;;  %939 = vrot.lane.b32.xlu1 %v936_v32, %s7855_s27  ;;  %v1116_v32 = vmul.f32 %v1114_v27, %v5447_v58  ;;  %v1220_v27 = vstv %s4595_s8  ;;  %v1207_v36 = vrot.slane %v1201_v23, 6  ;;  %s5806_s8 = sld [smem:[#allocation11 + $0x34]] }
 0x175   : > { %v1122_v42 = vrot.slane %v1116_v32, 5 }
 0x177   : > { %979 = vrot.lane.b32.xlu0 %v976_v39, %s7855_s27  ;;  %960 = vrot.lane.b32.xlu1 %v957_v41, %s7855_s27  ;;  %v1102_v41 = vsel %vm314_vm5, %v1100_v37, %v1101_v31  ;;  %v1123_v55 = vsel %vm314_vm5, %v1121_v49, %v1122_v42  ;;  %v1125_v9 = vsel %vm314_vm5, %v1122_v42, %v1124_v60  ;;  %v1188_v37 = vrot.slane %v1181_v24, 6 }
 0x178   : > { %v1206_v42 = vrot.slane %v1200_v26, 6  ;;  %v1243_v49 = vmul.f32 %v1241_v43, %v5447_v58 }
 0x17b   : > { %1000 = vrot.lane.b32.xlu0 %v997_v51, %s7863_s5  ;;  %981 = vrot.lane.b32.xlu1 %v978_v53, %s7855_s27  ;;  %v1157_v51 = vstv %s4592_s23  ;;  %s5762_s23 = sld [smem:[#allocation11 + $0x31]] }
 0x17c   : > { %v1159_v56 = vmul.f32 %v1157_v51, %v5447_v58  ;;  %v1160_v11 = vmul.f32 %v1157_v51, %v5454_v0 }
 0x17e   : > { %v1165_v5 = vrot.slane %v1159_v56, 6  ;;  %v1167_v22 = vrot.slane %v1160_v11, 6  ;;  %v1223_v56 = vmul.f32 %v1220_v27, %v5454_v0 }
 0x17f   : > { %1021 = vrot.lane.b32.xlu0 %v1018_v62, %s7861_s30  ;;  %1002 = vrot.lane.b32.xlu1 %v999_v63, %s7863_s5  ;;  %v1158_v62 = vmul.f32 %v1157_v51, %v5439_v52  ;;  %v1143_v63 = vrot.slane %v1136_v50, 6  ;;  %v1208_v50 = vsel %vm1142_vm10, %v1206_v42, %v1207_v36 }
 0x180   : > { %v1168_v35 = vsel %vm1142_vm10, %v1165_v5, %v1167_v22 }
 0x181   : > { %v5652_v6 = vpop.permute.xlu0 %375  ;;  %v1145_v8 = vsel %vm1142_vm10, %v1143_v63, %v1144_v59  ;;  %v1164_v12 = vrot.slane %v1158_v62, 6 }
 0x182   : > { %7905 = vst [vmem:[#allocation23_spill] sm:$0xff] %v5652_v6 }
 0x183   : > { %1042 = vrot.lane.b32.xlu0 %v1039_v7, %s7861_s30  ;;  %1023 = vrot.lane.b32.xlu1 %v1020_v10, %s7861_s30  ;;  %v1180_v7 = vmul.f32 %v1178_v1, %v5447_v58  ;;  %v1146_v10 = vrot.slane %v1138_v61, 6  ;;  %v1166_v16 = vsel %vm1142_vm10, %v1164_v12, %v1165_v5  ;;  %v332_v61 = vsel %vm306_vm3, 0.0, %v5649_v3 }
 0x184   : > { %v1249_v5 = vrot.slane %v1243_v49, 6  ;;  %v5768_v13 = vsel %vm309_vm4, %v332_v61, 0.0  ;;  %v1297_v49 = vstv %s5777_s19  ;;  %s5839_s19 = sld [smem:[#allocation11 + $0x37]] }
 0x185   : > { %v5661_v17 = vpop.permute.xlu0 %389  ;;  %v5663_v18 = vpop.permute.xlu1 %377 }
 0x186   : > { %7906 = vst [vmem:[#allocation24_spill] sm:$0xff] %v5663_v18 }
 0x187   : > { %1063 = vrot.lane.b32.xlu0 %v1060_v19, %s7861_s30  ;;  %1044 = vrot.lane.b32.xlu1 %v1041_v21, %s7861_s30  ;;  %v1186_v19 = vrot.slane %v1180_v7, 6  ;;  %v1147_v21 = vsel %vm1142_vm10, %v1144_v59, %v1146_v10  ;;  %v1262_v59 = vstv %s4597_s28  ;;  %v1244_v10 = vmul.f32 %v1241_v43, %v5454_v0  ;;  %s5828_s28 = sld [smem:[#allocation11 + $0x36]] }
 0x188   : > { %v1263_v11 = vmul.f32 %v1262_v59, %v5439_v52  ;;  %v1265_v20 = vmul.f32 %v1262_v59, %v5454_v0 }
 0x189   : > { %v5672_v28 = vpop.permute.xlu0 %403  ;;  %v5674_v29 = vpop.permute.xlu1 %391  ;;  %v1189_v51 = vsel %vm1142_vm10, %v1186_v19, %v1188_v37  ;;  %v1251_v24 = vrot.slane %v1244_v10, 6  ;;  %v1339_v10 = vstv %s5817_s11  ;;  %s4612_s11 = sld [smem:[#allocation11 + $0x3f]] }
 0x18a   : > { %7907 = vst [vmem:[#allocation25_spill] sm:$0xff] %v5672_v28  ;;  %v1272_v37 = vrot.slane %v1265_v20, 6 }
 0x18b   : > { %1084 = vrot.lane.b32.xlu0 %v1081_v33, %s7861_s30  ;;  %1065 = vrot.lane.b32.xlu1 %v1062_v34, %s7861_s30  ;;  %v1187_v33 = vsel %vm1142_vm10, %v1185_v25, %v1186_v19  ;;  %v1222_v34 = vmul.f32 %v1220_v27, %v5447_v58  ;;  %v1269_v25 = vrot.slane %v1263_v11, 6 }
 0x18d   : > { %v5683_v39 = vpop.permute.xlu0 %425  ;;  %v5685_v40 = vpop.permute.xlu1 %405  ;;  %v1228_v47 = vrot.slane %v1222_v34, 6  ;;  %v1353_v20 = vstv %s5828_s28  ;;  %s4613_s28 = sld [smem:[#allocation11 + $0x40]] }
 0x18e   : > { %7908 = vst [vmem:[#allocation26_spill] sm:$0xff] %v5685_v40 }
 0x18f   : > { %1105 = vrot.lane.b32.xlu0 %v1102_v41, %s7853_s10  ;;  %1086 = vrot.lane.b32.xlu1 %v1083_v44, %s7861_s30  ;;  %v1221_v41 = vmul.f32 %v1220_v27, %v5439_v52  ;;  %v331_v44 = vsel %vm306_vm3, 0.0, %v5634_v48  ;;  %v1242_v48 = vmul.f32 %v1241_v43, %v5439_v52  ;;  %v338_v27 = vrot.slane %v5768_v13, 5 }
 0x190   : > { %v333_v60 = vsel %vm309_vm4, %v331_v44, 0.0 }
 0x191   : > { %v5694_v53 = vpop.permute.xlu0 %446  ;;  %v5696_v54 = vpop.permute.xlu1 %427  ;;  %v1248_v3 = vrot.slane %v1242_v48, 6  ;;  %v337_v12 = vrot.slane %v333_v60, 5 }
 0x192   : > { %7909 = vst [vmem:[#allocation27_spill] sm:$0xff] %v5694_v53 }
 0x193   : > { %1126 = vrot.lane.b32.xlu0 %v1123_v55, %s7853_s10  ;;  %1107 = vrot.lane.b32.xlu1 %v1104_v57, %s7853_s10  ;;  %v1209_v55 = vrot.slane %v1202_v38, 6  ;;  %v1227_v57 = vrot.slane %v1221_v41, 6  ;;  %v5782_v26 = vsel %vm314_vm5, 0.0, %v337_v12  ;;  %v1283_v38 = vstv %s5762_s23  ;;  %s4609_s23 = sld [smem:[#allocation11 + $0x3c]] }
 0x194   : > { %7916 = vst [vmem:[#allocation34_spill] sm:$0xff] %v5782_v26  ;;  %v1284_v43 = vmul.f32 %v1283_v38, %v5782_v26  ;;  %v5802_v44 = vsel %vm314_vm5, %v337_v12, %v338_v27  ;;  %v1340_v12 = vmul.f32 %v1339_v10, %v5782_v26 }
 0x195   : > { %v5705_v2 = vpop.permute.xlu0 %467  ;;  %v5707_v4 = vpop.permute.xlu1 %448  ;;  %v1229_v1 = vsel %vm1142_vm10, %v1227_v57, %v1228_v47  ;;  %v1210_v7 = vsel %vm1142_vm10, %v1207_v36, %v1209_v55  ;;  %v1252_v36 = vsel %vm1142_vm10, %v1249_v5, %v1251_v24  ;;  %7919 = vst [vmem:[#allocation37_spill] sm:$0xff] %v5802_v44  ;;  %v1298_v55 = vmul.f32 %v1297_v49, %v5782_v26 }
 0x196   : > { %7910 = vst [vmem:[#allocation28_spill] sm:$0xff] %v5707_v4  ;;  %v1311_v57 = vstv %s5792_s7  ;;  %v1299_v61 = vmul.f32 %v1297_v49, %v5802_v44  ;;  %s4610_s7 = sld [smem:[#allocation11 + $0x3d]]  ;;  %v1354_v24 = vmul.f32 %v1353_v20, %v5782_v26 }
 0x197   : > { %1148 = vrot.lane.b32.xlu0 %v1145_v8, %s7859_s20  ;;  %1128 = vrot.lane.b32.xlu1 %v1125_v9, %s7853_s10  ;;  %v1230_v8 = vrot.slane %v1223_v56, 6  ;;  %v1264_v9 = vmul.f32 %v1262_v59, %v5447_v58  ;;  %v1285_v56 = vmul.f32 %v1283_v38, %v5802_v44  ;;  %v1312_v60 = vmul.f32 %v1311_v57, %v5782_v26 }
 0x199   : > { %v5716_v14 = vpop.permute.xlu0 %488  ;;  %v5718_v15 = vpop.permute.xlu1 %469  ;;  %v1231_v22 = vsel %vm1142_vm10, %v1228_v47, %v1230_v8  ;;  %v1270_v23 = vrot.slane %v1264_v9, 6  ;;  %v1313_v9 = vmul.f32 %v1311_v57, %v5802_v44 }
 0x19a   : > { %7911 = vst [vmem:[#allocation29_spill] sm:$0xff] %v5716_v14 }
 0x19b   : > { %1169 = vrot.lane.b32.xlu0 %v1166_v16, %s7859_s20  ;;  %1150 = vrot.lane.b32.xlu1 %v1147_v21, %s7859_s20  ;;  %v1250_v21 = vsel %vm1142_vm10, %v1248_v3, %v1249_v5  ;;  %v1273_v47 = vsel %vm1142_vm10, %v1270_v23, %v1272_v37 }
 0x19d   : > { %v5727_v31 = vpop.permute.xlu0 %509  ;;  %v5729_v32 = vpop.permute.xlu1 %490 }
 0x19e   : > { %7912 = vst [vmem:[#allocation30_spill] sm:$0xff] %v5729_v32 }
 0x19f   : > { %1190 = vrot.lane.b32.xlu0 %v1187_v33, %s7857_s4  ;;  %1171 = vrot.lane.b32.xlu1 %v1168_v35, %s7859_s20  ;;  %v1271_v35 = vsel %vm1142_vm10, %v1269_v25, %v1270_v23  ;;  %v1341_v25 = vmul.f32 %v1339_v10, %v5802_v44 }
 0x1a1   : > { %v5740_v45 = vpop.permute.xlu0 %530  ;;  %v5742_v46 = vpop.permute.xlu1 %511 }
 0x1a2   : > { %7913 = vst [vmem:[#allocation31_spill] sm:$0xff] %v5740_v45 }
 0x1a3   : > { %1211 = vrot.lane.b32.xlu0 %v1208_v50, %s7857_s4  ;;  %1192 = vrot.lane.b32.xlu1 %v1189_v51, %s7857_s4 }
 0x1a5   : > { %v5754_v62 = vpop.permute.xlu0 %551  ;;  %v5756_v63 = vpop.permute.xlu1 %532 }
 0x1a6   : > { %7914 = vst [vmem:[#allocation32_spill] sm:$0xff] %v5756_v63 }
 0x1a7   : > { %1232 = vrot.lane.b32.xlu0 %v1229_v1, %s7857_s4  ;;  %1213 = vrot.lane.b32.xlu1 %v1210_v7, %s7857_s4  ;;  %v1325_v1 = vstv %s5806_s8  ;;  %s4611_s8 = sld [smem:[#allocation11 + $0x3e]] }
 0x1a8   : > { %v1326_v8 = vmul.f32 %v1325_v1, %v5782_v26  ;;  %v1327_v13 = vmul.f32 %v1325_v1, %v5802_v44 }
 0x1a9   : > { %v5770_v16 = vpop.permute.xlu0 %573  ;;  %v5772_v19 = vpop.permute.xlu1 %553 }
 0x1aa   : > { %7915 = vst [vmem:[#allocation33_spill] sm:$0xff] %v5770_v16 }
 0x1ab   : > { %1253 = vrot.lane.b32.xlu0 %v1250_v21, %s7857_s4  ;;  %1234 = vrot.lane.b32.xlu1 %v1231_v22, %s7857_s4  ;;  %v1449_v21 = vstv %s4609_s23  ;;  %s4614_s23 = sld [smem:[#allocation11 + $0x41]] }
 0x1ac   : > { %v1450_v37 = vmul.f32 %v1449_v21, %v5782_v26  ;;  %v1451_v38 = vmul.f32 %v1449_v21, %v5802_v44 }
 0x1ad   : > { %v5785_v33 = vpop.permute.xlu0 %594  ;;  %v5787_v34 = vpop.permute.xlu1 %575  ;;  %v1491_v57 = vstv %s4611_s8  ;;  %s4617_s8 = sld [smem:[#allocation11 + $0x44]] }
 0x1ae   : > { %7917 = vst [vmem:[#allocation35_spill] sm:$0xff] %v5787_v34 }
 0x1af   : > { %1274 = vrot.lane.b32.xlu0 %v1271_v35, %s7851_s9  ;;  %1255 = vrot.lane.b32.xlu1 %v1252_v36, %s7857_s4  ;;  %v5859_v35 = vsel %vm314_vm5, %v338_v27, 0.0  ;;  %v1367_v36 = vstv %s5839_s19  ;;  %s4615_s19 = sld [smem:[#allocation11 + $0x42]] }
 0x1b0   : > { %7925 = vst [vmem:[#allocation43_spill] sm:$0xff] %v5859_v35  ;;  %v1452_v27 = vmul.f32 %v1449_v21, %v5859_v35  ;;  %v1493_v21 = vmul.f32 %v1491_v57, %v5802_v44 }
 0x1b1   : > { %v5796_v41 = vpop.permute.xlu0 %615  ;;  %v5798_v42 = vpop.permute.xlu1 %596 }
 0x1b2   : > { %7918 = vst [vmem:[#allocation36_spill] sm:$0xff] %v5796_v41 }
 0x1b3   : > { %1276 = vrot.lane.b32.xlu1 %v1273_v47, %s7851_s9  ;;  %1288 = vrot.lane.b32.xlu0 %v1284_v43, %s7849_s17  ;;  %v1470_v43 = vstv %s4610_s7  ;;  %s4616_s7 = sld [smem:[#allocation11 + $0x43]] }
 0x1b4   : > { %v1471_v1 = vmul.f32 %v1470_v43, %v5782_v26 }
 0x1b5   : > { %v5810_v50 = vpop.permute.xlu0 %636  ;;  %v5812_v51 = vpop.permute.xlu1 %617  ;;  %v1575_v45 = vstv %s4615_s19  ;;  %s4621_s19 = sld [smem:[#allocation11 + $0x48]] }
 0x1b6   : > { %7920 = vst [vmem:[#allocation38_spill] sm:$0xff] %v5812_v51  ;;  %v1499_v51 = vrot.slane %v1493_v21, 1  ;;  %v1578_v53 = vmul.f32 %v1575_v45, %v5859_v35 }
 0x1b7   : > { %1302 = vrot.lane.b32.xlu0 %v1298_v55, %s7849_s17  ;;  %1290 = vrot.lane.b32.xlu1 %v1285_v56, %s7849_s17  ;;  %v1368_v55 = vmul.f32 %v1367_v36, %v5782_v26  ;;  %v1355_v56 = vmul.f32 %v1353_v20, %v5802_v44  ;;  %v1492_v20 = vmul.f32 %v1491_v57, %v5782_v26 }
 0x1b9   : > { %v5821_v48 = vpop.permute.xlu0 %657  ;;  %v5823_v59 = vpop.permute.xlu1 %638  ;;  %v1596_v4 = vstv %s4616_s7  ;;  %s4622_s7 = sld [smem:[#allocation11 + $0x49]] }
 0x1ba   : > { %7921 = vst [vmem:[#allocation39_spill] sm:$0xff] %v5821_v48 }
 0x1bb   : > { %1316 = vrot.lane.b32.xlu0 %v1312_v60, %s7849_s17  ;;  %1304 = vrot.lane.b32.xlu1 %v1299_v61, %s7849_s17  ;;  %v1456_v60 = vrot.slane %v1450_v37, 1  ;;  %v1457_v61 = vrot.slane %v1451_v38, 1  ;;  %v1477_v37 = vrot.slane %v1471_v1, 1 }
 0x1bd   : > { %v5832_v5 = vpop.permute.xlu0 %678  ;;  %v5834_v7 = vpop.permute.xlu1 %659 }
 0x1be   : > { %7922 = vst [vmem:[#allocation40_spill] sm:$0xff] %v5834_v7 }
 0x1bf   : > { %1330 = vrot.lane.b32.xlu0 %v1326_v8, %s7847_s22  ;;  %1318 = vrot.lane.b32.xlu1 %v1313_v9, %s7849_s17  ;;  %v1472_v8 = vmul.f32 %v1470_v43, %v5802_v44  ;;  %v1369_v9 = vmul.f32 %v1367_v36, %v5802_v44 }
 0x1c1   : > { %v5843_v3 = vpop.permute.xlu0 %699  ;;  %v5845_v11 = vpop.permute.xlu1 %680  ;;  %v1478_v38 = vrot.slane %v1472_v8, 1  ;;  %v1494_v8 = vmul.f32 %v1491_v57, %v5859_v35 }
 0x1c2   : > { %7923 = vst [vmem:[#allocation41_spill] sm:$0xff] %v5843_v3  ;;  %v1498_v3 = vrot.slane %v1492_v20, 1 }
 0x1c3   : > { %1344 = vrot.lane.b32.xlu0 %v1340_v12, %s7847_s22  ;;  %1332 = vrot.lane.b32.xlu1 %v1327_v13, %s7847_s22  ;;  %v1459_v13 = vrot.slane %v1452_v27, 1  ;;  %v1501_v41 = vrot.slane %v1494_v8, 1 }
 0x1c5   : > { %v5852_v22 = vpop.permute.xlu0 %721  ;;  %v5854_v23 = vpop.permute.xlu1 %701 }
 0x1c6   : > { %7924 = vst [vmem:[#allocation42_spill] sm:$0xff] %v5854_v23  ;;  %v1460_v23 = vsel %vm419_vm6, %v1457_v61, %v1459_v13 }
 0x1c7   : > { %1358 = vrot.lane.b32.xlu0 %v1354_v24, %s7847_s22  ;;  %1346 = vrot.lane.b32.xlu1 %v1341_v25, %s7847_s22  ;;  %v1512_v24 = vstv %s4612_s11  ;;  %v1458_v25 = vsel %vm419_vm6, %v1456_v60, %v1457_v61  ;;  %s4618_s11 = sld [smem:[#allocation11 + $0x45]] }
 0x1c8   : > { %v1513_v36 = vmul.f32 %v1512_v24, %v5782_v26  ;;  %v1514_v60 = vmul.f32 %v1512_v24, %v5802_v44 }
 0x1c9   : > { %v5866_v47 = vpop.permute.xlu0 %742  ;;  %v5868_v49 = vpop.permute.xlu1 %723 }
 0x1ca   : > { %7926 = vst [vmem:[#allocation44_spill] sm:$0xff] %v5866_v47  ;;  %v1519_v13 = vrot.slane %v1513_v36, 2  ;;  %v1520_v20 = vrot.slane %v1514_v60, 2 }
 0x1cb   : > { %1372 = vrot.lane.b32.xlu0 %v1368_v55, %s7847_s22  ;;  %1360 = vrot.lane.b32.xlu1 %v1355_v56, %s7847_s22  ;;  %v1473_v55 = vmul.f32 %v1470_v43, %v5859_v35  ;;  %v1479_v43 = vsel %vm419_vm6, %v1477_v37, %v1478_v38 }
 0x1cc   : > { %v1521_v60 = vsel %vm567_vm7, %v1519_v13, %v1520_v20 }
 0x1cd   : > { %v5878_v10 = vpop.permute.xlu0 %763  ;;  %v5880_v12 = vpop.permute.xlu1 %744  ;;  %v1480_v1 = vrot.slane %v1473_v55, 1  ;;  %v1500_v55 = vsel %vm419_vm6, %v1498_v3, %v1499_v51  ;;  %v1502_v3 = vsel %vm419_vm6, %v1499_v51, %v1501_v41  ;;  %v1577_v51 = vmul.f32 %v1575_v45, %v5802_v44 }
 0x1ce   : > { %7927 = vst [vmem:[#allocation45_spill] sm:$0xff] %v5880_v12  ;;  %v1701_v12 = vstv %s4621_s19  ;;  %s4627_s19 = sld [smem:[#allocation11 + $0x4e]] }
 0x1cf   : > { %1461 = vrot.lane.b32.xlu0 %v1458_v25, %s7855_s27  ;;  %1374 = vrot.lane.b32.xlu1 %v1369_v9, %s7847_s22  ;;  %v1533_v9 = vstv %s4613_s28  ;;  %v1515_v25 = vmul.f32 %v1512_v24, %v5859_v35  ;;  %v1481_v57 = vsel %vm419_vm6, %v1478_v38, %v1480_v1  ;;  %s4619_s28 = sld [smem:[#allocation11 + $0x46]] }
 0x1d0   : > { %v1534_v21 = vmul.f32 %v1533_v9, %v5782_v26  ;;  %v1535_v37 = vmul.f32 %v1533_v9, %v5802_v44  ;;  %v1536_v8 = vmul.f32 %v1533_v9, %v5859_v35 }
 0x1d1   : > { %v5889_v56 = vpop.permute.xlu0 %784  ;;  %v5891_v27 = vpop.permute.xlu1 %765  ;;  %v1522_v24 = vrot.slane %v1515_v25, 2  ;;  %v1576_v25 = vmul.f32 %v1575_v45, %v5782_v26  ;;  %v1617_v45 = vstv %s4617_s8  ;;  %s4623_s8 = sld [smem:[#allocation11 + $0x4a]] }
 0x1d2   : > { %7928 = vst [vmem:[#allocation46_spill] sm:$0xff] %v5889_v56  ;;  %v1541_v63 = vrot.slane %v1535_v37, 2 }
 0x1d3   : > { %1482 = vrot.lane.b32.xlu0 %v1479_v43, %s7855_s27  ;;  %1463 = vrot.lane.b32.xlu1 %v1460_v23, %s7855_s27  ;;  %v1554_v23 = vstv %s4614_s23  ;;  %v1523_v41 = vsel %vm567_vm7, %v1520_v20, %v1522_v24  ;;  %v1583_v20 = vrot.slane %v1577_v51, 2  ;;  %s4620_s23 = sld [smem:[#allocation11 + $0x47]] }
 0x1d4   : > { %v1555_v38 = vmul.f32 %v1554_v23, %v5782_v26  ;;  %v1556_v1 = vmul.f32 %v1554_v23, %v5802_v44  ;;  %v1557_v37 = vmul.f32 %v1554_v23, %v5859_v35  ;;  %v1597_v23 = vmul.f32 %v1596_v4, %v5782_v26 }
 0x1d5   : > { %v5900_v56 = vpop.permute.xlu0 %805  ;;  %v5902_v61 = vpop.permute.xlu1 %786  ;;  %v1659_v30 = vstv %s4619_s28  ;;  %s4625_s28 = sld [smem:[#allocation11 + $0x4c]] }
 0x1d6   : > { %7929 = vst [vmem:[#allocation47_spill] sm:$0xff] %v5902_v61  ;;  %v1540_v61 = vrot.slane %v1534_v21, 2  ;;  %v1561_v9 = vrot.slane %v1555_v38, 2  ;;  %v1564_v24 = vrot.slane %v1557_v37, 2  ;;  %v1598_v38 = vmul.f32 %v1596_v4, %v5802_v44 }
 0x1d7   : > { %1503 = vrot.lane.b32.xlu0 %v1500_v55, %s7855_s27  ;;  %1484 = vrot.lane.b32.xlu1 %v1481_v57, %s7855_s27  ;;  %v1562_v57 = vrot.slane %v1556_v1, 2 }
 0x1d8   : > { %v1542_v21 = vsel %vm567_vm7, %v1540_v61, %v1541_v63  ;;  %v1604_v6 = vrot.slane %v1598_v38, 2 }
 0x1d9   : > { %v5910_v43 = vpop.permute.xlu0 %826  ;;  %v5912_v36 = vpop.permute.xlu1 %807  ;;  %v1563_v1 = vsel %vm567_vm7, %v1561_v9, %v1562_v57  ;;  %v1565_v37 = vsel %vm567_vm7, %v1562_v57, %v1564_v24  ;;  %v1618_v9 = vmul.f32 %v1617_v45, %v5782_v26 }
 0x1da   : > { %7930 = vst [vmem:[#allocation48_spill] sm:$0xff] %v5910_v43  ;;  %v1704_v43 = vmul.f32 %v1701_v12, %v5859_v35 }
 0x1db   : > { %1524 = vrot.lane.b32.xlu0 %v1521_v60, %s7863_s5  ;;  %1505 = vrot.lane.b32.xlu1 %v1502_v3, %s7855_s27  ;;  %v1543_v60 = vrot.slane %v1536_v8, 2  ;;  %v1582_v3 = vrot.slane %v1576_v25, 2  ;;  %v1585_v25 = vrot.slane %v1578_v53, 2  ;;  %v1624_v38 = vrot.slane %v1618_v9, 2 }
 0x1dd   : > { %v5922_v55 = vpop.permute.xlu0 %847  ;;  %v5924_v13 = vpop.permute.xlu1 %828  ;;  %v1544_v8 = vsel %vm567_vm7, %v1541_v63, %v1543_v60  ;;  %v1584_v51 = vsel %vm567_vm7, %v1582_v3, %v1583_v20  ;;  %v1619_v63 = vmul.f32 %v1617_v45, %v5802_v44  ;;  %v1599_v60 = vmul.f32 %v1596_v4, %v5859_v35 }
 0x1de   : > { %7931 = vst [vmem:[#allocation49_spill] sm:$0xff] %v5924_v13  ;;  %v1586_v53 = vsel %vm567_vm7, %v1583_v20, %v1585_v25  ;;  %v1620_v4 = vmul.f32 %v1617_v45, %v5859_v35  ;;  %v1660_v45 = vmul.f32 %v1659_v30, %v5782_v26 }
 0x1df   : > { %1545 = vrot.lane.b32.xlu0 %v1542_v21, %s7861_s30  ;;  %1526 = vrot.lane.b32.xlu1 %v1523_v41, %s7863_s5 }
 0x1e0   : > { %v1627_v13 = vrot.slane %v1620_v4, 2 }
 0x1e1   : > { %v5933_v18 = vpop.permute.xlu0 %937  ;;  %v5935_v61 = vpop.permute.xlu1 %849 }
 0x1e2   : > { %7932 = vst [vmem:[#allocation50_spill] sm:$0xff] %v5933_v18  ;;  %v1603_v18 = vrot.slane %v1597_v23, 2 }
 0x1e3   : > { %1566 = vrot.lane.b32.xlu0 %v1563_v1, %s7861_s30  ;;  %1547 = vrot.lane.b32.xlu1 %v1544_v8, %s7861_s30  ;;  %v1638_v1 = vstv %s4618_s11  ;;  %s4624_s11 = sld [smem:[#allocation11 + $0x4b]] }
 0x1e4   : > { %v1605_v57 = vsel %vm567_vm7, %v1603_v18, %v1604_v6  ;;  %v1639_v24 = vmul.f32 %v1638_v1, %v5782_v26  ;;  %v1640_v23 = vmul.f32 %v1638_v1, %v5802_v44  ;;  %v1641_v20 = vmul.f32 %v1638_v1, %v5859_v35 }
 0x1e5   : > { %v5943_v21 = vpop.permute.xlu0 %958  ;;  %v5945_v41 = vpop.permute.xlu1 %939  ;;  %v1680_v1 = vstv %s4620_s23  ;;  %s4626_s23 = sld [smem:[#allocation11 + $0x4d]] }
 0x1e6   : > { %7933 = vst [vmem:[#allocation51_spill] sm:$0xff] %v5945_v41  ;;  %v1625_v41 = vrot.slane %v1619_v63, 2 }
 0x1e7   : > { %1587 = vrot.lane.b32.xlu0 %v1584_v51, %s7861_s30  ;;  %1568 = vrot.lane.b32.xlu1 %v1565_v37, %s7861_s30  ;;  %v1606_v51 = vrot.slane %v1599_v60, 2  ;;  %v1645_v37 = vrot.slane %v1639_v24, 2  ;;  %v1661_v60 = vmul.f32 %v1659_v30, %v5802_v44 }
 0x1e8   : > { %v1626_v9 = vsel %vm567_vm7, %v1624_v38, %v1625_v41  ;;  %v1628_v4 = vsel %vm567_vm7, %v1625_v41, %v1627_v13  ;;  %v1666_v38 = vrot.slane %v1660_v45, 3  ;;  %v1702_v41 = vmul.f32 %v1701_v12, %v5782_v26 }
 0x1e9   : > { %v5955_v8 = vpop.permute.xlu0 %979  ;;  %v5957_v3 = vpop.permute.xlu1 %960  ;;  %v1607_v63 = vsel %vm567_vm7, %v1604_v6, %v1606_v51  ;;  %v1662_v6 = vmul.f32 %v1659_v30, %v5859_v35  ;;  %v1667_v51 = vrot.slane %v1661_v60, 3  ;;  %v1703_v45 = vmul.f32 %v1701_v12, %v5802_v44 }
 0x1ea   : > { %7934 = vst [vmem:[#allocation52_spill] sm:$0xff] %v5955_v8  ;;  %v1646_v8 = vrot.slane %v1640_v23, 2 }
 0x1eb   : > { %1608 = vrot.lane.b32.xlu0 %v1605_v57, %s7861_s30  ;;  %1589 = vrot.lane.b32.xlu1 %v1586_v53, %s7861_s30  ;;  %v1648_v53 = vrot.slane %v1641_v20, 2  ;;  %v1683_v20 = vmul.f32 %v1680_v1, %v5859_v35  ;;  %v1669_v30 = vrot.slane %v1662_v6, 3  ;;  %v1668_v60 = vsel %vm715_vm8, %v1666_v38, %v1667_v51 }
 0x1ec   : > { %v1647_v23 = vsel %vm567_vm7, %v1645_v37, %v1646_v8  ;;  %v1806_v48 = vstv %s4626_s23  ;;  %s4632_s23 = sld [smem:[#allocation11 + $0x53]] }
 0x1ed   : > { %v5966_v25 = vpop.permute.xlu0 %1000  ;;  %v5968_v18 = vpop.permute.xlu1 %981  ;;  %v1649_v13 = vsel %vm567_vm7, %v1646_v8, %v1648_v53  ;;  %v1708_v8 = vrot.slane %v1702_v41, 3  ;;  %v1709_v53 = vrot.slane %v1703_v45, 3 }
 0x1ee   : > { %7935 = vst [vmem:[#allocation53_spill] sm:$0xff] %v5968_v18  ;;  %v1681_v18 = vmul.f32 %v1680_v1, %v5782_v26 }
 0x1ef   : > { %1629 = vrot.lane.b32.xlu0 %v1626_v9, %s7853_s10  ;;  %1610 = vrot.lane.b32.xlu1 %v1607_v63, %s7861_s30  ;;  %v1682_v9 = vmul.f32 %v1680_v1, %v5802_v44  ;;  %v1690_v1 = vrot.slane %v1683_v20, 3  ;;  %v1743_v20 = vstv %s4623_s8  ;;  %v1710_v12 = vsel %vm715_vm8, %v1708_v8, %v1709_v53  ;;  %s4629_s8 = sld [smem:[#allocation11 + $0x50]] }
 0x1f1   : > { %v5976_v57 = vpop.permute.xlu0 %1021  ;;  %v5978_v24 = vpop.permute.xlu1 %1002 }
 0x1f2   : > { %7936 = vst [vmem:[#allocation54_spill] sm:$0xff] %v5976_v57  ;;  %v1688_v57 = vrot.slane %v1682_v9, 3 }
 0x1f3   : > { %1650 = vrot.lane.b32.xlu0 %v1647_v23, %s7853_s10  ;;  %1631 = vrot.lane.b32.xlu1 %v1628_v4, %s7853_s10  ;;  %v1687_v23 = vrot.slane %v1681_v18, 3  ;;  %v1722_v4 = vstv %s4622_s7  ;;  %v1670_v18 = vsel %vm715_vm8, %v1667_v51, %v1669_v30  ;;  %v1744_v30 = vmul.f32 %v1743_v20, %v5782_v26  ;;  %s4628_s7 = sld [smem:[#allocation11 + $0x4f]] }
 0x1f4   : > { %v1723_v6 = vmul.f32 %v1722_v4, %v5782_v26  ;;  %v1724_v9 = vmul.f32 %v1722_v4, %v5802_v44 }
 0x1f5   : > { %v5988_v63 = vpop.permute.xlu0 %1042  ;;  %v5990_v37 = vpop.permute.xlu1 %1023  ;;  %v1689_v38 = vsel %vm715_vm8, %v1687_v23, %v1688_v57  ;;  %v1711_v23 = vrot.slane %v1704_v43, 3  ;;  %v1750_v34 = vrot.slane %v1744_v30, 3 }
 0x1f6   : > { %7937 = vst [vmem:[#allocation55_spill] sm:$0xff] %v5990_v37  ;;  %v1730_v51 = vrot.slane %v1724_v9, 3  ;;  %v1746_v9 = vmul.f32 %v1743_v20, %v5859_v35 }
 0x1f7   : > { %1671 = vrot.lane.b32.xlu0 %v1668_v60, %s7859_s20  ;;  %1652 = vrot.lane.b32.xlu1 %v1649_v13, %s7853_s10  ;;  %v1691_v13 = vsel %vm715_vm8, %v1688_v57, %v1690_v1  ;;  %v1729_v60 = vrot.slane %v1723_v6, 3  ;;  %v1712_v43 = vsel %vm715_vm8, %v1709_v53, %v1711_v23 }
 0x1f8   : > { %v1753_v23 = vrot.slane %v1746_v9, 3 }
 0x1f9   : > { %v5998_v7 = vpop.permute.xlu0 %1063  ;;  %v6000_v37 = vpop.permute.xlu1 %1044 }
 0x1fa   : > { %7938 = vst [vmem:[#allocation56_spill] sm:$0xff] %v5998_v7  ;;  %v1764_v7 = vstv %s4624_s11  ;;  %s4630_s11 = sld [smem:[#allocation11 + $0x51]] }
 0x1fb   : > { %1692 = vrot.lane.b32.xlu0 %v1689_v38, %s7859_s20  ;;  %1673 = vrot.lane.b32.xlu1 %v1670_v18, %s7859_s20  ;;  %v1745_v38 = vmul.f32 %v1743_v20, %v5802_v44  ;;  %v1725_v18 = vmul.f32 %v1722_v4, %v5859_v35  ;;  %v1765_v57 = vmul.f32 %v1764_v7, %v5782_v26 }
 0x1fc   : > { %v1766_v6 = vmul.f32 %v1764_v7, %v5802_v44  ;;  %v1767_v20 = vmul.f32 %v1764_v7, %v5859_v35 }
 0x1fd   : > { %v6010_v41 = vpop.permute.xlu0 %1084  ;;  %v6012_v45 = vpop.permute.xlu1 %1065  ;;  %v1751_v4 = vrot.slane %v1745_v38, 3  ;;  %v1732_v47 = vrot.slane %v1725_v18, 3  ;;  %v1807_v18 = vmul.f32 %v1806_v48, %v5782_v26 }
 0x1fe   : > { %7939 = vst [vmem:[#allocation57_spill] sm:$0xff] %v6012_v45  ;;  %v1731_v45 = vsel %vm715_vm8, %v1729_v60, %v1730_v51  ;;  %v1772_v53 = vrot.slane %v1766_v6, 3 }
 0x1ff   : > { %1713 = vrot.lane.b32.xlu0 %v1710_v12, %s7857_s4  ;;  %1694 = vrot.lane.b32.xlu1 %v1691_v13, %s7859_s20  ;;  %v1785_v13 = vstv %s4625_s28  ;;  %v1771_v12 = vrot.slane %v1765_v57, 3  ;;  %v1752_v60 = vsel %vm715_vm8, %v1750_v34, %v1751_v4  ;;  %v1733_v30 = vsel %vm715_vm8, %v1730_v51, %v1732_v47  ;;  %s4631_s28 = sld [smem:[#allocation11 + $0x52]] }
 0x200   : > { %v1786_v38 = vmul.f32 %v1785_v13, %v5782_v26  ;;  %v1808_v57 = vmul.f32 %v1806_v48, %v5802_v44  ;;  %v1754_v47 = vsel %vm715_vm8, %v1751_v4, %v1753_v23  ;;  %v1774_v51 = vrot.slane %v1767_v20, 3 }
 0x201   : > { %v6021_v1 = vpop.permute.xlu0 %1105  ;;  %v6023_v8 = vpop.permute.xlu1 %1086  ;;  %v1773_v34 = vsel %vm715_vm8, %v1771_v12, %v1772_v53  ;;  %v1890_v14 = vstv %s4630_s11  ;;  %s4640_s11 = sld [smem:[#allocation11 + $0x5b]] }
 0x202   : > { %7940 = vst [vmem:[#allocation58_spill] sm:$0xff] %v6021_v1  ;;  %7941 = vst [vmem:[#allocation59_spill] sm:$0xff] %v6023_v8  ;;  %v1792_v6 = vrot.slane %v1786_v38, 3  ;;  %v1814_v40 = vrot.slane %v1808_v57, 4  ;;  %v1775_v20 = vsel %vm715_vm8, %v1772_v53, %v1774_v51  ;;  %v1809_v38 = vmul.f32 %v1806_v48, %v5859_v35 }
 0x203   : > { %1734 = vrot.lane.b32.xlu0 %v1731_v45, %s7857_s4  ;;  %1715 = vrot.lane.b32.xlu1 %v1712_v43, %s7857_s4  ;;  %v1787_v45 = vmul.f32 %v1785_v13, %v5802_v44  ;;  %v1869_v53 = vstv %s4629_s8  ;;  %s4639_s8 = sld [smem:[#allocation11 + $0x5a]] }
 0x204   : > { %v1816_v48 = vrot.slane %v1809_v38, 4 }
 0x205   : > { %v6031_v1 = vpop.permute.xlu0 %1126  ;;  %v6033_v32 = vpop.permute.xlu1 %1107  ;;  %v1793_v9 = vrot.slane %v1787_v45, 3  ;;  %v1848_v45 = vstv %s4628_s7  ;;  %s4638_s7 = sld [smem:[#allocation11 + $0x59]] }
 0x206   : > { %7942 = vst [vmem:[#allocation60_spill] sm:$0xff] %v6033_v32  ;;  %v1813_v32 = vrot.slane %v1807_v18, 4  ;;  %v1817_v38 = vsel %vm863_vm9, %v1814_v40, %v1816_v48 }
 0x207   : > { %1755 = vrot.lane.b32.xlu0 %v1752_v60, %s7857_s4  ;;  %1736 = vrot.lane.b32.xlu1 %v1733_v30, %s7857_s4  ;;  %v1788_v60 = vmul.f32 %v1785_v13, %v5859_v35  ;;  %v1827_v30 = vstv %s4627_s19  ;;  %v1794_v23 = vsel %vm715_vm8, %v1792_v6, %v1793_v9  ;;  %s4637_s19 = sld [smem:[#allocation11 + $0x58]] }
 0x208   : > { %v1828_v12 = vmul.f32 %v1827_v30, %v5782_v26  ;;  %v1829_v4 = vmul.f32 %v1827_v30, %v5802_v44  ;;  %v1815_v18 = vsel %vm863_vm9, %v1813_v32, %v1814_v40  ;;  %v1830_v6 = vmul.f32 %v1827_v30, %v5859_v35 }
 0x209   : > { %v6044_v43 = vpop.permute.xlu0 %1148  ;;  %v6046_v7 = vpop.permute.xlu1 %1128  ;;  %v1795_v13 = vrot.slane %v1788_v60, 3  ;;  %v1849_v60 = vmul.f32 %v1848_v45, %v5782_v26  ;;  %v1870_v32 = vmul.f32 %v1869_v53, %v5782_v26  ;;  %v1872_v40 = vmul.f32 %v1869_v53, %v5859_v35 }
 0x20a   : > { %7943 = vst [vmem:[#allocation61_spill] sm:$0xff] %v6044_v43 }
 0x20b   : > { %1776 = vrot.lane.b32.xlu0 %v1773_v34, %s7857_s4  ;;  %1757 = vrot.lane.b32.xlu1 %v1754_v47, %s7857_s4  ;;  %v1834_v47 = vrot.slane %v1828_v12, 4  ;;  %v1796_v51 = vsel %vm715_vm8, %v1793_v9, %v1795_v13  ;;  %v1871_v12 = vmul.f32 %v1869_v53, %v5802_v44  ;;  %v1851_v13 = vmul.f32 %v1848_v45, %v5859_v35 }
 0x20c   : > { %v2042_v8 = vstv %s4638_s7  ;;  %s4644_s7 = sld [smem:[#allocation11 + $0x5f]] }
 0x20d   : > { %v6053_v43 = vpop.permute.xlu0 %1169  ;;  %v6055_v16 = vpop.permute.xlu1 %1150  ;;  %v1877_v28 = vrot.slane %v1871_v12, 4 }
 0x20e   : > { %7944 = vst [vmem:[#allocation62_spill] sm:$0xff] %v6053_v43  ;;  %7945 = vst [vmem:[#allocation63_spill] sm:$0xff] %v6055_v16  ;;  %v1835_v16 = vrot.slane %v1829_v4, 4 }
 0x20f   : > { %1797 = vrot.lane.b32.xlu0 %v1794_v23, %s7851_s9  ;;  %1778 = vrot.lane.b32.xlu1 %v1775_v20, %s7857_s4  ;;  %v1850_v23 = vmul.f32 %v1848_v45, %v5802_v44  ;;  %v1837_v20 = vrot.slane %v1830_v6, 4  ;;  %v1891_v6 = vmul.f32 %v1890_v14, %v5782_v26  ;;  %v1892_v45 = vmul.f32 %v1890_v14, %v5802_v44 }
 0x210   : > { %v1836_v9 = vsel %vm863_vm9, %v1834_v47, %v1835_v16  ;;  %v1858_v47 = vrot.slane %v1851_v13, 4 }
 0x211   : > { %v6065_v57 = vpop.permute.xlu0 %1190  ;;  %v6067_v34 = vpop.permute.xlu1 %1171  ;;  %v1898_v53 = vrot.slane %v1892_v45, 4 }
 0x212   : > { %7946 = vst [vmem:[#allocation64_spill] sm:$0xff] %v6065_v57  ;;  %7947 = vst [vmem:[#allocation65_spill] sm:$0xff] %v6067_v34  ;;  %v1855_v57 = vrot.slane %v1849_v60, 4  ;;  %v1838_v60 = vsel %vm863_vm9, %v1835_v16, %v1837_v20  ;;  %v1893_v20 = vmul.f32 %v1890_v14, %v5859_v35 }
 0x213   : > { %1818 = vrot.lane.b32.xlu0 %v1815_v18, %s7849_s17  ;;  %1799 = vrot.lane.b32.xlu1 %v1796_v51, %s7851_s9  ;;  %v1856_v18 = vrot.slane %v1850_v23, 4  ;;  %v1876_v51 = vrot.slane %v1870_v32, 4  ;;  %v1911_v23 = vstv %s4631_s28  ;;  %s4641_s28 = sld [smem:[#allocation11 + $0x5c]]  ;;  %s6492_s9 = sld [smem:[#allocation11 + $0x6d]] }
 0x214   : > { %v1912_v16 = vmul.f32 %v1911_v23, %v5782_v26 }
 0x215   : > { %v6077_v4 = vpop.permute.xlu0 %1211  ;;  %v6079_v30 = vpop.permute.xlu1 %1192  ;;  %v1857_v48 = vsel %vm863_vm9, %v1855_v57, %v1856_v18  ;;  %v1878_v32 = vsel %vm863_vm9, %v1876_v51, %v1877_v28  ;;  %v1859_v13 = vsel %vm863_vm9, %v1856_v18, %v1858_v47  ;;  %v1913_v57 = vmul.f32 %v1911_v23, %v5802_v44 }
 0x216   : > { %7948 = vst [vmem:[#allocation66_spill] sm:$0xff] %v6079_v30  ;;  %v1914_v51 = vmul.f32 %v1911_v23, %v5859_v35  ;;  %v1918_v14 = vrot.slane %v1912_v16, 4  ;;  %v2021_v23 = vstv %s4637_s19  ;;  %s4643_s19 = sld [smem:[#allocation11 + $0x5e]] }
 0x217   : > { %1839 = vrot.lane.b32.xlu0 %v1836_v9, %s7849_s17  ;;  %1820 = vrot.lane.b32.xlu1 %v1817_v38, %s7849_s17  ;;  %v1897_v38 = vrot.slane %v1891_v6, 4  ;;  %v2022_v16 = vmul.f32 %v2021_v23, %v5782_v26 }
 0x219   : > { %v6086_v34 = vpop.permute.xlu0 %1232  ;;  %v6088_v30 = vpop.permute.xlu1 %1213  ;;  %v1899_v47 = vsel %vm863_vm9, %v1897_v38, %v1898_v53 }
 0x21a   : > { %7949 = vst [vmem:[#allocation67_spill] sm:$0xff] %v6086_v34  ;;  %v1879_v34 = vrot.slane %v1872_v40, 4 }
 0x21b   : > { %1860 = vrot.lane.b32.xlu0 %v1857_v48, %s7849_s17  ;;  %1841 = vrot.lane.b32.xlu1 %v1838_v60, %s7849_s17  ;;  %v1932_v48 = vstv %s4632_s23  ;;  %s4642_s23 = sld [smem:[#allocation11 + $0x5d]] }
 0x21c   : > { %v1933_v6 = vmul.f32 %v1932_v48, %v5782_v26  ;;  %v1934_v45 = vmul.f32 %v1932_v48, %v5802_v44  ;;  %v1880_v40 = vsel %vm863_vm9, %v1877_v28, %v1879_v34  ;;  %v1935_v43 = vmul.f32 %v1932_v48, %v5859_v35 }
 0x21d   : > { %v6098_v12 = vpop.permute.xlu0 %1253  ;;  %v6100_v9 = vpop.permute.xlu1 %1234 }
 0x21e   : > { %7950 = vst [vmem:[#allocation68_spill] sm:$0xff] %v6098_v12  ;;  %7951 = vst [vmem:[#allocation69_spill] sm:$0xff] %v6100_v9  ;;  %v1919_v9 = vrot.slane %v1913_v57, 4  ;;  %v1900_v12 = vrot.slane %v1893_v20, 4  ;;  %v1939_v38 = vrot.slane %v1933_v6, 4  ;;  %v2023_v57 = vmul.f32 %v2021_v23, %v5802_v44 }
 0x21f   : > { %1881 = vrot.lane.b32.xlu0 %v1878_v32, %s7847_s22  ;;  %1862 = vrot.lane.b32.xlu1 %v1859_v13, %s7849_s17  ;;  %v1921_v32 = vrot.slane %v1914_v51, 4  ;;  %v2043_v20 = vmul.f32 %v2042_v8, %v5782_v26  ;;  %s6484_s17 = sld [smem:[#allocation11 + $0x6b]] }
 0x220   : > { %v1920_v28 = vsel %vm863_vm9, %v1918_v14, %v1919_v9  ;;  %v1901_v34 = vsel %vm863_vm9, %v1898_v53, %v1900_v12  ;;  %v1942_v12 = vrot.slane %v1935_v43, 4  ;;  %v2044_v53 = vmul.f32 %v2042_v8, %v5802_v44 }
 0x221   : > { %v6109_v60 = vpop.permute.xlu0 %1274  ;;  %v6111_v18 = vpop.permute.xlu1 %1255  ;;  %v1922_v6 = vsel %vm863_vm9, %v1919_v9, %v1921_v32  ;;  %v2024_v14 = vmul.f32 %v2021_v23, %v5859_v35  ;;  %v2045_v32 = vmul.f32 %v2042_v8, %v5859_v35 }
 0x222   : > { %7952 = vst [vmem:[#allocation70_spill] sm:$0xff] %v6109_v60  ;;  %7953 = vst [vmem:[#allocation71_spill] sm:$0xff] %v6111_v18  ;;  %v1940_v18 = vrot.slane %v1934_v45, 4  ;;  %v2028_v45 = vrot.slane %v2022_v16, 5 }
 0x223   : > { %1902 = vrot.lane.b32.xlu0 %v1899_v47, %s7847_s22  ;;  %1883 = vrot.lane.b32.xlu1 %v1880_v40, %s7847_s22  ;;  %v2029_v40 = vrot.slane %v2023_v57, 5  ;;  %v2031_v57 = vrot.slane %v2024_v14, 5 }
 0x224   : > { %v1941_v48 = vsel %vm863_vm9, %v1939_v38, %v1940_v18  ;;  %v2050_v38 = vrot.slane %v2044_v53, 5  ;;  %v1943_v16 = vsel %vm863_vm9, %v1940_v18, %v1942_v12 }
 0x225   : > { %v6119_v13 = vpop.permute.xlu0 %1288  ;;  %v6121_v60 = vpop.permute.xlu1 %1276  ;;  %v2030_v23 = vsel %vm314_vm5, %v2028_v45, %v2029_v40  ;;  %v2052_v45 = vrot.slane %v2045_v32, 5  ;;  %v2032_v18 = vsel %vm314_vm5, %v2029_v40, %v2031_v57 }
 0x226   : > { %7954 = vst [vmem:[#allocation72_spill] sm:$0xff] %v6121_v60 }
 0x227   : > { %1923 = vrot.lane.b32.xlu0 %v1920_v28, %s7847_s22  ;;  %1904 = vrot.lane.b32.xlu1 %v1901_v34, %s7847_s22  ;;  %v2063_v28 = vstv %s4639_s8  ;;  %v2049_v34 = vrot.slane %v2043_v20, 5  ;;  %v2084_v20 = vstv %s4640_s11  ;;  %s4645_s8 = sld [smem:[#allocation11 + $0x60]]  ;;  %s4646_s11 = sld [smem:[#allocation11 + $0x61]] }
 0x228   : > { %v2064_v43 = vmul.f32 %v2063_v28, %v5782_v26  ;;  %v2065_v9 = vmul.f32 %v2063_v28, %v5802_v44  ;;  %v2085_v12 = vmul.f32 %v2084_v20, %v5782_v26  ;;  %v2086_v14 = vmul.f32 %v2084_v20, %v5802_v44 }
 0x229   : > { %v6131_v51 = vpop.permute.xlu0 %1302  ;;  %v6133_v47 = vpop.permute.xlu1 %1290 }
 0x22a   : > { %7955 = vst [vmem:[#allocation73_spill] sm:$0xff] %v6131_v51  ;;  %7956 = vst [vmem:[#allocation74_spill] sm:$0xff] %v6133_v47  ;;  %v2070_v8 = vrot.slane %v2064_v43, 5  ;;  %v2053_v43 = vsel %vm314_vm5, %v2050_v38, %v2052_v45  ;;  %v2091_v32 = vrot.slane %v2085_v12, 6  ;;  %v2092_v57 = vrot.slane %v2086_v14, 6 }
 0x22b   : > { %1944 = vrot.lane.b32.xlu0 %v1941_v48, %s7847_s22  ;;  %1925 = vrot.lane.b32.xlu1 %v1922_v6, %s7847_s22  ;;  %v2066_v48 = vmul.f32 %v2063_v28, %v5859_v35 }
 0x22d   : > { %v6141_v60 = vpop.permute.xlu0 %1316  ;;  %v6143_v51 = vpop.permute.xlu1 %1304  ;;  %v2073_v28 = vrot.slane %v2066_v48, 5 }
 0x22e   : > { %7957 = vst [vmem:[#allocation75_spill] sm:$0xff] %v6141_v60  ;;  %7958 = vst [vmem:[#allocation76_spill] sm:$0xff] %v6143_v51  ;;  %v2051_v51 = vsel %vm314_vm5, %v2049_v34, %v2050_v38  ;;  %v2071_v60 = vrot.slane %v2065_v9, 5 }
 0x22f   : > { %2033 = vrot.lane.b32.xlu0 %v2030_v23, %s7855_s27  ;;  %1946 = vrot.lane.b32.xlu1 %v1943_v16, %s7847_s22  ;;  %v2105_v23 = vstv %s4641_s28  ;;  %s4550_s28 = sld [smem:[#allocation11 + $0x1]]  ;;  %s6482_s22 = sld [smem:[#allocation11 + $0x6a]] }
 0x230   : > { %v2072_v34 = vsel %vm314_vm5, %v2070_v8, %v2071_v60  ;;  %v2106_v40 = vmul.f32 %v2105_v23, %v5782_v26  ;;  %v2107_v9 = vmul.f32 %v2105_v23, %v5802_v44  ;;  %v2108_v48 = vmul.f32 %v2105_v23, %v5859_v35 }
 0x231   : > { %v6153_v6 = vpop.permute.xlu0 %1330  ;;  %v6155_v53 = vpop.permute.xlu1 %1318  ;;  %v2074_v14 = vsel %vm314_vm5, %v2071_v60, %v2073_v28  ;;  %v2147_v23 = vstv %s4643_s19  ;;  %s4578_s19 = sld [smem:[#allocation11 + $0x1d]] }
 0x232   : > { %7959 = vst [vmem:[#allocation77_spill] sm:$0xff] %v6153_v6  ;;  %7960 = vst [vmem:[#allocation78_spill] sm:$0xff] %v6155_v53  ;;  %v2126_v53 = vstv %s4642_s23  ;;  %v2112_v38 = vrot.slane %v2106_v40, 6  ;;  %v2113_v45 = vrot.slane %v2107_v9, 6  ;;  %v2149_v60 = vmul.f32 %v2147_v23, %v5802_v44  ;;  %s4552_s23 = sld [smem:[#allocation11 + $0x3]] }
 0x233   : > { %2054 = vrot.lane.b32.xlu0 %v2051_v51, %s7855_s27  ;;  %2035 = vrot.lane.b32.xlu1 %v2032_v18, %s7855_s27  ;;  %v2087_v51 = vmul.f32 %v2084_v20, %v5859_v35  ;;  %v2128_v12 = vmul.f32 %v2126_v53, %v5802_v44  ;;  %v2093_v20 = vsel %vm1142_vm10, %v2091_v32, %v2092_v57 }
 0x234   : > { %v2114_v40 = vsel %vm1142_vm10, %v2112_v38, %v2113_v45  ;;  %v2148_v32 = vmul.f32 %v2147_v23, %v5782_v26  ;;  %v2129_v28 = vmul.f32 %v2126_v53, %v5859_v35 }
 0x235   : > { %v6163_v16 = vpop.permute.xlu0 %1344  ;;  %v6165_v6 = vpop.permute.xlu1 %1332 }
 0x236   : > { %7961 = vst [vmem:[#allocation79_spill] sm:$0xff] %v6163_v16  ;;  %7962 = vst [vmem:[#allocation80_spill] sm:$0xff] %v6165_v6  ;;  %v2127_v6 = vmul.f32 %v2126_v53, %v5782_v26  ;;  %v2115_v16 = vrot.slane %v2108_v48, 6  ;;  %v2154_v38 = vrot.slane %v2148_v32, 6 }
 0x237   : > { %2075 = vrot.lane.b32.xlu0 %v2072_v34, %s7855_s27  ;;  %2056 = vrot.lane.b32.xlu1 %v2053_v43, %s7855_s27  ;;  %v2094_v34 = vrot.slane %v2087_v51, 6 }
 0x238   : > { %v2133_v9 = vrot.slane %v2127_v6, 6  ;;  %v2116_v48 = vsel %vm1142_vm10, %v2113_v45, %v2115_v16 }
 0x239   : > { %v6175_v18 = vpop.permute.xlu0 %1358  ;;  %v6177_v8 = vpop.permute.xlu1 %1346  ;;  %v2095_v47 = vsel %vm1142_vm10, %v2092_v57, %v2094_v34  ;;  %v2168_v57 = vstv %s4644_s7  ;;  %v2150_v34 = vmul.f32 %v2147_v23, %v5859_v35  ;;  %s4580_s7 = sld [smem:[#allocation11 + $0x1f]] }
 0x23a   : > { %7963 = vst [vmem:[#allocation81_spill] sm:$0xff] %v6175_v18  ;;  %7964 = vst [vmem:[#allocation82_spill] sm:$0xff] %v6177_v8  ;;  %v2134_v8 = vrot.slane %v2128_v12, 6  ;;  %v2155_v12 = vrot.slane %v2149_v60, 6  ;;  %v2169_v16 = vmul.f32 %v2168_v57, %v5782_v26  ;;  %v2189_v60 = vstv %s4645_s8  ;;  %s4606_s8 = sld [smem:[#allocation11 + $0x39]] }
 0x23b   : > { %2096 = vrot.lane.b32.xlu0 %v2093_v20, %s7863_s5  ;;  %2077 = vrot.lane.b32.xlu1 %v2074_v14, %s7855_s27  ;;  %v2136_v14 = vrot.slane %v2129_v28, 6  ;;  %v2157_v23 = vrot.slane %v2150_v34, 6  ;;  %v3272_v28 = vld [vmem:[#allocation4] sm:$0xf]  ;;  %v2210_v34 = vstv %s4646_s11  ;;  %s4608_s11 = sld [smem:[#allocation11 + $0x3b]] }
 0x23c   : > { %v2135_v6 = vsel %vm1142_vm10, %v2133_v9, %v2134_v8  ;;  %v2171_v9 = vmul.f32 %v2168_v57, %v5859_v35  ;;  %v2156_v45 = vsel %vm1142_vm10, %v2154_v38, %v2155_v12  ;;  %v2192_v38 = vmul.f32 %v2189_v60, %v5859_v35 }
 0x23d   : > { %v6185_v43 = vpop.permute.xlu0 %1372  ;;  %v6187_v18 = vpop.permute.xlu1 %1360  ;;  %v2137_v32 = vsel %vm1142_vm10, %v2134_v8, %v2136_v14  ;;  %v2158_v8 = vsel %vm1142_vm10, %v2155_v12, %v2157_v23  ;;  %v2190_v14 = vmul.f32 %v2189_v60, %v5782_v26  ;;  %v2212_v12 = vmul.f32 %v2210_v34, %v5802_v44 }
 0x23e   : > { %7965 = vst [vmem:[#allocation83_spill] sm:$0xff] %v6187_v18  ;;  %v2175_v18 = vrot.slane %v2169_v16, 6  ;;  %v2213_v23 = vmul.f32 %v2210_v34, %v5859_v35 }
 0x23f   : > { %2117 = vrot.lane.b32.xlu0 %v2114_v40, %s7861_s30  ;;  %2098 = vrot.lane.b32.xlu1 %v2095_v47, %s7863_s5  ;;  %v2170_v47 = vmul.f32 %v2168_v57, %v5802_v44  ;;  %v2191_v57 = vmul.f32 %v2189_v60, %v5802_v44  ;;  %v2211_v60 = vmul.f32 %v2210_v34, %v5782_v26 }
 0x241   : > { %v6196_v51 = vpop.permute.xlu0 %1461  ;;  %v6198_v20 = vpop.permute.xlu1 %1374 }
 0x242   : > { %7966 = vst [vmem:[#allocation84_spill] sm:$0xff] %v6196_v51 }
 0x243   : > { %2138 = vrot.lane.b32.xlu0 %v2135_v6, %s7861_s30  ;;  %2119 = vrot.lane.b32.xlu1 %v2116_v48, %s7861_s30  ;;  %v2176_v6 = vrot.slane %v2170_v47, 6 }
 0x245   : > { %v6206_v53 = vpop.permute.xlu0 %1482  ;;  %v6208_v40 = vpop.permute.xlu1 %1463  ;;  %v2177_v16 = vsel %vm1142_vm10, %v2175_v18, %v2176_v6 }
 0x246   : > { %7967 = vst [vmem:[#allocation85_spill] sm:$0xff] %v6208_v40  ;;  %v2178_v40 = vrot.slane %v2171_v9, 6 }
 0x247   : > { %2159 = vrot.lane.b32.xlu0 %v2156_v45, %s7861_s30  ;;  %2140 = vrot.lane.b32.xlu1 %v2137_v32, %s7861_s30  ;;  %v2197_v32 = vrot.slane %v2191_v57, 6  ;;  %v2220_v57 = vrot.slane %v2213_v23, 6 }
 0x248   : > { %v2179_v9 = vsel %vm1142_vm10, %v2176_v6, %v2178_v40  ;;  %v2218_v6 = vrot.slane %v2212_v12, 6 }
 0x249   : > { %v6216_v48 = vpop.permute.xlu0 %1503  ;;  %v6218_v51 = vpop.permute.xlu1 %1484 }
 0x24a   : > { %7968 = vst [vmem:[#allocation86_spill] sm:$0xff] %v6216_v48  ;;  %7969 = vst [vmem:[#allocation87_spill] sm:$0xff] %v6218_v51  ;;  %v2199_v48 = vrot.slane %v2192_v38, 6  ;;  %v2196_v51 = vrot.slane %v2190_v14, 6  ;;  %v2217_v38 = vrot.slane %v2211_v60, 6 }
 0x24b   : > { %3276 = vrot.lane.b32.xlu0 %v3272_v28, %s7863_s5  ;;  %2161 = vrot.lane.b32.xlu1 %v2158_v8, %s7861_s30 }
 0x24c   : > { %v2200_v40 = vsel %vm1142_vm10, %v2197_v32, %v2199_v48  ;;  %v2198_v18 = vsel %vm1142_vm10, %v2196_v51, %v2197_v32 }
 0x24d   : > { %v6226_v47 = vpop.permute.xlu0 %1524  ;;  %v6228_v45 = vpop.permute.xlu1 %1505 }
 0x24e   : > { %7970 = vst [vmem:[#allocation88_spill] sm:$0xff] %v6228_v45 }
 0x24f   : > { %2182 = vrot.lane.b32.xlu0 %v2179_v9, %s7861_s30  ;;  %2180 = vrot.lane.b32.xlu1 %v2177_v16, %s7861_s30  ;;  %v2221_v9 = vsel %vm1142_vm10, %v2218_v6, %v2220_v57  ;;  %v2219_v16 = vsel %vm1142_vm10, %v2217_v38, %v2218_v6 }
 0x251   : > { %v6237_v28 = vpop.permute.xlu0 %1545  ;;  %v6239_v8 = vpop.permute.xlu1 %1526 }
 0x252   : > { %7971 = vst [vmem:[#allocation89_spill] sm:$0xff] %v6237_v28 }
 0x253   : > { %2203 = vrot.lane.b32.xlu0 %v2200_v40, %s7853_s10  ;;  %2201 = vrot.lane.b32.xlu1 %v2198_v18, %s7853_s10 }
 0x255   : > { %v6245_v14 = vpop.permute.xlu0 %1566  ;;  %v6247_v34 = vpop.permute.xlu1 %1547 }
 0x256   : > { %7972 = vst [vmem:[#allocation90_spill] sm:$0xff] %v6247_v34 }
 0x257   : > { %2224 = vrot.lane.b32.xlu0 %v2221_v9, %s7853_s10  ;;  %2222 = vrot.lane.b32.xlu1 %v2219_v16, %s7853_s10 }
 0x259   : > { %v6253_v51 = vpop.permute.xlu0 %1587  ;;  %v6255_v48 = vpop.permute.xlu1 %1568 }
 0x25a   : > { %7973 = vst [vmem:[#allocation91_spill] sm:$0xff] %v6253_v51 }
 0x25d   : > { %v6257_v32 = vpop.permute.xlu0 %1608  ;;  %v6259_v12 = vpop.permute.xlu1 %1589 }
 0x25e   : > { %7974 = vst [vmem:[#allocation92_spill] sm:$0xff] %v6257_v32  ;;  %7975 = vst [vmem:[#allocation93_spill] sm:$0xff] %v6259_v12 }
 0x261   : > { %v6261_v23 = vpop.permute.xlu0 %1629  ;;  %v6263_v60 = vpop.permute.xlu1 %1610 }
 0x262   : > { %7976 = vst [vmem:[#allocation94_spill] sm:$0xff] %v6261_v23  ;;  %7977 = vst [vmem:[#allocation95_spill] sm:$0xff] %v6263_v60 }
 0x265   : > { %v6265_v40 = vpop.permute.xlu0 %1650  ;;  %v6267_v18 = vpop.permute.xlu1 %1631 }
 0x266   : > { %7978 = vst [vmem:[#allocation96_spill] sm:$0xff] %v6267_v18 }
 0x269   : > { %v6269_v6 = vpop.permute.xlu0 %1671  ;;  %v6271_v57 = vpop.permute.xlu1 %1652 }
 0x26a   : > { %7979 = vst [vmem:[#allocation97_spill] sm:$0xff] %v6269_v6 }
 0x26d   : > { %v6273_v38 = vpop.permute.xlu0 %1692  ;;  %v6275_v9 = vpop.permute.xlu1 %1673 }
 0x26e   : > { %7980 = vst [vmem:[#allocation98_spill] sm:$0xff] %v6273_v38  ;;  %7981 = vst [vmem:[#allocation99_spill] sm:$0xff] %v6275_v9 }
 0x271   : > { %v6277_v16 = vpop.permute.xlu0 %1713  ;;  %v6279_v34 = vpop.permute.xlu1 %1694 }
 0x272   : > { %7982 = vst [vmem:[#allocation100_spill] sm:$0xff] %v6277_v16  ;;  %7983 = vst [vmem:[#allocation101_spill] sm:$0xff] %v6279_v34 }
 0x275   : > { %v6281_v28 = vpop.permute.xlu0 %1734  ;;  %v6283_v23 = vpop.permute.xlu1 %1715 }
 0x276   : > { %7984 = vst [vmem:[#allocation102_spill] sm:$0xff] %v6281_v28  ;;  %7985 = vst [vmem:[#allocation103_spill] sm:$0xff] %v6283_v23 }
 0x279   : > { %v6285_v12 = vpop.permute.xlu0 %1755  ;;  %v6287_v45 = vpop.permute.xlu1 %1736 }
 0x27a   : > { %7986 = vst [vmem:[#allocation104_spill] sm:$0xff] %v6285_v12  ;;  %7987 = vst [vmem:[#allocation105_spill] sm:$0xff] %v6287_v45  ;;  %v874_v45 = vstv %s4578_s19  ;;  %s4551_s19 = sld [smem:[#allocation11 + $0x2]] }
 0x27d   : > { %v6289_v18 = vpop.permute.xlu0 %1776  ;;  %v6291_v6 = vpop.permute.xlu1 %1757 }
 0x27e   : > { %7988 = vst [vmem:[#allocation106_spill] sm:$0xff] %v6289_v18  ;;  %7989 = vst [vmem:[#allocation107_spill] sm:$0xff] %v6291_v6  ;;  %v352_v18 = vstv %s4550_s28  ;;  %s4634_s28 = sld [smem:[#allocation11 + $0x55]] }
 0x281   : > { %v6293_v51 = vpop.permute.xlu0 %1797  ;;  %v6295_v38 = vpop.permute.xlu1 %1778 }
 0x282   : > { %7990 = vst [vmem:[#allocation108_spill] sm:$0xff] %v6293_v51  ;;  %7991 = vst [vmem:[#allocation109_spill] sm:$0xff] %v6295_v38  ;;  %v353_v38 = vmul.f32 %v352_v18, %v5439_v52 }
 0x285   : > { %v6297_v9 = vpop.permute.xlu0 %1818  ;;  %v6299_v16 = vpop.permute.xlu1 %1799 }
 0x286   : > { %7992 = vst [vmem:[#allocation110_spill] sm:$0xff] %v6297_v9  ;;  %7993 = vst [vmem:[#allocation111_spill] sm:$0xff] %v6299_v16  ;;  %v354_v16 = vmul.f32 %v352_v18, %v5447_v58 }
 0x289   : > { %v6301_v34 = vpop.permute.xlu0 %1839  ;;  %v6303_v23 = vpop.permute.xlu1 %1820 }
 0x28a   : > { %7994 = vst [vmem:[#allocation112_spill] sm:$0xff] %v6301_v34  ;;  %7995 = vst [vmem:[#allocation113_spill] sm:$0xff] %v6303_v23  ;;  %v395_v23 = vadd.f32 %v5661_v17, %v353_v38  ;;  %v877_v38 = vmul.f32 %v874_v45, %v5454_v0 }
 0x28c   : > { %v473_v32 = vadd.f32 %v5705_v2, %v395_v23 }
 0x28d   : > { %v6305_v12 = vpop.permute.xlu0 %1860  ;;  %v6307_v60 = vpop.permute.xlu1 %1841 }
 0x28e   : > { %7996 = vst [vmem:[#allocation114_spill] sm:$0xff] %v6305_v12  ;;  %7997 = vst [vmem:[#allocation115_spill] sm:$0xff] %v6307_v60  ;;  %v396_v12 = vadd.f32 %v5674_v29, %v354_v16  ;;  %v364_v60 = vstv %s4552_s23  ;;  %v876_v29 = vmul.f32 %v874_v45, %v5447_v58  ;;  %v875_v16 = vmul.f32 %v874_v45, %v5439_v52  ;;  %s4636_s23 = sld [smem:[#allocation11 + $0x57]] }
 0x28f   : > { %v365_v18 = vmul.f32 %v364_v60, %v5439_v52 }
 0x291   : > { %v6309_v6 = vpop.permute.xlu0 %1881  ;;  %v6311_v51 = vpop.permute.xlu1 %1862  ;;  %v431_v2 = vadd.f32 %v5683_v39, %v365_v18  ;;  %v881_v18 = vrot.slane %v875_v16, 4 }
 0x292   : > { %7998 = vst [vmem:[#allocation116_spill] sm:$0xff] %v6309_v6  ;;  %7999 = vst [vmem:[#allocation117_spill] sm:$0xff] %v6311_v51  ;;  %v474_v6 = vadd.f32 %v5718_v15, %v396_v12 }
 0x294   : > { %v558_v17 = vadd.f32 %v5772_v19, %v474_v6  ;;  %v882_v6 = vrot.slane %v876_v29, 4 }
 0x295   : > { %v6315_v9 = vpop.permute.xlu0 %1902  ;;  %v6317_v34 = vpop.permute.xlu1 %1883 }
 0x296   : > { %8000 = vst [vmem:[#allocation118_spill] sm:$0xff] %v6315_v9  ;;  %8001 = vst [vmem:[#allocation119_spill] sm:$0xff] %v6317_v34  ;;  %v366_v9 = vmul.f32 %v364_v60, %v5447_v58  ;;  %v557_v34 = vadd.f32 %v5754_v62, %v473_v32  ;;  %v643_v23 = vadd.f32 %v5823_v59, %v558_v17 }
 0x297   : > { %v515_v62 = vadd.f32 %v5727_v31, %v431_v2 }
 0x298   : > { %v432_v15 = vadd.f32 %v5696_v54, %v366_v9  ;;  %v642_v12 = vadd.f32 %v5810_v50, %v557_v34  ;;  %v728_v39 = vadd.f32 %v5868_v49, %v643_v23  ;;  %v884_v54 = vrot.slane %v877_v38, 4 }
 0x299   : > { %v6323_v51 = vpop.permute.xlu0 %1923  ;;  %v6325_v28 = vpop.permute.xlu1 %1904  ;;  %v908_v9 = vstv %s4580_s7  ;;  %v600_v50 = vadd.f32 %v5785_v33, %v515_v62  ;;  %s4654_s7 = sld [smem:[#allocation11 + $0x66]] }
 0x29a   : > { %8002 = vst [vmem:[#allocation120_spill] sm:$0xff] %v6323_v51  ;;  %v516_v19 = vadd.f32 %v5742_v46, %v432_v15  ;;  %v727_v32 = vadd.f32 %v5852_v22, %v642_v12  ;;  %v812_v34 = vadd.f32 %v5912_v36, %v728_v39  ;;  %v910_v31 = vmul.f32 %v908_v9, %v5447_v58 }
 0x29b   : > { %v911_v46 = vmul.f32 %v908_v9, %v5454_v0  ;;  %v684_v17 = vadd.f32 %v5832_v5, %v600_v50  ;;  %v909_v36 = vmul.f32 %v908_v9, %v5439_v52 }
 0x29c   : > { %v601_v59 = vadd.f32 %v5798_v42, %v516_v19  ;;  %v811_v45 = vadd.f32 %v5900_v56, %v727_v32  ;;  %v883_v42 = vsel %vm863_vm9, %v881_v18, %v882_v6  ;;  %v885_v56 = vsel %vm863_vm9, %v882_v6, %v884_v54 }
 0x29d   : > { %v6338_v51 = vpop.permute.xlu0 %1944  ;;  %v6340_v60 = vpop.permute.xlu1 %1925  ;;  %v769_v29 = vadd.f32 %v5878_v10, %v684_v17  ;;  %v889_v15 = vadd.f32 %v885_v56, %v812_v34  ;;  %v916_v12 = vrot.slane %v910_v31, 4  ;;  %v918_v23 = vrot.slane %v911_v46, 4 }
 0x29e   : > { %v685_v33 = vadd.f32 %v5845_v11, %v601_v59  ;;  %v888_v2 = vadd.f32 %v883_v42, %v811_v45  ;;  %v915_v10 = vrot.slane %v909_v36, 4  ;;  %v1398_v6 = vstv %s4606_s8  ;;  %v8005_v42 = vld [vmem:[#allocation59_spill] sm:$0xff]  ;;  %s4655_s8 = sld [smem:[#allocation11 + $0x67]] }
 0x29f   : > { %v853_v11 = vadd.f32 %v5922_v55, %v769_v29  ;;  %v965_v32 = vadd.f32 %v5957_v3, %v889_v15  ;;  %v919_v9 = vsel %vm863_vm9, %v916_v12, %v918_v23  ;;  %v1399_v45 = vmul.f32 %v1398_v6, %v5782_v26  ;;  %v8006_v29 = vld [vmem:[#allocation74_spill] sm:$0xff]  ;;  %v8009_v23 = vld [vmem:[#allocation79_spill] sm:$0xff] }
 0x2a0   : > { %v770_v38 = vadd.f32 %v5891_v27, %v685_v33  ;;  %v964_v19 = vadd.f32 %v5943_v21, %v888_v2  ;;  %v917_v54 = vsel %vm863_vm9, %v915_v10, %v916_v12  ;;  %v1432_v17 = vstv %s4608_s11  ;;  %v8007_v15 = vld [vmem:[#allocation62_spill] sm:$0xff]  ;;  %v8008_v12 = vld [vmem:[#allocation65_spill] sm:$0xff]  ;;  %s4657_s11 = sld [smem:[#allocation11 + $0x69]] }
 0x2a1   : > { %v6352_v22 = vpop.permute.xlu0 %2033  ;;  %v6354_v49 = vpop.permute.xlu1 %1946  ;;  %v1049_v39 = vadd.f32 %v6000_v37, %v965_v32  ;;  %v922_v55 = vadd.f32 %v917_v54, %v853_v11  ;;  %v1401_v37 = vmul.f32 %v1398_v6, %v5859_v35  ;;  %v1434_v32 = vmul.f32 %v1432_v17, %v5802_v44  ;;  %v8013_v54 = vld [vmem:[#allocation71_spill] sm:$0xff] }
 0x2a2   : > { %8003 = vst [vmem:[#allocation121_spill] sm:$0xff] %v6352_v22  ;;  %v854_v62 = vadd.f32 %v5935_v61, %v770_v38  ;;  %v1048_v27 = vadd.f32 %v5988_v63, %v964_v19  ;;  %v1400_v63 = vmul.f32 %v1398_v6, %v5802_v44 }
 0x2a3   : > { %v1133_v3 = vadd.f32 %v6046_v7, %v1049_v39  ;;  %v1006_v34 = vadd.f32 %v5966_v25, %v922_v55  ;;  %v1405_v25 = vrot.slane %v1399_v45, 1  ;;  %v8012_v39 = vld [vmem:[#allocation68_spill] sm:$0xff]  ;;  %v8015_v45 = vld [vmem:[#allocation78_spill] sm:$0xff] }
 0x2a4   : > { %v923_v61 = vadd.f32 %v919_v9, %v854_v62  ;;  %v1132_v21 = vadd.f32 %v6031_v1, %v1048_v27  ;;  %v1406_v2 = vrot.slane %v1400_v63, 1  ;;  %v8010_v62 = vld [vmem:[#allocation82_spill] sm:$0xff] }
 0x2a5   : > { %v6363_v16 = vpop.permute.xlu0 %2054  ;;  %v6365_v5 = vpop.permute.xlu1 %2035  ;;  %v1218_v46 = vadd.f32 %v6088_v30, %v1133_v3  ;;  %v1090_v7 = vadd.f32 %v6010_v41, %v1006_v34  ;;  %v1433_v41 = vmul.f32 %v1432_v17, %v5782_v26 }
 0x2a6   : > { %8004 = vst [vmem:[#allocation122_spill] sm:$0xff] %v6365_v5  ;;  %v1007_v18 = vadd.f32 %v5978_v24, %v923_v61  ;;  %v1217_v31 = vadd.f32 %v6077_v4, %v1132_v21  ;;  %v1408_v24 = vrot.slane %v1401_v37, 1  ;;  %v1407_v55 = vsel %vm419_vm6, %v1405_v25, %v1406_v2  ;;  %v8014_v21 = vld [vmem:[#allocation75_spill] sm:$0xff] }
 0x2a7   : > { %v1295_v38 = vadd.f32 %v8006_v29, %v1218_v46  ;;  %v1175_v4 = vadd.f32 %v8007_v15, %v1090_v7  ;;  %v8017_v29 = vld [vmem:[#allocation87_spill] sm:$0xff] }
 0x2a8   : > { %v1091_v56 = vadd.f32 %v8005_v42, %v1007_v18  ;;  %v1294_v36 = vadd.f32 %v6119_v13, %v1217_v31  ;;  %v1435_v13 = vmul.f32 %v1432_v17, %v5859_v35  ;;  %v1409_v61 = vsel %vm419_vm6, %v1406_v2, %v1408_v24 }
 0x2a9   : > { %v6375_v50 = vpop.permute.xlu0 %2075  ;;  %v6377_v59 = vpop.permute.xlu1 %2056  ;;  %v1351_v19 = vadd.f32 %v8010_v62, %v1295_v38  ;;  %v1259_v6 = vadd.f32 %v8012_v39, %v1175_v4  ;;  %v1439_v18 = vrot.slane %v1433_v41, 1  ;;  %v1440_v31 = vrot.slane %v1434_v32, 1  ;;  %v8018_v41 = vld [vmem:[#allocation102_spill] sm:$0xff] }
 0x2aa   : > { %v1176_v30 = vadd.f32 %v8008_v12, %v1091_v56  ;;  %v1350_v11 = vadd.f32 %v8009_v23, %v1294_v36  ;;  %v1442_v46 = vrot.slane %v1435_v13, 1  ;;  %v1970_v24 = vstv %s4634_s28  ;;  %v8019_v13 = vld [vmem:[#allocation105_spill] sm:$0xff]  ;;  %s4579_s28 = sld [smem:[#allocation11 + $0x1e]] }
 0x2ab   : > { %v1322_v3 = vadd.f32 %v8014_v21, %v1259_v6  ;;  %v1413_v34 = vadd.f32 %v1409_v61, %v1351_v19  ;;  %v1441_v15 = vsel %vm419_vm6, %v1439_v18, %v1440_v31  ;;  %v2004_v6 = vstv %s4636_s23  ;;  %v8022_v21 = vld [vmem:[#allocation110_spill] sm:$0xff]  ;;  %s6480_s23 = sld [smem:[#allocation11 + $0x68]] }
 0x2ac   : > { %v1260_v9 = vadd.f32 %v8013_v54, %v1176_v30  ;;  %v1412_v37 = vadd.f32 %v1407_v55, %v1350_v11  ;;  %v1443_v4 = vsel %vm419_vm6, %v1440_v31, %v1442_v46  ;;  %v1971_v11 = vmul.f32 %v1970_v24, %v5782_v26  ;;  %v8021_v55 = vld [vmem:[#allocation95_spill] sm:$0xff]  ;;  %v8025_v31 = vld [vmem:[#allocation101_spill] sm:$0xff] }
 0x2ad   : > { %v6388_v33 = vpop.permute.xlu0 %2096  ;;  %v6390_v1 = vpop.permute.xlu1 %2077  ;;  %v1378_v42 = vadd.f32 %v6185_v43, %v1322_v3  ;;  %v1489_v38 = vadd.f32 %v8017_v29, %v1413_v34  ;;  %v8024_v34 = vld [vmem:[#allocation98_spill] sm:$0xff]  ;;  %v2005_v29 = vmul.f32 %v2004_v6, %v5782_v26 }
 0x2ae   : > { %v1323_v63 = vadd.f32 %v8015_v45, %v1260_v9  ;;  %v1488_v36 = vadd.f32 %v6206_v53, %v1412_v37  ;;  %v8023_v45 = vld [vmem:[#allocation113_spill] sm:$0xff] }
 0x2af   : > { %v1573_v2 = vadd.f32 %v6255_v48, %v1489_v38  ;;  %v1446_v23 = vadd.f32 %v1441_v15, %v1378_v42  ;;  %v1973_v48 = vmul.f32 %v1970_v24, %v5859_v35  ;;  %v8026_v42 = vld [vmem:[#allocation118_spill] sm:$0xff]  ;;  %v2006_v38 = vmul.f32 %v2004_v6, %v5802_v44 }
 0x2b0   : > { %v1379_v56 = vadd.f32 %v6198_v20, %v1323_v63  ;;  %v1572_v25 = vadd.f32 %v6245_v14, %v1488_v36  ;;  %v1972_v14 = vmul.f32 %v1970_v24, %v5802_v44  ;;  %v8027_v15 = vld [vmem:[#allocation106_spill] sm:$0xff] }
 0x2b1   : > { %v6403_v10 = vpop.permute.xlu0 %2117  ;;  %v6405_v27 = vpop.permute.xlu1 %2098  ;;  %v1657_v53 = vadd.f32 %v6271_v57, %v1573_v2  ;;  %v1530_v62 = vadd.f32 %v6226_v47, %v1446_v23  ;;  %v8020_v57 = vld [vmem:[#allocation92_spill] sm:$0xff]  ;;  %v1977_v47 = vrot.slane %v1971_v11, 5  ;;  %v8028_v23 = vld [vmem:[#allocation109_spill] sm:$0xff]  ;;  %v8029_v11 = vld [vmem:[#allocation114_spill] sm:$0xff] }
 0x2b2   : > { %8011 = vst [vmem:[#allocation59_spill] sm:$0xff] %v6403_v10  ;;  %v1447_v43 = vadd.f32 %v1443_v4, %v1379_v56  ;;  %v1656_v20 = vadd.f32 %v6265_v40, %v1572_v25  ;;  %v1978_v37 = vrot.slane %v1972_v14, 5  ;;  %v2007_v25 = vmul.f32 %v2004_v6, %v5859_v35 }
 0x2b3   : > { %v1741_v39 = vadd.f32 %v8019_v13, %v1657_v53  ;;  %v1614_v9 = vadd.f32 %v8020_v57, %v1530_v62 }
 0x2b4   : > { %v1531_v19 = vadd.f32 %v6239_v8, %v1447_v43  ;;  %v1740_v32 = vadd.f32 %v8018_v41, %v1656_v20  ;;  %v1980_v8 = vrot.slane %v1973_v48, 5  ;;  %v1979_v20 = vsel %vm314_vm5, %v1977_v47, %v1978_v37  ;;  %v8030_v48 = vld [vmem:[#allocation117_spill] sm:$0xff] }
 0x2b5   : > { %v2139_v17 = vpop.permute.xlu0 %2138  ;;  %v6413_v7 = vpop.permute.xlu1 %2119  ;;  %v1825_v63 = vadd.f32 %v8023_v45, %v1741_v39  ;;  %v1698_v18 = vadd.f32 %v8024_v34, %v1614_v9  ;;  %v2011_v41 = vrot.slane %v2005_v29, 5  ;;  %v2014_v13 = vrot.slane %v2007_v25, 5 }
 0x2b6   : > { %8016 = vst [vmem:[#allocation74_spill] sm:$0xff] %v6413_v7  ;;  %v1615_v61 = vadd.f32 %v8021_v55, %v1531_v19  ;;  %v1824_v3 = vadd.f32 %v8022_v21, %v1740_v32  ;;  %v1981_v53 = vsel %vm314_vm5, %v1978_v37, %v1980_v8  ;;  %v2012_v32 = vrot.slane %v2006_v38, 5 }
 0x2b7   : > { %v1909_v36 = vadd.f32 %v6325_v28, %v1825_v63  ;;  %v1782_v4 = vadd.f32 %v8027_v15, %v1698_v18  ;;  %v358_v29 = vstv %s4551_s19  ;;  %s6490_s19 = sld [smem:[#allocation11 + $0x6c]] }
 0x2b8   : > { %v1699_v46 = vadd.f32 %v8025_v31, %v1615_v61  ;;  %v1908_v56 = vadd.f32 %v8026_v42, %v1824_v3  ;;  %v2013_v45 = vsel %vm314_vm5, %v2011_v41, %v2012_v32  ;;  %v2015_v63 = vsel %vm314_vm5, %v2012_v32, %v2014_v13 }
 0x2b9   : > { %v6423_v12 = vpop.permute.xlu0 %2159  ;;  %v2141_v30 = vpop.permute.xlu1 %2140  ;;  %v1866_v14 = vadd.f32 %v8029_v11, %v1782_v4  ;;  %v1985_v19 = vadd.f32 %v1981_v53, %v1909_v36  ;;  %v8034_v4 = vld [vmem:[#allocation25_spill] sm:$0xff]  ;;  %v2346_v53 = vstv %s4657_s11  ;;  %s4607_s11 = sld [smem:[#allocation11 + $0x3a]] }
 0x2ba   : > { %v1783_v43 = vadd.f32 %v8028_v23, %v1699_v46  ;;  %v1984_v62 = vadd.f32 %v1979_v20, %v1908_v56  ;;  %v2281_v46 = vld [vmem:[#allocation3] sm:$0xf]  ;;  %v2330_v20 = vstv %s4655_s8  ;;  %s6509_s8 = sld [smem:[#allocation11 + $0x6f]] }
 0x2bb   : > { %v1950_v57 = vadd.f32 %v6338_v51, %v1866_v14  ;;  %v2061_v61 = vadd.f32 %v6377_v59, %v1985_v19  ;;  %v2282_v42 = vmul.f32 0.0625, %v2281_v46  ;;  %v8035_v14 = vld [vmem:[#allocation29_spill] sm:$0xff]  ;;  %v360_v19 = vmul.f32 %v358_v29, %v5447_v58 }
 0x2bc   : > { %v1867_v28 = vadd.f32 %v8030_v48, %v1783_v43  ;;  %v2060_v55 = vadd.f32 %v6363_v16, %v1984_v62  ;;  %v3273_v16 = vld [vmem:[#allocation5] sm:$0xf]  ;;  %v2322_v43 = vstv %s4654_s7  ;;  %s6507_s7 = sld [smem:[#allocation11 + $0x6e]]  ;;  %v2382_v46 = vstv %s6492_s9  ;;  %s6538_s9 = sld [smem:[#allocation11 + $0x72]] }
 0x2bd   : > { %v6434_v54 = vpop.permute.xlu0 %3276  ;;  %v6436_v40 = vpop.permute.xlu1 %2161  ;;  %v2145_v3 = vadd.f32 %v2141_v30, %v2061_v61  ;;  %v2018_v8 = vadd.f32 %v2013_v45, %v1950_v57  ;;  %v3274_v30 = vmul.f32 0.0625, %v3273_v16  ;;  %v8036_v57 = vld [vmem:[#allocation33_spill] sm:$0xff]  ;;  %v2355_v61 = vstv %s6482_s22  ;;  %v8037_v45 = vld [vmem:[#allocation26_spill] sm:$0xff]  ;;  %s6526_s22 = sld [smem:[#allocation11 + $0x71]] }
 0x2be   : > { %v1951_v9 = vadd.f32 %v6354_v49, %v1867_v28  ;;  %v2144_v21 = vadd.f32 %v2139_v17, %v2060_v55  ;;  %v891_v28 = vstv %s4579_s28  ;;  %v2338_v55 = vstv %s6480_s23  ;;  %s6540_s28 = sld [smem:[#allocation11 + $0x73]]  ;;  %s6552_s23 = sld [smem:[#allocation11 + $0x74]] }
 0x2bf   : > { %v2102_v51 = vadd.f32 %v6388_v33, %v2018_v8  ;;  %v2280_v33 = vld [vmem:[#allocation2] sm:$0xf]  ;;  %v892_v8 = vmul.f32 %v891_v28, %v5439_v52 }
 0x2c0   : > { %v2019_v34 = vadd.f32 %v2015_v63, %v1951_v9  ;;  %v410_v63 = vadd.f32 %v8037_v45, %v360_v19 }
 0x2c1   : > { %v2183_v2 = vpop.permute.xlu0 %2182  ;;  %v2181_v24 = vpop.permute.xlu1 %2180 }
 0x2c2   : > { %v2103_v49 = vadd.f32 %v6405_v27, %v2019_v34  ;;  %v2186_v17 = vadd.f32 %v2181_v24, %v2102_v51 }
 0x2c4   : > { %v2187_v59 = vadd.f32 %v2183_v2, %v2103_v49  ;;  %v359_v2 = vmul.f32 %v358_v29, %v5439_v52  ;;  %v8039_v49 = vld [vmem:[#allocation30_spill] sm:$0xff] }
 0x2c5   : > { %v6455_v39 = vpop.permute.xlu0 %2203  ;;  %v6457_v6 = vpop.permute.xlu1 %2201  ;;  %v495_v16 = vadd.f32 %v8039_v49, %v410_v63 }
 0x2c6   : > { %8031 = vst [vmem:[#allocation62_spill] sm:$0xff] %v6455_v39  ;;  %8032 = vst [vmem:[#allocation65_spill] sm:$0xff] %v6457_v6  ;;  %v409_v23 = vadd.f32 %v8034_v4, %v359_v2  ;;  %v898_v2 = vrot.slane %v892_v8, 4  ;;  %v8047_v8 = vld [vmem:[#allocation56_spill] sm:$0xff] }
 0x2c8   : > { %v494_v48 = vadd.f32 %v8035_v14, %v409_v23  ;;  %v2400_v14 = vstv %s6509_s8  ;;  %s6569_s8 = sld [smem:[#allocation11 + $0x77]] }
 0x2c9   : > { %v2225_v47 = vpop.permute.xlu0 %2224  ;;  %v2223_v37 = vpop.permute.xlu1 %2222 }
 0x2ca   : > { %v2229_v18 = vadd.f32 %v2225_v47, %v2145_v3  ;;  %v2228_v31 = vadd.f32 %v2223_v37, %v2144_v21  ;;  %v579_v9 = vadd.f32 %v8036_v57, %v494_v48  ;;  %v2364_v21 = vstv %s6484_s17  ;;  %v8038_v47 = vld [vmem:[#allocation39_spill] sm:$0xff]  ;;  %s6524_s17 = sld [smem:[#allocation11 + $0x70]] }
 0x2cb   : > { %v893_v3 = vmul.f32 %v891_v28, %v5447_v58 }
 0x2cc   : > { %2234 = vrot.lane.b32.xlu0 %v2229_v18, %s7861_s30  ;;  %2232 = vrot.lane.b32.xlu1 %v2228_v31, %s7861_s30  ;;  %v663_v37 = vadd.f32 %v8038_v47, %v579_v9  ;;  %v2418_v47 = vstv %s6526_s22  ;;  %s6586_s22 = sld [smem:[#allocation11 + $0xcf]] }
 0x2d0   : > { %2244 = vrot.lane.b32.xlu0 %v2187_v59, %s7861_s30  ;;  %2242 = vrot.lane.b32.xlu1 %v2186_v17, %s7861_s30  ;;  %v8040_v59 = vld [vmem:[#allocation44_spill] sm:$0xff]  ;;  %v2409_v63 = vstv %s6524_s17  ;;  %s6584_s17 = sld [smem:[#allocation11 + $0xcb]] }
 0x2d1   : > { %v748_v17 = vadd.f32 %v8040_v59, %v663_v37 }
 0x2d4   : > { %3287 = vrot.lane.b32.xlu0 %v3274_v30, %s7863_s5  ;;  %2295 = vrot.lane.b32.xlu1 %v2282_v42, %s7863_s5  ;;  %v2373_v30 = vstv %s6490_s19  ;;  %v899_v42 = vrot.slane %v893_v3, 4  ;;  %v8046_v3 = vld [vmem:[#allocation52_spill] sm:$0xff]  ;;  %s6554_s19 = sld [smem:[#allocation11 + $0x75]] }
 0x2d6   : > { %v900_v48 = vsel %vm863_vm9, %v898_v2, %v899_v42  ;;  %v8050_v2 = vld [vmem:[#allocation67_spill] sm:$0xff] }
 0x2d8   : > { %2284 = vrot.lane.b32.xlu0 %v2280_v33, %s7863_s5  ;;  %v8041_v33 = vld [vmem:[#allocation35_spill] sm:$0xff] }
 0x2d9   : > { %v580_v29 = vadd.f32 %v8041_v33, %v495_v16  ;;  %v2427_v33 = vstv %s6538_s9  ;;  %s6600_s9 = sld [smem:[#allocation11 + $0xd3]] }
 0x33e   : > { %v6474_v27 = vpop.permute.xlu0 %2234 }
 0x33f   : > { %8033 = vst [vmem:[#allocation79_spill] sm:$0xff] %v6474_v27 }
 0x342   : > { %v6476_v56 = vpop.permute.xlu0 %2244 }
 0x346   : > { %v6478_v36 = vpop.permute.xlu0 %3287 }
 0x34a   : > { %v2285_v38 = vpop.permute.xlu0 %2284 }
 0x34b   : > { %v2287_v25 = vsel %vm306_vm3, 0.0, %v2285_v38  ;;  %v8042_v38 = vld [vmem:[#allocation48_spill] sm:$0xff] }
 0x34c   : > { %v2288_v24 = vsel %vm309_vm4, %v2287_v25, 0.0  ;;  %v832_v25 = vadd.f32 %v8042_v38, %v748_v17  ;;  %v8049_v38 = vld [vmem:[#allocation53_spill] sm:$0xff] }
 0x34d   : > { %v2290_v15 = vrot.slane %v2288_v24, 5  ;;  %v894_v24 = vmul.f32 %v891_v28, %v5454_v0  ;;  %v8044_v28 = vld [vmem:[#allocation45_spill] sm:$0xff] }
 0x34f   : > { %v2292_v11 = vsel %vm314_vm5, 0.0, %v2290_v15 }
 0x350   : > { %v6497_v62 = vsel %vm419_vm6, %v2292_v11, 0.0  ;;  %v2391_v11 = vstv %s6507_s7  ;;  %s6567_s7 = sld [smem:[#allocation11 + $0x76]] }
 0x351   : > { %v2323_v41 = vmul.f32 %v2322_v43, %v6497_v62  ;;  %v2331_v32 = vmul.f32 %v2330_v20, %v6497_v62  ;;  %v2347_v13 = vmul.f32 %v2346_v53, %v6497_v62  ;;  %v2339_v34 = vmul.f32 %v2338_v55, %v6497_v62  ;;  %v8043_v20 = vld [vmem:[#allocation40_spill] sm:$0xff] }
 0x352   : > { %v2356_v31 = vmul.f32 %v2355_v61, %v6497_v62  ;;  %v2365_v51 = vmul.f32 %v2364_v21, %v6497_v62  ;;  %v2374_v23 = vmul.f32 %v2373_v30, %v6497_v62  ;;  %v2383_v43 = vmul.f32 %v2382_v46, %v6497_v62  ;;  %v8045_v61 = vld [vmem:[#allocation49_spill] sm:$0xff] }
 0x353   : > { %2325 = vrot.lane.b32.xlu0 %v2323_v41, %s7855_s27  ;;  %2333 = vrot.lane.b32.xlu1 %v2331_v32, %s7855_s27  ;;  %v2349_v18 = vrot.slane %v2347_v13, 1  ;;  %v664_v53 = vadd.f32 %v8043_v20, %v580_v29  ;;  %v905_v41 = vadd.f32 %v900_v48, %v832_v25  ;;  %v901_v32 = vrot.slane %v894_v24, 4  ;;  %v8048_v30 = vld [vmem:[#allocation61_spill] sm:$0xff] }
 0x354   : > { %v2358_v15 = vrot.slane %v2356_v31, 1  ;;  %v2367_v4 = vrot.slane %v2365_v51, 1  ;;  %v2376_v13 = vrot.slane %v2374_v23, 1  ;;  %v2385_v57 = vrot.slane %v2383_v43, 1 }
 0x355   : > { %v749_v19 = vadd.f32 %v8044_v28, %v664_v53  ;;  %v2392_v9 = vmul.f32 %v2391_v11, %v6497_v62  ;;  %v2401_v55 = vmul.f32 %v2400_v14, %v6497_v62  ;;  %v985_v45 = vadd.f32 %v8046_v3, %v905_v41  ;;  %v8051_v53 = vld [vmem:[#allocation57_spill] sm:$0xff] }
 0x356   : > { %v902_v37 = vsel %vm863_vm9, %v899_v42, %v901_v32  ;;  %v3279_v31 = vsel %vm306_vm3, 0.0, %v6434_v54  ;;  %v2410_v16 = vmul.f32 %v2409_v63, %v6497_v62  ;;  %v2419_v59 = vmul.f32 %v2418_v47, %v6497_v62  ;;  %v8052_v14 = vld [vmem:[#allocation73_spill] sm:$0xff] }
 0x357   : > { %2341 = vrot.lane.b32.xlu0 %v2339_v34, %s7855_s27  ;;  %2350 = vrot.lane.b32.xlu1 %v2349_v18, %s7863_s5  ;;  %v833_v21 = vadd.f32 %v8045_v61, %v749_v19  ;;  %v1069_v34 = vadd.f32 %v8047_v8, %v985_v45  ;;  %v1415_v18 = vstv %s4607_s11  ;;  %v2394_v51 = vrot.slane %v2392_v9, 1  ;;  %s6593_s11 = sld [smem:[#allocation11 + $0x56]]  ;;  %s6711_s27 = sld [smem:[#allocation11 + $0x123]] }
 0x358   : > { %v2403_v49 = vrot.slane %v2401_v55, 1  ;;  %v2436_v29 = vstv %s6540_s28  ;;  %v1416_v42 = vmul.f32 %v1415_v18, %v5782_v26  ;;  %v1417_v54 = vmul.f32 %v1415_v18, %v5802_v44  ;;  %v8054_v55 = vld [vmem:[#allocation81_spill] sm:$0xff]  ;;  %s6602_s28 = sld [smem:[#allocation11 + $0xd7]] }
 0x359   : > { %v906_v17 = vadd.f32 %v902_v37, %v833_v21  ;;  %v1154_v46 = vadd.f32 %v8048_v30, %v1069_v34  ;;  %v2421_v23 = vrot.slane %v2419_v59, 2  ;;  %v2428_v43 = vmul.f32 %v2427_v33, %v6497_v62  ;;  %v8055_v37 = vld [vmem:[#allocation69_spill] sm:$0xff] }
 0x35a   : > { %v2437_v20 = vmul.f32 %v2436_v29, %v6497_v62  ;;  %v2445_v28 = vstv %s6552_s23  ;;  %v2454_v19 = vstv %s6554_s19  ;;  %v1422_v41 = vrot.slane %v1416_v42, 1  ;;  %v8057_v42 = vld [vmem:[#allocation83_spill] sm:$0xff]  ;;  %s6617_s23 = sld [smem:[#allocation11 + $0xdb]]  ;;  %s6619_s19 = sld [smem:[#allocation11 + $0xdf]] }
 0x35b   : > { %2359 = vrot.lane.b32.xlu0 %v2358_v15, %s7861_s30  ;;  %2368 = vrot.lane.b32.xlu1 %v2367_v4, %s7861_s30  ;;  %v986_v25 = vadd.f32 %v8049_v38, %v906_v17  ;;  %v1238_v24 = vadd.f32 %v8050_v2, %v1154_v46  ;;  %v3280_v15 = vsel %vm309_vm4, %v3279_v31, 0.0  ;;  %v2412_v4 = vrot.slane %v2410_v16, 2 }
 0x35c   : > { %v1423_v32 = vrot.slane %v1417_v54, 1  ;;  %v1418_v21 = vmul.f32 %v1415_v18, %v5859_v35  ;;  %v2430_v3 = vrot.slane %v2428_v43, 2  ;;  %v2439_v45 = vrot.slane %v2437_v20, 2 }
 0x35d   : > { %v1070_v11 = vadd.f32 %v8051_v53, %v986_v25  ;;  %v1308_v48 = vadd.f32 %v8052_v14, %v1238_v24  ;;  %v2446_v63 = vmul.f32 %v2445_v28, %v6497_v62  ;;  %v2455_v47 = vmul.f32 %v2454_v19, %v6497_v62  ;;  %v8058_v24 = vld [vmem:[#allocation86_spill] sm:$0xff] }
 0x35e   : > { %v2463_v34 = vstv %s6567_s7  ;;  %v2472_v31 = vstv %s6569_s8  ;;  %v1424_v18 = vsel %vm419_vm6, %v1422_v41, %v1423_v32  ;;  %v1425_v17 = vrot.slane %v1418_v21, 1  ;;  %s6623_s7 = sld [smem:[#allocation11 + $0xe7]]  ;;  %s6628_s8 = sld [smem:[#allocation11 + $0xeb]] }
 0x35f   : > { %2377 = vrot.lane.b32.xlu0 %v2376_v13, %s7861_s30  ;;  %2386 = vrot.lane.b32.xlu1 %v2385_v57, %s7861_s30  ;;  %v3282_v13 = vrot.slane %v3280_v15, 5  ;;  %v8053_v57 = vld [vmem:[#allocation63_spill] sm:$0xff]  ;;  %v1364_v61 = vadd.f32 %v8054_v55, %v1308_v48  ;;  %v2448_v30 = vrot.slane %v2446_v63, 2  ;;  %v2457_v46 = vrot.slane %v2455_v47, 2  ;;  %v8064_v47 = vld [vmem:[#allocation93_spill] sm:$0xff] }
 0x360   : > { %v1155_v9 = vadd.f32 %v8053_v57, %v1070_v11  ;;  %v2464_v33 = vmul.f32 %v2463_v34, %v6497_v62  ;;  %v2473_v29 = vmul.f32 %v2472_v31, %v6497_v62  ;;  %v3338_v25 = vstv %s6584_s17  ;;  %v8059_v48 = vld [vmem:[#allocation91_spill] sm:$0xff]  ;;  %s6635_s17 = sld [smem:[#allocation11 + $0x78]] }
 0x361   : > { %v1429_v59 = vadd.f32 %v1424_v18, %v1364_v61  ;;  %v3374_v2 = vstv %s6586_s22  ;;  %v3410_v19 = vstv %s6600_s9  ;;  %v3446_v41 = vstv %s6602_s28  ;;  %s8060_s22 = smov 122   ;;  %s6649_s9 = sld [smem:[#allocation11 + $0xf3]] }
 0x362   : > { %v1239_v8 = vadd.f32 %v8055_v37, %v1155_v9  ;;  %v2466_v43 = vrot.slane %v2464_v33, 2  ;;  %v2475_v20 = vrot.slane %v2473_v29, 3  ;;  %v8063_v9 = vld [vmem:[#allocation97_spill] sm:$0xff]  ;;  %v3482_v31 = vstv %s6617_s23  ;;  %s6660_s28 = sld [smem:[#allocation11 + $0xef]]  ;;  %s8072_s23 = smov 125  }
 0x363   : > { %2395 = vrot.lane.b32.xlu0 %v2394_v51, %s7853_s10  ;;  %2404 = vrot.lane.b32.xlu1 %v2403_v49, %s7853_s10  ;;  %v3284_v51 = vsel %vm314_vm5, 0.0, %v3282_v13  ;;  %v8056_v49 = vld [vmem:[#allocation76_spill] sm:$0xff]  ;;  %v1509_v15 = vadd.f32 %v8058_v24, %v1429_v59  ;;  %v3518_v18 = vstv %s6619_s19  ;;  %v8066_v59 = vld [vmem:[#allocation99_spill] sm:$0xff]  ;;  %s6686_s19 = sld [smem:[#allocation11 + $0xfb]]  ;;  %s4818_s10 = sld [smem:[#allocation11 + $0x107]] }
 0x364   : > { %v1309_v16 = vadd.f32 %v8056_v49, %v1239_v8  ;;  %v6613_v38 = vsel %vm419_vm6, %v3284_v51, 0.0  ;;  %v8062_v13 = vld [vmem:[#allocation88_spill] sm:$0xff]  ;;  %v3634_v29 = vstv %s6628_s8  ;;  %v8068_v24 = vld [vmem:[#allocation107_spill] sm:$0xff]  ;;  %s6695_s8 = sld [smem:[#allocation11 + $0xf7]] }
 0x365   : > { %v3339_v53 = vmul.f32 %v3338_v25, %v6613_v38  ;;  %v3375_v11 = vmul.f32 %v3374_v2, %v6613_v38  ;;  %v1593_v28 = vadd.f32 %v8059_v48, %v1509_v15  ;;  %v3447_v63 = vmul.f32 %v3446_v41, %v6613_v38  ;;  %v8065_v8 = vld [vmem:[#allocation104_spill] sm:$0xff] }
 0x366   : > { %v1365_v54 = vadd.f32 %v8057_v42, %v1309_v16  ;;  %v3582_v16 = vstv %s6623_s7  ;;  %v3483_v25 = vmul.f32 %v3482_v31, %v6613_v38  ;;  %v3519_v2 = vmul.f32 %v3518_v18, %v6613_v38  ;;  %s6688_s7 = sld [smem:[#allocation11 + $0x103]] }
 0x367   : > { %2413 = vrot.lane.b32.xlu0 %v2412_v4, %s7859_s20  ;;  %2422 = vrot.lane.b32.xlu1 %v2421_v23, %s7859_s20  ;;  %v1426_v4 = vsel %vm419_vm6, %v1423_v32, %v1425_v17  ;;  %v1987_v23 = vstv %s6593_s11  ;;  %s8061_s11 = smov 1   ;;  %v1677_v55 = vadd.f32 %v8063_v9, %v1593_v28  ;;  %v3341_v21 = vrot.slane %v3339_v53, 1 }
 0x368   : > { %v1430_v14 = vadd.f32 %v1426_v4, %v1365_v54  ;;  %v1988_v32 = vmul.f32 %v1987_v23, %v5782_v26  ;;  %v1989_v61 = vmul.f32 %v1987_v23, %v5802_v44  ;;  %v1990_v49 = vmul.f32 %v1987_v23, %v5859_v35 }
 0x369   : > { %v1761_v34 = vadd.f32 %v8065_v8, %v1677_v55  ;;  %v3449_v54 = vrot.slane %v3447_v63, 2  ;;  %v2481_v4 = vstv %s6635_s17  ;;  %v3583_v23 = vmul.f32 %v3582_v16, %v6613_v38  ;;  %s4822_s17 = sld [smem:[#allocation11 + $0x10b]] }
 0x36a   : > { %v1510_v57 = vadd.f32 %v8062_v13, %v1430_v14  ;;  %v1994_v51 = vrot.slane %v1988_v32, 5  ;;  %v1995_v33 = vrot.slane %v1989_v61, 5  ;;  %v1997_v28 = vrot.slane %v1990_v49, 5 }
 0x36b   : > { %2431 = vrot.lane.b32.xlu0 %v2430_v3, %s7857_s4  ;;  %2440 = vrot.lane.b32.xlu1 %v2439_v45, %s7857_s4  ;;  %v3377_v3 = vrot.slane %v3375_v11, 1  ;;  %v3411_v45 = vmul.f32 %v3410_v19, %v6613_v38  ;;  %v8070_v11 = vld [vmem:[#allocation115_spill] sm:$0xff]  ;;  %v6670_v19 = vpop.permute.xlu1 %2232  ;;  %v3636_v41 = vmul.f32 0.0, %v3634_v29  ;;  %v3290_v32 = vsel %vm306_vm3, 0.0, %v6478_v36 }
 0x36c   : > { %v1594_v37 = vadd.f32 %v8064_v47, %v1510_v57  ;;  %v1996_v48 = vsel %vm314_vm5, %v1994_v51, %v1995_v33  ;;  %8071 = vst [vmem:[#allocation82_spill] sm:$0xff] %v6670_v19  ;;  %v3485_v13 = vrot.slane %v3483_v25, 3  ;;  %v3521_v57 = vrot.slane %v3519_v2, 3 }
 0x36d   : > { %v3413_v42 = vrot.slane %v3411_v45, 2  ;;  %v2482_v9 = vmul.f32 %v2481_v4, %v6497_v62  ;;  %v3587_v55 = vrot.slane %v3583_v23, 5  ;;  %v1998_v47 = vsel %vm314_vm5, %v1995_v33, %v1997_v28 }
 0x36e   : > { %v1678_v17 = vadd.f32 %v8066_v59, %v1594_v37  ;;  %v3291_v36 = vsel %vm309_vm4, %v3290_v32, 0.0  ;;  %v3686_v31 = vstv %s6660_s28  ;;  %s4830_s28 = sld [smem:[#allocation11 + $0x113]] }
 0x36f   : > { %2449 = vrot.lane.b32.xlu0 %v2448_v30, %s7857_s4  ;;  %2458 = vrot.lane.b32.xlu1 %v2457_v46, %s7857_s4  ;;  %v8067_v30 = vld [vmem:[#allocation112_spill] sm:$0xff]  ;;  %v2484_v8 = vrot.slane %v2482_v9, 3  ;;  %v2243_v18 = vpop.permute.xlu1 %2242  ;;  %v3687_v33 = vmul.f32 %v3686_v31, %v6613_v38  ;;  %v3911_v9 = vstv %s4818_s10  ;;  %s4675_s10 = sld [smem:[#allocation11 + $0x7b]] }
 0x370   : > { %v1845_v46 = vadd.f32 %v8067_v30, %v1761_v34  ;;  %v1762_v15 = vadd.f32 %v8068_v24, %v1678_v17  ;;  %v3293_v30 = vrot.slane %v3291_v36, 5 }
 0x371   : > { %v3691_v24 = vrot.slane %v3687_v33, 6 }
 0x372   : > { %v1846_v14 = vadd.f32 %v8070_v11, %v1762_v15  ;;  %v3295_v2 = vsel %vm314_vm5, 0.0, %v3293_v30  ;;  %v3780_v11 = vstv %s6695_s8  ;;  %s4842_s8 = sld [smem:[#allocation11 + $0x11f]] }
 0x373   : > { %2467 = vrot.lane.b32.xlu0 %v2466_v43, %s8060_s22  ;;  %2476 = vrot.lane.b32.xlu1 %v2475_v20, %s8061_s11  ;;  %v3584_v43 = vmul.f32 0.0, %v3582_v16  ;;  %v8069_v20 = vld [vmem:[#allocation120_spill] sm:$0xff]  ;;  %v3640_v16 = vrot.slane %v3636_v41, 5  ;;  %v6704_v4 = vsel %vm419_vm6, %v3295_v2, 0.0 }
 0x374   : > { %v1929_v53 = vadd.f32 %v8069_v20, %v1845_v46  ;;  %v1930_v45 = vadd.f32 %v6340_v60, %v1846_v14  ;;  %v3875_v20 = vstv %s6688_s7  ;;  %v3947_v14 = vstv %s4822_s17  ;;  %s4826_s7 = sld [smem:[#allocation11 + $0x10f]]  ;;  %s4676_s17 = sld [smem:[#allocation11 + $0x7c]] }
 0x375   : > { %v3588_v61 = vrot.slane %v3584_v43, 5  ;;  %v3812_v43 = vstv %s6686_s19  ;;  %s4674_s19 = sld [smem:[#allocation11 + $0x7a]]  ;;  %v3781_v41 = vmul.f32 %v3780_v11, %v6704_v4  ;;  %v3948_v32 = vmul.f32 %v3947_v14, %v6704_v4 }
 0x376   : > { %v2001_v63 = vadd.f32 %v1996_v48, %v1929_v53  ;;  %v2002_v59 = vadd.f32 %v1998_v47, %v1930_v45  ;;  %v3912_v45 = vmul.f32 %v3911_v9, %v6704_v4 }
 0x377   : > { %3342 = vrot.lane.b32.xlu0 %v3341_v21, %s7863_s5  ;;  %3378 = vrot.lane.b32.xlu1 %v3377_v3, %s7861_s30  ;;  %v3635_v21 = vmul.f32 %v3634_v29, %v6613_v38  ;;  %v3738_v3 = vstv %s6649_s9  ;;  %v3589_v51 = vsel %vm314_vm5, %v3587_v55, %v3588_v61  ;;  %v3688_v29 = vmul.f32 0.0, %v3686_v31  ;;  %s4673_s9 = sld [smem:[#allocation11 + $0x79]] }
 0x378   : > { %v2081_v37 = vadd.f32 %v6375_v50, %v2001_v63  ;;  %v3740_v34 = vmul.f32 0.0, %v3738_v3  ;;  %v3739_v60 = vmul.f32 %v3738_v3, %v6613_v38  ;;  %v2082_v50 = vadd.f32 %v6390_v1, %v2002_v59 }
 0x379   : > { %v3639_v49 = vrot.slane %v3635_v21, 5  ;;  %v3692_v15 = vrot.slane %v3688_v29, 6  ;;  %v4199_v55 = vstv %s6711_s27  ;;  %v3950_v61 = vrot.slane %v3948_v32, 3  ;;  %s6731_s27 = sld [smem:[#allocation11 + $0x82]] }
 0x37a   : > { %v2165_v17 = vadd.f32 %v6423_v12, %v2081_v37  ;;  %v3744_v25 = vrot.slane %v3740_v34, 6  ;;  %v2166_v12 = vadd.f32 %v6436_v40, %v2082_v50  ;;  %v3813_v40 = vmul.f32 %v3812_v43, %v6704_v4 }
 0x37b   : > { %3414 = vrot.lane.b32.xlu0 %v3413_v42, %s7859_s20  ;;  %3450 = vrot.lane.b32.xlu1 %v3449_v54, %s7857_s4  ;;  %v3641_v42 = vsel %vm314_vm5, %v3639_v49, %v3640_v16  ;;  %v3743_v54 = vrot.slane %v3739_v60, 6  ;;  %v3693_v53 = vsel %vm1142_vm10, %v3691_v24, %v3692_v15  ;;  %v2499_v63 = vstv %s4674_s19  ;;  %s4760_s19 = sld [smem:[#allocation11 + $0xcd]] }
 0x37c   : > { %v2248_v46 = vadd.f32 %v2243_v18, %v2165_v17  ;;  %v2249_v1 = vadd.f32 %v6476_v56, %v2166_v12  ;;  %v3876_v56 = vmul.f32 %v3875_v20, %v6704_v4  ;;  %v3983_v47 = vstv %s4826_s7  ;;  %s4683_s7 = sld [smem:[#allocation11 + $0x83]] }
 0x37d   : > { %v3745_v23 = vsel %vm1142_vm10, %v3743_v54, %v3744_v25  ;;  %v2490_v48 = vstv %s4673_s9  ;;  %v4201_v36 = vmul.f32 0.0, %v4199_v55  ;;  %v2500_v34 = vmul.f32 %v2499_v63, %v6497_v62  ;;  %s4677_s9 = sld [smem:[#allocation11 + $0x7d]] }
 0x37e   : > { %v3878_v28 = vrot.slane %v3876_v56, 2  ;;  %v3984_v31 = vmul.f32 %v3983_v47, %v6704_v4  ;;  %v4200_v18 = vmul.f32 %v4199_v55, %v6704_v4  ;;  %v4147_v49 = vstv %s4842_s8  ;;  %s4764_s8 = sld [smem:[#allocation11 + $0xd1]] }
 0x37f   : > { %3486 = vrot.lane.b32.xlu0 %v3485_v13, %s8061_s11  ;;  %3522 = vrot.lane.b32.xlu1 %v3521_v57, %s8072_s23  ;;  %v2491_v13 = vmul.f32 %v2490_v48, %v6497_v62  ;;  %v4019_v57 = vstv %s4830_s28  ;;  %v2502_v16 = vrot.slane %v2500_v34, 3  ;;  %v4205_v59 = vrot.slane %v4201_v36, 6  ;;  %s4756_s28 = sld [smem:[#allocation11 + $0xc9]] }
 0x380   : > { %v4020_v3 = vmul.f32 %v4019_v57, %v6704_v4  ;;  %v3986_v60 = vrot.slane %v3984_v31, 3  ;;  %v4204_v30 = vrot.slane %v4200_v18, 6  ;;  %v2517_v50 = vstv %s4676_s17  ;;  %s4757_s17 = sld [smem:[#allocation11 + $0xca]] }
 0x381   : > { %v2493_v21 = vrot.slane %v2491_v13, 3  ;;  %v4149_v33 = vmul.f32 0.0, %v4147_v49  ;;  %v2563_v54 = vstv %s6731_s27  ;;  %v3356_v14 = vstv %s4760_s19  ;;  %s4765_s27 = sld [smem:[#allocation11 + $0xd2]]  ;;  %s6761_s19 = sld [smem:[#allocation11 + $0xd5]] }
 0x382   : > { %v4022_v37 = vrot.slane %v4020_v3, 4  ;;  %v4206_v25 = vsel %vm1142_vm10, %v4204_v30, %v4205_v59  ;;  %v2564_v15 = vmul.f32 %v2563_v54, %v6497_v62  ;;  %v2572_v48 = vstv %s4683_s7  ;;  %s8075_s7 = smov 127  }
 0x383   : > { %2485 = vrot.lane.b32.xlu0 %v2484_v8, %s8061_s11  ;;  %3590 = vrot.lane.b32.xlu1 %v3589_v51, %s7863_s5  ;;  %v3914_v8 = vrot.slane %v3912_v45, 2  ;;  %v4153_v2 = vrot.slane %v4149_v33, 6  ;;  %v2526_v20 = vstv %s4677_s9  ;;  %s4689_s9 = sld [smem:[#allocation11 + $0x89]]  ;;  %v3357_v32 = vmul.f32 %v3356_v14, %v6613_v38 }
 0x384   : > { %v2573_v13 = vmul.f32 %v2572_v48, %v6497_v62  ;;  %v3392_v57 = vstv %s4764_s8  ;;  %s6770_s8 = sld [smem:[#allocation11 + $0xda]] }
 0x385   : > { %v3322_v11 = vstv %s4756_s28  ;;  %v3359_v9 = vrot.slane %v3357_v32, 1  ;;  %s6759_s28 = sld [smem:[#allocation11 + $0xd9]] }
 0x386   : > { %v2575_v55 = vrot.slane %v2573_v13, 4 }
 0x387   : > { %3642 = vrot.lane.b32.xlu0 %v3641_v42, %s7861_s30  ;;  %2252 = vrot.lane.b32.xlu1 %v2248_v46, %s7857_s4  ;;  %v4148_v46 = vmul.f32 %v4147_v49, %v6704_v4  ;;  %v2518_v42 = vmul.f32 %v2517_v50, %v6497_v62  ;;  %v3401_v3 = vstv %s4765_s27  ;;  %s6776_s27 = sld [smem:[#allocation11 + $0x91]] }
 0x389   : > { %v4152_v12 = vrot.slane %v4148_v46, 6  ;;  %v2520_v24 = vrot.slane %v2518_v42, 3  ;;  %v2642_v63 = vstv %s4689_s9  ;;  %s8077_s9 = smov 2  }
 0x38a   : > { %v2643_v31 = vmul.f32 %v2642_v63, %v6497_v62  ;;  %v2644_v18 = vmul.f32 0.0, %v2642_v63 }
 0x38b   : > { %3746 = vrot.lane.b32.xlu0 %v3745_v23, %s7857_s4  ;;  %2254 = vrot.lane.b32.xlu1 %v2249_v1, %s7857_s4  ;;  %s4834_s4 = sld [smem:[#allocation11 + $0x117]]  ;;  %v2508_v1 = vstv %s4675_s10  ;;  %v4154_v43 = vsel %vm1142_vm10, %v4152_v12, %v4153_v2  ;;  %s4761_s10 = sld [smem:[#allocation11 + $0xce]]  ;;  %v3464_v59 = vstv %s6759_s28 }
 0x38c   : > { %v2509_v23 = vmul.f32 %v2508_v1, %v6497_v62  ;;  %v2647_v30 = vrot.slane %v2643_v31, 5  ;;  %v2648_v50 = vrot.slane %v2644_v18, 5  ;;  %v3465_v54 = vmul.f32 %v3464_v59, %v6613_v38  ;;  %s6787_s28 = sld [smem:[#allocation11 + $0xdd]] }
 0x38d   : > { %v3473_v1 = vstv %s6770_s8  ;;  %s6804_s8 = sld [smem:[#allocation11 + $0x95]] }
 0x38e   : > { %v2511_v56 = vrot.slane %v2509_v23, 3  ;;  %v2649_v12 = vsel %vm314_vm5, %v2647_v30, %v2648_v50 }
 0x38f   : > { %3815 = vrot.lane.b32.xlu0 %v3813_v40, %s8072_s23  ;;  %3694 = vrot.lane.b32.xlu1 %v3693_v53, %s7859_s20  ;;  %v2566_v40 = vrot.slane %v2564_v15, 4  ;;  %v2527_v53 = vmul.f32 %v2526_v20, %v6497_v62  ;;  %v2746_v15 = vstv %s6776_s27  ;;  %v3467_v20 = vrot.slane %v3465_v54, 3  ;;  %s6815_s27 = sld [smem:[#allocation11 + $0xe5]] }
 0x390   : > { %v2748_v14 = vmul.f32 0.0, %v2746_v15  ;;  %v3573_v54 = vstv %s6824_s0  ;;  %s6871_s0 = sld [smem:[#allocation11 + $0xa5]] }
 0x391   : > { %v4055_v51 = vstv %s4834_s4  ;;  %s8073_s4 = smov 126   ;;  %v3365_v45 = vstv %s4761_s10  ;;  %s6778_s10 = sld [smem:[#allocation11 + $0x8d]] }
 0x392   : > { %v4056_v17 = vmul.f32 %v4055_v51, %v6704_v4  ;;  %v3366_v34 = vmul.f32 %v3365_v45, %v6613_v38 }
 0x393   : > { %3879 = vrot.lane.b32.xlu0 %v3878_v28, %s7863_s5  ;;  %3783 = vrot.lane.b32.xlu1 %v3781_v41, %s8061_s11  ;;  %v3323_v28 = vmul.f32 %v3322_v11, %v6613_v38  ;;  %v2529_v41 = vrot.slane %v2527_v53, 3  ;;  %v2747_v11 = vmul.f32 %v2746_v15, %v6497_v62 }
 0x394   : > { %v4058_v29 = vrot.slane %v4056_v17, 4  ;;  %v3428_v17 = vstv %s6761_s19  ;;  %s6800_s19 = sld [smem:[#allocation11 + $0xde]] }
 0x397   : > { %3951 = vrot.lane.b32.xlu0 %v3950_v61, %s7859_s20  ;;  %2494 = vrot.lane.b32.xlu1 %v2493_v21, %s8061_s11  ;;  %s8074_s20 = smov 124   ;;  %v3393_v61 = vmul.f32 %v3392_v57, %v6613_v38  ;;  %v3330_v21 = vstv %s4757_s17  ;;  %s6772_s17 = sld [smem:[#allocation11 + $0xd6]]  ;;  %v2694_v23 = vstv %s6778_s10 }
 0x398   : > { %v2695_v48 = vmul.f32 %v2694_v23, %v6497_v62  ;;  %s6817_s10 = sld [smem:[#allocation11 + $0xed]] }
 0x399   : > { %v3395_v36 = vrot.slane %v3393_v61, 1  ;;  %v2751_v61 = vrot.slane %v2747_v11, 6 }
 0x39b   : > { %4023 = vrot.lane.b32.xlu0 %v4022_v37, %s8061_s11  ;;  %3915 = vrot.lane.b32.xlu1 %v3914_v8, %s7861_s30  ;;  %v3331_v37 = vmul.f32 %v3330_v21, %v6613_v38  ;;  %v3402_v8 = vmul.f32 %v3401_v3, %v6613_v38  ;;  %v2752_v21 = vrot.slane %v2748_v14, 6  ;;  %v2699_v3 = vrot.slane %v2695_v48, 6 }
 0x39d   : > { %v2753_v31 = vsel %vm1142_vm10, %v2751_v61, %v2752_v21 }
 0x39e   : > { %v3660_v50 = vstv %s6817_s10  ;;  %s6913_s10 = sld [smem:[#allocation11 + $0xa9]] }
 0x39f   : > { %2503 = vrot.lane.b32.xlu0 %v2502_v16, %s8072_s23  ;;  %3987 = vrot.lane.b32.xlu1 %v3986_v60, %s8073_s4  ;;  %v3404_v16 = vrot.slane %v3402_v8, 2  ;;  %v3368_v60 = vrot.slane %v3366_v34, 1  ;;  %v3509_v8 = vstv %s6800_s19  ;;  %s6858_s19 = sld [smem:[#allocation11 + $0xf1]] }
 0x3a0   : > { %v3510_v30 = vmul.f32 %v3509_v8, %v6613_v38 }
 0x3a3   : > { %4207 = vrot.lane.b32.xlu0 %v4206_v25, %s7861_s30  ;;  %4059 = vrot.lane.b32.xlu1 %v4058_v29, %s8072_s23  ;;  %s4685_s30 = sld [smem:[#allocation11 + $0x85]]  ;;  %v2296_v29 = vpop.permute.xlu1 %2295  ;;  %v3429_v25 = vmul.f32 %v3428_v17, %v6613_v38 }
 0x3a4   : > { %v2298_v42 = vsel %vm306_vm3, 0.0, %v2296_v29 }
 0x3a7   : > { %2521 = vrot.lane.b32.xlu0 %v2520_v24, %s8072_s23  ;;  %4155 = vrot.lane.b32.xlu1 %v4154_v43, %s7863_s5  ;;  %v3437_v24 = vstv %s6772_s17  ;;  %v2299_v43 = vsel %vm309_vm4, %v2298_v42, 0.0  ;;  %s6808_s17 = sld [smem:[#allocation11 + $0xe9]] }
 0x3a8   : > { %v3438_v53 = vmul.f32 %v3437_v24, %v6613_v38 }
 0x3a9   : > { %v2590_v47 = vstv %s4685_s30  ;;  %s8076_s30 = smov 123  }
 0x3aa   : > { %v2591_v51 = vmul.f32 %v2590_v47, %v6497_v62  ;;  %v2592_v49 = vmul.f32 0.0, %v2590_v47 }
 0x3ab   : > { %2567 = vrot.lane.b32.xlu0 %v2566_v40, %s8074_s20  ;;  %2512 = vrot.lane.b32.xlu1 %v2511_v56, %s8072_s23  ;;  %v3431_v40 = vrot.slane %v3429_v25, 2  ;;  %v3474_v56 = vmul.f32 %v3473_v1, %v6613_v38  ;;  %v3662_v25 = vmul.f32 0.0, %v3660_v50  ;;  %v3512_v1 = vrot.slane %v3510_v30, 3 }
 0x3ac   : > { %v2595_v46 = vrot.slane %v2591_v51, 5  ;;  %v2596_v33 = vrot.slane %v2592_v49, 5  ;;  %v2788_v51 = vstv %s6804_s8  ;;  %s6895_s8 = sld [smem:[#allocation11 + $0xf5]] }
 0x3ad   : > { %v3476_v57 = vrot.slane %v3474_v56, 3  ;;  %v3608_v49 = vstv %s6808_s17  ;;  %v3673_v56 = vstv %s6840_s1  ;;  %v3666_v61 = vrot.slane %v3662_v25, 5  ;;  %s6883_s1 = sld [smem:[#allocation11 + $0xf2]]  ;;  %s6905_s17 = sld [smem:[#allocation11 + $0xc7]] }
 0x3ae   : > { %v2597_v2 = vsel %vm314_vm5, %v2595_v46, %v2596_v33  ;;  %v3564_v33 = vstv %s6815_s27  ;;  %v3609_v29 = vmul.f32 %v3608_v49, %v6613_v38  ;;  %v3610_v42 = vmul.f32 0.0, %v3608_v49  ;;  %s6907_s27 = sld [smem:[#allocation11 + $0xf6]] }
 0x3af   : > { %3325 = vrot.lane.b32.xlu0 %v3323_v28, %s8074_s20  ;;  %2530 = vrot.lane.b32.xlu1 %v2529_v41, %s8072_s23  ;;  %v2696_v28 = vmul.f32 0.0, %v2694_v23  ;;  %v2301_v41 = vrot.slane %v2299_v43, 5  ;;  %v3565_v15 = vmul.f32 %v3564_v33, %v6613_v38  ;;  %v3674_v21 = vmul.f32 %v3673_v56, %v6613_v38 }
 0x3b0   : > { %v3613_v43 = vrot.slane %v3609_v29, 5 }
 0x3b1   : > { %v2700_v45 = vrot.slane %v2696_v28, 6  ;;  %v2303_v63 = vsel %vm314_vm5, 0.0, %v2301_v41  ;;  %v3567_v48 = vrot.slane %v3565_v15, 4  ;;  %v3574_v28 = vmul.f32 %v3573_v54, %v6613_v38 }
 0x3b2   : > { %v6835_v34 = vsel %vm419_vm6, %v2303_v63, 0.0  ;;  %v3678_v49 = vrot.slane %v3674_v21, 6 }
 0x3b3   : > { %3360 = vrot.lane.b32.xlu0 %v3359_v9, %s8075_s7  ;;  %2576 = vrot.lane.b32.xlu1 %v2575_v55, %s8074_s20  ;;  %v3440_v9 = vrot.slane %v3438_v53, 2  ;;  %v3500_v55 = vstv %s6787_s28  ;;  %s6832_s28 = sld [smem:[#allocation11 + $0xea]]  ;;  %v2701_v18 = vsel %vm1142_vm10, %v2699_v3, %v2700_v45  ;;  %v2789_v17 = vmul.f32 %v2788_v51, %v6835_v34 }
 0x3b4   : > { %v3712_v3 = vstv %s6858_s19  ;;  %s6925_s19 = sld [smem:[#allocation11 + $0xb1]] }
 0x3b5   : > { %v3714_v29 = vmul.f32 0.0, %v3712_v3  ;;  %v3713_v25 = vmul.f32 %v3712_v3, %v6613_v38  ;;  %v3772_v3 = vstv %s6907_s27  ;;  %s6955_s27 = sld [smem:[#allocation11 + $0x101]] }
 0x3b7   : > { %3396 = vrot.lane.b32.xlu0 %v3395_v36, %s8076_s30  ;;  %3333 = vrot.lane.b32.xlu1 %v3331_v37, %s8074_s20  ;;  %v3501_v37 = vmul.f32 %v3500_v55, %v6613_v38 }
 0x3b9   : > { %v3503_v59 = vrot.slane %v3501_v37, 3  ;;  %v3621_v23 = vstv %s6832_s28  ;;  %v3576_v37 = vrot.slane %v3574_v28, 4  ;;  %s6915_s28 = sld [smem:[#allocation11 + $0xad]] }
 0x3ba   : > { %v3623_v53 = vmul.f32 0.0, %v3621_v23  ;;  %v3622_v41 = vmul.f32 %v3621_v23, %v6613_v38 }
 0x3bb   : > { %3405 = vrot.lane.b32.xlu0 %v3404_v16, %s8077_s9  ;;  %3369 = vrot.lane.b32.xlu1 %v3368_v60, %s8075_s7 }
 0x3bc   : > { %v3626_v8 = vrot.slane %v3622_v41, 5 }
 0x3bf   : > { %2650 = vrot.lane.b32.xlu0 %v2649_v12, %s8075_s7  ;;  %2598 = vrot.lane.b32.xlu1 %v2597_v2, %s7863_s5  ;;  %s6819_s5 = sld [smem:[#allocation11 + $0x99]] }
 0x3c3   : > { %3468 = vrot.lane.b32.xlu0 %v3467_v20, %s8061_s11  ;;  %3432 = vrot.lane.b32.xlu1 %v3431_v40, %s8073_s4  ;;  %v3614_v20 = vrot.slane %v3610_v42, 5  ;;  %v3661_v40 = vmul.f32 %v3660_v50, %v6613_v38 }
 0x3c5   : > { %v6810_v32 = vpop.permute.xlu0 %2325  ;;  %v6812_v13 = vpop.permute.xlu1 %2333  ;;  %v2820_v46 = vstv %s6819_s5  ;;  %s6869_s5 = sld [smem:[#allocation11 + $0xa1]]  ;;  %v3665_v55 = vrot.slane %v3661_v40, 5 }
 0x3c6   : > { %v2821_v24 = vmul.f32 %v2820_v46, %v6835_v34 }
 0x3c7   : > { %3477 = vrot.lane.b32.xlu0 %v3476_v57, %s8061_s11  ;;  %3441 = vrot.lane.b32.xlu1 %v3440_v9, %s8073_s4  ;;  %v3675_v57 = vmul.f32 0.0, %v3673_v56  ;;  %v3615_v9 = vsel %vm314_vm5, %v3613_v43, %v3614_v20  ;;  %v3667_v51 = vsel %vm314_vm5, %v3665_v55, %v3666_v61  ;;  %v3717_v56 = vrot.slane %v3713_v25, 6 }
 0x3c9   : > { %v6826_v47 = vpop.permute.xlu0 %2341  ;;  %v6828_v36 = vpop.permute.xlu1 %2350 }
 0x3cb   : > { %2754 = vrot.lane.b32.xlu0 %v2753_v31, %s8073_s4  ;;  %2702 = vrot.lane.b32.xlu1 %v2701_v18, %s8077_s9  ;;  %v3627_v31 = vrot.slane %v3623_v53, 5  ;;  %v3679_v18 = vrot.slane %v3675_v57, 6  ;;  %v3718_v53 = vrot.slane %v3714_v29, 6  ;;  %v3027_v29 = vstv %s6925_s19  ;;  %s6967_s19 = sld [smem:[#allocation11 + $0x109]] }
 0x3cd   : > { %v6845_v16 = vpop.permute.xlu0 %2359  ;;  %v6847_v60 = vpop.permute.xlu1 %2368  ;;  %v3628_v42 = vsel %vm314_vm5, %v3626_v8, %v3627_v31  ;;  %v3680_v54 = vsel %vm1142_vm10, %v3678_v49, %v3679_v18  ;;  %v3719_v21 = vsel %vm1142_vm10, %v3717_v56, %v3718_v53  ;;  %v2991_v8 = vstv %s6915_s28  ;;  %s6965_s28 = sld [smem:[#allocation11 + $0x102]] }
 0x3ce   : > { %v3773_v49 = vmul.f32 %v3772_v3, %v6704_v4 }
 0x3cf   : > { %3504 = vrot.lane.b32.xlu1 %v3503_v59, %s8072_s23  ;;  %2791 = vrot.lane.b32.xlu0 %v2789_v17, %s8061_s11  ;;  %v2883_v59 = vstv %s6869_s5  ;;  %v2919_v17 = vstv %s6871_s0  ;;  %s8078_s5 = smov 3   ;;  %s6935_s0 = sld [smem:[#allocation11 + $0xe3]] }
 0x3d0   : > { %v2884_v46 = vmul.f32 %v2883_v59, %v6835_v34  ;;  %v2920_v33 = vmul.f32 %v2919_v17, %v6835_v34  ;;  %v2992_v17 = vmul.f32 %v2991_v8, %v6835_v34 }
 0x3d1   : > { %v6860_v12 = vpop.permute.xlu0 %2377  ;;  %v6862_v2 = vpop.permute.xlu1 %2386 }
 0x3d2   : > { %v2886_v23 = vrot.slane %v2884_v46, 2  ;;  %v2922_v43 = vrot.slane %v2920_v33, 2 }
 0x3d3   : > { %3513 = vrot.lane.b32.xlu1 %v3512_v1, %s8072_s23  ;;  %2823 = vrot.lane.b32.xlu0 %v2821_v24, %s8072_s23  ;;  %v3725_v1 = vstv %s6883_s1  ;;  %s6941_s1 = sld [smem:[#allocation11 + $0xf9]] }
 0x3d4   : > { %v3726_v20 = vmul.f32 %v3725_v1, %v6613_v38  ;;  %v3727_v40 = vmul.f32 0.0, %v3725_v1 }
 0x3d5   : > { %v6875_v11 = vpop.permute.xlu0 %2395  ;;  %v6877_v14 = vpop.permute.xlu1 %2404  ;;  %v3548_v56 = vstv %s6935_s0  ;;  %s6979_s0 = sld [smem:[#allocation11 + $0x10a]] }
 0x3d6   : > { %v3730_v55 = vrot.slane %v3726_v20, 6  ;;  %v3731_v61 = vrot.slane %v3727_v40, 6 }
 0x3d7   : > { %3568 = vrot.lane.b32.xlu1 %v3567_v48, %s8074_s20  ;;  %3616 = vrot.lane.b32.xlu0 %v3615_v9, %s8075_s7  ;;  %v3764_v48 = vstv %s6895_s8  ;;  %v3310_v9 = vstv %s6905_s17  ;;  %s6943_s8 = sld [smem:[#allocation11 + $0xb5]]  ;;  %s6951_s17 = sld [smem:[#allocation11 + $0xfa]] }
 0x3d8   : > { %v3765_v57 = vmul.f32 %v3764_v48, %v6704_v4  ;;  %v3311_v31 = vmul.f32 %v3310_v9, %v6613_v38  ;;  %v3732_v33 = vsel %vm1142_vm10, %v3730_v55, %v3731_v61 }
 0x3d9   : > { %v6888_v45 = vpop.permute.xlu0 %2413  ;;  %v6890_v63 = vpop.permute.xlu1 %2422  ;;  %v3796_v40 = vstv %s6941_s1  ;;  %s6981_s1 = sld [smem:[#allocation11 + $0xbd]] }
 0x3da   : > { %v3797_v55 = vmul.f32 %v3796_v40, %v6704_v4 }
 0x3db   : > { %3577 = vrot.lane.b32.xlu1 %v3576_v37, %s8074_s20  ;;  %3668 = vrot.lane.b32.xlu0 %v3667_v51, %s8076_s30  ;;  %v2955_v37 = vstv %s6913_s10  ;;  %s6957_s10 = sld [smem:[#allocation11 + $0x105]] }
 0x3dc   : > { %v2956_v59 = vmul.f32 %v2955_v37, %v6835_v34 }
 0x3dd   : > { %v6899_v30 = vpop.permute.xlu0 %2431  ;;  %v6901_v50 = vpop.permute.xlu1 %2440  ;;  %v3063_v53 = vstv %s6943_s8  ;;  %v3804_v8 = vstv %s6951_s17  ;;  %s6985_s8 = sld [smem:[#allocation11 + $0xc1]]  ;;  %s6997_s17 = sld [smem:[#allocation11 + $0x10d]] }
 0x3de   : > { %v2958_v1 = vrot.slane %v2956_v59, 3  ;;  %v3064_v3 = vmul.f32 %v3063_v53, %v6835_v34 }
 0x3df   : > { %3629 = vrot.lane.b32.xlu1 %v3628_v42, %s8075_s7  ;;  %3681 = vrot.lane.b32.xlu0 %v3680_v54, %s8077_s9 }
 0x3e1   : > { %v6919_v24 = vpop.permute.xlu0 %2449  ;;  %v6921_v15 = vpop.permute.xlu1 %2458 }
 0x3e3   : > { %2887 = vrot.lane.b32.xlu1 %v2886_v23, %s8078_s5  ;;  %2923 = vrot.lane.b32.xlu0 %v2922_v43, %s8075_s7  ;;  %v2994_v23 = vrot.slane %v2992_v17, 3  ;;  %v3028_v43 = vmul.f32 %v3027_v29, %v6835_v34  ;;  %v3805_v17 = vmul.f32 %v3804_v8, %v6704_v4 }
 0x3e5   : > { %v6929_v28 = vpop.permute.xlu0 %2467  ;;  %v6931_v41 = vpop.permute.xlu1 %2476  ;;  %v3030_v61 = vrot.slane %v3028_v43, 4 }
 0x3e6   : > { %8079 = vst [vmem:[#allocation68_spill] sm:$0xff] %v6929_v28 }
 0x3e7   : > { %3720 = vrot.lane.b32.xlu1 %v3719_v21, %s8073_s4  ;;  %3767 = vrot.lane.b32.xlu0 %v3765_v57, %s8061_s11  ;;  %v3549_v21 = vmul.f32 %v3548_v56, %v6613_v38 }
 0x3e9   : > { %v3343_v18 = vpop.permute.xlu0 %3342  ;;  %v3379_v51 = vpop.permute.xlu1 %3378 }
 0x3ea   : > { %v3345_v46 = vadd.f32 %v3343_v18, %v3311_v31  ;;  %v3857_v31 = vstv %s6955_s27  ;;  %v3893_v18 = vstv %s6957_s10  ;;  %s6999_s27 = sld [smem:[#allocation11 + $0x111]]  ;;  %s7005_s10 = sld [smem:[#allocation11 + $0xff]] }
 0x3eb   : > { %3733 = vrot.lane.b32.xlu1 %v3732_v33, %s8073_s4  ;;  %3775 = vrot.lane.b32.xlu0 %v3773_v49, %s8061_s11  ;;  %v3858_v33 = vmul.f32 %v3857_v31, %v6704_v4  ;;  %v3894_v29 = vmul.f32 %v3893_v18, %v6704_v4 }
 0x3ec   : > { %v3381_v42 = vadd.f32 %v3379_v51, %v3345_v46  ;;  %v3066_v46 = vrot.slane %v3064_v3, 4 }
 0x3ed   : > { %v3415_v54 = vpop.permute.xlu0 %3414  ;;  %v3451_v25 = vpop.permute.xlu1 %3450  ;;  %v3860_v40 = vrot.slane %v3858_v33, 1  ;;  %v3896_v56 = vrot.slane %v3894_v29, 2  ;;  %v3965_v29 = vstv %s6997_s17  ;;  %s7038_s17 = sld [smem:[#allocation11 + $0x125]] }
 0x3ee   : > { %v3417_v20 = vadd.f32 %v3415_v54, %v3381_v42  ;;  %v3551_v42 = vrot.slane %v3549_v21, 4  ;;  %v3866_v54 = vstv %s6965_s28  ;;  %s7020_s28 = sld [smem:[#allocation11 + $0x115]] }
 0x3ef   : > { %2959 = vrot.lane.b32.xlu1 %v2958_v1, %s8077_s9  ;;  %2995 = vrot.lane.b32.xlu0 %v2994_v23, %s8073_s4  ;;  %v3902_v23 = vstv %s6971_s2  ;;  %v3867_v53 = vmul.f32 %v3866_v54, %v6704_v4  ;;  %s7017_s2 = sld [smem:[#allocation11 + $0x10e]] }
 0x3f0   : > { %v3453_v48 = vadd.f32 %v3451_v25, %v3417_v20  ;;  %v3929_v25 = vstv %s6967_s19  ;;  %v3903_v21 = vmul.f32 %v3902_v23, %v6704_v4  ;;  %s7024_s19 = sld [smem:[#allocation11 + $0x11d]] }
 0x3f1   : > { %v3487_v57 = vpop.permute.xlu0 %3486  ;;  %v3523_v9 = vpop.permute.xlu1 %3522  ;;  %v3869_v8 = vrot.slane %v3867_v53, 1 }
 0x3f2   : > { %v3489_v37 = vadd.f32 %v3487_v57, %v3453_v48  ;;  %v3930_v48 = vmul.f32 %v3929_v25, %v6704_v4  ;;  %v3938_v57 = vstv %s6979_s0  ;;  %s7028_s0 = sld [smem:[#allocation11 + $0x121]] }
 0x3f3   : > { %3799 = vrot.lane.b32.xlu1 %v3797_v55, %s8072_s23  ;;  %3031 = vrot.lane.b32.xlu0 %v3030_v61, %s8061_s11  ;;  %v3207_v55 = vstv %s6985_s8  ;;  %v3939_v18 = vmul.f32 %v3938_v57, %v6704_v4  ;;  %s7035_s8 = sld [smem:[#allocation11 + $0x11b]] }
 0x3f4   : > { %v3525_v51 = vadd.f32 %v3523_v9, %v3489_v37  ;;  %v3155_v9 = vstv %s6981_s1  ;;  %v3932_v31 = vrot.slane %v3930_v48, 2  ;;  %s7031_s1 = sld [smem:[#allocation11 + $0x112]] }
 0x3f5   : > { %v6987_v49 = vpop.permute.xlu0 %2485  ;;  %v3591_v59 = vpop.permute.xlu1 %3590  ;;  %v3941_v23 = vrot.slane %v3939_v18, 3  ;;  %v3974_v18 = vstv %s7017_s2  ;;  %s7058_s2 = sld [smem:[#allocation11 + $0x122]] }
 0x3f6   : > { %v3553_v1 = vadd.f32 %v3551_v42, %v3525_v51  ;;  %v3156_v51 = vmul.f32 %v3155_v9, %v6835_v34  ;;  %v4001_v42 = vstv %s6999_s27  ;;  %s7040_s27 = sld [smem:[#allocation11 + $0x11e]] }
 0x3f7   : > { %3807 = vrot.lane.b32.xlu1 %v3805_v17, %s8072_s23  ;;  %3067 = vrot.lane.b32.xlu0 %v3066_v46, %s8072_s23  ;;  %v3157_v17 = vmul.f32 0.0, %v3155_v9  ;;  %v3208_v46 = vmul.f32 %v3207_v55, %v6835_v34 }
 0x3f8   : > { %v3593_v61 = vadd.f32 %v3591_v59, %v3553_v1  ;;  %v3209_v59 = vmul.f32 0.0, %v3207_v55  ;;  %v3905_v1 = vrot.slane %v3903_v21, 2 }
 0x3f9   : > { %v3643_v43 = vpop.permute.xlu0 %3642  ;;  %v7001_v20 = vpop.permute.xlu1 %2252  ;;  %v3161_v48 = vrot.slane %v3157_v17, 6  ;;  %v3212_v57 = vrot.slane %v3208_v46, 6  ;;  %v4037_v46 = vstv %s7020_s28  ;;  %s7079_s28 = sld [smem:[#allocation11 + $0xd0]] }
 0x3fa   : > { %8080 = vst [vmem:[#allocation71_spill] sm:$0xff] %v7001_v20  ;;  %v3645_v33 = vadd.f32 %v3643_v43, %v3593_v61  ;;  %v3213_v9 = vrot.slane %v3209_v59, 6  ;;  %v4121_v59 = vstv %s7024_s19  ;;  %s7086_s19 = sld [smem:[#allocation11 + $0x87]] }
 0x3fb   : > { %3861 = vrot.lane.b32.xlu1 %v3860_v40, %s8074_s20  ;;  %3897 = vrot.lane.b32.xlu0 %v3896_v56, %s8075_s7  ;;  %v3160_v40 = vrot.slane %v3156_v51, 6  ;;  %v3841_v56 = vstv %s7005_s10  ;;  %s7048_s10 = sld [smem:[#allocation11 + $0x116]] }
 0x3fc   : > { %v3842_v55 = vmul.f32 %v3841_v56, %v6704_v4  ;;  %v3975_v56 = vmul.f32 %v3974_v18, %v6704_v4 }
 0x3fd   : > { %v3747_v3 = vpop.permute.xlu0 %3746  ;;  %v7013_v37 = vpop.permute.xlu1 %2254  ;;  %v3162_v17 = vsel %vm1142_vm10, %v3160_v40, %v3161_v48 }
 0x3fe   : > { %8081 = vst [vmem:[#allocation75_spill] sm:$0xff] %v7013_v37 }
 0x3ff   : > { %3870 = vrot.lane.b32.xlu1 %v3869_v8, %s8074_s20  ;;  %3933 = vrot.lane.b32.xlu0 %v3932_v31, %s8076_s30  ;;  %v3966_v8 = vmul.f32 %v3965_v29, %v6704_v4  ;;  %v4002_v31 = vmul.f32 %v4001_v42, %v6704_v4  ;;  %v4173_v29 = vstv %s7028_s0  ;;  %s7090_s0 = sld [smem:[#allocation11 + $0xcc]] }
 0x401   : > { %v3816_v54 = vpop.permute.xlu0 %3815  ;;  %v3695_v25 = vpop.permute.xlu1 %3694  ;;  %v4004_v40 = vrot.slane %v4002_v31, 4  ;;  %v4134_v31 = vstv %s7040_s27  ;;  %s7116_s27 = sld [smem:[#allocation11 + $0xd4]] }
 0x402   : > { %v3697_v53 = vadd.f32 %v3695_v25, %v3645_v33  ;;  %v3844_v25 = vrot.slane %v3842_v55, 1 }
 0x403   : > { %3906 = vrot.lane.b32.xlu1 %v3905_v1, %s8075_s7  ;;  %3942 = vrot.lane.b32.xlu0 %v3941_v23, %s8077_s9  ;;  %v3968_v23 = vrot.slane %v3966_v8, 3  ;;  %v4225_v8 = vstv %s7038_s17  ;;  %s7108_s17 = sld [smem:[#allocation11 + $0xd8]] }
 0x404   : > { %v3749_v43 = vadd.f32 %v3747_v3, %v3697_v53  ;;  %v3214_v3 = vsel %vm1142_vm10, %v3212_v57, %v3213_v9  ;;  %v4038_v53 = vmul.f32 %v4037_v46, %v6704_v4  ;;  %v4010_v57 = vstv %s7031_s1  ;;  %s7094_s1 = sld [smem:[#allocation11 + $0x88]] }
 0x405   : > { %v3880_v61 = vpop.permute.xlu0 %3879  ;;  %v3784_v21 = vpop.permute.xlu1 %3783  ;;  %v4123_v9 = vmul.f32 0.0, %v4121_v59  ;;  %v4011_v46 = vmul.f32 %v4010_v57, %v6704_v4 }
 0x406   : > { %v3786_v51 = vadd.f32 %v3784_v21, %v3749_v43  ;;  %v4175_v43 = vmul.f32 0.0, %v4173_v29  ;;  %v4097_v21 = vstv %s7035_s8  ;;  %s7101_s8 = sld [smem:[#allocation11 + $0x84]] }
 0x407   : > { %3163 = vrot.lane.b32.xlu1 %v3162_v17, %s8078_s5  ;;  %3215 = vrot.lane.b32.xlu0 %v3214_v3, %s8075_s7  ;;  %v3977_v17 = vrot.slane %v3975_v56, 3  ;;  %v4040_v3 = vrot.slane %v4038_v53, 4  ;;  %v4127_v37 = vrot.slane %v4123_v9, 5  ;;  %v4098_v20 = vmul.f32 %v4097_v21, %v6704_v4  ;;  %s7076_s5 = sld [smem:[#allocation11 + $0xc8]] }
 0x408   : > { %v3818_v33 = vadd.f32 %v3816_v54, %v3786_v51  ;;  %v4122_v54 = vmul.f32 %v4121_v59, %v6704_v4  ;;  %v4227_v56 = vmul.f32 0.0, %v4225_v8  ;;  %v4136_v53 = vmul.f32 0.0, %v4134_v31 }
 0x409   : > { %v3952_v42 = vpop.permute.xlu0 %3951  ;;  %v7054_v1 = vpop.permute.xlu1 %2494  ;;  %v4186_v9 = vstv %s7058_s2  ;;  %s7123_s2 = sld [smem:[#allocation11 + $0x8b]] }
 0x40a   : > { %v3846_v48 = vadd.f32 %v3844_v25, %v3818_v33  ;;  %v4174_v33 = vmul.f32 %v4173_v29, %v6704_v4  ;;  %v4126_v59 = vrot.slane %v4122_v54, 5  ;;  %v4013_v29 = vrot.slane %v4011_v46, 4 }
 0x40b   : > { %3969 = vrot.lane.b32.xlu1 %v3968_v23, %s8073_s4  ;;  %4005 = vrot.lane.b32.xlu0 %v4004_v40, %s8061_s11  ;;  %v4046_v23 = vstv %s7048_s10  ;;  %v4099_v40 = vmul.f32 0.0, %v4097_v21  ;;  %v4135_v21 = vmul.f32 %v4134_v31, %v6704_v4  ;;  %s7118_s10 = sld [smem:[#allocation11 + $0x8f]] }
 0x40c   : > { %v3882_v55 = vadd.f32 %v3880_v61, %v3846_v48  ;;  %v4179_v61 = vrot.slane %v4175_v43, 6  ;;  %v4047_v54 = vmul.f32 %v4046_v23, %v6704_v4  ;;  %v4128_v43 = vsel %vm314_vm5, %v4126_v59, %v4127_v37 }
 0x40d   : > { %v4024_v18 = vpop.permute.xlu0 %4023  ;;  %v3916_v51 = vpop.permute.xlu1 %3915  ;;  %v4103_v46 = vrot.slane %v4099_v40, 5  ;;  %v4188_v59 = vmul.f32 0.0, %v4186_v9 }
 0x40e   : > { %v3918_v25 = vadd.f32 %v3916_v51, %v3882_v55  ;;  %v4178_v55 = vrot.slane %v4174_v33, 6  ;;  %v4231_v33 = vrot.slane %v4227_v56, 6  ;;  %v4049_v37 = vrot.slane %v4047_v54, 4 }
 0x40f   : > { %3978 = vrot.lane.b32.xlu1 %v3977_v17, %s8073_s4  ;;  %4041 = vrot.lane.b32.xlu0 %v4040_v3, %s8072_s23  ;;  %v4102_v3 = vrot.slane %v4098_v20, 5  ;;  %v3314_v56 = vstv %s7076_s5  ;;  %s7135_s5 = sld [smem:[#allocation11 + $0x90]] }
 0x410   : > { %v3954_v48 = vadd.f32 %v3952_v42, %v3918_v25  ;;  %v4226_v42 = vmul.f32 %v4225_v8, %v6704_v4  ;;  %v4140_v8 = vrot.slane %v4136_v53, 5  ;;  %v3383_v53 = vstv %s7079_s28  ;;  %s7139_s28 = sld [smem:[#allocation11 + $0x8c]] }
 0x411   : > { %v7073_v27 = vpop.permute.xlu0 %2503  ;;  %v3988_v57 = vpop.permute.xlu1 %3987  ;;  %v4104_v20 = vsel %vm314_vm5, %v4102_v3, %v4103_v46  ;;  %v3315_v46 = vmul.f32 %v3314_v56, %v6613_v38 }
 0x412   : > { %8082 = vst [vmem:[#allocation78_spill] sm:$0xff] %v7073_v27  ;;  %v3990_v51 = vadd.f32 %v3988_v57, %v3954_v48  ;;  %v4180_v48 = vsel %vm1142_vm10, %v4178_v55, %v4179_v61  ;;  %v4230_v57 = vrot.slane %v4226_v42, 6  ;;  %v2616_v42 = vstv %s7086_s19  ;;  %s7161_s19 = sld [smem:[#allocation11 + $0xdc]] }
 0x413   : > { %4014 = vrot.lane.b32.xlu1 %v4013_v29, %s8061_s11  ;;  %4129 = vrot.lane.b32.xlu0 %v4128_v43, %s8074_s20  ;;  %v4139_v29 = vrot.slane %v4135_v21, 5  ;;  %v4187_v43 = vmul.f32 %v4186_v9, %v6704_v4 }
 0x414   : > { %v4026_v17 = vadd.f32 %v4024_v18, %v3990_v51  ;;  %v4232_v55 = vsel %vm1142_vm10, %v4230_v57, %v4231_v33  ;;  %v4192_v51 = vrot.slane %v4188_v59, 6  ;;  %v3384_v33 = vmul.f32 %v3383_v53, %v6613_v38 }
 0x415   : > { %v4208_v25 = vpop.permute.xlu0 %4207  ;;  %v4060_v23 = vpop.permute.xlu1 %4059  ;;  %v4141_v54 = vsel %vm314_vm5, %v4139_v29, %v4140_v8  ;;  %v4191_v9 = vrot.slane %v4187_v43, 6  ;;  %v3347_v8 = vstv %s7090_s0  ;;  %v2629_v59 = vstv %s7094_s1  ;;  %s7168_s0 = sld [smem:[#allocation11 + $0xe4]]  ;;  %s7175_s1 = sld [smem:[#allocation11 + $0xe8]] }
 0x416   : > { %v4062_v31 = vadd.f32 %v4060_v23, %v4026_v17  ;;  %v3386_v43 = vrot.slane %v3384_v33, 1  ;;  %v2630_v53 = vmul.f32 %v2629_v59, %v6497_v62 }
 0x417   : > { %4181 = vrot.lane.b32.xlu0 %v4180_v48, %s8075_s7  ;;  %4050 = vrot.lane.b32.xlu1 %v4049_v37, %s8072_s23  ;;  %v4193_v23 = vsel %vm1142_vm10, %v4191_v9, %v4192_v51  ;;  %v2617_v48 = vmul.f32 %v2616_v42, %v6497_v62  ;;  %v2618_v37 = vmul.f32 0.0, %v2616_v42 }
 0x418   : > { %v4106_v61 = vadd.f32 %v4104_v20, %v4062_v31  ;;  %v3348_v20 = vmul.f32 %v3347_v8, %v6613_v38 }
 0x419   : > { %v7097_v18 = vpop.permute.xlu0 %2521  ;;  %v4156_v40 = vpop.permute.xlu1 %4155  ;;  %v2622_v56 = vrot.slane %v2618_v37, 5  ;;  %v2668_v37 = vstv %s7123_s2  ;;  %s7207_s2 = sld [smem:[#allocation11 + $0x97]] }
 0x41a   : > { %v4158_v21 = vadd.f32 %v4156_v40, %v4106_v61  ;;  %v2581_v61 = vstv %s7101_s8  ;;  %v2621_v40 = vrot.slane %v2617_v48, 5  ;;  %v3350_v51 = vrot.slane %v3348_v20, 1  ;;  %s7178_s8 = sld [smem:[#allocation11 + $0x94]] }
 0x41b   : > { %4233 = vrot.lane.b32.xlu0 %v4232_v55, %s8076_s30  ;;  %4142 = vrot.lane.b32.xlu1 %v4141_v54, %s8074_s20  ;;  %v2631_v55 = vmul.f32 0.0, %v2629_v59  ;;  %v2582_v42 = vmul.f32 %v2581_v61, %v6497_v62  ;;  %v3595_v7 = vstv %s7175_s1  ;;  %s7232_s1 = sld [smem:[#allocation11 + $0xf4]] }
 0x41c   : > { %v4210_v31 = vadd.f32 %v4208_v25, %v4158_v21  ;;  %v3455_v25 = vstv %s7108_s17  ;;  %v3419_v21 = vstv %s7116_s27  ;;  %v2623_v33 = vsel %vm314_vm5, %v2621_v40, %v2622_v56  ;;  %s7182_s17 = sld [smem:[#allocation11 + $0x65]]  ;;  %s7190_s27 = sld [smem:[#allocation11 + $0xec]] }
 0x41d   : > { %v7110_v17 = vpop.permute.xlu0 %2567  ;;  %v7112_v3 = vpop.permute.xlu1 %2512  ;;  %v2635_v48 = vrot.slane %v2631_v55, 5  ;;  %v3456_v8 = vmul.f32 %v3455_v25, %v6613_v38  ;;  %v3420_v59 = vmul.f32 %v3419_v21, %v6613_v38  ;;  %v2584_v20 = vrot.slane %v2582_v42, 4 }
 0x41e   : > { %8083 = vst [vmem:[#allocation87_spill] sm:$0xff] %v7110_v17  ;;  %v2669_v56 = vmul.f32 %v2668_v37, %v6497_v62  ;;  %v2670_v55 = vmul.f32 0.0, %v2668_v37  ;;  %v2681_v25 = vstv %s7139_s28  ;;  %s7223_s28 = sld [smem:[#allocation11 + $0xa3]] }
 0x41f   : > { %3317 = vrot.lane.b32.xlu0 %v3315_v46, %s8074_s20  ;;  %4194 = vrot.lane.b32.xlu1 %v4193_v23, %s8075_s7  ;;  %v2720_v46 = vstv %s7118_s10  ;;  %v2634_v23 = vrot.slane %v2630_v53, 5  ;;  %v3458_v21 = vrot.slane %v3456_v8, 2  ;;  %v2683_v8 = vmul.f32 0.0, %v2681_v25  ;;  %s7193_s10 = sld [smem:[#allocation11 + $0x93]] }
 0x420   : > { %v2721_v61 = vmul.f32 %v2720_v46, %v6497_v62  ;;  %v2722_v40 = vmul.f32 0.0, %v2720_v46  ;;  %v2673_v6 = vrot.slane %v2669_v56, 5 }
 0x421   : > { %v7128_v57 = vpop.permute.xlu0 %3325  ;;  %v7130_v29 = vpop.permute.xlu1 %2530  ;;  %v2636_v53 = vsel %vm314_vm5, %v2634_v23, %v2635_v48  ;;  %v2674_v48 = vrot.slane %v2670_v55, 5 }
 0x422   : > { %v2725_v19 = vrot.slane %v2721_v61, 6  ;;  %v2726_v39 = vrot.slane %v2722_v40, 6  ;;  %v3647_v10 = vstv %s7190_s27  ;;  %s7246_s27 = sld [smem:[#allocation11 + $0xa0]] }
 0x423   : > { %3387 = vrot.lane.b32.xlu0 %v3386_v43, %s8076_s30  ;;  %4243 = vrot.lane.b32.xlu1 %v4210_v31, %s8075_s7  ;;  %v2675_v55 = vsel %vm314_vm5, %v2673_v6, %v2674_v48  ;;  %v3648_v22 = vmul.f32 %v3647_v10, %v6613_v38 }
 0x424   : > { %v2727_v40 = vsel %vm1142_vm10, %v2725_v19, %v2726_v39 }
 0x425   : > { %v7142_v54 = vpop.permute.xlu0 %3360  ;;  %v7144_v9 = vpop.permute.xlu1 %2576 }
 0x427   : > { %2624 = vrot.lane.b32.xlu0 %v2623_v33, %s8075_s7  ;;  %3351 = vrot.lane.b32.xlu1 %v3350_v51, %s8075_s7  ;;  %v2733_v51 = vstv %s7135_s5  ;;  %v3422_v33 = vrot.slane %v3420_v59, 2  ;;  %s7219_s5 = sld [smem:[#allocation11 + $0x98]] }
 0x428   : > { %v2734_v23 = vmul.f32 %v2733_v51, %v6497_v62  ;;  %v2735_v37 = vmul.f32 0.0, %v2733_v51 }
 0x429   : > { %v7155_v31 = vpop.permute.xlu0 %3396  ;;  %v7157_v43 = vpop.permute.xlu1 %3333 }
 0x42a   : > { %v2738_v56 = vrot.slane %v2734_v23, 6  ;;  %v2739_v51 = vrot.slane %v2735_v37, 6  ;;  %v3555_v23 = vstv %s7168_s0  ;;  %v2780_v37 = vstv %s7178_s8  ;;  %s7227_s0 = sld [smem:[#allocation11 + $0x81]]  ;;  %s7234_s8 = sld [smem:[#allocation11 + $0xf0]] }
 0x42b   : > { %2637 = vrot.lane.b32.xlu0 %v2636_v53, %s8075_s7  ;;  %2585 = vrot.lane.b32.xlu1 %v2584_v20, %s8074_s20  ;;  %v2682_v20 = vmul.f32 %v2681_v25, %v6497_v62  ;;  %v3491_v53 = vstv %s7161_s19  ;;  %s7225_s19 = sld [smem:[#allocation11 + $0x9f]] }
 0x42c   : > { %v3492_v19 = vmul.f32 %v3491_v53, %v6613_v38  ;;  %v2740_v6 = vsel %vm1142_vm10, %v2738_v56, %v2739_v51  ;;  %v2781_v56 = vmul.f32 %v2780_v37, %v6835_v34 }
 0x42d   : > { %v7170_v42 = vpop.permute.xlu0 %3405  ;;  %v7172_v46 = vpop.permute.xlu1 %3369  ;;  %v2686_v25 = vrot.slane %v2682_v20, 6  ;;  %v3556_v20 = vmul.f32 %v3555_v23, %v6613_v38  ;;  %v2812_v44 = vstv %s7219_s5  ;;  %s7283_s5 = sld [smem:[#allocation11 + $0xa7]] }
 0x42e   : > { %v3494_v51 = vrot.slane %v3492_v19, 3 }
 0x42f   : > { %3459 = vrot.lane.b32.xlu0 %v3458_v21, %s8060_s22  ;;  %3423 = vrot.lane.b32.xlu1 %v3422_v33, %s8073_s4  ;;  %v2687_v21 = vrot.slane %v2683_v8, 6  ;;  %v3596_v8 = vmul.f32 %v3595_v7, %v6613_v38 }
 0x430   : > { %v2556_v26 = vstv %s7227_s0  ;;  %s7302_s0 = sld [smem:[#allocation11 + $0xa8]] }
 0x431   : > { %v7184_v59 = vpop.permute.xlu0 %2650  ;;  %v7186_v61 = vpop.permute.xlu1 %2598  ;;  %v2688_v48 = vsel %vm1142_vm10, %v2686_v25, %v2687_v21  ;;  %v3597_v25 = vmul.f32 0.0, %v3595_v7  ;;  %v2772_v21 = vstv %s7193_s10  ;;  %v3600_v19 = vrot.slane %v3596_v8, 5  ;;  %s7248_s10 = sld [smem:[#allocation11 + $0xc5]] }
 0x432   : > { %v2773_v37 = vmul.f32 %v2772_v21, %v6835_v34  ;;  %v3652_v21 = vrot.slane %v3648_v22, 5 }
 0x433   : > { %2728 = vrot.lane.b32.xlu0 %v2727_v40, %s8073_s4  ;;  %2676 = vrot.lane.b32.xlu1 %v2675_v55, %s8076_s30  ;;  %v2318_v40 = vstv %s7182_s17  ;;  %v3601_v5 = vrot.slane %v3597_v25, 5  ;;  %s7244_s17 = sld [smem:[#allocation11 + $0xa4]] }
 0x434   : > { %v2319_v23 = vmul.f32 %v2318_v40, %v6497_v62 }
 0x435   : > { %v7197_v33 = vpop.permute.xlu0 %3468  ;;  %v7199_v39 = vpop.permute.xlu1 %3432  ;;  %v3602_v40 = vsel %vm314_vm5, %v3600_v19, %v3601_v5  ;;  %v3751_v5 = vstv %s7232_s1  ;;  %v3699_v19 = vstv %s7234_s8  ;;  %s7304_s1 = sld [smem:[#allocation11 + $0xe1]]  ;;  %s7317_s8 = sld [smem:[#allocation11 + $0xb0]] }
 0x437   : > { %2741 = vrot.lane.b32.xlu0 %v2740_v6, %s8073_s4  ;;  %2689 = vrot.lane.b32.xlu1 %v2688_v48, %s8077_s9  ;;  %v3558_v6 = vrot.slane %v3556_v20, 4  ;;  %v2804_v20 = vstv %s7207_s2  ;;  %s7281_s2 = sld [smem:[#allocation11 + $0xab]] }
 0x438   : > { %v2805_v25 = vmul.f32 %v2804_v20, %v6835_v34 }
 0x439   : > { %v7214_v53 = vpop.permute.xlu0 %3477  ;;  %v7216_v55 = vpop.permute.xlu1 %3441  ;;  %v2910_v0 = vstv %s7244_s17  ;;  %s7323_s17 = sld [smem:[#allocation11 + $0xf8]] }
 0x43b   : > { %2783 = vrot.lane.b32.xlu0 %v2781_v56, %s8061_s11  ;;  %3495 = vrot.lane.b32.xlu1 %v3494_v51, %s8072_s23  ;;  %v3649_v56 = vmul.f32 0.0, %v3647_v10  ;;  %v2353_v51 = vadd.f32 %v6828_v36, %v2319_v23 }
 0x43d   : > { %v7236_v7 = vpop.permute.xlu0 %2754  ;;  %v7238_v48 = vpop.permute.xlu1 %2702  ;;  %v2389_v10 = vadd.f32 %v6862_v2, %v2353_v51  ;;  %v3653_v23 = vrot.slane %v3649_v56, 5  ;;  %v2813_v56 = vmul.f32 %v2812_v44, %v6835_v34  ;;  %v3752_v44 = vmul.f32 %v3751_v5, %v6613_v38 }
 0x43e   : > { %v2973_v28 = vstv %s7281_s2  ;;  %s7341_s2 = sld [smem:[#allocation11 + $0xaf]] }
 0x43f   : > { %3559 = vrot.lane.b32.xlu0 %v3558_v6, %s8074_s20  ;;  %2775 = vrot.lane.b32.xlu1 %v2773_v37, %s8061_s11  ;;  %v2425_v35 = vadd.f32 %v6890_v63, %v2389_v10  ;;  %v2901_v6 = vstv %s7223_s28  ;;  %v2865_v37 = vstv %s7225_s19  ;;  %v3654_v63 = vsel %vm314_vm5, %v3652_v21, %v3653_v23  ;;  %s7290_s28 = sld [smem:[#allocation11 + $0xc6]]  ;;  %s7300_s19 = sld [smem:[#allocation11 + $0xac]] }
 0x440   : > { %v2902_v20 = vmul.f32 %v2901_v6, %v6835_v34  ;;  %v2866_v10 = vmul.f32 %v2865_v37, %v6835_v34  ;;  %v3701_v23 = vmul.f32 0.0, %v3699_v19 }
 0x441   : > { %v7253_v8 = vpop.permute.xlu0 %2791  ;;  %v7255_v36 = vpop.permute.xlu1 %3504  ;;  %v2461_v2 = vadd.f32 %v6921_v15, %v2425_v35  ;;  %v2874_v35 = vstv %s7246_s27  ;;  %v3302_v15 = vstv %s7248_s10  ;;  %s7331_s27 = sld [smem:[#allocation11 + $0x9d]]  ;;  %s7339_s10 = sld [smem:[#allocation11 + $0x100]] }
 0x442   : > { %v2868_v58 = vrot.slane %v2866_v10, 1  ;;  %v3303_v52 = vmul.f32 %v3302_v15, %v6613_v38  ;;  %v3705_v15 = vrot.slane %v3701_v23, 6  ;;  %v2946_v23 = vstv %s7302_s0  ;;  %s7366_s0 = sld [smem:[#allocation11 + $0x108]] }
 0x443   : > { %3603 = vrot.lane.b32.xlu0 %v3602_v40, %s8075_s7  ;;  %2807 = vrot.lane.b32.xlu1 %v2805_v25, %s8072_s23  ;;  %v2497_v40 = vadd.f32 %v7054_v1, %v2461_v2  ;;  %v2557_v25 = vmul.f32 %v2556_v26, %v6497_v62  ;;  %v3753_v1 = vmul.f32 0.0, %v3751_v5  ;;  %v3700_v26 = vmul.f32 %v3699_v19, %v6613_v38 }
 0x444   : > { %v2904_v2 = vrot.slane %v2902_v20, 2  ;;  %v3756_v5 = vrot.slane %v3752_v44, 6 }
 0x445   : > { %v7269_v51 = vpop.permute.xlu0 %2823  ;;  %v7271_v22 = vpop.permute.xlu1 %3513  ;;  %v2533_v21 = vadd.f32 %v7130_v29, %v2497_v40  ;;  %v2559_v17 = vrot.slane %v2557_v25, 4  ;;  %v3328_v29 = vadd.f32 %v7128_v57, %v3303_v52  ;;  %v3757_v19 = vrot.slane %v3753_v1, 6 }
 0x447   : > { %3655 = vrot.lane.b32.xlu0 %v3654_v63, %s8076_s30  ;;  %2815 = vrot.lane.b32.xlu1 %v2813_v56, %s8072_s23  ;;  %v2911_v63 = vmul.f32 %v2910_v0, %v6835_v34  ;;  %v2875_v56 = vmul.f32 %v2874_v35, %v6835_v34  ;;  %v2561_v0 = vadd.f32 %v2559_v17, %v2533_v21  ;;  %v3704_v35 = vrot.slane %v3700_v26, 6 }
 0x448   : > { %v3363_v27 = vadd.f32 %v7142_v54, %v3328_v29  ;;  %v3306_v17 = vstv %s7290_s28  ;;  %v2974_v21 = vmul.f32 %v2973_v28, %v6835_v34  ;;  %v2982_v26 = vstv %s7300_s19  ;;  %s7356_s28 = sld [smem:[#allocation11 + $0x104]]  ;;  %s7362_s19 = sld [smem:[#allocation11 + $0xb3]] }
 0x449   : > { %v7293_v6 = vpop.permute.xlu0 %3616  ;;  %v7295_v37 = vpop.permute.xlu1 %3568  ;;  %v2913_v40 = vrot.slane %v2911_v63, 2  ;;  %v2877_v25 = vrot.slane %v2875_v56, 1  ;;  %v3706_v44 = vsel %vm1142_vm10, %v3704_v35, %v3705_v15  ;;  %v3534_v63 = vstv %s7304_s1  ;;  %s7372_s1 = sld [smem:[#allocation11 + $0xb4]] }
 0x44a   : > { %v3399_v52 = vadd.f32 %v7155_v31, %v3363_v27  ;;  %v3307_v28 = vmul.f32 %v3306_v17, %v6613_v38  ;;  %v2976_v29 = vrot.slane %v2974_v21, 3  ;;  %v3018_v35 = vstv %s7317_s8  ;;  %s7374_s8 = sld [smem:[#allocation11 + $0xbf]] }
 0x44b   : > { %2905 = vrot.lane.b32.xlu0 %v2904_v2, %s8075_s7  ;;  %2869 = vrot.lane.b32.xlu1 %v2868_v58, %s8074_s20  ;;  %v2601_v2 = vadd.f32 %v7186_v61, %v2561_v0  ;;  %v2937_v58 = vstv %s7283_s5  ;;  %v3758_v61 = vsel %vm1142_vm10, %v3756_v5, %v3757_v19  ;;  %s7344_s5 = sld [smem:[#allocation11 + $0xe2]]  ;;  %v2983_v5 = vmul.f32 %v2982_v26, %v6835_v34 }
 0x44c   : > { %v2938_v1 = vmul.f32 %v2937_v58, %v6835_v34  ;;  %v3435_v27 = vadd.f32 %v7199_v39, %v3399_v52  ;;  %v2947_v19 = vmul.f32 %v2946_v23, %v6835_v34  ;;  %v2849_v58 = vstv %s7331_s27  ;;  %s7411_s27 = sld [smem:[#allocation11 + $0xbc]] }
 0x44d   : > { %v7309_v20 = vpop.permute.xlu0 %3668  ;;  %v7311_v10 = vpop.permute.xlu1 %3577  ;;  %v2653_v31 = vadd.f32 %v7184_v59, %v2601_v2  ;;  %v3788_v2 = vstv %s7323_s17  ;;  %v3019_v21 = vmul.f32 %v3018_v35, %v6835_v34  ;;  %s7406_s17 = sld [smem:[#allocation11 + $0xc0]] }
 0x44e   : > { %v2940_v0 = vrot.slane %v2938_v1, 2  ;;  %v3848_v1 = vstv %s7339_s10  ;;  %s7428_s10 = sld [smem:[#allocation11 + $0x110]] }
 0x44f   : > { %2914 = vrot.lane.b32.xlu0 %v2913_v40, %s8075_s7  ;;  %2878 = vrot.lane.b32.xlu1 %v2877_v25, %s8074_s20  ;;  %v2705_v39 = vadd.f32 %v7238_v48, %v2653_v31  ;;  %v3336_v40 = vadd.f32 %v7157_v43, %v3307_v28  ;;  %v3471_v25 = vadd.f32 %v7197_v33, %v3435_v27 }
 0x450   : > { %v3535_v48 = vmul.f32 %v3534_v63, %v6613_v38  ;;  %v3789_v27 = vmul.f32 %v3788_v2, %v6704_v4  ;;  %v2850_v63 = vmul.f32 %v2849_v58, %v6835_v34 }
 0x451   : > { %v7325_v57 = vpop.permute.xlu0 %3681  ;;  %v7327_v54 = vpop.permute.xlu1 %3629  ;;  %v3372_v15 = vadd.f32 %v7172_v46, %v3336_v40  ;;  %v2757_v43 = vadd.f32 %v7236_v7, %v2705_v39  ;;  %v3507_v33 = vadd.f32 %v7255_v36, %v3471_v25  ;;  %v3009_v7 = vstv %s7341_s2  ;;  %s7430_s2 = sld [smem:[#allocation11 + $0x10c]] }
 0x452   : > { %v3537_v46 = vrot.slane %v3535_v48, 4  ;;  %v3541_v36 = vstv %s7344_s5  ;;  %v3045_v25 = vstv %s7362_s19  ;;  %v2852_v35 = vrot.slane %v2850_v63, 1  ;;  %s7446_s5 = sld [smem:[#allocation11 + $0xfe]]  ;;  %s7456_s19 = sld [smem:[#allocation11 + $0x120]] }
 0x453   : > { %3759 = vrot.lane.b32.xlu0 %v3758_v61, %s8060_s22  ;;  %3707 = vrot.lane.b32.xlu1 %v3706_v44, %s8073_s4  ;;  %v2985_v61 = vrot.slane %v2983_v5, 3  ;;  %v2949_v44 = vrot.slane %v2947_v19, 3  ;;  %v3408_v31 = vadd.f32 %v7170_v42, %v3372_v15  ;;  %v2794_v26 = vadd.f32 %v7253_v8, %v2757_v43 }
 0x454   : > { %v3539_v23 = vadd.f32 %v3537_v46, %v3507_v33  ;;  %v3010_v5 = vmul.f32 %v3009_v7, %v6835_v34  ;;  %v3884_v19 = vstv %s7356_s28  ;;  %v3542_v48 = vmul.f32 %v3541_v36, %v6613_v38  ;;  %s7451_s28 = sld [smem:[#allocation11 + $0x114]] }
 0x455   : > { %v7350_v56 = vpop.permute.xlu0 %2923  ;;  %v7352_v59 = vpop.permute.xlu1 %2887  ;;  %v3444_v42 = vadd.f32 %v7216_v55, %v3408_v31  ;;  %v2826_v8 = vadd.f32 %v7269_v51, %v2794_v26  ;;  %v3920_v55 = vstv %s7366_s0  ;;  %v3054_v15 = vstv %s7372_s1  ;;  %s7469_s0 = sld [smem:[#allocation11 + $0x11c]]  ;;  %s7485_s1 = sld [smem:[#allocation11 + $0x119]] }
 0x456   : > { %v3571_v40 = vadd.f32 %v7295_v37, %v3539_v23  ;;  %v3181_v51 = vstv %s7374_s8  ;;  %v3012_v2 = vrot.slane %v3010_v5, 4  ;;  %v3885_v58 = vmul.f32 %v3884_v19, %v6704_v4  ;;  %s7490_s8 = sld [smem:[#allocation11 + $0x124]] }
 0x457   : > { %2977 = vrot.lane.b32.xlu0 %v2976_v29, %s8073_s4  ;;  %2941 = vrot.lane.b32.xlu1 %v2940_v0, %s8076_s30  ;;  %v3021_v29 = vrot.slane %v3019_v21, 4  ;;  %v3849_v0 = vmul.f32 %v3848_v1, %v6704_v4  ;;  %v2854_v46 = vadd.f32 %v2852_v35, %v2826_v8  ;;  %v3129_v1 = vstv %s7384_s21  ;;  %s7434_s21 = sld [smem:[#allocation11 + $0xb9]] }
 0x458   : > { %v3619_v21 = vadd.f32 %v7293_v6, %v3571_v40  ;;  %v3921_v7 = vmul.f32 %v3920_v55, %v6704_v4  ;;  %v3055_v36 = vmul.f32 %v3054_v15, %v6835_v34  ;;  %v3183_v31 = vmul.f32 0.0, %v3181_v51 }
 0x459   : > { %v7377_v52 = vpop.permute.xlu0 %3767  ;;  %v7379_v17 = vpop.permute.xlu1 %3720  ;;  %v3851_v33 = vrot.slane %v3849_v0, 1  ;;  %v2890_v6 = vadd.f32 %v7352_v59, %v2854_v46  ;;  %v3887_v63 = vrot.slane %v3885_v58, 2  ;;  %v3130_v0 = vmul.f32 %v3129_v1, %v6835_v34 }
 0x45a   : > { %v3131_v5 = vmul.f32 0.0, %v3129_v1  ;;  %v3671_v19 = vadd.f32 %v7309_v20, %v3619_v21  ;;  %v3194_v8 = vstv %s7406_s17  ;;  %v3923_v59 = vrot.slane %v3921_v7, 2  ;;  %s7516_s17 = sld [smem:[#allocation11 + $0x86]] }
 0x45b   : > { %2986 = vrot.lane.b32.xlu0 %v2985_v61, %s8073_s4  ;;  %2950 = vrot.lane.b32.xlu1 %v2949_v44, %s8077_s9  ;;  %s7404_s9 = sld [smem:[#allocation11 + $0xfd]]  ;;  %v3046_v61 = vmul.f32 %v3045_v25, %v6835_v34  ;;  %v3480_v44 = vadd.f32 %v7214_v53, %v3444_v42  ;;  %v3544_v42 = vrot.slane %v3542_v48, 4  ;;  %v3057_v40 = vrot.slane %v3055_v36, 4 }
 0x45c   : > { %v3142_v35 = vstv %s7411_s27  ;;  %v3723_v15 = vadd.f32 %v7379_v17, %v3671_v19  ;;  %v3135_v58 = vrot.slane %v3131_v5, 5  ;;  %v3992_v7 = vstv %s7428_s10  ;;  %s7520_s27 = sld [smem:[#allocation11 + $0x8e]]  ;;  %s7527_s10 = sld [smem:[#allocation11 + $0x8a]] }
 0x45d   : > { %v7393_v28 = vpop.permute.xlu0 %3775  ;;  %v7395_v39 = vpop.permute.xlu1 %3733  ;;  %v3516_v53 = vadd.f32 %v7271_v22, %v3480_v44  ;;  %v3196_v44 = vmul.f32 0.0, %v3194_v8  ;;  %v3144_v46 = vmul.f32 0.0, %v3142_v35  ;;  %v3956_v36 = vstv %s7430_s2  ;;  %s7530_s2 = sld [smem:[#allocation11 + $0xc4]] }
 0x45f   : > { %3022 = vrot.lane.b32.xlu0 %v3021_v29, %s8061_s11  ;;  %3791 = vrot.lane.b32.xlu1 %v3789_v27, %s8072_s23  ;;  %v3182_v27 = vmul.f32 %v3181_v51, %v6835_v34  ;;  %v3048_v29 = vrot.slane %v3046_v61, 4  ;;  %v3546_v55 = vadd.f32 %v3544_v42, %v3516_v53  ;;  %v2926_v51 = vadd.f32 %v7350_v56, %v2890_v6 }
 0x460   : > { %v3195_v61 = vmul.f32 %v3194_v8, %v6835_v34  ;;  %v3143_v56 = vmul.f32 %v3142_v35, %v6835_v34  ;;  %v3770_v53 = vadd.f32 %v7377_v52, %v3723_v15  ;;  %v3834_v8 = vstv %s7446_s5  ;;  %s7541_s5 = sld [smem:[#allocation11 + $0xa2]] }
 0x461   : > { %v7416_v43 = vpop.permute.xlu0 %2995  ;;  %v2960_v37 = vpop.permute.xlu1 %2959  ;;  %v3827_v22 = vstv %s7404_s9  ;;  %v3186_v25 = vrot.slane %v3182_v27, 6  ;;  %v3580_v17 = vadd.f32 %v7311_v10, %v3546_v55  ;;  %v3105_v10 = vstv %s7434_s21  ;;  %s7507_s9 = sld [smem:[#allocation11 + $0x11a]] }
 0x462   : > { %v2962_v21 = vadd.f32 %v2960_v37, %v2926_v51  ;;  %v3828_v1 = vmul.f32 %v3827_v22, %v6704_v4  ;;  %v3148_v22 = vrot.slane %v3144_v46, 5  ;;  %v3993_v35 = vmul.f32 %v3992_v7, %v6704_v4  ;;  %s7534_s21 = sld [smem:[#allocation11 + $0x92]] }
 0x463   : > { %3852 = vrot.lane.b32.xlu0 %v3851_v33, %s8074_s20  ;;  %3013 = vrot.lane.b32.xlu1 %v3012_v2, %s8061_s11  ;;  %s7439_s11 = sld [smem:[#allocation11 + $0xc3]]  ;;  %v3187_v33 = vrot.slane %v3183_v31, 6  ;;  %v3134_v2 = vrot.slane %v3130_v0, 5  ;;  %v3632_v27 = vadd.f32 %v7327_v54, %v3580_v17  ;;  %v3200_v0 = vrot.slane %v3196_v44, 6 }
 0x464   : > { %v2998_v19 = vadd.f32 %v7416_v43, %v2962_v21  ;;  %v3147_v54 = vrot.slane %v3143_v56, 5  ;;  %v3830_v52 = vrot.slane %v3828_v1, 1  ;;  %v3957_v55 = vmul.f32 %v3956_v36, %v6704_v4 }
 0x465   : > { %v7436_v26 = vpop.permute.xlu0 %3031  ;;  %v3800_v23 = vpop.permute.xlu1 %3799  ;;  %v3188_v6 = vsel %vm1142_vm10, %v3186_v25, %v3187_v33  ;;  %v3684_v25 = vadd.f32 %v7325_v57, %v3632_v27  ;;  %v4028_v43 = vstv %s7451_s28  ;;  %v3835_v21 = vmul.f32 %v3834_v8, %v6704_v4  ;;  %s7546_s28 = sld [smem:[#allocation11 + $0xaa]] }
 0x466   : > { %v3802_v42 = vadd.f32 %v3800_v23, %v3770_v53  ;;  %v3034_v57 = vadd.f32 %v7436_v26, %v2998_v19  ;;  %v3149_v17 = vsel %vm314_vm5, %v3147_v54, %v3148_v22  ;;  %v4108_v36 = vstv %s7469_s0  ;;  %s7555_s0 = sld [smem:[#allocation11 + $0xb2]] }
 0x467   : > { %3888 = vrot.lane.b32.xlu0 %v3887_v63, %s8075_s7  ;;  %3049 = vrot.lane.b32.xlu1 %v3048_v29, %s8072_s23  ;;  %v3136_v63 = vsel %vm314_vm5, %v3134_v2, %v3135_v58  ;;  %v3199_v29 = vrot.slane %v3195_v61, 6  ;;  %v4160_v58 = vstv %s7456_s19  ;;  %v3736_v61 = vadd.f32 %v7395_v39, %v3684_v25  ;;  %s7549_s19 = sld [smem:[#allocation11 + $0x9e]] }
 0x468   : > { %v3832_v44 = vadd.f32 %v3830_v52, %v3802_v42  ;;  %v3995_v53 = vrot.slane %v3993_v35, 3  ;;  %v3959_v26 = vrot.slane %v3957_v55, 3  ;;  %v3837_v19 = vrot.slane %v3835_v21, 1 }
 0x469   : > { %v3068_v20 = vpop.permute.xlu0 %3067  ;;  %v7453_v48 = vpop.permute.xlu1 %3807  ;;  %v3233_v5 = vstv %s7439_s11  ;;  %v3201_v51 = vsel %vm1142_vm10, %v3199_v29, %v3200_v0  ;;  %v4109_v22 = vmul.f32 %v4108_v36, %v6704_v4  ;;  %v4075_v25 = vstv %s7485_s1  ;;  %s7538_s11 = sld [smem:[#allocation11 + $0x96]] }
 0x46a   : > { %v3234_v33 = vmul.f32 %v3233_v5, %v6835_v34  ;;  %v3235_v2 = vmul.f32 0.0, %v3233_v5  ;;  %v3070_v1 = vadd.f32 %v3068_v20, %v3034_v57  ;;  %v4162_v5 = vmul.f32 0.0, %v4160_v58  ;;  %s7560_s1 = sld [smem:[#allocation11 + $0xa6]] }
 0x46b   : > { %3924 = vrot.lane.b32.xlu0 %v3923_v59, %s8076_s30  ;;  %3058 = vrot.lane.b32.xlu1 %v3057_v40, %s8072_s23  ;;  %v3106_v59 = vmul.f32 %v3105_v10, %v6835_v34  ;;  %v3107_v40 = vmul.f32 0.0, %v3105_v10  ;;  %v4161_v10 = vmul.f32 %v4160_v58, %v6704_v4  ;;  %v4113_v57 = vrot.slane %v4109_v22, 5 }
 0x46c   : > { %v3238_v29 = vrot.slane %v3234_v33, 6  ;;  %v3239_v0 = vrot.slane %v3235_v2, 6  ;;  %v4076_v2 = vmul.f32 %v4075_v25, %v6704_v4 }
 0x46d   : > { %v3898_v37 = vpop.permute.xlu0 %3897  ;;  %v3862_v31 = vpop.permute.xlu1 %3861  ;;  %v3110_v56 = vrot.slane %v3106_v59, 5  ;;  %v3111_v46 = vrot.slane %v3107_v40, 5  ;;  %v4165_v59 = vrot.slane %v4161_v10, 6  ;;  %v4110_v40 = vmul.f32 0.0, %v4108_v36 }
 0x46e   : > { %v3864_v7 = vadd.f32 %v3862_v31, %v3832_v44  ;;  %v3240_v55 = vsel %vm1142_vm10, %v3238_v29, %v3239_v0  ;;  %v4080_v10 = vrot.slane %v4076_v2, 5 }
 0x46f   : > { %3189 = vrot.lane.b32.xlu0 %v3188_v6, %s8075_s7  ;;  %3137 = vrot.lane.b32.xlu1 %v3136_v63, %s8074_s20  ;;  %v4029_v6 = vmul.f32 %v4028_v43, %v6704_v4  ;;  %v3778_v63 = vadd.f32 %v7393_v28, %v3736_v61  ;;  %v3112_v20 = vsel %vm314_vm5, %v3110_v56, %v3111_v46  ;;  %v4166_v43 = vrot.slane %v4162_v5, 6 }
 0x470   : > { %v3900_v42 = vadd.f32 %v3898_v37, %v3864_v7  ;;  %v3114_v54 = vadd.f32 %v3112_v20, %v3070_v1  ;;  %v4114_v44 = vrot.slane %v4110_v40, 5  ;;  %v4086_v5 = vstv %s7507_s9  ;;  %s7568_s9 = sld [smem:[#allocation11 + $0xae]] }
 0x471   : > { %v3934_v23 = vpop.permute.xlu0 %3933  ;;  %v3871_v15 = vpop.permute.xlu1 %3870  ;;  %v3810_v31 = vadd.f32 %v7453_v48, %v3778_v63  ;;  %v4031_v8 = vrot.slane %v4029_v6, 4  ;;  %v4167_v1 = vsel %vm1142_vm10, %v4165_v59, %v4166_v43  ;;  %v2603_v59 = vstv %s7516_s17  ;;  %s7577_s17 = sld [smem:[#allocation11 + $0xba]] }
 0x472   : > { %v3936_v48 = vadd.f32 %v3934_v23, %v3900_v42  ;;  %v4115_v6 = vsel %vm314_vm5, %v4113_v57, %v4114_v44  ;;  %v4087_v42 = vmul.f32 %v4086_v5, %v6704_v4 }
 0x473   : > { %3202 = vrot.lane.b32.xlu0 %v3201_v51, %s8075_s7  ;;  %3150 = vrot.lane.b32.xlu1 %v3149_v17, %s8074_s20  ;;  %v4212_v51 = vstv %s7490_s8  ;;  %v3839_v37 = vadd.f32 %v3837_v19, %v3810_v31  ;;  %v4077_v17 = vmul.f32 0.0, %v4075_v25  ;;  %s7562_s8 = sld [smem:[#allocation11 + $0xbe]] }
 0x474   : > { %v4213_v21 = vmul.f32 %v4212_v51, %v6704_v4  ;;  %v4214_v7 = vmul.f32 0.0, %v4212_v51  ;;  %v4091_v25 = vrot.slane %v4087_v42, 5  ;;  %v2707_v51 = vstv %s7520_s27  ;;  %s7589_s27 = sld [smem:[#allocation11 + $0xe0]] }
 0x475   : > { %v3943_v27 = vpop.permute.xlu0 %3942  ;;  %v3907_v39 = vpop.permute.xlu1 %3906  ;;  %v3873_v56 = vadd.f32 %v3871_v15, %v3839_v37  ;;  %v4081_v63 = vrot.slane %v4077_v17, 5  ;;  %v2605_v37 = vmul.f32 0.0, %v2603_v59  ;;  %v2708_v57 = vmul.f32 %v2707_v51, %v6497_v62 }
 0x476   : > { %v4217_v29 = vrot.slane %v4213_v21, 6  ;;  %v4218_v0 = vrot.slane %v4214_v7, 6  ;;  %v2709_v21 = vmul.f32 0.0, %v2707_v51  ;;  %v3298_v7 = vstv %s7530_s2  ;;  %s7597_s2 = sld [smem:[#allocation11 + $0x64]] }
 0x477   : > { %3996 = vrot.lane.b32.xlu0 %v3995_v53, %s8060_s22  ;;  %3960 = vrot.lane.b32.xlu1 %v3959_v26, %s8073_s4  ;;  %v3909_v23 = vadd.f32 %v3907_v39, %v3873_v56  ;;  %v4082_v39 = vsel %vm314_vm5, %v4080_v10, %v4081_v63 }
 0x479   : > { %v3216_v52 = vpop.permute.xlu0 %3215  ;;  %v3164_v28 = vpop.permute.xlu1 %3163  ;;  %v3945_v19 = vadd.f32 %v3943_v27, %v3909_v23 }
 0x47a   : > { %v3166_v35 = vadd.f32 %v3164_v28, %v3114_v54  ;;  %v4088_v54 = vmul.f32 0.0, %v4086_v5  ;;  %v4219_v28 = vsel %vm1142_vm10, %v4217_v29, %v4218_v0  ;;  %v2759_v0 = vstv %s7534_s21  ;;  %s7604_s21 = sld [smem:[#allocation11 + $0x63]] }
 0x47b   : > { %4032 = vrot.lane.b32.xlu0 %v4031_v8, %s8072_s23  ;;  %3241 = vrot.lane.b32.xlu1 %v3240_v55, %s8076_s30  ;;  %v3299_v5 = vmul.f32 %v3298_v7, %v6613_v38 }
 0x47c   : > { %v3218_v33 = vadd.f32 %v3216_v52, %v3166_v35  ;;  %v4092_v35 = vrot.slane %v4088_v54, 5 }
 0x47d   : > { %v4006_v58 = vpop.permute.xlu0 %4005  ;;  %v3970_v61 = vpop.permute.xlu1 %3969 }
 0x47e   : > { %v3972_v46 = vadd.f32 %v3970_v61, %v3936_v48  ;;  %v2604_v48 = vmul.f32 %v2603_v59, %v6497_v62 }
 0x47f   : > { %4168 = vrot.lane.b32.xlu0 %v4167_v1, %s8075_s7  ;;  %3251 = vrot.lane.b32.xlu1 %v3218_v33, %s8075_s7  ;;  %v2655_v1 = vstv %s7527_s10  ;;  %s7593_s10 = sld [smem:[#allocation11 + $0xc2]] }
 0x480   : > { %v4008_v36 = vadd.f32 %v4006_v58, %v3972_v46  ;;  %v4093_v58 = vsel %vm314_vm5, %v4091_v25, %v4092_v35  ;;  %v2608_v56 = vrot.slane %v2604_v48, 5  ;;  %v2609_v46 = vrot.slane %v2605_v37, 5 }
 0x481   : > { %v4042_v53 = vpop.permute.xlu0 %4041  ;;  %v3979_v26 = vpop.permute.xlu1 %3978  ;;  %v2656_v10 = vmul.f32 %v2655_v1, %v6497_v62  ;;  %v2657_v63 = vmul.f32 0.0, %v2655_v1 }
 0x482   : > { %v4044_v15 = vadd.f32 %v4042_v53, %v4008_v36  ;;  %v3981_v22 = vadd.f32 %v3979_v26, %v3945_v19  ;;  %v2712_v53 = vrot.slane %v2708_v57, 6 }
 0x483   : > { %4116 = vrot.lane.b32.xlu1 %v4115_v6, %s8074_s20  ;;  %v2713_v6 = vrot.slane %v2709_v21, 6  ;;  %v2660_v42 = vrot.slane %v2656_v10, 5  ;;  %v2661_v54 = vrot.slane %v2657_v63, 5 }
 0x484   : > { %v4084_v52 = vadd.f32 %v4082_v39, %v4044_v15  ;;  %v2610_v15 = vsel %vm314_vm5, %v2608_v56, %v2609_v46  ;;  %v2928_v56 = vstv %s7560_s1  ;;  %v3168_v46 = vstv %s7562_s8  ;;  %s4678_s1 = sld [smem:[#allocation11 + $0x7e]]  ;;  %s4706_s8 = sld [smem:[#allocation11 + $0x9a]] }
 0x485   : > { %v4130_v20 = vpop.permute.xlu0 %4129  ;;  %v4015_v31 = vpop.permute.xlu1 %4014  ;;  %v2662_v51 = vsel %vm314_vm5, %v2660_v42, %v2661_v54  ;;  %v3169_v10 = vmul.f32 %v3168_v46, %v6835_v34  ;;  %v3170_v63 = vmul.f32 0.0, %v3168_v46 }
 0x486   : > { %v4017_v8 = vadd.f32 %v4015_v31, %v3981_v22  ;;  %v4132_v55 = vadd.f32 %v4130_v20, %v4084_v52  ;;  %v2714_v31 = vsel %vm1142_vm10, %v2712_v53, %v2713_v6  ;;  %v2796_v22 = vstv %s7538_s11  ;;  %s4679_s11 = sld [smem:[#allocation11 + $0x7f]] }
 0x487   : > { %4220 = vrot.lane.b32.xlu1 %v4219_v28, %s8076_s30  ;;  %v2892_v52 = vstv %s7541_s5  ;;  %v2760_v28 = vmul.f32 %v2759_v0, %v6497_v62  ;;  %v2797_v35 = vmul.f32 %v2796_v22, %v6835_v34  ;;  %v3000_v53 = vstv %s7568_s9  ;;  %s4807_s5 = sld [smem:[#allocation11 + $0xfc]]  ;;  %s345_s9 = sld [smem:[#allocation11]] }
 0x488   : > { %v2929_v6 = vmul.f32 %v2928_v56, %v6835_v34  ;;  %v3173_v42 = vrot.slane %v3169_v10, 6  ;;  %v3174_v54 = vrot.slane %v3170_v63, 6 }
 0x489   : > { %v4182_v40 = vpop.permute.xlu0 %4181  ;;  %v4051_v27 = vpop.permute.xlu1 %4050  ;;  %v2764_v48 = vrot.slane %v2760_v28, 6  ;;  %v3527_v28 = vstv %s7589_s27  ;;  %s4605_s27 = sld [smem:[#allocation11 + $0x38]] }
 0x48a   : > { %v4053_v43 = vadd.f32 %v4051_v27, %v4017_v8  ;;  %v4184_v33 = vadd.f32 %v4182_v40, %v4132_v55  ;;  %v2761_v8 = vmul.f32 0.0, %v2759_v0  ;;  %v2893_v55 = vmul.f32 %v2892_v52, %v6835_v34 }
 0x48c   : > { %v4095_v17 = vadd.f32 %v4093_v58, %v4053_v43  ;;  %v2964_v43 = vstv %s7546_s28  ;;  %v2765_v37 = vrot.slane %v2761_v8, 6  ;;  %v2895_v57 = vrot.slane %v2893_v55, 2  ;;  %s4736_s28 = sld [smem:[#allocation11 + $0xb8]] }
 0x48d   : > { %v4234_v2 = vpop.permute.xlu0 %4233  ;;  %v4143_v61 = vpop.permute.xlu1 %4142  ;;  %v2314_v55 = vstv %s7597_s2  ;;  %s4633_s2 = sld [smem:[#allocation11 + $0x54]] }
 0x48e   : > { %v4236_v44 = vadd.f32 %v4234_v2, %v4184_v33  ;;  %v4145_v26 = vadd.f32 %v4143_v61, %v4095_v17  ;;  %v2856_v33 = vstv %s7549_s19  ;;  %v2965_v61 = vmul.f32 %v2964_v43, %v6835_v34  ;;  %s4835_s19 = sld [smem:[#allocation11 + $0x118]] }
 0x48f   : > { %v3036_v17 = vstv %s7555_s0  ;;  %v2766_v21 = vsel %vm1142_vm10, %v2764_v48, %v2765_v37  ;;  %v3528_v43 = vmul.f32 %v3527_v28, %v6613_v38  ;;  %s4850_s0 = sld [smem:[#allocation12 + $0x5]] }
 0x490   : > { %4238 = vrot.lane.b32.xlu0 %v4236_v44, %s8075_s7  ;;  %v2857_v44 = vmul.f32 %v2856_v33, %v6835_v34 }
 0x491   : > { %v3318_v23 = vpop.permute.xlu0 %3317  ;;  %v4195_v36 = vpop.permute.xlu1 %4194  ;;  %v3530_v46 = vrot.slane %v3528_v43, 4 }
 0x492   : > { %v4197_v29 = vadd.f32 %v4195_v36, %v4145_v26  ;;  %v3320_v59 = vadd.f32 %v3318_v23, %v3299_v5  ;;  %v2967_v23 = vrot.slane %v2965_v61, 3  ;;  %v3037_v36 = vmul.f32 %v3036_v17, %v6835_v34 }
 0x493   : > { %v2859_v26 = vrot.slane %v2857_v44, 1 }
 0x494   : > { %2611 = vrot.lane.b32.xlu0 %v2610_v15, %s8075_s7  ;;  %v3116_v15 = vstv %s7577_s17  ;;  %v3039_v5 = vrot.slane %v3037_v36, 4  ;;  %s4577_s17 = sld [smem:[#allocation11 + $0x1c]] }
 0x495   : > { %v3388_v19 = vpop.permute.xlu0 %3387  ;;  %v4244_v39 = vpop.permute.xlu1 %4243  ;;  %v3117_v22 = vmul.f32 %v3116_v15, %v6835_v34  ;;  %v3118_v52 = vmul.f32 0.0, %v3116_v15 }
 0x496   : > { %v4246_v20 = vadd.f32 %v4244_v39, %v4197_v29  ;;  %v3001_v39 = vmul.f32 %v3000_v53, %v6835_v34 }
 0x497   : > { %v3122_v48 = vrot.slane %v3118_v52, 5 }
 0x498   : > { %2715 = vrot.lane.b32.xlu0 %v2714_v31, %s8073_s4  ;;  %4248 = vrot.lane.b32.xlu1 %v4246_v20, %s8073_s4  ;;  %v2931_v31 = vrot.slane %v2929_v6, 2 }
 0x499   : > { %v7566_v40 = vpop.permute.xlu0 %2624  ;;  %v3352_v27 = vpop.permute.xlu1 %3351 }
 0x49a   : > { %v3354_v25 = vadd.f32 %v3352_v27, %v3320_v59  ;;  %v3220_v59 = vstv %s7593_s10  ;;  %s4734_s10 = sld [smem:[#allocation11 + $0xb6]] }
 0x49b   : > { %v3221_v37 = vmul.f32 %v3220_v59, %v6835_v34  ;;  %v3222_v33 = vmul.f32 0.0, %v3220_v59 }
 0x49c   : > { %2799 = vrot.lane.b32.xlu0 %v2797_v35, %s8072_s23  ;;  %2663 = vrot.lane.b32.xlu1 %v2662_v51, %s8076_s30  ;;  %v3390_v20 = vadd.f32 %v3388_v19, %v3354_v25  ;;  %v3175_v19 = vsel %vm1142_vm10, %v3173_v42, %v3174_v54  ;;  %v3003_v25 = vrot.slane %v3001_v39, 3  ;;  %v3121_v51 = vrot.slane %v3117_v22, 5 }
 0x49d   : > { %v7579_v2 = vpop.permute.xlu0 %2637  ;;  %v7581_v58 = vpop.permute.xlu1 %2585  ;;  %v2542_v22 = vstv %s4679_s11  ;;  %s2260_s11 = sld [smem:[#allocation12]] }
 0x49e   : > { %v3123_v38 = vsel %vm314_vm5, %v3121_v51, %v3122_v48  ;;  %v2543_v59 = vmul.f32 %v2542_v22, %v6497_v62 }
 0x4a0   : > { %2896 = vrot.lane.b32.xlu0 %v2895_v57, %s8075_s7  ;;  %2767 = vrot.lane.b32.xlu1 %v2766_v21, %s8060_s22  ;;  %v2310_v57 = vstv %s7604_s21  ;;  %v2315_v21 = vmul.f32 %v2314_v55, %v6497_v62  ;;  %s4748_s21 = sld [smem:[#allocation12 + $0x2]] }
 0x4a1   : > { %v3460_v1 = vpop.permute.xlu0 %3459  ;;  %v3424_v7 = vpop.permute.xlu1 %3423  ;;  %v2311_v36 = vmul.f32 %v2310_v57, %v6497_v62 }
 0x4a2   : > { %v3426_v8 = vadd.f32 %v3424_v7, %v3390_v20  ;;  %v3225_v7 = vrot.slane %v3221_v37, 6  ;;  %v2344_v53 = vadd.f32 %v6826_v47, %v2315_v21 }
 0x4a3   : > { %v2336_v10 = vadd.f32 %v6812_v13, %v2311_v36 }
 0x4a4   : > { %2968 = vrot.lane.b32.xlu0 %v2967_v23, %s8073_s4  ;;  %2860 = vrot.lane.b32.xlu1 %v2859_v26, %s8074_s20  ;;  %v3462_v61 = vadd.f32 %v3460_v1, %v3426_v8  ;;  %v3226_v23 = vrot.slane %v3222_v33, 6  ;;  %v2380_v63 = vadd.f32 %v6860_v12, %v2344_v53 }
 0x4a5   : > { %v7606_v29 = vpop.permute.xlu0 %2728  ;;  %v7608_v0 = vpop.permute.xlu1 %2676 }
 0x4a6   : > { %v3227_v15 = vsel %vm1142_vm10, %v3225_v7, %v3226_v23  ;;  %v2416_v39 = vadd.f32 %v6888_v45, %v2380_v63 }
 0x4a8   : > { %3040 = vrot.lane.b32.xlu0 %v3039_v5, %s8072_s23  ;;  %2932 = vrot.lane.b32.xlu1 %v2931_v31, %s8076_s30  ;;  %s4680_s23 = sld [smem:[#allocation11 + $0x80]]  ;;  %v2371_v5 = vadd.f32 %v6847_v60, %v2336_v10  ;;  %v2452_v54 = vadd.f32 %v6919_v24, %v2416_v39 }
 0x4a9   : > { %v7616_v27 = vpop.permute.xlu0 %2741  ;;  %v7618_v35 = vpop.permute.xlu1 %2689 }
 0x4aa   : > { %v2407_v42 = vadd.f32 %v6877_v14, %v2371_v5  ;;  %v2488_v12 = vadd.f32 %v6987_v49, %v2452_v54 }
 0x4ac   : > { %3176 = vrot.lane.b32.xlu0 %v3175_v19, %s8075_s7  ;;  %3004 = vrot.lane.b32.xlu1 %v3003_v25, %s8060_s22  ;;  %v2443_v13 = vadd.f32 %v6901_v50, %v2407_v42  ;;  %v2524_v8 = vadd.f32 %v7097_v18, %v2488_v12  ;;  %v2545_v25 = vrot.slane %v2543_v59, 4  ;;  %s4708_s22 = sld [smem:[#allocation11 + $0x9c]] }
 0x4ad   : > { %v7627_v44 = vpop.permute.xlu0 %2783  ;;  %v3496_v17 = vpop.permute.xlu1 %3495 }
 0x4ae   : > { %v3498_v56 = vadd.f32 %v3496_v17, %v3462_v61  ;;  %v2549_v47 = vstv %s4680_s23  ;;  %v2479_v45 = vadd.f32 %v6931_v41, %v2443_v13  ;;  %s4749_s23 = sld [smem:[#allocation12 + $0x3]] }
 0x4af   : > { %v2550_v52 = vmul.f32 %v2549_v47, %v6497_v62 }
 0x4b0   : > { %3124 = vrot.lane.b32.xlu1 %v3123_v38, %s8074_s20  ;;  %v7634_v1 = vadd.f32 %v3530_v46, %v3498_v56  ;;  %v2515_v55 = vadd.f32 %v7112_v3, %v2479_v45  ;;  %s4707_s20 = sld [smem:[#allocation11 + $0x9b]] }
 0x4b1   : > { %v7636_v26 = vpop.permute.xlu0 %3559  ;;  %v2776_v6 = vpop.permute.xlu1 %2775  ;;  %v2552_v14 = vrot.slane %v2550_v52, 4 }
 0x4b2   : > { %v2547_v50 = vadd.f32 %v2545_v25, %v2515_v55  ;;  %v2842_v38 = vstv %s4708_s22  ;;  %v3820_v55 = vstv %s4807_s5  ;;  %s4858_s22 = sshll.u32 %s5229_s16, 10  ;;  %s4403_s16 = scalar_lea.sflag [#allocation8], %s5362_s29 }
 0x4b3   : > { %v2554_v43 = vadd.f32 %v2552_v14, %v2524_v8 }
 0x4b4   : > { %3228 = vrot.lane.b32.xlu1 %v3227_v15, %s8076_s30  ;;  %v2579_v37 = vadd.f32 %v7144_v9, %v2547_v50  ;;  %s4735_s30 = sld [smem:[#allocation11 + $0xb7]]  ;;  %v3094_v50 = vstv %s4736_s28 }
 0x4b5   : > { %v3604_v20 = vpop.permute.xlu0 %3603  ;;  %v2808_v31 = vpop.permute.xlu1 %2807  ;;  %v2588_v49 = vadd.f32 %v7581_v58, %v2554_v43 }
 0x4b6   : > { %v2627_v41 = vadd.f32 %v7566_v40, %v2579_v37  ;;  %v2835_v17 = vstv %s4707_s20  ;;  %s4647_s20 = sld [smem:[#allocation12 + $0x1]] }
 0x4b7   : > { %v2640_v18 = vadd.f32 %v7579_v2, %v2588_v49  ;;  %v2836_v7 = vmul.f32 %v2835_v17, %v6835_v34 }
 0x4b8   : > { %v2679_v61 = vadd.f32 %v7608_v0, %v2627_v41  ;;  %v2843_v0 = vmul.f32 %v2842_v38, %v6835_v34 }
 0x4b9   : > { %v3656_v28 = vpop.permute.xlu0 %3655  ;;  %v2816_v60 = vpop.permute.xlu1 %2815  ;;  %v2692_v57 = vadd.f32 %v7618_v35, %v2640_v18  ;;  %v2838_v35 = vrot.slane %v2836_v7, 1 }
 0x4ba   : > { %v2731_v46 = vadd.f32 %v7606_v29, %v2679_v61  ;;  %v3083_v13 = vstv %s4735_s30  ;;  %s4416_s30 = sshll.u32 %s5380_s26, 4  ;;  %s7789_s30 = int_to_ptr.vmem [resolvable:$true] %s4416_s30 }
 0x4bb   : > { %v2744_v58 = vadd.f32 %v7616_v27, %v2692_v57  ;;  %v2845_v27 = vrot.slane %v2843_v0, 1  ;;  %v3084_v8 = vmul.f32 %v3083_v13, %v6835_v34 }
 0x4bc   : > { %v2778_v9 = vadd.f32 %v2776_v6, %v2731_v46 }
 0x4bd   : > { %v2906_v19 = vpop.permute.xlu0 %2905  ;;  %v2870_v24 = vpop.permute.xlu1 %2869  ;;  %v2786_v2 = vadd.f32 %v7627_v44, %v2744_v58  ;;  %v3562_v44 = vadd.f32 %v7636_v26, %v7634_v1  ;;  %v3821_v1 = vmul.f32 %v3820_v55, %v6704_v4 }
 0x4be   : > { %v2810_v36 = vadd.f32 %v2808_v31, %v2778_v9 }
 0x4bf   : > { %v2818_v53 = vadd.f32 %v2816_v60, %v2786_v2  ;;  %v3606_v42 = vadd.f32 %v3604_v20, %v3562_v44  ;;  %v3088_v20 = vrot.slane %v3084_v8, 5  ;;  %v3823_v57 = vrot.slane %v3821_v1, 1 }
 0x4c0   : > { %v2840_v15 = vadd.f32 %v2838_v35, %v2810_v36  ;;  %v4256_v1 = vstv %s4850_s0 }
 0x4c1   : > { %v2915_v51 = vpop.permute.xlu0 %2914  ;;  %v2879_v48 = vpop.permute.xlu1 %2878  ;;  %v2847_v29 = vadd.f32 %v2845_v27, %v2818_v53  ;;  %v3658_v60 = vadd.f32 %v3656_v28, %v3606_v42  ;;  %v3095_v28 = vmul.f32 %v3094_v50, %v6835_v34 }
 0x4c2   : > { %v2872_v5 = vadd.f32 %v2870_v24, %v2840_v15  ;;  %v3085_v24 = vmul.f32 0.0, %v3083_v13 }
 0x4c3   : > { %v2881_v47 = vadd.f32 %v2879_v48, %v2847_v29 }
 0x4c4   : > { %v2908_v31 = vadd.f32 %v2906_v19, %v2872_v5  ;;  %v3089_v48 = vrot.slane %v3085_v24, 5 }
 0x4c5   : > { %v3760_v33 = vpop.permute.xlu0 %3759  ;;  %v3708_v3 = vpop.permute.xlu1 %3707  ;;  %v2917_v52 = vadd.f32 %v2915_v51, %v2881_v47  ;;  %v3096_v51 = vmul.f32 0.0, %v3094_v50  ;;  %v4064_v47 = vstv %s4835_s19  ;;  %s7787_s19 = scalar_lea.hbm %s7840_s3, %s4858_s22 }
 0x4c6   : > { %v3710_v59 = vadd.f32 %v3708_v3, %v3658_v60  ;;  %v3090_v17 = vsel %vm314_vm5, %v3088_v20, %v3089_v48  ;;  %v4066_v42 = vmul.f32 0.0, %v4064_v47 }
 0x4c8   : > { %v3762_v19 = vadd.f32 %v3760_v33, %v3710_v59 }
 0x4c9   : > { %v2978_v21 = vpop.permute.xlu0 %2977  ;;  %v2942_v56 = vpop.permute.xlu1 %2941 }
 0x4ca   : > { %v2944_v12 = vadd.f32 %v2942_v56, %v2908_v31  ;;  %v3100_v56 = vrot.slane %v3096_v51, 5  ;;  %v4065_v31 = vmul.f32 %v4064_v47, %v6704_v4 }
 0x4cc   : > { %v2980_v25 = vadd.f32 %v2978_v21, %v2944_v12  ;;  %v3099_v21 = vrot.slane %v3095_v28, 5  ;;  %v4069_v13 = vrot.slane %v4065_v31, 5  ;;  %v8088_v31 = vld [vmem:[#allocation20_spill] sm:$0xff] }
 0x4cd   : > { %v2987_v40 = vpop.permute.xlu0 %2986  ;;  %v2951_v23 = vpop.permute.xlu1 %2950 }
 0x4ce   : > { %v2953_v45 = vadd.f32 %v2951_v23, %v2917_v52  ;;  %v3101_v33 = vsel %vm314_vm5, %v3099_v21, %v3100_v56 }
 0x4d0   : > { %v2989_v49 = vadd.f32 %v2987_v40, %v2953_v45 }
 0x4d1   : > { %v3023_v10 = vpop.permute.xlu0 %3022  ;;  %v3792_v63 = vpop.permute.xlu1 %3791 }
 0x4d2   : > { %v3794_v18 = vadd.f32 %v3792_v63, %v3762_v19  ;;  %v3025_v3 = vadd.f32 %v3023_v10, %v2989_v49 }
 0x4d4   : > { %v3825_v9 = vadd.f32 %v3823_v57, %v3794_v18  ;;  %v2535_v18 = vstv %s4678_s1 }
 0x4d5   : > { %v3853_v6 = vpop.permute.xlu0 %3852  ;;  %v3014_v39 = vpop.permute.xlu1 %3013  ;;  %v2536_v56 = vmul.f32 %v2535_v18, %v6497_v62 }
 0x4d6   : > { %v3016_v26 = vadd.f32 %v3014_v39, %v2980_v25  ;;  %v3855_v36 = vadd.f32 %v3853_v6, %v3825_v9 }
 0x4d9   : > { %v3889_v54 = vpop.permute.xlu0 %3888  ;;  %v3050_v22 = vpop.permute.xlu1 %3049 }
 0x4da   : > { %v3052_v41 = vadd.f32 %v3050_v22, %v3016_v26  ;;  %v3891_v35 = vadd.f32 %v3889_v54, %v3855_v36  ;;  %v4070_v54 = vrot.slane %v4066_v42, 5 }
 0x4dc   : > { %v3092_v38 = vadd.f32 %v3090_v17, %v3052_v41  ;;  %v4071_v52 = vsel %vm314_vm5, %v4069_v13, %v4070_v54  ;;  %v8084_v17 = vld [vmem:[#allocation68_spill] sm:$0xff]  ;;  %v8089_v13 = vld [vmem:[#allocation21_spill] sm:$0xff] }
 0x4dd   : > { %v3059_v14 = vpop.permute.xlu1 %3058  ;;  %v3925_v43 = vpop.permute.xlu0 %3924 }
 0x4de   : > { %v3061_v46 = vadd.f32 %v3059_v14, %v3025_v3  ;;  %v3927_v15 = vadd.f32 %v3925_v43, %v3891_v35 }
 0x4e0   : > { %v3103_v2 = vadd.f32 %v3101_v33, %v3061_v46 }
 0x4e1   : > { %v3138_v37 = vpop.permute.xlu1 %3137  ;;  %v3190_v61 = vpop.permute.xlu0 %3189 }
 0x4e2   : > { %v3140_v7 = vadd.f32 %v3138_v37, %v3092_v38  ;;  %v2538_v38 = vrot.slane %v2536_v56, 4 }
 0x4e4   : > { %v3192_v53 = vadd.f32 %v3190_v61, %v3140_v7 }
 0x4e5   : > { %v3151_v58 = vpop.permute.xlu1 %3150  ;;  %v3203_v23 = vpop.permute.xlu0 %3202 }
 0x4e6   : > { %v3153_v0 = vadd.f32 %v3151_v58, %v3103_v2  ;;  %v8085_v58 = vld [vmem:[#allocation78_spill] sm:$0xff] }
 0x4e8   : > { %v3205_v5 = vadd.f32 %v3203_v23, %v3153_v0 }
 0x4e9   : > { %v3961_v40 = vpop.permute.xlu1 %3960  ;;  %v3997_v27 = vpop.permute.xlu0 %3996 }
 0x4ea   : > { %v3963_v29 = vadd.f32 %v3961_v40, %v3927_v15  ;;  %v2828_v15 = vstv %s4706_s8 }
 0x4eb   : > { %v2829_v47 = vmul.f32 %v2828_v15, %v6835_v34  ;;  %v1381_v15 = vstv %s4605_s27 }
 0x4ec   : > { %v3999_v6 = vadd.f32 %v3997_v27, %v3963_v29 }
 0x4ed   : > { %v3242_v10 = vpop.permute.xlu1 %3241  ;;  %v4033_v22 = vpop.permute.xlu0 %4032 }
 0x4ee   : > { %v3244_v63 = vadd.f32 %v3242_v10, %v3192_v53  ;;  %v4035_v12 = vadd.f32 %v4033_v22, %v3999_v6 }
 0x4f0   : > { %3246 = vrot.lane.b32.xlu0 %v3244_v63, %s8075_s7  ;;  %v4073_v45 = vadd.f32 %v4071_v52, %v4035_v12  ;;  %s4849_s7 = sld [smem:[#allocation12 + $0x4]]  ;;  %v8090_v12 = vld [vmem:[#allocation23_spill] sm:$0xff] }
 0x4f1   : > { %v3252_v39 = vpop.permute.xlu1 %3251  ;;  %v4169_v59 = vpop.permute.xlu0 %4168 }
 0x4f2   : > { %v3254_v44 = vadd.f32 %v3252_v39, %v3205_v5  ;;  %v346_v39 = vstv %s345_s9 }
 0x4f3   : > { %v347_v42 = vmul.f32 %v346_v39, %v8088_v31  ;;  %v348_v54 = vmul.f32 %v346_v39, %v8089_v13 }
 0x4f4   : > { %3256 = vrot.lane.b32.xlu1 %v3254_v44, %s8073_s4  ;;  %s4650_s4 = sld [smem:[#allocation11 + $0x62]] }
 0x4f5   : > { %v4117_v60 = vpop.permute.xlu1 %4116  ;;  %v381_v52 = vadd.f32 %v8090_v12, %v347_v42  ;;  %v8107_v42 = vld [vmem:[#allocation58_spill] sm:$0xff] }
 0x4f6   : > { %v4119_v8 = vadd.f32 %v4117_v60, %v4073_v45  ;;  %v4253_v4 = vstv %s4849_s7  ;;  %v2831_v60 = vrot.slane %v2829_v47, 1  ;;  %v8091_v45 = vld [vmem:[#allocation24_spill] sm:$0xff]  ;;  %v3072_v47 = vstv %s4734_s10  ;;  %s5185_s7 = smov [#allocation13]  }
 0x4f7   : > { %s5058_s0 = sshll.u32 %s5185_s7, 4  ;;  %s5059_s0 = int_to_ptr.vmem [resolvable:$false] %s5058_s0 }
 0x4f8   : > { %v4171_v55 = vadd.f32 %v4169_v59, %v4119_v8  ;;  %v382_v8 = vadd.f32 %v8091_v45, %v348_v54  ;;  %v8092_v59 = vld [vmem:[#allocation27_spill] sm:$0xff]  ;;  %v8109_v54 = vld [vmem:[#allocation60_spill] sm:$0xff]  ;;  %p5061_p12 = scmp.lt.s32.totalorder %s7789_s30, %s5059_s0 }
 0x4f9   : > { %v4221_v14 = vpop.permute.xlu1 %4220 }
 0x4fa   : > { %v4223_v25 = vadd.f32 %v4221_v14, %v4171_v55  ;;  %v2306_v48 = vstv %s4650_s4  ;;  %v452_v55 = vadd.f32 %v8092_v59, %v381_v52  ;;  %v8110_v52 = vld [vmem:[#allocation37_spill] sm:$0xff]  ;;  %v3074_v59 = vmul.f32 0.0, %v3072_v47  ;;  %s5060_s4 = scalar_lea.vmem %s5059_s0, 2048 }
 0x4fb   : > { %v2307_v37 = vmul.f32 %v2306_v48, %v6497_v62 }
 0x4fd   : > { %v2328_v28 = vadd.f32 %v6810_v32, %v2307_v37  ;;  %v8086_v32 = vld [vmem:[#allocation87_spill] sm:$0xff]  ;;  %v8097_v37 = vld [vmem:[#allocation22_spill] sm:$0xff] }
 0x4ff   : > { %v2362_v51 = vadd.f32 %v6845_v16, %v2328_v28  ;;  %v8087_v16 = vld [vmem:[#allocation19_spill] sm:$0xff] }
 0x500   : > { %v7685_v40 = vsub.s32 0, %v8087_v16  ;;  %v4330_v62 = vsub.s32 1, %v8087_v16  ;;  %v4341_v10 = vsub.s32 2, %v8087_v16  ;;  %v4352_v29 = vsub.s32 3, %v8087_v16 }
 0x501   : > { %v2398_v41 = vadd.f32 %v6875_v11, %v2362_v51 }
 0x502   : > { %v4239_v24 = vpop.permute.xlu0 %4238 }
 0x503   : > { %v4241_v43 = vadd.f32 %v4239_v24, %v4223_v25  ;;  %v2434_v61 = vadd.f32 %v6899_v30, %v2398_v41  ;;  %v8093_v24 = vld [vmem:[#allocation28_spill] sm:$0xff]  ;;  %v8098_v41 = vld [vmem:[#allocation38_spill] sm:$0xff] }
 0x504   : > { %v453_v25 = vadd.f32 %v8093_v24, %v382_v8  ;;  %v3073_v8 = vmul.f32 %v3072_v47, %v6835_v34  ;;  %v8112_v24 = vld [vmem:[#allocation43_spill] sm:$0xff] }
 0x505   : > { %v2470_v21 = vadd.f32 %v8084_v17, %v2434_v61  ;;  %v8099_v61 = vld [vmem:[#allocation41_spill] sm:$0xff]  ;;  %v8100_v17 = vld [vmem:[#allocation42_spill] sm:$0xff] }
 0x506   : > { %v2612_v7 = vpop.permute.xlu0 %2611 }
 0x507   : > { %v2506_v46 = vadd.f32 %v8085_v58, %v2470_v21 }
 0x509   : > { %v2540_v9 = vadd.f32 %v2538_v38, %v2506_v46  ;;  %v8101_v46 = vld [vmem:[#allocation46_spill] sm:$0xff] }
 0x50a   : > { %v4249_v50 = vpop.permute.xlu1 %4248  ;;  %v2716_v0 = vpop.permute.xlu0 %2715 }
 0x50b   : > { %v4251_v49 = vadd.f32 %v4249_v50, %v4241_v43  ;;  %v2570_v33 = vadd.f32 %v8086_v32, %v2540_v9  ;;  %v8094_v43 = vld [vmem:[#allocation31_spill] sm:$0xff]  ;;  %v856_v50 = vstv %s4577_s17 }
 0x50c   : > { %v859_v28 = vmul.f32 %v856_v50, %v8097_v37  ;;  %v8102_v32 = vld [vmem:[#allocation47_spill] sm:$0xff] }
 0x50d   : > { %v4254_v26 = vmul.f32 %v4253_v4, %v4251_v49  ;;  %v2614_v23 = vadd.f32 %v2612_v7, %v2570_v33  ;;  %v536_v4 = vadd.f32 %v8094_v43, %v452_v55  ;;  %v8095_v49 = vld [vmem:[#allocation32_spill] sm:$0xff] }
 0x50e   : > { %v2664_v11 = vpop.permute.xlu1 %2663  ;;  %v2800_v44 = vpop.permute.xlu0 %2799  ;;  %v867_v9 = vrot.slane %v859_v28, 4  ;;  %v8111_v55 = vld [vmem:[#allocation64_spill] sm:$0xff]  ;;  %v3077_v28 = vrot.slane %v3073_v8, 5 }
 0x50f   : > { %v4257_v20 = vadd.f32 %v4256_v1, %v4254_v26  ;;  %v2666_v30 = vadd.f32 %v2664_v11, %v2614_v23  ;;  %v537_v1 = vadd.f32 %v8095_v49, %v453_v25  ;;  %v858_v26 = vmul.f32 %v856_v50, %v8089_v13  ;;  %v8114_v49 = vld [vmem:[#allocation70_spill] sm:$0xff] }
 0x510   : > { %v1384_v25 = vmul.f32 %v1381_v15, %v8112_v24 }
 0x511   : > { %v4851_v19 = vmul.f32 -1.442695, %v4257_v20  ;;  %v2718_v53 = vadd.f32 %v2716_v0, %v2666_v30  ;;  %v622_v18 = vadd.f32 %v8098_v41, %v537_v1  ;;  %v865_v56 = vrot.slane %v858_v26, 4  ;;  %v8116_v41 = vld [vmem:[#allocation77_spill] sm:$0xff] }
 0x512   : > { %v2768_v63 = vpop.permute.xlu1 %2767  ;;  %v2897_v58 = vpop.permute.xlu0 %2896  ;;  %v1391_v34 = vrot.slane %v1384_v25, 1  ;;  %v8129_v25 = vld [vmem:[#allocation119_spill] sm:$0xff] }
 0x513   : > { %4980 = vpow2.f32 %v4851_v19  ;;  %v2770_v27 = vadd.f32 %v2768_v63, %v2718_v53  ;;  %v8096_v19 = vld [vmem:[#allocation36_spill] sm:$0xff]  ;;  %v706_v21 = vadd.f32 %v8100_v17, %v622_v18  ;;  %v8103_v53 = vld [vmem:[#allocation50_spill] sm:$0xff] }
 0x514   : > { %v621_v48 = vadd.f32 %v8096_v19, %v536_v4  ;;  %v8113_v4 = vld [vmem:[#allocation66_spill] sm:$0xff] }
 0x515   : > { %v2802_v6 = vadd.f32 %v2800_v44, %v2770_v27  ;;  %v791_v33 = vadd.f32 %v8102_v32, %v706_v21  ;;  %v8106_v44 = vld [vmem:[#allocation55_spill] sm:$0xff]  ;;  %v8119_v32 = vld [vmem:[#allocation85_spill] sm:$0xff] }
 0x516   : > { %v2861_v20 = vpop.permute.xlu1 %2860  ;;  %v2969_v27 = vpop.permute.xlu0 %2968 }
 0x517   : > { %v2833_v14 = vadd.f32 %v2831_v60, %v2802_v6  ;;  %v1383_v60 = vmul.f32 %v1381_v15, %v8110_v52 }
 0x519   : > { %v2863_v51 = vadd.f32 %v2861_v20, %v2833_v14  ;;  %v8115_v20 = vld [vmem:[#allocation72_spill] sm:$0xff] }
 0x51a   : > { %v3041_v37 = vpop.permute.xlu0 %3040 }
 0x51b   : > { %v2899_v7 = vadd.f32 %v2897_v58, %v2863_v51  ;;  %v3078_v51 = vrot.slane %v3074_v59, 5  ;;  %v8128_v59 = vld [vmem:[#allocation116_spill] sm:$0xff] }
 0x51d   : > { %v4981_v3 = vpop.eup %4980  ;;  %v3079_v21 = vsel %vm314_vm5, %v3077_v28, %v3078_v51  ;;  %v3264_v28 = vstv %s4749_s23 }
 0x51e   : > { %v4261_v57 = vadd.f32 1.0, %v4981_v3  ;;  %v857_v3 = vmul.f32 %v856_v50, %v8088_v31 }
 0x520   : > { %4982 = vrcp.f32 %v4261_v57  ;;  %v705_v57 = vadd.f32 %v8099_v61, %v621_v48  ;;  %v864_v11 = vrot.slane %v857_v3, 4  ;;  %v1389_v48 = vrot.slane %v1383_v60, 1  ;;  %v8117_v61 = vld [vmem:[#allocation80_spill] sm:$0xff] }
 0x522   : > { %v790_v38 = vadd.f32 %v8101_v46, %v705_v57  ;;  %v866_v23 = vsel %vm863_vm9, %v864_v11, %v865_v56  ;;  %v1392_v58 = vsel %vm419_vm6, %v1389_v48, %v1391_v34  ;;  %v8132_v34 = vld [vmem:[#allocation59_spill] sm:$0xff] }
 0x524   : > { %v871_v30 = vadd.f32 %v866_v23, %v790_v38  ;;  %v8120_v23 = vld [vmem:[#allocation89_spill] sm:$0xff] }
 0x52a   : > { %v4983_v2 = vpop.eup %4982 }
 0x52b   : > { %v4320_v36 = vrot.slane %v4983_v2, %v7685_v40  ;;  %v4331_v35 = vrot.slane %v4983_v2, %v4330_v62  ;;  %v4342_v5 = vrot.slane %v4983_v2, %v4341_v10  ;;  %v4353_v22 = vrot.slane %v4983_v2, %v4352_v29  ;;  %v2933_v2 = vpop.permute.xlu1 %2932  ;;  %v8104_v10 = vld [vmem:[#allocation51_spill] sm:$0xff] }
 0x52c   : > { %v2935_v62 = vadd.f32 %v2933_v2, %v2899_v7 }
 0x52d   : > { %4326 = vbcast.lane.b32.xlu1 %v4320_v36, 264  ;;  %4322 = vbcast.lane.b32.xlu0 %v4320_v36, 256  ;;  %v868_v36 = vsel %vm863_vm9, %v865_v56, %v867_v9  ;;  %v8118_v9 = vld [vmem:[#allocation84_spill] sm:$0xff] }
 0x52e   : > { %v872_v0 = vadd.f32 %v868_v36, %v791_v33  ;;  %v2971_v39 = vadd.f32 %v2969_v27, %v2935_v62  ;;  %v8121_v62 = vld [vmem:[#allocation90_spill] sm:$0xff] }
 0x52f   : > { %v3005_v45 = vpop.permute.xlu1 %3004 }
 0x530   : > { %v944_v63 = vadd.f32 %v8104_v10, %v872_v0  ;;  %v3007_v43 = vadd.f32 %v3005_v45, %v2971_v39  ;;  %v8123_v10 = vld [vmem:[#allocation96_spill] sm:$0xff] }
 0x531   : > { %4337 = vbcast.lane.b32.xlu1 %v4331_v35, 264  ;;  %4333 = vbcast.lane.b32.xlu0 %v4331_v35, 256  ;;  %v943_v35 = vadd.f32 %v8103_v53, %v871_v30  ;;  %v1953_v30 = vstv %s4633_s2  ;;  %v8122_v53 = vld [vmem:[#allocation94_spill] sm:$0xff] }
 0x532   : > { %v1028_v31 = vadd.f32 %v8106_v44, %v944_v63  ;;  %v3043_v3 = vadd.f32 %v3041_v37, %v3007_v43  ;;  %v1955_v27 = vmul.f32 %v1953_v30, %v8110_v52  ;;  %v1956_v47 = vmul.f32 %v1953_v30, %v8112_v24 }
 0x533   : > { %v3125_v11 = vpop.permute.xlu1 %3124 }
 0x534   : > { %v1112_v12 = vadd.f32 %v8109_v54, %v1028_v31  ;;  %v3081_v46 = vadd.f32 %v3079_v21, %v3043_v3  ;;  %v8125_v31 = vld [vmem:[#allocation103_spill] sm:$0xff]  ;;  %v1961_v45 = vrot.slane %v1955_v27, 5  ;;  %v8134_v21 = vld [vmem:[#allocation65_spill] sm:$0xff] }
 0x535   : > { %4348 = vbcast.lane.b32.xlu1 %v4342_v5, 264  ;;  %4344 = vbcast.lane.b32.xlu0 %v4342_v5, 256  ;;  %v8105_v5 = vld [vmem:[#allocation54_spill] sm:$0xff]  ;;  %v8127_v54 = vld [vmem:[#allocation111_spill] sm:$0xff] }
 0x536   : > { %v1027_v29 = vadd.f32 %v8105_v5, %v943_v35  ;;  %v1197_v50 = vadd.f32 %v8113_v4, %v1112_v12  ;;  %v3127_v36 = vadd.f32 %v3125_v11, %v3081_v46  ;;  %v3177_v5 = vpop.permute.xlu0 %3176  ;;  %v8138_v11 = vld [vmem:[#allocation71_spill] sm:$0xff] }
 0x537   : > { %v3229_v8 = vpop.permute.xlu1 %3228 }
 0x538   : > { %v1111_v6 = vadd.f32 %v8107_v42, %v1027_v29  ;;  %v1281_v19 = vadd.f32 %v8115_v20, %v1197_v50  ;;  %v8124_v29 = vld [vmem:[#allocation100_spill] sm:$0xff]  ;;  %v3179_v44 = vadd.f32 %v3177_v5, %v3127_v36  ;;  %v3261_v50 = vstv %s4748_s21 }
 0x539   : > { %4359 = vbcast.lane.b32.xlu1 %v4353_v22, 264  ;;  %4355 = vbcast.lane.b32.xlu0 %v4353_v22, 256  ;;  %v8108_v22 = vld [vmem:[#allocation34_spill] sm:$0xff] }
 0x53a   : > { %v1382_v13 = vmul.f32 %v1381_v15, %v8108_v22  ;;  %v1196_v14 = vadd.f32 %v8111_v55, %v1111_v6  ;;  %v1337_v57 = vadd.f32 %v8117_v61, %v1281_v19  ;;  %v1954_v15 = vmul.f32 %v1953_v30, %v8108_v22  ;;  %v8126_v6 = vld [vmem:[#allocation108_spill] sm:$0xff]  ;;  %v8133_v61 = vld [vmem:[#allocation74_spill] sm:$0xff]  ;;  %v8139_v30 = vld [vmem:[#allocation75_spill] sm:$0xff] }
 0x53b   : > { %v1963_v55 = vrot.slane %v1956_v47, 5 }
 0x53c   : > { %v1280_v1 = vadd.f32 %v8114_v49, %v1196_v14  ;;  %v1388_v26 = vrot.slane %v1382_v13, 1  ;;  %v1396_v38 = vadd.f32 %v1392_v58, %v1337_v57  ;;  %v1960_v60 = vrot.slane %v1954_v15, 5  ;;  %v8135_v58 = vld [vmem:[#allocation62_spill] sm:$0xff] }
 0x53d   : > { %v3231_v14 = vadd.f32 %v3229_v8, %v3179_v44 }
 0x53e   : > { %v1336_v18 = vadd.f32 %v8116_v41, %v1280_v1  ;;  %v1390_v17 = vsel %vm419_vm6, %v1388_v26, %v1389_v48  ;;  %v1468_v33 = vadd.f32 %v8119_v32, %v1396_v38  ;;  %v1962_v24 = vsel %vm314_vm5, %v1960_v60, %v1961_v45  ;;  %v8130_v48 = vld [vmem:[#allocation121_spill] sm:$0xff]  ;;  %v8131_v41 = vld [vmem:[#allocation122_spill] sm:$0xff] }
 0x53f   : > { %v1964_v26 = vsel %vm314_vm5, %v1961_v45, %v1963_v55  ;;  %v8136_v38 = vld [vmem:[#allocation82_spill] sm:$0xff] }
 0x540   : > { %v1395_v56 = vadd.f32 %v1390_v17, %v1336_v18  ;;  %v1552_v0 = vadd.f32 %v8121_v62, %v1468_v33 }
 0x542   : > { %v1467_v7 = vadd.f32 %v8118_v9, %v1395_v56  ;;  %v1636_v63 = vadd.f32 %v8123_v10, %v1552_v0  ;;  %v2265_v0 = vstv %s4647_s20 }
 0x544   : > { %v1551_v2 = vadd.f32 %v8120_v23, %v1467_v7  ;;  %v1720_v42 = vadd.f32 %v8125_v31, %v1636_v63  ;;  %v8137_v7 = vld [vmem:[#allocation79_spill] sm:$0xff] }
 0x546   : > { %v1635_v35 = vadd.f32 %v8122_v53, %v1551_v2  ;;  %v1804_v12 = vadd.f32 %v8127_v54, %v1720_v42  ;;  %v2261_v2 = vstv %s2260_s11 }
 0x548   : > { %v1719_v39 = vadd.f32 %v8124_v29, %v1635_v35  ;;  %v1888_v43 = vadd.f32 %v8129_v25, %v1804_v12  ;;  %v5184_v29 = vmov 1966171168  }
 0x54a   : > { %v1803_v13 = vadd.f32 %v8126_v6, %v1719_v39  ;;  %v1968_v19 = vadd.f32 %v1964_v26, %v1888_v43  ;;  %v4266_v39 = vunpack.c.l.s4 %v5184_v29  ;;  %v4376_v29 = vld [vmem:[%s5366_s6 + $0x38] sm:$0xff] }
 0x54c   : > { %v1887_v52 = vadd.f32 %v8128_v59, %v1803_v13  ;;  %v2040_v18 = vadd.f32 %v8131_v41, %v1968_v19  ;;  %v4267_v47 = vunpack.c.0.s8 %v4266_v39 }
 0x54e   : > { %v1967_v1 = vadd.f32 %v1962_v24, %v1887_v52  ;;  %v2124_v57 = vadd.f32 %v8133_v61, %v2040_v18  ;;  %v4270_v6 = vsub.s32 %v4267_v47, %v8087_v16 }
 0x550   : > { %v2039_v37 = vadd.f32 %v8130_v48, %v1967_v1  ;;  %v2208_v46 = vadd.f32 %v8135_v58, %v2124_v57  ;;  %v4370_v1 = vld [vmem:[%s5366_s6 + $0x8] sm:$0xff]  ;;  %v4371_v57 = vld [vmem:[%s5366_s6 + $0x10] sm:$0xff] }
 0x552   : > { %v2123_v3 = vadd.f32 %v8132_v34, %v2039_v37  ;;  %v2239_v32 = vadd.f32 %v8137_v7, %v2208_v46 }
 0x554   : > { %v2207_v56 = vadd.f32 %v8134_v21, %v2123_v3  ;;  %v2259_v36 = vadd.f32 %v8139_v30, %v2239_v32  ;;  %v4374_v30 = vld [vmem:[%s5366_s6 + $0x28] sm:$0xff] }
 0x556   : > { %v2238_v9 = vadd.f32 %v8136_v38, %v2207_v56  ;;  %v2263_v53 = vmul.f32 %v2261_v2, %v2259_v36 }
 0x558   : > { %v2258_v23 = vadd.f32 %v8138_v11, %v2238_v9  ;;  %v2267_v10 = vadd.f32 %v2265_v0, %v2263_v53 }
 0x55a   : > { %v2262_v62 = vmul.f32 %v2261_v2, %v2258_v23  ;;  %v4649_v27 = vmul.f32 -1.442695, %v2267_v10  ;;  %v4373_v2 = vld [vmem:[%s5366_s6 + $0x20] sm:$0xff] }
 0x55c   : > { %v2266_v35 = vadd.f32 %v2265_v0, %v2262_v62 }
 0x55e   : > { %v4648_v63 = vmul.f32 -1.442695, %v2266_v35 }
 0x562   : > { %v3247_v22 = vpop.permute.xlu0 %3246 }
 0x563   : > { %v3249_v4 = vadd.f32 %v3247_v22, %v3231_v14 }
 0x566   : > { %v3257_v49 = vpop.permute.xlu1 %3256 }
 0x567   : > { %v3259_v20 = vadd.f32 %v3257_v49, %v3249_v4  ;;  %v4369_v49 = vld [vmem:[%s5366_s6] sm:$0xff] }
 0x569   : > { %v3262_v51 = vmul.f32 %v3261_v50, %v3259_v20 }
 0x56b   : > { %v3265_v17 = vadd.f32 %v3264_v28, %v3262_v51 }
 0x56d   : > { %v4750_v33 = vmul.f32 -1.442695, %v3265_v17  ;;  %v4372_v17 = vld [vmem:[%s5366_s6 + $0x18] sm:$0xff] }
 0x56f   : > { %4984 = vpow2.f32 %v4750_v33 }
 0x570   : > { %4986 = vpow2.f32 %v4648_v63 }
 0x571   : > { %4988 = vpow2.f32 %v4649_v27 }
 0x579   : > { %v4985_v15 = vpop.eup %4984 }
 0x57a   : > { %v3269_v5 = vadd.f32 1.0, %v4985_v15  ;;  %v4987_v44 = vpop.eup %4986 }
 0x57b   : > { %v4989_v31 = vpop.eup %4988  ;;  %v2274_v42 = vadd.f32 1.0, %v4987_v44 }
 0x57c   : > { %4990 = vrcp.f32 %v3269_v5  ;;  %v2275_v54 = vadd.f32 1.0, %v4989_v31  ;;  %v4375_v5 = vld [vmem:[%s5366_s6 + $0x30] sm:$0xff]  ;;  %s5054_s6 = scalar_lea.vmem %s7789_s30, 1024 }
 0x57d   : > { %4992 = vrcp.f32 %v2274_v42  ;;  %p5055_p8 = scmp.ne.s32.totalorder %s7789_s30, %s5054_s6  ;;  %p5062_p1 = scmp.lt.s32.totalorder %s5060_s4, %s5054_s6 }
 0x57e   : > { %4994 = vrcp.f32 %v2275_v54 }
 0x57f   : > { %p5056_p4 = pnand %p5055_p8, %p8140_p10  ;;  %p5063_p7 = por %p5062_p1, %p5061_p12 }
 0x581   : > { %p5057_p6 = pneg %p5056_p4 }
 0x583   : > { %p5064_p11 = pnand %p5063_p7, %p5057_p6 }
 0x586   : > { %v4991_v13 = vpop.eup %4990 }
 0x587   : > { %v4271_v12 = vrot.slane %v4991_v13, %v4270_v6  ;;  %v4993_v59 = vpop.eup %4992 }
 0x588   : > { %v4995_v52 = vpop.eup %4994 }
 0x589   : > { %v4279_v60 = vrot.slane %v4271_v12, %v4270_v6  ;;  %v4272_v45 = vcombine.high %v4271_v12, %v4271_v12 }
 0x58b   : > { %v4292_v8 = vrot.slane %v4279_v60, %v7685_v40  ;;  %v4286_v22 = vrot.slane %v4272_v45, %v4270_v6  ;;  %v4287_v55 = vcombine.high %v4279_v60, %v4279_v60 }
 0x58d   : > { %v4309_v14 = vadd.f32 %v4993_v59, %v4292_v8  ;;  %v4310_v25 = vadd.f32 %v4995_v52, %v4292_v8  ;;  %v4296_v43 = vrot.slane %v4286_v22, %v7685_v40  ;;  %v4300_v26 = vrot.slane %v4287_v55, %v7685_v40 }
 0x58e   : > { %v4288_v20 = vcombine.high %v4286_v22, %v4286_v22 }
 0x58f   : > { %v4311_v37 = vadd.f32 %v4993_v59, %v4296_v43  ;;  %v4312_v28 = vadd.f32 %v4995_v52, %v4296_v43  ;;  %v4313_v21 = vadd.f32 %v4993_v59, %v4300_v26  ;;  %v4314_v46 = vadd.f32 %v4995_v52, %v4300_v26 }
 0x590   : > { %v4304_v38 = vrot.slane %v4288_v20, %v7685_v40 }
 0x592   : > { %v4315_v62 = vadd.f32 %v4993_v59, %v4304_v38  ;;  %v4316_v0 = vadd.f32 %v4995_v52, %v4304_v38 }
 0x59f   : > { %v4323_v16 = vpop.permute.xlu0 %4322  ;;  %v4327_v4 = vpop.permute.xlu1 %4326 }
 0x5a0   : > { %v4361_v24 = vadd.f32 %v4323_v16, %v4309_v14  ;;  %v4362_v50 = vadd.f32 %v4327_v4, %v4310_v25 }
 0x5a2   : > { %v4377_v19 = vmul.f32 0.33333334, %v4361_v24  ;;  %v4378_v48 = vmul.f32 0.33333334, %v4362_v50 }
 0x5a3   : > { %v4334_v51 = vpop.permute.xlu0 %4333  ;;  %v4338_v41 = vpop.permute.xlu1 %4337 }
 0x5a4   : > { %v4385_v18 = vmul.f32 %v4377_v19, %v4369_v49  ;;  %v4386_v34 = vmul.f32 %v4378_v48, %v4370_v1  ;;  %v4363_v3 = vadd.f32 %v4334_v51, %v4311_v37  ;;  %v4364_v61 = vadd.f32 %v4338_v41, %v4312_v28 }
 0x5a6   : > { %4394 = vst.msk [vmem:[%s5380_s26] sm:$0xff] %vm228_vm0, %v4385_v18  ;;  %4395 = vst.msk [vmem:[%s5380_s26 + $0x8] sm:$0xff] %vm228_vm0, %v4386_v34  ;;  %v4379_v56 = vmul.f32 0.33333334, %v4363_v3  ;;  %v4380_v58 = vmul.f32 0.33333334, %v4364_v61 }
 0x5a7   : > { %v4345_v9 = vpop.permute.xlu0 %4344  ;;  %v4349_v7 = vpop.permute.xlu1 %4348 }
 0x5a8   : > { %v4387_v32 = vmul.f32 %v4379_v56, %v4371_v57  ;;  %v4388_v33 = vmul.f32 %v4380_v58, %v4372_v17  ;;  %v4365_v11 = vadd.f32 %v4345_v9, %v4313_v21  ;;  %v4366_v23 = vadd.f32 %v4349_v7, %v4314_v46 }
 0x5aa   : > { %4396 = vst.msk [vmem:[%s5380_s26 + $0x10] sm:$0xff] %vm228_vm0, %v4387_v32  ;;  %4397 = vst.msk [vmem:[%s5380_s26 + $0x18] sm:$0xff] %vm228_vm0, %v4388_v33  ;;  %v4381_v36 = vmul.f32 0.33333334, %v4365_v11  ;;  %v4382_v40 = vmul.f32 0.33333334, %v4366_v23 }
 0x5ab   : > { %v4356_v53 = vpop.permute.xlu0 %4355  ;;  %v4360_v35 = vpop.permute.xlu1 %4359 }
 0x5ac   : > { %v4389_v10 = vmul.f32 %v4381_v36, %v4373_v2  ;;  %v4390_v63 = vmul.f32 %v4382_v40, %v4374_v30  ;;  %v4367_v15 = vadd.f32 %v4356_v53, %v4315_v62  ;;  %v4368_v27 = vadd.f32 %v4360_v35, %v4316_v0 }
 0x5ae   : > { %4398 = vst.msk [vmem:[%s5380_s26 + $0x20] sm:$0xff] %vm228_vm0, %v4389_v10  ;;  %4399 = vst.msk [vmem:[%s5380_s26 + $0x28] sm:$0xff] %vm228_vm0, %v4390_v63  ;;  %v4383_v39 = vmul.f32 0.33333334, %v4367_v15  ;;  %v4384_v47 = vmul.f32 0.33333334, %v4368_v27 }
 0x5b0   : > { %v4391_v44 = vmul.f32 %v4383_v39, %v4375_v5  ;;  %v4392_v31 = vmul.f32 %v4384_v47, %v4376_v29 }
 0x5b2   : > { %4400 = vst.msk [vmem:[%s5380_s26 + $0x30] sm:$0xff] %vm228_vm0, %v4391_v44  ;;  %4401 = vst.msk [vmem:[%s5380_s26 + $0x38] sm:$0xff] %vm228_vm0, %v4392_v31 }
 0x5b3   : > { %5067 = shalt.err (!%p5064_p11)
}
 0x5b4   : > { %s5068_s26 = scalar_lea.hbm %s7787_s19, 1024  ;;  %s5072_s9 = scalar_lea.hbm %s7840_s3, 2048 }
 0x5b5   : > { %p5069_p13 = scmp.ne.s32.totalorder %s7787_s19, %s5068_s26  ;;  %p5073_p2 = scmp.lt.u32.totalorder %s7787_s19, %s7840_s3 }
 0x5b6   : > { %p5074_p5 = scmp.lt.u32.totalorder %s5072_s9, %s5068_s26  ;;  %p5076_p8 = scmp.lt.u32.totalorder %s5068_s26, %s7787_s19 }
 0x5b7   : > { %p5070_p3 = pnand %p5069_p13, %p8140_p10 }
 0x5b8   : > { %p5075_p0 = por %p5074_p5, %p5073_p2 }
 0x5b9   : > { %p5071_p9 = pneg %p5070_p3 }
 0x5ba   : > { %p5077_p4 = por %p5076_p8, %p5075_p0 }
 0x5bc   : > { %p5078_p6 = pnand %p5077_p4, %p5071_p9 }
 0x5be   : > { %5081 = shalt.err (!%p5078_p6)
}
 0x5bf   : > { %s5186_s10 = smov 128   ;;  %s5187_s2 = smov 8  }
 0x5c0   : > { %4869 = dma.vmem_to_hbm [thread:$0]  (%p8140_p10), %s7789_s30, 1024, %s7787_s19, %s4403_s16, %s5186_s10, %s5186_s10, %s5187_s2  }
 0x5c1 PF: > { %s4431_s21 = sand.u32 1, %s5136_s12   ;;  %p8141_p12 = scmp.ne.s32.totalorder %s7883_s25, 0 }
 0x5c2   : > { %p8142_p1 = scmp.ge.s32.totalorder %s5148_s15, 2  ;;  %s4432_s23 = scalar_lea.sflag [#allocation8], %s4431_s21 }
 0x5c4   : > { %p4883_p7 = pnand %p8142_p1, %p8141_p12 }
 0x5c6   : > { %5131 = dma.done.wait (!%p4883_p7), %s4432_s23, 1024  }
 0x5c7   : > { %5133 = vsyncadd (!%p4883_p7), %s4432_s23, 4294966272  ;;  %s8143_s11 = sld [smem:[#allocation18_spill]]  ;;  %p18_p11 = scmp.ge.s32.totalorder %s5233_s18, 4  }
 0x5c8   : > { %s8144_s12 = smov %s5140_s13  ;;  %s8145_s13 = smov %s5144_s14 }
 0x5c9   : > { %s8147_s15 = smov %s5233_s18  ;;  %20 = sbr.rel (!%p18_p11) target bundleno = 11 (0xb), region = 110 }
 0x5cd   : > { %s8146_s14 = smov %s8143_s11 }
 0x5d0   :  { %4437 = vsyncpa [#allocation7], 1 }
 0x5d1   :  { %4439 = vsyncpa [#allocation7 + $0x1], 1 }
 0x5d2   :  { %4440 = vsyncpa [#allocation8], 1 }
 0x5d3   :  { %4442 = vsyncpa [#allocation8 + $0x1], 1 }
 0x5d4   :  { %4443 = vsyncpa [#allocation9], 1 }
 0x5d5   :  { %4445 = vsyncpa [#allocation9 + $0x1], 1 }
 0x5d6   :  { %4446 = vsyncpa [#allocation10], 1 }
 0x5d7   :  { %4448 = vsyncpa [#allocation10 + $0x1], 1 }

</bundles_post_ra>
